<compile_context>
chip_gen: v5e
topology: v5e:2x2
jax: 0.10.0
libtpu: 0.0.40
codegen_flags: <defaults>
</compile_context>

<pallas_src>
import functools

import jax
import jax.numpy as jnp
from jax.experimental import pallas as pl
from jax.experimental.pallas import tpu as pltpu


def _round_up(x, m):
    return (x + m - 1) // m * m


def _choose_m_tiling(m, cap=512):
    """Row tile for the conv kernels: multiple of 8, prefer >=2 blocks (2 TCs)."""
    if m <= 8:
        return 8, 8
    tm = min(cap, _round_up((m + 1) // 2, 8))
    return tm, _round_up(m, tm)


# ----------------------------- Pallas kernels ------------------------------

def _conv_relu_pool_kernel(x_ref, w_ref, b_ref, o_ref):
    """Fused conv-as-matmul + bias + ReLU + 2x2 maxpool.

    x_ref: (4, tm, K)  -- im2col patches, one slab per pool-window phase
    w_ref: (K, N)      -- conv weights in (kh*kw*Cin, Cout) layout
    b_ref: (1, N)      -- f32 bias
    o_ref: (tm, N)     -- pooled, activated output rows
    """
    w = w_ref[...]
    acc = jnp.dot(x_ref[0], w, preferred_element_type=jnp.float32)
    for p in range(1, 4):
        acc = jnp.maximum(acc, jnp.dot(x_ref[p], w,
                                       preferred_element_type=jnp.float32))
    acc = acc + b_ref[...]                      # pool(relu(x+b)) == relu(max+b)
    o_ref[...] = jnp.maximum(acc, 0.0).astype(o_ref.dtype)


def conv_relu_pool(phases, w, b, *, out_dtype=jnp.bfloat16, cap=512):
    """phases: (4, M, K) phase-grouped patches; w: (K, N); b: (N,). Returns (M, N)."""
    P, M, K = phases.shape
    K2, N = w.shape
    assert P == 4 and K == K2 and b.shape == (N,)

    phases = phases.astype(jnp.bfloat16)
    w = w.astype(jnp.bfloat16)
    b2 = b.reshape(1, N).astype(jnp.float32)

    tm, mp = _choose_m_tiling(M, cap)
    if mp != M:
        phases = jnp.pad(phases, ((0, 0), (0, mp - M), (0, 0)))

    out = pl.pallas_call(
        _conv_relu_pool_kernel,
        out_shape=jax.ShapeDtypeStruct((mp, N), out_dtype),
        grid=(mp // tm,),
        in_specs=[
            pl.BlockSpec((4, tm, K), lambda i: (0, i, 0)),
            pl.BlockSpec((K, N), lambda i: (0, 0)),
            pl.BlockSpec((1, N), lambda i: (0, 0)),
        ],
        out_specs=pl.BlockSpec((tm, N), lambda i: (i, 0)),
        compiler_params=pltpu.CompilerParams(dimension_semantics=("parallel",)),
    )(phases, w, b2)
    return out[:M] if mp != M else out


def _matmul_bias_act_kernel(x_ref, w_ref, b_ref, o_ref, *, relu):
    # bf16 x bf16 -> f32 accumulation on the MXU; epilogue (bias + ReLU) in f32.
    acc = jnp.dot(x_ref[...], w_ref[...], preferred_element_type=jnp.float32)
    acc = acc + b_ref[...]                      # b is (1, tn), broadcasts over rows
    if relu:
        acc = jnp.maximum(acc, 0.0)
    o_ref[...] = acc.astype(o_ref.dtype)


def matmul_bias_act(x, w, b, *, relu, out_dtype=jnp.float32):
    """y = relu?(x @ w + b); x:(M,K), w:(K,N), b:(N,). bf16 operands, f32 acc."""
    M, K = x.shape
    K2, N = w.shape
    assert K == K2 and b.shape == (N,)

    x = x.astype(jnp.bfloat16)
    w = w.astype(jnp.bfloat16)
    b2 = b.reshape(1, N).astype(jnp.float32)

    # Lane-dense N tiles: 256 when possible (matches v6e/v7x 256-wide MXU and
    # keeps >=2 parallel blocks on fc1's N=1024), else 128, else one full block.
    if N % 256 == 0:
        tn = 256
    elif N % 128 == 0:
        tn = 128
    else:
        tn = N

    if M <= 512:
        tm, mp = M, M                           # single full-M block
    else:
        tm, mp = _choose_m_tiling(M, cap=512)
    if mp != M:
        x = jnp.pad(x, ((0, mp - M), (0, 0)))

    kernel = functools.partial(_matmul_bias_act_kernel, relu=relu)
    out = pl.pallas_call(
        kernel,
        out_shape=jax.ShapeDtypeStruct((mp, N), out_dtype),
        grid=(mp // tm, N // tn),
        in_specs=[
            pl.BlockSpec((tm, K), lambda i, j: (i, 0)),
            pl.BlockSpec((K, tn), lambda i, j: (0, j)),
            pl.BlockSpec((1, tn), lambda i, j: (0, j)),
        ],
        out_specs=pl.BlockSpec((tm, tn), lambda i, j: (i, j)),
        compiler_params=pltpu.CompilerParams(
            dimension_semantics=("parallel", "parallel")),
    )(x, w, b2)
    return out[:M] if mp != M else out


# ------------------------------ glue / model -------------------------------

def _im2col_pooled(x, k, pad):
    """Phase-grouped im2col for a 'same'-padded kxk conv followed by 2x2 pool.

    x: (B, H, W, Cin) NHWC, even H/W.  Returns (4, B*(H//2)*(W//2), k*k*Cin) where
    slab p = hp*2+wp holds the patches of unpooled positions (2ho+hp, 2wo+wp).
    Tap order (kh, kw, cin) matches the (kh*kw*Cin, Cout) weight layout.
    XLA glue: the window gather itself has no Pallas equivalent.
    """
    B, H, W, C = x.shape
    Ho, Wo = H // 2, W // 2
    xp = jnp.pad(x, ((0, 0), (pad, pad + 1), (pad, pad + 1), (0, 0)))
    phases = []
    for hp in range(2):
        for wp in range(2):
            taps = []
            for kh in range(k):
                for kw in range(k):
                    taps.append(xp[:, hp + kh:hp + kh + H:2,
                                   wp + kw:wp + kw + W:2, :])   # (B, Ho, Wo, C)
            ph = jnp.stack(taps, axis=3)                         # (B,Ho,Wo,k*k,C)
            phases.append(ph.reshape(B * Ho * Wo, k * k * C))
    return jnp.stack(phases, axis=0)                             # (4, M, K)


def init_params(key):
    """Deterministic PyTorch-shaped parameters (uniform +/- 1/sqrt(fan_in))."""
    ks = jax.random.split(key, 8)

    def u(k, shape, fan_in):
        bound = 1.0 / jnp.sqrt(jnp.float32(fan_in))
        return jax.random.uniform(k, shape, jnp.float32, -bound, bound)

    return {
        "conv1_w": u(ks[0], (32, 1, 5, 5), 1 * 5 * 5),
        "conv1_b": u(ks[1], (32,), 1 * 5 * 5),
        "conv2_w": u(ks[2], (64, 32, 5, 5), 32 * 5 * 5),
        "conv2_b": u(ks[3], (64,), 32 * 5 * 5),
        "fc1_w":   u(ks[4], (1000, 64 * 7 * 7), 64 * 7 * 7),
        "fc1_b":   u(ks[5], (1000,), 64 * 7 * 7),
        "fc2_w":   u(ks[6], (10, 1000), 1000),
        "fc2_b":   u(ks[7], (10,), 1000),
    }


def prepare_params(p):
    """One-time conversion of PyTorch-layout params to kernel-friendly layout."""
    def conv_w_mat(w):  # (Cout,Cin,kh,kw) -> (kh*kw*Cin, Cout), matches patch order
        cout, cin, kh, kw = w.shape
        return jnp.transpose(w, (2, 3, 1, 0)).reshape(kh * kw * cin, cout)

    # fc1: transpose to (K, N) AND permute K from NCHW-flatten to NHWC-flatten
    # order so the forward pass needs no transpose before the flatten.
    n1, kflat = p["fc1_w"].shape                 # (1000, 64*7*7)
    c, h, w = 64, 7, 7
    fc1_w = p["fc1_w"].reshape(n1, c, h, w)
    fc1_w = jnp.transpose(fc1_w, (2, 3, 1, 0)).reshape(kflat, n1)
    n1p = _round_up(n1, 128)                     # 1000 -> 1024 (lane-dense stores)
    fc1_w = jnp.pad(fc1_w, ((0, 0), (0, n1p - n1)))
    fc1_b = jnp.pad(p["fc1_b"], (0, n1p - n1))

    # fc2: (10,1000) -> (K,N); pad K to eat fc1's zero-padded columns, pad N to 128.
    n2, k2 = p["fc2_w"].shape
    n2p = _round_up(n2, 128)                     # 10 -> 128
    fc2_w = jnp.pad(p["fc2_w"].T, ((0, n1p - k2), (0, n2p - n2)))
    fc2_b = jnp.pad(p["fc2_b"], (0, n2p - n2))

    return {
        "conv1_w": conv_w_mat(p["conv1_w"]).astype(jnp.bfloat16),
        "conv1_b": p["conv1_b"].astype(jnp.float32),
        "conv2_w": conv_w_mat(p["conv2_w"]).astype(jnp.bfloat16),
        "conv2_b": p["conv2_b"].astype(jnp.float32),
        "fc1_w": fc1_w.astype(jnp.bfloat16),
        "fc1_b": fc1_b.astype(jnp.float32),
        "fc2_w": fc2_w.astype(jnp.bfloat16),
        "fc2_b": fc2_b.astype(jnp.float32),
    }


def simple_cnn_forward(params, x_nchw):
    # NCHW (PyTorch) -> NHWC internal layout, bf16 activations throughout.
    x = jnp.transpose(x_nchw, (0, 2, 3, 1)).astype(jnp.bfloat16)     # (B,28,28,1)
    B = x.shape[0]

    # conv1 + bias + relu + pool (fused epilogue)
    p1 = _im2col_pooled(x, 5, 2)                                     # (4, B*196, 25)
    y1 = conv_relu_pool(p1, params["conv1_w"], params["conv1_b"])    # (B*196, 32)
    y1 = y1.reshape(B, 14, 14, 32)

    # conv2 + bias + relu + pool (fused epilogue)
    p2 = _im2col_pooled(y1, 5, 2)                                    # (4, B*49, 800)
    y2 = conv_relu_pool(p2, params["conv2_w"], params["conv2_b"])    # (B*49, 64)

    # fc1 + relu: fc1_w is pre-permuted to NHWC-flatten order -> free reshape.
    h1 = matmul_bias_act(y2.reshape(B, 7 * 7 * 64), params["fc1_w"],
                         params["fc1_b"], relu=True,
                         out_dtype=jnp.bfloat16)                     # (B, 1024)

    # fc2: padded K rows / N cols are zero; slice the 10 real logits.
    logits = matmul_bias_act(h1, params["fc2_w"], params["fc2_b"],
                             relu=False, out_dtype=jnp.float32)      # (B, 128)
    return logits[:, :10]                                            # (B, 10)


if __name__ == "__main__":
    key = jax.random.PRNGKey(0)
    pkey, xkey = jax.random.split(key)
    params = prepare_params(init_params(pkey))
    # fc1 = Linear(64*7*7, ...) implies 28x28 single-channel input
    x = jax.random.normal(xkey, (2, 1, 28, 28), jnp.float32)
    out = jax.jit(simple_cnn_forward)(params, x)
    out = jax.block_until_ready(out)
    assert out.shape == (2, 10) and out.dtype == jnp.float32
    print("KERNEL_OK")
</pallas_src>

<mosaic_0001>
module attributes {stable_mosaic.version = 11 : i64} {
  func.func @_conv_relu_pool_kernel(%arg0: i32, %arg1: memref<4x200x25xbf16, #tpu.memory_space<vmem>>, %arg2: memref<25x32xbf16, #tpu.memory_space<vmem>>, %arg3: memref<1x32xf32, #tpu.memory_space<vmem>>, %arg4: memref<200x32xbf16, #tpu.memory_space<vmem>>) attributes {dimension_semantics = [#tpu.dimension_semantics<parallel>], iteration_bounds = array<i64: 2>, scalar_prefetch = 0 : i64, scratch_operands = 0 : i64, tpu.core_type = #tpu.core_type<tc>, window_params = [{transform_indices = @transform_0, window_bounds = array<i64: 4, 200, 25>}, {pipeline_mode = #tpu.pipeline_mode<synchronous>, transform_indices = @transform_1, window_bounds = array<i64: 25, 32>}, {pipeline_mode = #tpu.pipeline_mode<synchronous>, transform_indices = @transform_2, window_bounds = array<i64: 1, 32>}, {transform_indices = @transform_3, window_bounds = array<i64: 200, 32>}]} {
    %c0 = arith.constant 0 : index
    %c0_0 = arith.constant 0 : index
    %0 = vector.load %arg2[%c0, %c0_0] : memref<25x32xbf16, #tpu.memory_space<vmem>>, vector<25x32xbf16>
    %c0_1 = arith.constant 0 : index
    %c0_2 = arith.constant 0 : index
    %c0_3 = arith.constant 0 : index
    %1 = vector.load %arg1[%c0_1, %c0_2, %c0_3] : memref<4x200x25xbf16, #tpu.memory_space<vmem>>, vector<1x200x25xbf16>
    %2 = vector.shape_cast %1 : vector<1x200x25xbf16> to vector<200x25xbf16>
    %cst = arith.constant dense<0.000000e+00> : vector<200x32xf32>
    %3 = tpu.matmul %2, %0, %cst {dimension_numbers = #tpu.dot_dimension_numbers<[1], [0], [0], [1], [0, 0, 1, 1], [], []>} : vector<200x25xbf16>, vector<25x32xbf16>, vector<200x32xf32> -> vector<200x32xf32>
    %c1 = arith.constant 1 : index
    %c0_4 = arith.constant 0 : index
    %c0_5 = arith.constant 0 : index
    %4 = vector.load %arg1[%c1, %c0_4, %c0_5] : memref<4x200x25xbf16, #tpu.memory_space<vmem>>, vector<1x200x25xbf16>
    %5 = vector.shape_cast %4 : vector<1x200x25xbf16> to vector<200x25xbf16>
    %cst_6 = arith.constant dense<0.000000e+00> : vector<200x32xf32>
    %6 = tpu.matmul %5, %0, %cst_6 {dimension_numbers = #tpu.dot_dimension_numbers<[1], [0], [0], [1], [0, 0, 1, 1], [], []>} : vector<200x25xbf16>, vector<25x32xbf16>, vector<200x32xf32> -> vector<200x32xf32>
    %7 = arith.maximumf %3, %6 : vector<200x32xf32>
    %c2 = arith.constant 2 : index
    %c0_7 = arith.constant 0 : index
    %c0_8 = arith.constant 0 : index
    %8 = vector.load %arg1[%c2, %c0_7, %c0_8] : memref<4x200x25xbf16, #tpu.memory_space<vmem>>, vector<1x200x25xbf16>
    %9 = vector.shape_cast %8 : vector<1x200x25xbf16> to vector<200x25xbf16>
    %cst_9 = arith.constant dense<0.000000e+00> : vector<200x32xf32>
    %10 = tpu.matmul %9, %0, %cst_9 {dimension_numbers = #tpu.dot_dimension_numbers<[1], [0], [0], [1], [0, 0, 1, 1], [], []>} : vector<200x25xbf16>, vector<25x32xbf16>, vector<200x32xf32> -> vector<200x32xf32>
    %11 = arith.maximumf %7, %10 : vector<200x32xf32>
    %c3 = arith.constant 3 : index
    %c0_10 = arith.constant 0 : index
    %c0_11 = arith.constant 0 : index
    %12 = vector.load %arg1[%c3, %c0_10, %c0_11] : memref<4x200x25xbf16, #tpu.memory_space<vmem>>, vector<1x200x25xbf16>
    %13 = vector.shape_cast %12 : vector<1x200x25xbf16> to vector<200x25xbf16>
    %cst_12 = arith.constant dense<0.000000e+00> : vector<200x32xf32>
    %14 = tpu.matmul %13, %0, %cst_12 {dimension_numbers = #tpu.dot_dimension_numbers<[1], [0], [0], [1], [0, 0, 1, 1], [], []>} : vector<200x25xbf16>, vector<25x32xbf16>, vector<200x32xf32> -> vector<200x32xf32>
    %15 = arith.maximumf %11, %14 : vector<200x32xf32>
    %c0_13 = arith.constant 0 : index
    %c0_14 = arith.constant 0 : index
    %16 = vector.load %arg3[%c0_13, %c0_14] : memref<1x32xf32, #tpu.memory_space<vmem>>, vector<1x32xf32>
    %17 = vector.broadcast %16 : vector<1x32xf32> to vector<200x32xf32>
    %18 = arith.addf %15, %17 : vector<200x32xf32>
    %cst_15 = arith.constant 0.000000e+00 : f32
    %19 = vector.broadcast %cst_15 : f32 to vector<200x32xf32>
    %20 = arith.maximumf %18, %19 : vector<200x32xf32>
    %21 = arith.truncf %20 : vector<200x32xf32> to vector<200x32xbf16>
    %c0_16 = arith.constant 0 : index
    %c0_17 = arith.constant 0 : index
    %22 = vector.load %arg4[%c0_16, %c0_17] : memref<200x32xbf16, #tpu.memory_space<vmem>>, vector<200x32xbf16>
    tpu.vector_store %arg4[%c0_16, %c0_17], %21 {strides = array<i32>} : memref<200x32xbf16, #tpu.memory_space<vmem>>, vector<200x32xbf16>,
    return
  }
  func.func @transform_0(%arg0: i32) -> (i32, i32, i32) {
    %c0_i32 = arith.constant 0 : i32
    %c0_i32_0 = arith.constant 0 : i32
    %c0_i32_1 = arith.constant 0 : i32
    return %c0_i32, %arg0, %c0_i32_0 : i32, i32, i32
  }
  func.func @transform_1(%arg0: i32) -> (i32, i32) {
    %c0_i32 = arith.constant 0 : i32
    %c0_i32_0 = arith.constant 0 : i32
    %c0_i32_1 = arith.constant 0 : i32
    return %c0_i32, %c0_i32_0 : i32, i32
  }
  func.func @transform_2(%arg0: i32) -> (i32, i32) {
    %c0_i32 = arith.constant 0 : i32
    %c0_i32_0 = arith.constant 0 : i32
    %c0_i32_1 = arith.constant 0 : i32
    return %c0_i32, %c0_i32_0 : i32, i32
  }
  func.func @transform_3(%arg0: i32) -> (i32, i32) {
    %c0_i32 = arith.constant 0 : i32
    %c0_i32_0 = arith.constant 0 : i32
    return %arg0, %c0_i32 : i32, i32
  }
}

module attributes {stable_mosaic.version = 11 : i64} {
  func.func @_conv_relu_pool_kernel(%arg0: i32, %arg1: memref<4x56x800xbf16, #tpu.memory_space<vmem>>, %arg2: memref<800x64xbf16, #tpu.memory_space<vmem>>, %arg3: memref<1x64xf32, #tpu.memory_space<vmem>>, %arg4: memref<56x64xbf16, #tpu.memory_space<vmem>>) attributes {dimension_semantics = [#tpu.dimension_semantics<parallel>], iteration_bounds = array<i64: 2>, scalar_prefetch = 0 : i64, scratch_operands = 0 : i64, tpu.core_type = #tpu.core_type<tc>, window_params = [{transform_indices = @transform_0, window_bounds = array<i64: 4, 56, 800>}, {pipeline_mode = #tpu.pipeline_mode<synchronous>, transform_indices = @transform_1, window_bounds = array<i64: 800, 64>}, {pipeline_mode = #tpu.pipeline_mode<synchronous>, transform_indices = @transform_2, window_bounds = array<i64: 1, 64>}, {transform_indices = @transform_3, window_bounds = array<i64: 56, 64>}]} {
    %c0 = arith.constant 0 : index
    %c0_0 = arith.constant 0 : index
    %0 = vector.load %arg2[%c0, %c0_0] : memref<800x64xbf16, #tpu.memory_space<vmem>>, vector<800x64xbf16>
    %c0_1 = arith.constant 0 : index
    %c0_2 = arith.constant 0 : index
    %c0_3 = arith.constant 0 : index
    %1 = vector.load %arg1[%c0_1, %c0_2, %c0_3] : memref<4x56x800xbf16, #tpu.memory_space<vmem>>, vector<1x56x800xbf16>
    %2 = vector.shape_cast %1 : vector<1x56x800xbf16> to vector<56x800xbf16>
    %cst = arith.constant dense<0.000000e+00> : vector<56x64xf32>
    %3 = tpu.matmul %2, %0, %cst {dimension_numbers = #tpu.dot_dimension_numbers<[1], [0], [0], [1], [0, 0, 1, 1], [], []>} : vector<56x800xbf16>, vector<800x64xbf16>, vector<56x64xf32> -> vector<56x64xf32>
    %c1 = arith.constant 1 : index
    %c0_4 = arith.constant 0 : index
    %c0_5 = arith.constant 0 : index
    %4 = vector.load %arg1[%c1, %c0_4, %c0_5] : memref<4x56x800xbf16, #tpu.memory_space<vmem>>, vector<1x56x800xbf16>
    %5 = vector.shape_cast %4 : vector<1x56x800xbf16> to vector<56x800xbf16>
    %cst_6 = arith.constant dense<0.000000e+00> : vector<56x64xf32>
    %6 = tpu.matmul %5, %0, %cst_6 {dimension_numbers = #tpu.dot_dimension_numbers<[1], [0], [0], [1], [0, 0, 1, 1], [], []>} : vector<56x800xbf16>, vector<800x64xbf16>, vector<56x64xf32> -> vector<56x64xf32>
    %7 = arith.maximumf %3, %6 : vector<56x64xf32>
    %c2 = arith.constant 2 : index
    %c0_7 = arith.constant 0 : index
    %c0_8 = arith.constant 0 : index
    %8 = vector.load %arg1[%c2, %c0_7, %c0_8] : memref<4x56x800xbf16, #tpu.memory_space<vmem>>, vector<1x56x800xbf16>
    %9 = vector.shape_cast %8 : vector<1x56x800xbf16> to vector<56x800xbf16>
    %cst_9 = arith.constant dense<0.000000e+00> : vector<56x64xf32>
    %10 = tpu.matmul %9, %0, %cst_9 {dimension_numbers = #tpu.dot_dimension_numbers<[1], [0], [0], [1], [0, 0, 1, 1], [], []>} : vector<56x800xbf16>, vector<800x64xbf16>, vector<56x64xf32> -> vector<56x64xf32>
    %11 = arith.maximumf %7, %10 : vector<56x64xf32>
    %c3 = arith.constant 3 : index
    %c0_10 = arith.constant 0 : index
    %c0_11 = arith.constant 0 : index
    %12 = vector.load %arg1[%c3, %c0_10, %c0_11] : memref<4x56x800xbf16, #tpu.memory_space<vmem>>, vector<1x56x800xbf16>
    %13 = vector.shape_cast %12 : vector<1x56x800xbf16> to vector<56x800xbf16>
    %cst_12 = arith.constant dense<0.000000e+00> : vector<56x64xf32>
    %14 = tpu.matmul %13, %0, %cst_12 {dimension_numbers = #tpu.dot_dimension_numbers<[1], [0], [0], [1], [0, 0, 1, 1], [], []>} : vector<56x800xbf16>, vector<800x64xbf16>, vector<56x64xf32> -> vector<56x64xf32>
    %15 = arith.maximumf %11, %14 : vector<56x64xf32>
    %c0_13 = arith.constant 0 : index
    %c0_14 = arith.constant 0 : index
    %16 = vector.load %arg3[%c0_13, %c0_14] : memref<1x64xf32, #tpu.memory_space<vmem>>, vector<1x64xf32>
    %17 = vector.broadcast %16 : vector<1x64xf32> to vector<56x64xf32>
    %18 = arith.addf %15, %17 : vector<56x64xf32>
    %cst_15 = arith.constant 0.000000e+00 : f32
    %19 = vector.broadcast %cst_15 : f32 to vector<56x64xf32>
    %20 = arith.maximumf %18, %19 : vector<56x64xf32>
    %21 = arith.truncf %20 : vector<56x64xf32> to vector<56x64xbf16>
    %c0_16 = arith.constant 0 : index
    %c0_17 = arith.constant 0 : index
    %22 = vector.load %arg4[%c0_16, %c0_17] : memref<56x64xbf16, #tpu.memory_space<vmem>>, vector<56x64xbf16>
    tpu.vector_store %arg4[%c0_16, %c0_17], %21 {strides = array<i32>} : memref<56x64xbf16, #tpu.memory_space<vmem>>, vector<56x64xbf16>,
    return
  }
  func.func @transform_0(%arg0: i32) -> (i32, i32, i32) {
    %c0_i32 = arith.constant 0 : i32
    %c0_i32_0 = arith.constant 0 : i32
    %c0_i32_1 = arith.constant 0 : i32
    return %c0_i32, %arg0, %c0_i32_0 : i32, i32, i32
  }
  func.func @transform_1(%arg0: i32) -> (i32, i32) {
    %c0_i32 = arith.constant 0 : i32
    %c0_i32_0 = arith.constant 0 : i32
    %c0_i32_1 = arith.constant 0 : i32
    return %c0_i32, %c0_i32_0 : i32, i32
  }
  func.func @transform_2(%arg0: i32) -> (i32, i32) {
    %c0_i32 = arith.constant 0 : i32
    %c0_i32_0 = arith.constant 0 : i32
    %c0_i32_1 = arith.constant 0 : i32
    return %c0_i32, %c0_i32_0 : i32, i32
  }
  func.func @transform_3(%arg0: i32) -> (i32, i32) {
    %c0_i32 = arith.constant 0 : i32
    %c0_i32_0 = arith.constant 0 : i32
    return %arg0, %c0_i32 : i32, i32
  }
}

module attributes {stable_mosaic.version = 11 : i64} {
  func.func @_matmul_bias_act_kernel(%arg0: i32, %arg1: i32, %arg2: memref<2x3136xbf16, #tpu.memory_space<vmem>>, %arg3: memref<3136x256xbf16, #tpu.memory_space<vmem>>, %arg4: memref<1x256xf32, #tpu.memory_space<vmem>>, %arg5: memref<2x256xbf16, #tpu.memory_space<vmem>>) attributes {dimension_semantics = [#tpu.dimension_semantics<parallel>, #tpu.dimension_semantics<parallel>], iteration_bounds = array<i64: 1, 4>, scalar_prefetch = 0 : i64, scratch_operands = 0 : i64, tpu.core_type = #tpu.core_type<tc>, window_params = [{transform_indices = @transform_0, window_bounds = array<i64: 2, 3136>}, {transform_indices = @transform_1, window_bounds = array<i64: 3136, 256>}, {transform_indices = @transform_2, window_bounds = array<i64: 1, 256>}, {transform_indices = @transform_3, window_bounds = array<i64: 2, 256>}]} {
    %c0 = arith.constant 0 : index
    %c0_0 = arith.constant 0 : index
    %0 = vector.load %arg2[%c0, %c0_0] : memref<2x3136xbf16, #tpu.memory_space<vmem>>, vector<2x3136xbf16>
    %c0_1 = arith.constant 0 : index
    %c0_2 = arith.constant 0 : index
    %1 = vector.load %arg3[%c0_1, %c0_2] : memref<3136x256xbf16, #tpu.memory_space<vmem>>, vector<3136x256xbf16>
    %cst = arith.constant dense<0.000000e+00> : vector<2x256xf32>
    %2 = tpu.matmul %0, %1, %cst {dimension_numbers = #tpu.dot_dimension_numbers<[1], [0], [0], [1], [0, 0, 1, 1], [], []>} : vector<2x3136xbf16>, vector<3136x256xbf16>, vector<2x256xf32> -> vector<2x256xf32>
    %c0_3 = arith.constant 0 : index
    %c0_4 = arith.constant 0 : index
    %3 = vector.load %arg4[%c0_3, %c0_4] : memref<1x256xf32, #tpu.memory_space<vmem>>, vector<1x256xf32>
    %4 = vector.broadcast %3 : vector<1x256xf32> to vector<2x256xf32>
    %5 = arith.addf %2, %4 : vector<2x256xf32>
    %cst_5 = arith.constant 0.000000e+00 : f32
    %6 = vector.broadcast %cst_5 : f32 to vector<2x256xf32>
    %7 = arith.maximumf %5, %6 : vector<2x256xf32>
    %8 = arith.truncf %7 : vector<2x256xf32> to vector<2x256xbf16>
    %c0_6 = arith.constant 0 : index
    %c0_7 = arith.constant 0 : index
    %9 = vector.load %arg5[%c0_6, %c0_7] : memref<2x256xbf16, #tpu.memory_space<vmem>>, vector<2x256xbf16>
    tpu.vector_store %arg5[%c0_6, %c0_7], %8 {strides = array<i32>} : memref<2x256xbf16, #tpu.memory_space<vmem>>, vector<2x256xbf16>,
    return
  }
  func.func @transform_0(%arg0: i32, %arg1: i32) -> (i32, i32) {
    %c0_i32 = arith.constant 0 : i32
    %c0_i32_0 = arith.constant 0 : i32
    return %arg0, %c0_i32 : i32, i32
  }
  func.func @transform_1(%arg0: i32, %arg1: i32) -> (i32, i32) {
    %c0_i32 = arith.constant 0 : i32
    %c0_i32_0 = arith.constant 0 : i32
    return %c0_i32, %arg1 : i32, i32
  }
  func.func @transform_2(%arg0: i32, %arg1: i32) -> (i32, i32) {
    %c0_i32 = arith.constant 0 : i32
    %c0_i32_0 = arith.constant 0 : i32
    return %c0_i32, %arg1 : i32, i32
  }
  func.func @transform_3(%arg0: i32, %arg1: i32) -> (i32, i32) {
    %c0_i32 = arith.constant 0 : i32
    return %arg0, %arg1 : i32, i32
  }
}

module attributes {stable_mosaic.version = 11 : i64} {
  func.func @_matmul_bias_act_kernel(%arg0: i32, %arg1: i32, %arg2: memref<2x1024xbf16, #tpu.memory_space<vmem>>, %arg3: memref<1024x128xbf16, #tpu.memory_space<vmem>>, %arg4: memref<1x128xf32, #tpu.memory_space<vmem>>, %arg5: memref<2x128xf32, #tpu.memory_space<vmem>>) attributes {dimension_semantics = [#tpu.dimension_semantics<parallel>, #tpu.dimension_semantics<parallel>], iteration_bounds = array<i64: 1, 1>, scalar_prefetch = 0 : i64, scratch_operands = 0 : i64, tpu.core_type = #tpu.core_type<tc>, window_params = [{transform_indices = @transform_0, window_bounds = array<i64: 2, 1024>}, {transform_indices = @transform_1, window_bounds = array<i64: 1024, 128>}, {transform_indices = @transform_2, window_bounds = array<i64: 1, 128>}, {transform_indices = @transform_3, window_bounds = array<i64: 2, 128>}]} {
    %c0 = arith.constant 0 : index
    %c0_0 = arith.constant 0 : index
    %0 = vector.load %arg2[%c0, %c0_0] : memref<2x1024xbf16, #tpu.memory_space<vmem>>, vector<2x1024xbf16>
    %c0_1 = arith.constant 0 : index
    %c0_2 = arith.constant 0 : index
    %1 = vector.load %arg3[%c0_1, %c0_2] : memref<1024x128xbf16, #tpu.memory_space<vmem>>, vector<1024x128xbf16>
    %cst = arith.constant dense<0.000000e+00> : vector<2x128xf32>
    %2 = tpu.matmul %0, %1, %cst {dimension_numbers = #tpu.dot_dimension_numbers<[1], [0], [0], [1], [0, 0, 1, 1], [], []>} : vector<2x1024xbf16>, vector<1024x128xbf16>, vector<2x128xf32> -> vector<2x128xf32>
    %c0_3 = arith.constant 0 : index
    %c0_4 = arith.constant 0 : index
    %3 = vector.load %arg4[%c0_3, %c0_4] : memref<1x128xf32, #tpu.memory_space<vmem>>, vector<1x128xf32>
    %4 = vector.broadcast %3 : vector<1x128xf32> to vector<2x128xf32>
    %5 = arith.addf %2, %4 : vector<2x128xf32>
    %c0_5 = arith.constant 0 : index
    %c0_6 = arith.constant 0 : index
    %6 = vector.load %arg5[%c0_5, %c0_6] : memref<2x128xf32, #tpu.memory_space<vmem>>, vector<2x128xf32>
    tpu.vector_store %arg5[%c0_5, %c0_6], %5 {strides = array<i32>} : memref<2x128xf32, #tpu.memory_space<vmem>>, vector<2x128xf32>,
    return
  }
  func.func @transform_0(%arg0: i32, %arg1: i32) -> (i32, i32) {
    %c0_i32 = arith.constant 0 : i32
    %c0_i32_0 = arith.constant 0 : i32
    return %arg0, %c0_i32 : i32, i32
  }
  func.func @transform_1(%arg0: i32, %arg1: i32) -> (i32, i32) {
    %c0_i32 = arith.constant 0 : i32
    %c0_i32_0 = arith.constant 0 : i32
    return %c0_i32, %arg1 : i32, i32
  }
  func.func @transform_2(%arg0: i32, %arg1: i32) -> (i32, i32) {
    %c0_i32 = arith.constant 0 : i32
    %c0_i32_0 = arith.constant 0 : i32
    return %c0_i32, %arg1 : i32, i32
  }
  func.func @transform_3(%arg0: i32, %arg1: i32) -> (i32, i32) {
    %c0_i32 = arith.constant 0 : i32
    return %arg0, %arg1 : i32, i32
  }
}

</mosaic_0001>

<bundles_post_ra>
// kernel: simple_cnn_forward.4
= control target key start
LH: loop header
LB: loop body
LE: loop exit
PB: predicated region body
PF: predicated region fallthrough
CT: control target
= control target key end

     0   :  { %s2142_s12 = smov 0   ;;  %s2144_s13 = smov 0   ;;  %s2499_s0 = inlined_call_operand.vmem [shape: bf16[4,400,25], index: 0, kind: input, shape index: {}]   ;;  %s2500_s1 = inlined_call_operand.vmem [shape: bf16[25,32], index: 1, kind: input, shape index: {}]   ;;  %s2501_s2 = inlined_call_operand.vmem [shape: f32[1,32], index: 2, kind: input, shape index: {}]   ;;  %s2502_s3 = inlined_call_operand.vmem [shape: bf16[400,32], index: 3, kind: output, shape index: {}]  }
   0x1   :  { %s2146_s14 = smov 0  }
   0x2 LB: > { %s1682_s15 = sadd.s32 4294967295, %s2119_s14   ;;  %s2159_s16 = sadd.s32 1, %s2119_s14   ;;  %s2119_s14 = sphi %s2146_s14, %s2505_s14   ;;  %s2115_s13 = sphi %s2144_s13, %s2504_s13   ;;  %s2111_s12 = sphi %s2142_s12, %s2503_s12  }
   0x3   : > { %s17_s17 = ssub.s32 %s2119_s14, %s2159_s16  ;;  %s20_s18 = sadd.s32 1, %s2115_s13 }
   0x4   : > { %p18_p0 = scmp.eq.s32.totalorder %s17_s17, 0  ;;  %p27_p1 = scmp.ne.s32.totalorder %s2115_s13, %s2111_s12 }
   0x5   : > { %p28_p2 = scmp.eq.s32.totalorder %s2119_s14, 0  ;;  %p1685_p4 = scmp.ge.s32.totalorder %s2119_s14, 2 }
   0x6   : > { %s2168_s19 = scalar_select %p18_p0, %s2115_s13, %s20_s18  }
   0x7   : > { %p29_p3 = por %p28_p2, %p27_p1  ;;  %127 = sbr.rel (%p1685_p4) target bundleno = 69 (0x45), region = 24 }
   0xc   : > { %130 = sbr.rel (!%p29_p3) target bundleno = 69 (0x45), region = 28  ;;  %s132_s20 = sand.u32 (%p29_p3), 1, %s2115_s13  }
   0xd   : > { %s2018_s21 = smul.u32 (%p29_p3), 100, %s2119_s14 }
   0xe   : > { %s2069_s22 = smul.u32 (%p29_p3), 400, %s132_s20 }
   0xf   : > { %s2176_s25 = scalar_lea.vmem (%p29_p3), %s2499_s0, %s2018_s21 }
  0x10   : > { %v154_v0 = vld [vmem:[%s2176_s25] sm:$0xff] (%p29_p3)   ;;  %v158_v1 = vld [vmem:[%s2176_s25 + $0x8] sm:$0xff] (%p29_p3)   ;;  %v162_v2 = vld [vmem:[%s2176_s25 + $0x10] sm:$0xff] (%p29_p3)   ;;  %s2181_s26 = scalar_lea.vmem (%p29_p3), [#allocation2], %s2069_s22 }
  0x11   : > { %155 = vst [vmem:[%s2181_s26] sm:$0xff] %v154_v0   ;;  %v166_v3 = vld [vmem:[%s2176_s25 + $0x18] sm:$0xff]   ;;  %v170_v4 = vld [vmem:[%s2176_s25 + $0x20] sm:$0xff]   ;;  %v174_v5 = vld [vmem:[%s2176_s25 + $0x28] sm:$0xff]  }
  0x12   : > { %159 = vst [vmem:[%s2181_s26 + $0x8] sm:$0xff] %v158_v1   ;;  %v178_v6 = vld [vmem:[%s2176_s25 + $0x30] sm:$0xff]   ;;  %v182_v7 = vld [vmem:[%s2176_s25 + $0x38] sm:$0xff]   ;;  %v186_v8 = vld [vmem:[%s2176_s25 + $0x40] sm:$0xff]  }
  0x13   : > { %163 = vst [vmem:[%s2181_s26 + $0x10] sm:$0xff] %v162_v2   ;;  %v190_v9 = vld [vmem:[%s2176_s25 + $0x48] sm:$0xff]   ;;  %v194_v10 = vld [vmem:[%s2176_s25 + $0x50] sm:$0xff]   ;;  %v198_v11 = vld [vmem:[%s2176_s25 + $0x58] sm:$0xff]  }
  0x14   : > { %167 = vst [vmem:[%s2181_s26 + $0x18] sm:$0xff] %v166_v3   ;;  %v202_v12 = vld [vmem:[%s2176_s25 + $0x60] sm:$0xf]  ;;  %v204_v13 = vld [vmem:[%s2176_s25 + $0xc8] sm:$0xff]   ;;  %v208_v14 = vld [vmem:[%s2176_s25 + $0xd0] sm:$0xff]  }
  0x15   : > { %171 = vst [vmem:[%s2181_s26 + $0x20] sm:$0xff] %v170_v4   ;;  %v212_v15 = vld [vmem:[%s2176_s25 + $0xd8] sm:$0xff]   ;;  %v216_v16 = vld [vmem:[%s2176_s25 + $0xe0] sm:$0xff]   ;;  %v220_v17 = vld [vmem:[%s2176_s25 + $0xe8] sm:$0xff]  }
  0x16   : > { %175 = vst [vmem:[%s2181_s26 + $0x28] sm:$0xff] %v174_v5   ;;  %v224_v18 = vld [vmem:[%s2176_s25 + $0xf0] sm:$0xff]   ;;  %v228_v19 = vld [vmem:[%s2176_s25 + $0xf8] sm:$0xff]   ;;  %v232_v20 = vld [vmem:[%s2176_s25 + $0x100] sm:$0xff]  }
  0x17   : > { %179 = vst [vmem:[%s2181_s26 + $0x30] sm:$0xff] %v178_v6   ;;  %v236_v21 = vld [vmem:[%s2176_s25 + $0x108] sm:$0xff]   ;;  %v240_v22 = vld [vmem:[%s2176_s25 + $0x110] sm:$0xff]   ;;  %v244_v23 = vld [vmem:[%s2176_s25 + $0x118] sm:$0xff]  }
  0x18   : > { %183 = vst [vmem:[%s2181_s26 + $0x38] sm:$0xff] %v182_v7   ;;  %v248_v24 = vld [vmem:[%s2176_s25 + $0x120] sm:$0xff]   ;;  %v252_v25 = vld [vmem:[%s2176_s25 + $0x128] sm:$0xf]  ;;  %v254_v26 = vld [vmem:[%s2176_s25 + $0x190] sm:$0xff]  }
  0x19   : > { %187 = vst [vmem:[%s2181_s26 + $0x40] sm:$0xff] %v186_v8   ;;  %v258_v27 = vld [vmem:[%s2176_s25 + $0x198] sm:$0xff]   ;;  %v262_v28 = vld [vmem:[%s2176_s25 + $0x1a0] sm:$0xff]   ;;  %v266_v29 = vld [vmem:[%s2176_s25 + $0x1a8] sm:$0xff]  }
  0x1a   : > { %191 = vst [vmem:[%s2181_s26 + $0x48] sm:$0xff] %v190_v9   ;;  %v270_v30 = vld [vmem:[%s2176_s25 + $0x1b0] sm:$0xff]   ;;  %v274_v31 = vld [vmem:[%s2176_s25 + $0x1b8] sm:$0xff]   ;;  %v278_v32 = vld [vmem:[%s2176_s25 + $0x1c0] sm:$0xff]  }
  0x1b   : > { %195 = vst [vmem:[%s2181_s26 + $0x50] sm:$0xff] %v194_v10   ;;  %v282_v33 = vld [vmem:[%s2176_s25 + $0x1c8] sm:$0xff]   ;;  %v286_v34 = vld [vmem:[%s2176_s25 + $0x1d0] sm:$0xff]   ;;  %v290_v35 = vld [vmem:[%s2176_s25 + $0x1d8] sm:$0xff]  }
  0x1c   : > { %199 = vst [vmem:[%s2181_s26 + $0x58] sm:$0xff] %v198_v11   ;;  %v294_v36 = vld [vmem:[%s2176_s25 + $0x1e0] sm:$0xff]   ;;  %v298_v37 = vld [vmem:[%s2176_s25 + $0x1e8] sm:$0xff]   ;;  %v302_v38 = vld [vmem:[%s2176_s25 + $0x1f0] sm:$0xf] }
  0x1d   : > { %203 = vst [vmem:[%s2181_s26 + $0x60] sm:$0xf] %v202_v12  ;;  %v304_v39 = vld [vmem:[%s2176_s25 + $0x258] sm:$0xff]   ;;  %v308_v40 = vld [vmem:[%s2176_s25 + $0x260] sm:$0xff]   ;;  %v312_v41 = vld [vmem:[%s2176_s25 + $0x268] sm:$0xff]  }
  0x1e   : > { %205 = vst [vmem:[%s2181_s26 + $0x64] sm:$0xff] %v204_v13   ;;  %v316_v42 = vld [vmem:[%s2176_s25 + $0x270] sm:$0xff]   ;;  %v320_v43 = vld [vmem:[%s2176_s25 + $0x278] sm:$0xff]   ;;  %v324_v44 = vld [vmem:[%s2176_s25 + $0x280] sm:$0xff]  }
  0x1f   : > { %209 = vst [vmem:[%s2181_s26 + $0x6c] sm:$0xff] %v208_v14   ;;  %v328_v45 = vld [vmem:[%s2176_s25 + $0x288] sm:$0xff]   ;;  %v332_v46 = vld [vmem:[%s2176_s25 + $0x290] sm:$0xff]   ;;  %v336_v47 = vld [vmem:[%s2176_s25 + $0x298] sm:$0xff]  }
  0x20   : > { %213 = vst [vmem:[%s2181_s26 + $0x74] sm:$0xff] %v212_v15   ;;  %v340_v48 = vld [vmem:[%s2176_s25 + $0x2a0] sm:$0xff]   ;;  %v344_v49 = vld [vmem:[%s2176_s25 + $0x2a8] sm:$0xff]   ;;  %v348_v50 = vld [vmem:[%s2176_s25 + $0x2b0] sm:$0xff]  }
  0x21   : > { %217 = vst [vmem:[%s2181_s26 + $0x7c] sm:$0xff] %v216_v16   ;;  %v352_v51 = vld [vmem:[%s2176_s25 + $0x2b8] sm:$0xf] }
  0x22   : > { %221 = vst [vmem:[%s2181_s26 + $0x84] sm:$0xff] %v220_v17  }
  0x23   : > { %225 = vst [vmem:[%s2181_s26 + $0x8c] sm:$0xff] %v224_v18  }
  0x24   : > { %229 = vst [vmem:[%s2181_s26 + $0x94] sm:$0xff] %v228_v19  }
  0x25   : > { %233 = vst [vmem:[%s2181_s26 + $0x9c] sm:$0xff] %v232_v20  }
  0x26   : > { %237 = vst [vmem:[%s2181_s26 + $0xa4] sm:$0xff] %v236_v21  }
  0x27   : > { %241 = vst [vmem:[%s2181_s26 + $0xac] sm:$0xff] %v240_v22  }
  0x28   : > { %245 = vst [vmem:[%s2181_s26 + $0xb4] sm:$0xff] %v244_v23  }
  0x29   : > { %249 = vst [vmem:[%s2181_s26 + $0xbc] sm:$0xff] %v248_v24  }
  0x2a   : > { %253 = vst [vmem:[%s2181_s26 + $0xc4] sm:$0xf] %v252_v25 }
  0x2b   : > { %255 = vst [vmem:[%s2181_s26 + $0xc8] sm:$0xff] %v254_v26  }
  0x2c   : > { %259 = vst [vmem:[%s2181_s26 + $0xd0] sm:$0xff] %v258_v27  }
  0x2d   : > { %263 = vst [vmem:[%s2181_s26 + $0xd8] sm:$0xff] %v262_v28  }
  0x2e   : > { %267 = vst [vmem:[%s2181_s26 + $0xe0] sm:$0xff] %v266_v29  }
  0x2f   : > { %271 = vst [vmem:[%s2181_s26 + $0xe8] sm:$0xff] %v270_v30  }
  0x30   : > { %275 = vst [vmem:[%s2181_s26 + $0xf0] sm:$0xff] %v274_v31  }
  0x31   : > { %279 = vst [vmem:[%s2181_s26 + $0xf8] sm:$0xff] %v278_v32  }
  0x32   : > { %283 = vst [vmem:[%s2181_s26 + $0x100] sm:$0xff] %v282_v33  }
  0x33   : > { %287 = vst [vmem:[%s2181_s26 + $0x108] sm:$0xff] %v286_v34  }
  0x34   : > { %291 = vst [vmem:[%s2181_s26 + $0x110] sm:$0xff] %v290_v35  }
  0x35   : > { %295 = vst [vmem:[%s2181_s26 + $0x118] sm:$0xff] %v294_v36  }
  0x36   : > { %299 = vst [vmem:[%s2181_s26 + $0x120] sm:$0xff] %v298_v37  }
  0x37   : > { %303 = vst [vmem:[%s2181_s26 + $0x128] sm:$0xf] %v302_v38 }
  0x38   : > { %305 = vst [vmem:[%s2181_s26 + $0x12c] sm:$0xff] %v304_v39  }
  0x39   : > { %309 = vst [vmem:[%s2181_s26 + $0x134] sm:$0xff] %v308_v40  }
  0x3a   : > { %313 = vst [vmem:[%s2181_s26 + $0x13c] sm:$0xff] %v312_v41  }
  0x3b   : > { %317 = vst [vmem:[%s2181_s26 + $0x144] sm:$0xff] %v316_v42  }
  0x3c   : > { %321 = vst [vmem:[%s2181_s26 + $0x14c] sm:$0xff] %v320_v43  }
  0x3d   : > { %325 = vst [vmem:[%s2181_s26 + $0x154] sm:$0xff] %v324_v44  }
  0x3e   : > { %329 = vst [vmem:[%s2181_s26 + $0x15c] sm:$0xff] %v328_v45  }
  0x3f   : > { %333 = vst [vmem:[%s2181_s26 + $0x164] sm:$0xff] %v332_v46  }
  0x40   : > { %337 = vst [vmem:[%s2181_s26 + $0x16c] sm:$0xff] %v336_v47  }
  0x41   : > { %341 = vst [vmem:[%s2181_s26 + $0x174] sm:$0xff] %v340_v48  }
  0x42   : > { %345 = vst [vmem:[%s2181_s26 + $0x17c] sm:$0xff] %v344_v49  }
  0x43   : > { %349 = vst [vmem:[%s2181_s26 + $0x184] sm:$0xff] %v348_v50  }
  0x44   : > { %353 = vst [vmem:[%s2181_s26 + $0x18c] sm:$0xf] %v352_v51 }
  0x45 PF: > { %p1687_p5 = scmp.ge.s32.totalorder %s2119_s14, 1  ;;  %p576_p6 = scmp.lt.s32.totalorder %s2119_s14, 3 }
  0x47   : > { %p577_p7 = pnand %p1687_p5, %p576_p6 }
  0x48   : > { %s583_s4 = sand.u32 (!%p577_p7), 1, %s2111_s12   ;;  %s607_s9 = smul.u32 (!%p577_p7), 25, %s1682_s15 }
  0x49   : > { %580 = sbr.rel (%p577_p7) target bundleno = 427 (0x1ab), region = 69 }
  0x4a   : > { %s2070_s5 = smul.u32 (!%p577_p7), 400, %s583_s4  ;;  %p608_p8 = scmp.lt.s32.totalorder (!%p577_p7), %s607_s9, 49 }
  0x4c   : > { %s2296_s8 = scalar_lea.vmem (!%p577_p7), [#allocation2], %s2070_s5 }
  0x4e   : > { %v1743_v52 = vld [vmem:[%s2500_s1 + $0x8] sm:$0xf]  ;;  %v2020_v53 = vld [vmem:[%s2500_s1 + $0x8] sm:$0x10]  ;;  %vm757_vm0 = vcmask 1043456   ;;  %vm758_vm1 = vcmask 1044480  }
  0x4f   : > { %v1744_v54 = vor.u32 %v2020_v53, %v1743_v52  ;;  %v2121_v55 = vmov 65535   ;;  %v2019_v59 = vld [vmem:[%s2500_s1] sm:$0xff]  ;;  %vm717_vm2 = vcmask 203776   ;;  %v2045_v62 = vld [vmem:[%s2296_s8 + $0xc8] sm:$0xff]  ;;  %v2047_v6 = vld [vmem:[%s2296_s8 + $0xd8] sm:$0xff]  ;;  %s2507_s9 = smov (!%p608_p8, %s607_s9), 49 }
  0x50   : > { %v759_v56 = vsel %vm757_vm0, 4294967295, %v2121_v55  ;;  %v2021_v60 = vld [vmem:[%s2296_s8] sm:$0xff]  ;;  %v2057_v63 = vld [vmem:[%s2296_s8 + $0x12c] sm:$0xff]  ;;  %v2058_v3 = vld [vmem:[%s2296_s8 + $0x134] sm:$0xff]  ;;  %s1688_s12 = sshll.u32 %s2507_s9, 2  ;;  %vm1594_vm3 = vcmask 257024  }
  0x51   : > { %v760_v57 = vsel %vm758_vm1, %v759_v56, 0  ;;  %v2033_v61 = vld [vmem:[%s2296_s8 + $0x64] sm:$0xff]  ;;  %v2034_v1 = vld [vmem:[%s2296_s8 + $0x6c] sm:$0xff]  ;;  %v2035_v5 = vld [vmem:[%s2296_s8 + $0x74] sm:$0xff]  ;;  %s2381_s17 = scalar_lea.vmem %s2502_s3, %s1688_s12 }
  0x52   : > { %v762_v58 = vand.u32 %v1744_v54, %v760_v57  ;;  %v2022_v0 = vld [vmem:[%s2296_s8 + $0x8] sm:$0xff]  ;;  %v2046_v2 = vld [vmem:[%s2296_s8 + $0xd0] sm:$0xff]  ;;  %v2059_v7 = vld [vmem:[%s2296_s8 + $0x13c] sm:$0xff] }
  0x53   : > { %v2023_v4 = vld [vmem:[%s2296_s8 + $0x10] sm:$0xff]  ;;  %v2024_v8 = vld [vmem:[%s2296_s8 + $0x18] sm:$0xff]  ;;  %v2048_v10 = vld [vmem:[%s2296_s8 + $0xe0] sm:$0xff] }
  0x54   : > { %770 = vmatpush.bf16.msra.mxu0 %v762_v58  ;;  %971 = vmatpush.bf16.msra.mxu1 %v762_v58  ;;  %v2036_v9 = vld [vmem:[%s2296_s8 + $0x7c] sm:$0xff]  ;;  %v2060_v11 = vld [vmem:[%s2296_s8 + $0x144] sm:$0xff]  ;;  %v2061_v15 = vld [vmem:[%s2296_s8 + $0x14c] sm:$0xff] }
  0x55   : > { %1197 = vmatpush.bf16.msra.mxu2 %v762_v58  ;;  %1423 = vmatpush.bf16.msra.mxu3 %v762_v58  ;;  %v2025_v12 = vld [vmem:[%s2296_s8 + $0x20] sm:$0xff]  ;;  %v2049_v14 = vld [vmem:[%s2296_s8 + $0xe8] sm:$0xff]  ;;  %v2050_v18 = vld [vmem:[%s2296_s8 + $0xf0] sm:$0xff] }
  0x56   : > { %v2037_v13 = vld [vmem:[%s2296_s8 + $0x84] sm:$0xff]  ;;  %v2038_v17 = vld [vmem:[%s2296_s8 + $0x8c] sm:$0xff]  ;;  %v2062_v19 = vld [vmem:[%s2296_s8 + $0x154] sm:$0xff] }
  0x57   : > { %v2026_v16 = vld [vmem:[%s2296_s8 + $0x28] sm:$0xff]  ;;  %v2027_v20 = vld [vmem:[%s2296_s8 + $0x30] sm:$0xff]  ;;  %v2051_v22 = vld [vmem:[%s2296_s8 + $0xf8] sm:$0xff] }
  0x58   : > { %771 = vmatpush.bf16.msra.mxu0 %v2019_v59  ;;  %972 = vmatpush.bf16.msra.mxu1 %v2019_v59  ;;  %v2039_v21 = vld [vmem:[%s2296_s8 + $0x94] sm:$0xff]  ;;  %v2063_v23 = vld [vmem:[%s2296_s8 + $0x15c] sm:$0xff]  ;;  %v2064_v27 = vld [vmem:[%s2296_s8 + $0x164] sm:$0xff] }
  0x59   : > { %1198 = vmatpush.bf16.msra.mxu2 %v2019_v59  ;;  %1424 = vmatpush.bf16.msra.mxu3 %v2019_v59  ;;  %v2028_v24 = vld [vmem:[%s2296_s8 + $0x38] sm:$0xff]  ;;  %v2052_v26 = vld [vmem:[%s2296_s8 + $0x100] sm:$0xff]  ;;  %v2053_v32 = vld [vmem:[%s2296_s8 + $0x108] sm:$0xff] }
  0x5a   : > { %v2040_v25 = vld [vmem:[%s2296_s8 + $0x9c] sm:$0xff]  ;;  %v2041_v29 = vld [vmem:[%s2296_s8 + $0xa4] sm:$0xff]  ;;  %v2065_v33 = vld [vmem:[%s2296_s8 + $0x16c] sm:$0xff] }
  0x5b   : > { %1745 = vmatmul.msk.bf16.vlgmr.msra.gmra.mxu0 %vm717_vm2, %v2021_v60  ;;  %1831 = vmatmul.msk.bf16.vlgmr.msra.gmra.mxu1 %vm717_vm2, %v2033_v61  ;;  %v2029_v28 = vld [vmem:[%s2296_s8 + $0x40] sm:$0xff]  ;;  %v2030_v47 = vld [vmem:[%s2296_s8 + $0x48] sm:$0xff]  ;;  %v2054_v53 = vld [vmem:[%s2296_s8 + $0x110] sm:$0xff] }
  0x5c   : > { %1917 = vmatmul.msk.bf16.vlgmr.msra.gmra.mxu2 %vm717_vm2, %v2045_v62  ;;  %2003 = vmatmul.msk.bf16.vlgmr.msra.gmra.mxu3 %vm717_vm2, %v2057_v63  ;;  %v2375_v38 = vld [vmem:[%s2501_s2] ss:$0 sm:$0xff]  ;;  %v2066_v54 = vld [vmem:[%s2296_s8 + $0x174] sm:$0xff] }
  0x5d   : > { %v2042_v48 = vld [vmem:[%s2296_s8 + $0xac] sm:$0xff] }
  0x6b   : > { %1746 = vmatmul.msk.bf16.gmra.mxu0 %vm717_vm2, %v2022_v0  ;;  %1832 = vmatmul.msk.bf16.gmra.mxu1 %vm717_vm2, %v2034_v1 }
  0x6c   : > { %1918 = vmatmul.msk.bf16.gmra.mxu2 %vm717_vm2, %v2046_v2  ;;  %2004 = vmatmul.msk.bf16.gmra.mxu3 %vm717_vm2, %v2058_v3 }
  0x7b   : > { %1747 = vmatmul.msk.bf16.gmra.mxu0 %vm717_vm2, %v2023_v4  ;;  %1833 = vmatmul.msk.bf16.gmra.mxu1 %vm717_vm2, %v2035_v5 }
  0x7c   : > { %1919 = vmatmul.msk.bf16.gmra.mxu2 %vm717_vm2, %v2047_v6  ;;  %2005 = vmatmul.msk.bf16.gmra.mxu3 %vm717_vm2, %v2059_v7  ;;  %v2031_v7 = vld [vmem:[%s2296_s8 + $0x50] sm:$0xff] }
  0x8b   : > { %1748 = vmatmul.msk.bf16.gmra.mxu0 %vm717_vm2, %v2024_v8  ;;  %1834 = vmatmul.msk.bf16.gmra.mxu1 %vm717_vm2, %v2036_v9  ;;  %v2043_v8 = vld [vmem:[%s2296_s8 + $0xb4] sm:$0xff] }
  0x8c   : > { %1920 = vmatmul.msk.bf16.gmra.mxu2 %vm717_vm2, %v2048_v10  ;;  %2006 = vmatmul.msk.bf16.gmra.mxu3 %vm717_vm2, %v2060_v11 }
  0x9b   : > { %1749 = vmatmul.msk.bf16.gmra.mxu0 %vm717_vm2, %v2025_v12  ;;  %1835 = vmatmul.msk.bf16.gmra.mxu1 %vm717_vm2, %v2037_v13  ;;  %v2055_v13 = vld [vmem:[%s2296_s8 + $0x118] sm:$0xff] }
  0x9c   : > { %1921 = vmatmul.msk.bf16.gmra.mxu2 %vm717_vm2, %v2049_v14  ;;  %2007 = vmatmul.msk.bf16.gmra.mxu3 %vm717_vm2, %v2061_v15  ;;  %v2067_v14 = vld [vmem:[%s2296_s8 + $0x17c] sm:$0xff] }
  0xab   : > { %1750 = vmatmul.msk.bf16.gmra.mxu0 %vm717_vm2, %v2026_v16  ;;  %1836 = vmatmul.msk.bf16.gmra.mxu1 %vm717_vm2, %v2038_v17 }
  0xac   : > { %1922 = vmatmul.msk.bf16.gmra.mxu2 %vm717_vm2, %v2050_v18  ;;  %2008 = vmatmul.msk.bf16.gmra.mxu3 %vm717_vm2, %v2062_v19 }
  0xbb   : > { %1751 = vmatmul.msk.bf16.gmra.mxu0 %vm717_vm2, %v2027_v20  ;;  %1837 = vmatmul.msk.bf16.gmra.mxu1 %vm717_vm2, %v2039_v21 }
  0xbc   : > { %1923 = vmatmul.msk.bf16.gmra.mxu2 %vm717_vm2, %v2051_v22  ;;  %2009 = vmatmul.msk.bf16.gmra.mxu3 %vm717_vm2, %v2063_v23 }
  0xcb   : > { %1752 = vmatmul.msk.bf16.gmra.mxu0 %vm717_vm2, %v2028_v24  ;;  %1838 = vmatmul.msk.bf16.gmra.mxu1 %vm717_vm2, %v2040_v25 }
  0xcc   : > { %1924 = vmatmul.msk.bf16.gmra.mxu2 %vm717_vm2, %v2052_v26  ;;  %2010 = vmatmul.msk.bf16.gmra.mxu3 %vm717_vm2, %v2064_v27 }
  0xd8   : > { %v773_v30 = vpop.f32.mrf.mxu0  ;;  %v974_v31 = vpop.f32.mrf.mxu1 }
  0xd9   : > { %v1038_v34 = vmax.f32 %v773_v30, %v974_v31  ;;  %v2032_v31 = vld [vmem:[%s2296_s8 + $0x58] sm:$0xff] }
  0xdb   : > { %1753 = vmatmul.msk.bf16.gmra.mxu0 %vm717_vm2, %v2029_v28  ;;  %1839 = vmatmul.msk.bf16.gmra.mxu1 %vm717_vm2, %v2041_v29 }
  0xdc   : > { %1925 = vmatmul.msk.bf16.gmra.mxu2 %vm717_vm2, %v2053_v32  ;;  %2011 = vmatmul.msk.bf16.gmra.mxu3 %vm717_vm2, %v2065_v33  ;;  %v2044_v32 = vld [vmem:[%s2296_s8 + $0xbc] sm:$0xff] }
  0xdf   : > { %v1200_v35 = vpop.f32.mrf.mxu2  ;;  %v1426_v36 = vpop.f32.mrf.mxu3 }
  0xe0   : > { %v1264_v37 = vmax.f32 %v1038_v34, %v1200_v35  ;;  %v775_v39 = vpop.f32.mrf.mxu0  ;;  %v976_v40 = vpop.f32.mrf.mxu1 }
  0xe1   : > { %v1039_v44 = vmax.f32 %v775_v39, %v976_v40  ;;  %v2068_v39 = vld [vmem:[%s2296_s8 + $0x184] sm:$0xff] }
  0xe2   : > { %v1490_v41 = vmax.f32 %v1264_v37, %v1426_v36  ;;  %v2056_v37 = vld [vmem:[%s2296_s8 + $0x120] sm:$0xff] }
  0xe4   : > { %v1519_v42 = vadd.f32 %v2375_v38, %v1490_v41 }
  0xe6   : > { %v1544_v43 = vmax.f32 %v1519_v42, 0.0 }
  0xe7   : > { %v1202_v45 = vpop.f32.mrf.mxu2  ;;  %v1428_v46 = vpop.f32.mrf.mxu3 }
  0xe8   : > { %v1569_v49 = vpack.c.bf16 %v1544_v43, %v1544_v43  ;;  %v1265_v50 = vmax.f32 %v1039_v44, %v1202_v45  ;;  %v778_v51 = vpop.f32.mrf.mxu0  ;;  %v979_v52 = vpop.f32.mrf.mxu1 }
  0xe9   : > { %v1040_v57 = vmax.f32 %v778_v51, %v979_v52  ;;  %v1782_v51 = vld [vmem:[%s2296_s8 + $0xc4] sm:$0xf]  ;;  %v1868_v52 = vld [vmem:[%s2296_s8 + $0x128] sm:$0xf] }
  0xea   : > { %1595 = vst.msk [vmem:[%s2381_s17] sm:$0xf] %vm1594_vm3, %v1569_v49  ;;  %v1491_v55 = vmax.f32 %v1265_v50, %v1428_v46  ;;  %v642_v50 = vld [vmem:[%s2296_s8 + $0x60] sm:$0xf] }
  0xeb   : > { %1754 = vmatmul.msk.bf16.gmra.mxu0 %vm717_vm2, %v2030_v47  ;;  %1840 = vmatmul.msk.bf16.gmra.mxu1 %vm717_vm2, %v2042_v48 }
  0xec   : > { %v1520_v56 = vadd.f32 %v2375_v38, %v1491_v55  ;;  %1926 = vmatmul.msk.bf16.gmra.mxu2 %vm717_vm2, %v2054_v53  ;;  %2012 = vmatmul.msk.bf16.gmra.mxu3 %vm717_vm2, %v2066_v54  ;;  %v1954_v53 = vld [vmem:[%s2296_s8 + $0x18c] sm:$0xf]  ;;  %v692_v55 = vunpack.c.l.b16 %v642_v50 }
  0xee   : > { %v1545_v58 = vmax.f32 %v1520_v56, 0.0  ;;  %v912_v56 = vunpack.c.l.b16 %v1782_v51 }
  0xef   : > { %v1205_v59 = vpop.f32.mrf.mxu2  ;;  %v1431_v60 = vpop.f32.mrf.mxu3 }
  0xf0   : > { %v1570_v61 = vpack.c.bf16 %v1545_v58, %v1545_v58  ;;  %v1266_v62 = vmax.f32 %v1040_v57, %v1205_v59  ;;  %v780_v63 = vpop.f32.mrf.mxu0  ;;  %v981_v0 = vpop.f32.mrf.mxu1  ;;  %v1138_v58 = vunpack.c.l.b16 %v1868_v52  ;;  %v1364_v59 = vunpack.c.l.b16 %v1954_v53 }
  0xf1   : > { %v1041_v4 = vmax.f32 %v780_v63, %v981_v0  ;;  %v705_v0 = vpack.c.b16 %v692_v55, %v692_v55 }
  0xf2   : > { %1596 = vst.msk [vmem:[%s2381_s17 + $0x4] sm:$0xf] %vm1594_vm3, %v1570_v61  ;;  %v1492_v1 = vmax.f32 %v1266_v62, %v1431_v60 }
  0xf4   : > { %v1521_v2 = vadd.f32 %v2375_v38, %v1492_v1  ;;  %v925_v1 = vpack.c.b16 %v912_v56, %v912_v56 }
  0xf6   : > { %v1546_v3 = vmax.f32 %v1521_v2, 0.0 }
  0xf7   : > { %v1207_v5 = vpop.f32.mrf.mxu2  ;;  %v1433_v6 = vpop.f32.mrf.mxu3 }
  0xf8   : > { %v1571_v9 = vpack.c.bf16 %v1546_v3, %v1546_v3  ;;  %v1267_v10 = vmax.f32 %v1041_v4, %v1207_v5  ;;  %v783_v11 = vpop.f32.mrf.mxu0  ;;  %v984_v12 = vpop.f32.mrf.mxu1 }
  0xf9   : > { %v1042_v17 = vmax.f32 %v783_v11, %v984_v12 }
  0xfa   : > { %1597 = vst.msk [vmem:[%s2381_s17 + $0x8] sm:$0xf] %vm1594_vm3, %v1571_v9  ;;  %v1493_v15 = vmax.f32 %v1267_v10, %v1433_v6  ;;  %v1151_v6 = vpack.c.b16 %v1138_v58, %v1138_v58 }
  0xfb   : > { %1755 = vmatmul.msk.bf16.gmra.mxu0 %vm717_vm2, %v2031_v7  ;;  %1841 = vmatmul.msk.bf16.gmra.mxu1 %vm717_vm2, %v2043_v8  ;;  %v1377_v7 = vpack.c.b16 %v1364_v59, %v1364_v59 }
  0xfc   : > { %v1522_v16 = vadd.f32 %v2375_v38, %v1493_v15  ;;  %1927 = vmatmul.msk.bf16.gmra.mxu2 %vm717_vm2, %v2055_v13  ;;  %2013 = vmatmul.msk.bf16.gmra.mxu3 %vm717_vm2, %v2067_v14 }
  0xfe   : > { %v1547_v18 = vmax.f32 %v1522_v16, 0.0 }
  0xff   : > { %v1210_v19 = vpop.f32.mrf.mxu2  ;;  %v1436_v20 = vpop.f32.mrf.mxu3 }
 0x100   : > { %v1572_v21 = vpack.c.bf16 %v1547_v18, %v1547_v18  ;;  %v1268_v22 = vmax.f32 %v1042_v17, %v1210_v19  ;;  %v785_v23 = vpop.f32.mrf.mxu0  ;;  %v986_v24 = vpop.f32.mrf.mxu1 }
 0x101   : > { %v1043_v28 = vmax.f32 %v785_v23, %v986_v24 }
 0x102   : > { %1598 = vst.msk [vmem:[%s2381_s17 + $0xc] sm:$0xf] %vm1594_vm3, %v1572_v21  ;;  %v1494_v25 = vmax.f32 %v1268_v22, %v1436_v20 }
 0x104   : > { %v1523_v26 = vadd.f32 %v2375_v38, %v1494_v25 }
 0x106   : > { %v1548_v27 = vmax.f32 %v1523_v26, 0.0 }
 0x107   : > { %v1212_v29 = vpop.f32.mrf.mxu2  ;;  %v1438_v30 = vpop.f32.mrf.mxu3 }
 0x108   : > { %v1573_v33 = vpack.c.bf16 %v1548_v27, %v1548_v27  ;;  %v1269_v34 = vmax.f32 %v1043_v28, %v1212_v29  ;;  %v788_v35 = vpop.f32.mrf.mxu0  ;;  %v989_v36 = vpop.f32.mrf.mxu1 }
 0x109   : > { %v1044_v42 = vmax.f32 %v788_v35, %v989_v36 }
 0x10a   : > { %1599 = vst.msk [vmem:[%s2381_s17 + $0x10] sm:$0xf] %vm1594_vm3, %v1573_v33  ;;  %v1495_v40 = vmax.f32 %v1269_v34, %v1438_v30 }
 0x10b   : > { %1756 = vmatmul.msk.bf16.gmra.mxu0 %vm717_vm2, %v2032_v31  ;;  %1842 = vmatmul.msk.bf16.gmra.mxu1 %vm717_vm2, %v2044_v32 }
 0x10c   : > { %v1524_v41 = vadd.f32 %v2375_v38, %v1495_v40  ;;  %1928 = vmatmul.msk.bf16.gmra.mxu2 %vm717_vm2, %v2056_v37  ;;  %2014 = vmatmul.msk.bf16.gmra.mxu3 %vm717_vm2, %v2068_v39 }
 0x10e   : > { %v1549_v43 = vmax.f32 %v1524_v41, 0.0 }
 0x10f   : > { %v1215_v44 = vpop.f32.mrf.mxu2  ;;  %v1441_v45 = vpop.f32.mrf.mxu3 }
 0x110   : > { %v1574_v46 = vpack.c.bf16 %v1549_v43, %v1549_v43  ;;  %v1270_v47 = vmax.f32 %v1044_v42, %v1215_v44  ;;  %v790_v48 = vpop.f32.mrf.mxu0  ;;  %v991_v49 = vpop.f32.mrf.mxu1 }
 0x111   : > { %v1045_v61 = vmax.f32 %v790_v48, %v991_v49 }
 0x112   : > { %1600 = vst.msk [vmem:[%s2381_s17 + $0x14] sm:$0xf] %vm1594_vm3, %v1574_v46  ;;  %v1496_v54 = vmax.f32 %v1270_v47, %v1441_v45 }
 0x114   : > { %v1525_v57 = vadd.f32 %v2375_v38, %v1496_v54 }
 0x116   : > { %v1550_v60 = vmax.f32 %v1525_v57, 0.0 }
 0x117   : > { %v1217_v62 = vpop.f32.mrf.mxu2  ;;  %v1443_v63 = vpop.f32.mrf.mxu3 }
 0x118   : > { %v1575_v2 = vpack.c.bf16 %v1550_v60, %v1550_v60  ;;  %v1271_v3 = vmax.f32 %v1045_v61, %v1217_v62  ;;  %v793_v4 = vpop.f32.mrf.mxu0  ;;  %v994_v5 = vpop.f32.mrf.mxu1 }
 0x119   : > { %v1046_v10 = vmax.f32 %v793_v4, %v994_v5 }
 0x11a   : > { %1601 = vst.msk [vmem:[%s2381_s17 + $0x18] sm:$0xf] %vm1594_vm3, %v1575_v2  ;;  %v1497_v8 = vmax.f32 %v1271_v3, %v1443_v63 }
 0x11b   : > { %1757 = vmatmul.msk.bf16.gmra.mxu0 %vm717_vm2, %v705_v0  ;;  %1843 = vmatmul.msk.bf16.gmra.mxu1 %vm717_vm2, %v925_v1 }
 0x11c   : > { %v1526_v9 = vadd.f32 %v2375_v38, %v1497_v8  ;;  %1929 = vmatmul.msk.bf16.gmra.mxu2 %vm717_vm2, %v1151_v6  ;;  %2015 = vmatmul.msk.bf16.gmra.mxu3 %vm717_vm2, %v1377_v7 }
 0x11e   : > { %v1551_v11 = vmax.f32 %v1526_v9, 0.0 }
 0x11f   : > { %v1220_v12 = vpop.f32.mrf.mxu2  ;;  %v1446_v13 = vpop.f32.mrf.mxu3 }
 0x120   : > { %v1576_v14 = vpack.c.bf16 %v1551_v11, %v1551_v11  ;;  %v1272_v15 = vmax.f32 %v1046_v10, %v1220_v12  ;;  %v795_v16 = vpop.f32.mrf.mxu0  ;;  %v996_v17 = vpop.f32.mrf.mxu1 }
 0x121   : > { %v1047_v21 = vmax.f32 %v795_v16, %v996_v17 }
 0x122   : > { %1602 = vst.msk [vmem:[%s2381_s17 + $0x1c] sm:$0xf] %vm1594_vm3, %v1576_v14  ;;  %v1498_v18 = vmax.f32 %v1272_v15, %v1446_v13 }
 0x124   : > { %v1527_v19 = vadd.f32 %v2375_v38, %v1498_v18 }
 0x126   : > { %v1552_v20 = vmax.f32 %v1527_v19, 0.0 }
 0x127   : > { %v1222_v22 = vpop.f32.mrf.mxu2  ;;  %v1448_v23 = vpop.f32.mrf.mxu3 }
 0x128   : > { %v1577_v24 = vpack.c.bf16 %v1552_v20, %v1552_v20  ;;  %v1273_v25 = vmax.f32 %v1047_v21, %v1222_v22  ;;  %v798_v26 = vpop.f32.mrf.mxu0  ;;  %v999_v27 = vpop.f32.mrf.mxu1 }
 0x129   : > { %v1048_v30 = vmax.f32 %v798_v26, %v999_v27 }
 0x12a   : > { %1603 = vst.msk [vmem:[%s2381_s17 + $0x20] sm:$0xf] %vm1594_vm3, %v1577_v24  ;;  %v1499_v28 = vmax.f32 %v1273_v25, %v1448_v23 }
 0x12c   : > { %v1528_v29 = vadd.f32 %v2375_v38, %v1499_v28 }
 0x12e   : > { %v1553_v31 = vmax.f32 %v1528_v29, 0.0 }
 0x12f   : > { %v1225_v32 = vpop.f32.mrf.mxu2  ;;  %v1451_v33 = vpop.f32.mrf.mxu3 }
 0x130   : > { %v1578_v34 = vpack.c.bf16 %v1553_v31, %v1553_v31  ;;  %v1274_v35 = vmax.f32 %v1048_v30, %v1225_v32  ;;  %v800_v36 = vpop.f32.mrf.mxu0  ;;  %v1001_v37 = vpop.f32.mrf.mxu1 }
 0x131   : > { %v1049_v42 = vmax.f32 %v800_v36, %v1001_v37 }
 0x132   : > { %1604 = vst.msk [vmem:[%s2381_s17 + $0x24] sm:$0xf] %vm1594_vm3, %v1578_v34  ;;  %v1500_v39 = vmax.f32 %v1274_v35, %v1451_v33 }
 0x134   : > { %v1529_v40 = vadd.f32 %v2375_v38, %v1500_v39 }
 0x136   : > { %v1554_v41 = vmax.f32 %v1529_v40, 0.0 }
 0x137   : > { %v1227_v43 = vpop.f32.mrf.mxu2  ;;  %v1453_v44 = vpop.f32.mrf.mxu3 }
 0x138   : > { %v1579_v45 = vpack.c.bf16 %v1554_v41, %v1554_v41  ;;  %v1275_v46 = vmax.f32 %v1049_v42, %v1227_v43  ;;  %v803_v47 = vpop.f32.mrf.mxu0  ;;  %v1004_v48 = vpop.f32.mrf.mxu1 }
 0x139   : > { %v1050_v51 = vmax.f32 %v803_v47, %v1004_v48 }
 0x13a   : > { %1605 = vst.msk [vmem:[%s2381_s17 + $0x28] sm:$0xf] %vm1594_vm3, %v1579_v45  ;;  %v1501_v49 = vmax.f32 %v1275_v46, %v1453_v44 }
 0x13c   : > { %v1530_v50 = vadd.f32 %v2375_v38, %v1501_v49 }
 0x13e   : > { %v1555_v52 = vmax.f32 %v1530_v50, 0.0 }
 0x13f   : > { %v1230_v53 = vpop.f32.mrf.mxu2  ;;  %v1456_v54 = vpop.f32.mrf.mxu3 }
 0x140   : > { %v1580_v55 = vpack.c.bf16 %v1555_v52, %v1555_v52  ;;  %v1276_v56 = vmax.f32 %v1050_v51, %v1230_v53  ;;  %v805_v57 = vpop.f32.mrf.mxu0  ;;  %v1006_v58 = vpop.f32.mrf.mxu1 }
 0x141   : > { %v1051_v62 = vmax.f32 %v805_v57, %v1006_v58 }
 0x142   : > { %1606 = vst.msk [vmem:[%s2381_s17 + $0x2c] sm:$0xf] %vm1594_vm3, %v1580_v55  ;;  %v1502_v59 = vmax.f32 %v1276_v56, %v1456_v54 }
 0x144   : > { %v1531_v60 = vadd.f32 %v2375_v38, %v1502_v59 }
 0x146   : > { %v1556_v61 = vmax.f32 %v1531_v60, 0.0 }
 0x147   : > { %v1232_v63 = vpop.f32.mrf.mxu2  ;;  %v1458_v0 = vpop.f32.mrf.mxu3 }
 0x148   : > { %v1581_v1 = vpack.c.bf16 %v1556_v61, %v1556_v61  ;;  %v1277_v2 = vmax.f32 %v1051_v62, %v1232_v63  ;;  %v808_v3 = vpop.f32.mrf.mxu0  ;;  %v1009_v4 = vpop.f32.mrf.mxu1 }
 0x149   : > { %v1052_v7 = vmax.f32 %v808_v3, %v1009_v4 }
 0x14a   : > { %1607 = vst.msk [vmem:[%s2381_s17 + $0x30] sm:$0xf] %vm1594_vm3, %v1581_v1  ;;  %v1503_v5 = vmax.f32 %v1277_v2, %v1458_v0 }
 0x14c   : > { %v1532_v6 = vadd.f32 %v2375_v38, %v1503_v5 }
 0x14e   : > { %v1557_v8 = vmax.f32 %v1532_v6, 0.0 }
 0x14f   : > { %v1235_v9 = vpop.f32.mrf.mxu2  ;;  %v1461_v10 = vpop.f32.mrf.mxu3 }
 0x150   : > { %v1582_v11 = vpack.c.bf16 %v1557_v8, %v1557_v8  ;;  %v1278_v12 = vmax.f32 %v1052_v7, %v1235_v9  ;;  %v810_v13 = vpop.f32.mrf.mxu0  ;;  %v1011_v14 = vpop.f32.mrf.mxu1 }
 0x151   : > { %v1053_v18 = vmax.f32 %v810_v13, %v1011_v14 }
 0x152   : > { %1608 = vst.msk [vmem:[%s2381_s17 + $0x34] sm:$0xf] %vm1594_vm3, %v1582_v11  ;;  %v1504_v15 = vmax.f32 %v1278_v12, %v1461_v10 }
 0x154   : > { %v1533_v16 = vadd.f32 %v2375_v38, %v1504_v15 }
 0x156   : > { %v1558_v17 = vmax.f32 %v1533_v16, 0.0 }
 0x157   : > { %v1237_v19 = vpop.f32.mrf.mxu2  ;;  %v1463_v20 = vpop.f32.mrf.mxu3 }
 0x158   : > { %v1583_v21 = vpack.c.bf16 %v1558_v17, %v1558_v17  ;;  %v1279_v22 = vmax.f32 %v1053_v18, %v1237_v19  ;;  %v813_v23 = vpop.f32.mrf.mxu0  ;;  %v1014_v24 = vpop.f32.mrf.mxu1 }
 0x159   : > { %v1054_v27 = vmax.f32 %v813_v23, %v1014_v24 }
 0x15a   : > { %1609 = vst.msk [vmem:[%s2381_s17 + $0x38] sm:$0xf] %vm1594_vm3, %v1583_v21  ;;  %v1505_v25 = vmax.f32 %v1279_v22, %v1463_v20 }
 0x15c   : > { %v1534_v26 = vadd.f32 %v2375_v38, %v1505_v25 }
 0x15e   : > { %v1559_v28 = vmax.f32 %v1534_v26, 0.0 }
 0x15f   : > { %v1240_v29 = vpop.f32.mrf.mxu2  ;;  %v1466_v30 = vpop.f32.mrf.mxu3 }
 0x160   : > { %v1584_v31 = vpack.c.bf16 %v1559_v28, %v1559_v28  ;;  %v1280_v32 = vmax.f32 %v1054_v27, %v1240_v29  ;;  %v815_v33 = vpop.f32.mrf.mxu0  ;;  %v1016_v34 = vpop.f32.mrf.mxu1 }
 0x161   : > { %v1055_v39 = vmax.f32 %v815_v33, %v1016_v34 }
 0x162   : > { %1610 = vst.msk [vmem:[%s2381_s17 + $0x3c] sm:$0xf] %vm1594_vm3, %v1584_v31  ;;  %v1506_v35 = vmax.f32 %v1280_v32, %v1466_v30 }
 0x164   : > { %v1535_v36 = vadd.f32 %v2375_v38, %v1506_v35 }
 0x166   : > { %v1560_v37 = vmax.f32 %v1535_v36, 0.0 }
 0x167   : > { %v1242_v40 = vpop.f32.mrf.mxu2  ;;  %v1468_v41 = vpop.f32.mrf.mxu3 }
 0x168   : > { %v1585_v42 = vpack.c.bf16 %v1560_v37, %v1560_v37  ;;  %v1281_v43 = vmax.f32 %v1055_v39, %v1242_v40  ;;  %v818_v44 = vpop.f32.mrf.mxu0  ;;  %v1019_v45 = vpop.f32.mrf.mxu1 }
 0x169   : > { %v1056_v48 = vmax.f32 %v818_v44, %v1019_v45 }
 0x16a   : > { %1611 = vst.msk [vmem:[%s2381_s17 + $0x40] sm:$0xf] %vm1594_vm3, %v1585_v42  ;;  %v1507_v46 = vmax.f32 %v1281_v43, %v1468_v41 }
 0x16c   : > { %v1536_v47 = vadd.f32 %v2375_v38, %v1507_v46 }
 0x16e   : > { %v1561_v49 = vmax.f32 %v1536_v47, 0.0 }
 0x16f   : > { %v1245_v50 = vpop.f32.mrf.mxu2  ;;  %v1471_v51 = vpop.f32.mrf.mxu3 }
 0x170   : > { %v1586_v52 = vpack.c.bf16 %v1561_v49, %v1561_v49  ;;  %v1282_v53 = vmax.f32 %v1056_v48, %v1245_v50  ;;  %v820_v54 = vpop.f32.mrf.mxu0  ;;  %v1021_v55 = vpop.f32.mrf.mxu1 }
 0x171   : > { %v1057_v59 = vmax.f32 %v820_v54, %v1021_v55 }
 0x172   : > { %1612 = vst.msk [vmem:[%s2381_s17 + $0x44] sm:$0xf] %vm1594_vm3, %v1586_v52  ;;  %v1508_v56 = vmax.f32 %v1282_v53, %v1471_v51 }
 0x174   : > { %v1537_v57 = vadd.f32 %v2375_v38, %v1508_v56 }
 0x176   : > { %v1562_v58 = vmax.f32 %v1537_v57, 0.0 }
 0x177   : > { %v1247_v60 = vpop.f32.mrf.mxu2  ;;  %v1473_v61 = vpop.f32.mrf.mxu3 }
 0x178   : > { %v1587_v62 = vpack.c.bf16 %v1562_v58, %v1562_v58  ;;  %v1283_v63 = vmax.f32 %v1057_v59, %v1247_v60  ;;  %v823_v0 = vpop.f32.mrf.mxu0  ;;  %v1024_v1 = vpop.f32.mrf.mxu1 }
 0x179   : > { %v1058_v4 = vmax.f32 %v823_v0, %v1024_v1 }
 0x17a   : > { %1613 = vst.msk [vmem:[%s2381_s17 + $0x48] sm:$0xf] %vm1594_vm3, %v1587_v62  ;;  %v1509_v2 = vmax.f32 %v1283_v63, %v1473_v61 }
 0x17c   : > { %v1538_v3 = vadd.f32 %v2375_v38, %v1509_v2 }
 0x17e   : > { %v1563_v5 = vmax.f32 %v1538_v3, 0.0 }
 0x17f   : > { %v1250_v6 = vpop.f32.mrf.mxu2  ;;  %v1476_v7 = vpop.f32.mrf.mxu3 }
 0x180   : > { %v1588_v8 = vpack.c.bf16 %v1563_v5, %v1563_v5  ;;  %v1284_v9 = vmax.f32 %v1058_v4, %v1250_v6  ;;  %v825_v10 = vpop.f32.mrf.mxu0  ;;  %v1026_v11 = vpop.f32.mrf.mxu1 }
 0x181   : > { %v1059_v15 = vmax.f32 %v825_v10, %v1026_v11 }
 0x182   : > { %1614 = vst.msk [vmem:[%s2381_s17 + $0x4c] sm:$0xf] %vm1594_vm3, %v1588_v8  ;;  %v1510_v12 = vmax.f32 %v1284_v9, %v1476_v7 }
 0x184   : > { %v1539_v13 = vadd.f32 %v2375_v38, %v1510_v12 }
 0x186   : > { %v1564_v14 = vmax.f32 %v1539_v13, 0.0 }
 0x187   : > { %v1252_v16 = vpop.f32.mrf.mxu2  ;;  %v1478_v17 = vpop.f32.mrf.mxu3 }
 0x188   : > { %v1589_v18 = vpack.c.bf16 %v1564_v14, %v1564_v14  ;;  %v1285_v19 = vmax.f32 %v1059_v15, %v1252_v16  ;;  %v828_v20 = vpop.f32.mrf.mxu0  ;;  %v1029_v21 = vpop.f32.mrf.mxu1 }
 0x189   : > { %v1060_v24 = vmax.f32 %v828_v20, %v1029_v21 }
 0x18a   : > { %1615 = vst.msk [vmem:[%s2381_s17 + $0x50] sm:$0xf] %vm1594_vm3, %v1589_v18  ;;  %v1511_v22 = vmax.f32 %v1285_v19, %v1478_v17 }
 0x18c   : > { %v1540_v23 = vadd.f32 %v2375_v38, %v1511_v22 }
 0x18e   : > { %v1565_v25 = vmax.f32 %v1540_v23, 0.0 }
 0x18f   : > { %v1255_v26 = vpop.f32.mrf.mxu2  ;;  %v1481_v27 = vpop.f32.mrf.mxu3 }
 0x190   : > { %v1590_v28 = vpack.c.bf16 %v1565_v25, %v1565_v25  ;;  %v1286_v29 = vmax.f32 %v1060_v24, %v1255_v26  ;;  %v830_v30 = vpop.f32.mrf.mxu0  ;;  %v1031_v31 = vpop.f32.mrf.mxu1 }
 0x191   : > { %v1061_v35 = vmax.f32 %v830_v30, %v1031_v31 }
 0x192   : > { %1616 = vst.msk [vmem:[%s2381_s17 + $0x54] sm:$0xf] %vm1594_vm3, %v1590_v28  ;;  %v1512_v32 = vmax.f32 %v1286_v29, %v1481_v27 }
 0x194   : > { %v1541_v33 = vadd.f32 %v2375_v38, %v1512_v32 }
 0x196   : > { %v1566_v34 = vmax.f32 %v1541_v33, 0.0 }
 0x197   : > { %v1257_v36 = vpop.f32.mrf.mxu2  ;;  %v1483_v37 = vpop.f32.mrf.mxu3 }
 0x198   : > { %v1591_v39 = vpack.c.bf16 %v1566_v34, %v1566_v34  ;;  %v1287_v40 = vmax.f32 %v1061_v35, %v1257_v36  ;;  %v833_v41 = vpop.f32.mrf.mxu0  ;;  %v1034_v42 = vpop.f32.mrf.mxu1 }
 0x199   : > { %v1062_v45 = vmax.f32 %v833_v41, %v1034_v42 }
 0x19a   : > { %1617 = vst.msk [vmem:[%s2381_s17 + $0x58] sm:$0xf] %vm1594_vm3, %v1591_v39  ;;  %v1513_v43 = vmax.f32 %v1287_v40, %v1483_v37 }
 0x19c   : > { %v1542_v44 = vadd.f32 %v2375_v38, %v1513_v43 }
 0x19e   : > { %v1567_v46 = vmax.f32 %v1542_v44, 0.0 }
 0x19f   : > { %v1260_v47 = vpop.f32.mrf.mxu2  ;;  %v1486_v48 = vpop.f32.mrf.mxu3 }
 0x1a0   : > { %v1592_v49 = vpack.c.bf16 %v1567_v46, %v1567_v46  ;;  %v1288_v50 = vmax.f32 %v1062_v45, %v1260_v47  ;;  %v835_v51 = vpop.f32.mrf.mxu0  ;;  %v1036_v52 = vpop.f32.mrf.mxu1 }
 0x1a2   : > { %1618 = vst.msk [vmem:[%s2381_s17 + $0x5c] sm:$0xf] %vm1594_vm3, %v1592_v49  ;;  %v1514_v53 = vmax.f32 %v1288_v50, %v1486_v48 }
 0x1a4   : > { %v1543_v54 = vadd.f32 %v2375_v38, %v1514_v53 }
 0x1a6   : > { %v1568_v55 = vmax.f32 %v1543_v54, 0.0 }
 0x1a7   : > { %v1262_v56 = vpop.f32.mrf.mxu2  ;;  %v1488_v57 = vpop.f32.mrf.mxu3 }
 0x1a8   : > { %v1593_v58 = vpack.c.bf16 %v1568_v55, %v1568_v55 }
 0x1aa   : > { %1619 = vst.msk [vmem:[%s2381_s17 + $0x60] sm:$0xf] %vm1594_vm3, %v1593_v58 }
 0x1ab PF: > { %p10_p9 = scmp.ge.s32.totalorder %s2159_s16, 4   ;;  %s2503_s12 = smov %s2115_s13 }
 0x1ac   : > { %s2504_s13 = smov %s2168_s19  ;;  %s2505_s14 = smov %s2159_s16 }
 0x1ad   :  { %12 = sbr.rel (!%p10_p9) target bundleno = 2 (0x2), region = 111 }

// kernel: simple_cnn_forward.5
= control target key start
LH: loop header
LB: loop body
LE: loop exit
PB: predicated region body
PF: predicated region fallthrough
CT: control target
= control target key end

     0   :  { %s3345_s12 = smov 0   ;;  %s3347_s13 = smov 0   ;;  %s4582_s0 = inlined_call_operand.vmem [shape: bf16[4,112,800], index: 0, kind: input, shape index: {}]   ;;  %s4583_s1 = inlined_call_operand.vmem [shape: bf16[800,64], index: 1, kind: input, shape index: {}]   ;;  %s4584_s2 = inlined_call_operand.vmem [shape: f32[1,64], index: 2, kind: input, shape index: {}]   ;;  %s4585_s3 = inlined_call_operand.vmem [shape: bf16[112,64], index: 3, kind: output, shape index: {}]  }
   0x1   :  { %s3349_s14 = smov 0  }
   0x2 LB: > { %s2411_s15 = sadd.s32 4294967295, %s3323_s14   ;;  %s3362_s16 = sadd.s32 1, %s3323_s14   ;;  %s3323_s14 = sphi %s3349_s14, %s4606_s14   ;;  %s3319_s13 = sphi %s3347_s13, %s4605_s13   ;;  %s3315_s12 = sphi %s3345_s12, %s4604_s12  }
   0x3   : > { %s17_s17 = ssub.s32 %s3323_s14, %s3362_s16  ;;  %s20_s18 = sadd.s32 1, %s3319_s13 }
   0x4   : > { %p18_p0 = scmp.eq.s32.totalorder %s17_s17, 0  ;;  %p27_p1 = scmp.ne.s32.totalorder %s3319_s13, %s3315_s12 }
   0x5   : > { %p28_p2 = scmp.eq.s32.totalorder %s3323_s14, 0  ;;  %p2414_p4 = scmp.ge.s32.totalorder %s3323_s14, 2 }
   0x6   : > { %s3371_s19 = scalar_select %p18_p0, %s3319_s13, %s20_s18  }
   0x7   : > { %p29_p3 = por %p28_p2, %p27_p1  ;;  %127 = sbr.rel (%p2414_p4) target bundleno = 130 (0x82), region = 24 }
   0xc   : > { %130 = sbr.rel (!%p29_p3) target bundleno = 130 (0x82), region = 28  ;;  %s132_s20 = sand.u32 (%p29_p3), 1, %s3319_s13  }
   0xd   : > { %s3246_s21 = smul.u32 (%p29_p3), 784, %s132_s20 }
   0xe   : > { %s3249_s22 = smul.u32 (%p29_p3), 196, %s3323_s14 }
   0xf   : > { %s3384_s26 = scalar_lea.vmem (%p29_p3), [#allocation2], %s3246_s21 }
  0x10   : > { %s3379_s25 = scalar_lea.vmem (%p29_p3), %s4582_s0, %s3249_s22 }
  0x11   : > { %v153_v0 = vld [vmem:[%s3379_s25] sm:$0xff]  ;;  %v155_v1 = vld [vmem:[%s3379_s25 + $0x8] sm:$0xff]  ;;  %v157_v2 = vld [vmem:[%s3379_s25 + $0x10] sm:$0xff] }
  0x12   : > { %154 = vst [vmem:[%s3384_s26] sm:$0xff] %v153_v0  ;;  %v159_v3 = vld [vmem:[%s3379_s25 + $0x1c] sm:$0xff]  ;;  %v161_v4 = vld [vmem:[%s3379_s25 + $0x24] sm:$0xff]  ;;  %v163_v5 = vld [vmem:[%s3379_s25 + $0x2c] sm:$0xff] }
  0x13   : > { %156 = vst [vmem:[%s3384_s26 + $0x8] sm:$0xff] %v155_v1  ;;  %v165_v6 = vld [vmem:[%s3379_s25 + $0x38] sm:$0xff]  ;;  %v167_v7 = vld [vmem:[%s3379_s25 + $0x40] sm:$0xff]  ;;  %v169_v8 = vld [vmem:[%s3379_s25 + $0x48] sm:$0xff] }
  0x14   : > { %158 = vst [vmem:[%s3384_s26 + $0x10] sm:$0xff] %v157_v2  ;;  %v171_v9 = vld [vmem:[%s3379_s25 + $0x54] sm:$0xff]  ;;  %v173_v10 = vld [vmem:[%s3379_s25 + $0x5c] sm:$0xff]  ;;  %v175_v11 = vld [vmem:[%s3379_s25 + $0x64] sm:$0xff] }
  0x15   : > { %160 = vst [vmem:[%s3384_s26 + $0x1c] sm:$0xff] %v159_v3  ;;  %v177_v12 = vld [vmem:[%s3379_s25 + $0x70] sm:$0xff]  ;;  %v179_v13 = vld [vmem:[%s3379_s25 + $0x78] sm:$0xff]  ;;  %v181_v14 = vld [vmem:[%s3379_s25 + $0x80] sm:$0xff] }
  0x16   : > { %162 = vst [vmem:[%s3384_s26 + $0x24] sm:$0xff] %v161_v4  ;;  %v183_v15 = vld [vmem:[%s3379_s25 + $0x8c] sm:$0xff]  ;;  %v185_v16 = vld [vmem:[%s3379_s25 + $0x94] sm:$0xff]  ;;  %v187_v17 = vld [vmem:[%s3379_s25 + $0x9c] sm:$0xff] }
  0x17   : > { %164 = vst [vmem:[%s3384_s26 + $0x2c] sm:$0xff] %v163_v5  ;;  %v189_v18 = vld [vmem:[%s3379_s25 + $0xa8] sm:$0xff]  ;;  %v191_v19 = vld [vmem:[%s3379_s25 + $0xb0] sm:$0xff]  ;;  %v193_v20 = vld [vmem:[%s3379_s25 + $0xb8] sm:$0xff] }
  0x18   : > { %166 = vst [vmem:[%s3384_s26 + $0x38] sm:$0xff] %v165_v6  ;;  %v195_v21 = vld [vmem:[%s3379_s25 + $0x188] sm:$0xff]  ;;  %v197_v22 = vld [vmem:[%s3379_s25 + $0x190] sm:$0xff]  ;;  %v199_v23 = vld [vmem:[%s3379_s25 + $0x198] sm:$0xff] }
  0x19   : > { %168 = vst [vmem:[%s3384_s26 + $0x40] sm:$0xff] %v167_v7  ;;  %v201_v24 = vld [vmem:[%s3379_s25 + $0x1a4] sm:$0xff]  ;;  %v203_v25 = vld [vmem:[%s3379_s25 + $0x1ac] sm:$0xff]  ;;  %v205_v26 = vld [vmem:[%s3379_s25 + $0x1b4] sm:$0xff] }
  0x1a   : > { %170 = vst [vmem:[%s3384_s26 + $0x48] sm:$0xff] %v169_v8  ;;  %v207_v27 = vld [vmem:[%s3379_s25 + $0x1c0] sm:$0xff]  ;;  %v209_v28 = vld [vmem:[%s3379_s25 + $0x1c8] sm:$0xff]  ;;  %v211_v29 = vld [vmem:[%s3379_s25 + $0x1d0] sm:$0xff] }
  0x1b   : > { %172 = vst [vmem:[%s3384_s26 + $0x54] sm:$0xff] %v171_v9  ;;  %v213_v30 = vld [vmem:[%s3379_s25 + $0x1dc] sm:$0xff]  ;;  %v215_v31 = vld [vmem:[%s3379_s25 + $0x1e4] sm:$0xff]  ;;  %v217_v32 = vld [vmem:[%s3379_s25 + $0x1ec] sm:$0xff] }
  0x1c   : > { %174 = vst [vmem:[%s3384_s26 + $0x5c] sm:$0xff] %v173_v10  ;;  %v219_v33 = vld [vmem:[%s3379_s25 + $0x1f8] sm:$0xff]  ;;  %v221_v34 = vld [vmem:[%s3379_s25 + $0x200] sm:$0xff]  ;;  %v223_v35 = vld [vmem:[%s3379_s25 + $0x208] sm:$0xff] }
  0x1d   : > { %176 = vst [vmem:[%s3384_s26 + $0x64] sm:$0xff] %v175_v11  ;;  %v225_v36 = vld [vmem:[%s3379_s25 + $0x214] sm:$0xff]  ;;  %v227_v37 = vld [vmem:[%s3379_s25 + $0x21c] sm:$0xff]  ;;  %v229_v38 = vld [vmem:[%s3379_s25 + $0x224] sm:$0xff] }
  0x1e   : > { %178 = vst [vmem:[%s3384_s26 + $0x70] sm:$0xff] %v177_v12  ;;  %v231_v39 = vld [vmem:[%s3379_s25 + $0x230] sm:$0xff]  ;;  %v233_v40 = vld [vmem:[%s3379_s25 + $0x238] sm:$0xff]  ;;  %v235_v41 = vld [vmem:[%s3379_s25 + $0x240] sm:$0xff] }
  0x1f   : > { %180 = vst [vmem:[%s3384_s26 + $0x78] sm:$0xff] %v179_v13  ;;  %v237_v42 = vld [vmem:[%s3379_s25 + $0x310] sm:$0xff]  ;;  %v239_v43 = vld [vmem:[%s3379_s25 + $0x318] sm:$0xff]  ;;  %v241_v44 = vld [vmem:[%s3379_s25 + $0x320] sm:$0xff] }
  0x20   : > { %182 = vst [vmem:[%s3384_s26 + $0x80] sm:$0xff] %v181_v14  ;;  %v243_v45 = vld [vmem:[%s3379_s25 + $0x32c] sm:$0xff]  ;;  %v245_v46 = vld [vmem:[%s3379_s25 + $0x334] sm:$0xff]  ;;  %v247_v47 = vld [vmem:[%s3379_s25 + $0x33c] sm:$0xff] }
  0x21   : > { %184 = vst [vmem:[%s3384_s26 + $0x8c] sm:$0xff] %v183_v15  ;;  %v249_v48 = vld [vmem:[%s3379_s25 + $0x348] sm:$0xff]  ;;  %v251_v49 = vld [vmem:[%s3379_s25 + $0x350] sm:$0xff]  ;;  %v253_v50 = vld [vmem:[%s3379_s25 + $0x358] sm:$0xff] }
  0x22   : > { %186 = vst [vmem:[%s3384_s26 + $0x94] sm:$0xff] %v185_v16  ;;  %v255_v51 = vld [vmem:[%s3379_s25 + $0x364] sm:$0xff]  ;;  %v257_v52 = vld [vmem:[%s3379_s25 + $0x36c] sm:$0xff]  ;;  %v259_v53 = vld [vmem:[%s3379_s25 + $0x374] sm:$0xff] }
  0x23   : > { %188 = vst [vmem:[%s3384_s26 + $0x9c] sm:$0xff] %v187_v17  ;;  %v261_v54 = vld [vmem:[%s3379_s25 + $0x380] sm:$0xff]  ;;  %v263_v55 = vld [vmem:[%s3379_s25 + $0x388] sm:$0xff]  ;;  %v265_v56 = vld [vmem:[%s3379_s25 + $0x390] sm:$0xff] }
  0x24   : > { %190 = vst [vmem:[%s3384_s26 + $0xa8] sm:$0xff] %v189_v18  ;;  %v267_v57 = vld [vmem:[%s3379_s25 + $0x39c] sm:$0xff]  ;;  %v269_v58 = vld [vmem:[%s3379_s25 + $0x3a4] sm:$0xff]  ;;  %v271_v59 = vld [vmem:[%s3379_s25 + $0x3ac] sm:$0xff] }
  0x25   : > { %192 = vst [vmem:[%s3384_s26 + $0xb0] sm:$0xff] %v191_v19  ;;  %v273_v60 = vld [vmem:[%s3379_s25 + $0x3b8] sm:$0xff]  ;;  %v275_v61 = vld [vmem:[%s3379_s25 + $0x3c0] sm:$0xff]  ;;  %v277_v62 = vld [vmem:[%s3379_s25 + $0x3c8] sm:$0xff] }
  0x26   : > { %194 = vst [vmem:[%s3384_s26 + $0xb8] sm:$0xff] %v193_v20  ;;  %v279_v63 = vld [vmem:[%s3379_s25 + $0x498] sm:$0xff]  ;;  %v281_v0 = vld [vmem:[%s3379_s25 + $0x4a0] sm:$0xff]  ;;  %v283_v1 = vld [vmem:[%s3379_s25 + $0x4a8] sm:$0xff] }
  0x27   : > { %196 = vst [vmem:[%s3384_s26 + $0xc4] sm:$0xff] %v195_v21  ;;  %v285_v2 = vld [vmem:[%s3379_s25 + $0x4b4] sm:$0xff]  ;;  %v287_v3 = vld [vmem:[%s3379_s25 + $0x4bc] sm:$0xff]  ;;  %v289_v4 = vld [vmem:[%s3379_s25 + $0x4c4] sm:$0xff] }
  0x28   : > { %198 = vst [vmem:[%s3384_s26 + $0xcc] sm:$0xff] %v197_v22  ;;  %v291_v5 = vld [vmem:[%s3379_s25 + $0x4d0] sm:$0xff]  ;;  %v293_v6 = vld [vmem:[%s3379_s25 + $0x4d8] sm:$0xff]  ;;  %v295_v7 = vld [vmem:[%s3379_s25 + $0x4e0] sm:$0xff] }
  0x29   : > { %200 = vst [vmem:[%s3384_s26 + $0xd4] sm:$0xff] %v199_v23  ;;  %v297_v8 = vld [vmem:[%s3379_s25 + $0x4ec] sm:$0xff]  ;;  %v299_v9 = vld [vmem:[%s3379_s25 + $0x4f4] sm:$0xff]  ;;  %v301_v10 = vld [vmem:[%s3379_s25 + $0x4fc] sm:$0xff] }
  0x2a   : > { %202 = vst [vmem:[%s3384_s26 + $0xe0] sm:$0xff] %v201_v24  ;;  %v303_v11 = vld [vmem:[%s3379_s25 + $0x508] sm:$0xff]  ;;  %v305_v12 = vld [vmem:[%s3379_s25 + $0x510] sm:$0xff]  ;;  %v307_v13 = vld [vmem:[%s3379_s25 + $0x518] sm:$0xff] }
  0x2b   : > { %204 = vst [vmem:[%s3384_s26 + $0xe8] sm:$0xff] %v203_v25  ;;  %v309_v14 = vld [vmem:[%s3379_s25 + $0x524] sm:$0xff]  ;;  %v311_v15 = vld [vmem:[%s3379_s25 + $0x52c] sm:$0xff]  ;;  %v313_v16 = vld [vmem:[%s3379_s25 + $0x534] sm:$0xff] }
  0x2c   : > { %206 = vst [vmem:[%s3384_s26 + $0xf0] sm:$0xff] %v205_v26  ;;  %v315_v17 = vld [vmem:[%s3379_s25 + $0x540] sm:$0xff]  ;;  %v317_v18 = vld [vmem:[%s3379_s25 + $0x548] sm:$0xff]  ;;  %v319_v19 = vld [vmem:[%s3379_s25 + $0x550] sm:$0xff] }
  0x2d   : > { %208 = vst [vmem:[%s3384_s26 + $0xfc] sm:$0xff] %v207_v27  ;;  %v2416_v20 = vld [vmem:[%s3379_s25 + $0x18] sm:$0xf]  ;;  %v2418_v21 = vld [vmem:[%s3379_s25 + $0x34] sm:$0xf] }
  0x2e   : > { %210 = vst [vmem:[%s3384_s26 + $0x104] sm:$0xff] %v209_v28  ;;  %v2420_v22 = vld [vmem:[%s3379_s25 + $0x50] sm:$0xf]  ;;  %v2422_v23 = vld [vmem:[%s3379_s25 + $0x6c] sm:$0xf] }
  0x2f   : > { %212 = vst [vmem:[%s3384_s26 + $0x10c] sm:$0xff] %v211_v29  ;;  %v2424_v24 = vld [vmem:[%s3379_s25 + $0x88] sm:$0xf]  ;;  %v2426_v25 = vld [vmem:[%s3379_s25 + $0xa4] sm:$0xf] }
  0x30   : > { %214 = vst [vmem:[%s3384_s26 + $0x118] sm:$0xff] %v213_v30  ;;  %v2428_v26 = vld [vmem:[%s3379_s25 + $0xc0] sm:$0xf]  ;;  %v2432_v28 = vld [vmem:[%s3379_s25 + $0x1bc] sm:$0xf] }
  0x31   : > { %216 = vst [vmem:[%s3384_s26 + $0x120] sm:$0xff] %v215_v31  ;;  %v2430_v27 = vld [vmem:[%s3379_s25 + $0x1a0] sm:$0xf]  ;;  %v2434_v29 = vld [vmem:[%s3379_s25 + $0x1d8] sm:$0xf] }
  0x32   : > { %218 = vst [vmem:[%s3384_s26 + $0x128] sm:$0xff] %v217_v32  ;;  %v2436_v30 = vld [vmem:[%s3379_s25 + $0x1f4] sm:$0xf]  ;;  %v2438_v31 = vld [vmem:[%s3379_s25 + $0x210] sm:$0xf] }
  0x33   : > { %220 = vst [vmem:[%s3384_s26 + $0x134] sm:$0xff] %v219_v33  ;;  %v2440_v32 = vld [vmem:[%s3379_s25 + $0x22c] sm:$0xf]  ;;  %v2442_v33 = vld [vmem:[%s3379_s25 + $0x248] sm:$0xf] }
  0x34   : > { %222 = vst [vmem:[%s3384_s26 + $0x13c] sm:$0xff] %v221_v34  ;;  %v2444_v34 = vld [vmem:[%s3379_s25 + $0x328] sm:$0xf] }
  0x35   : > { %224 = vst [vmem:[%s3384_s26 + $0x144] sm:$0xff] %v223_v35  ;;  %v2446_v35 = vld [vmem:[%s3379_s25 + $0x344] sm:$0xf] }
  0x36   : > { %226 = vst [vmem:[%s3384_s26 + $0x150] sm:$0xff] %v225_v36  ;;  %v2448_v36 = vld [vmem:[%s3379_s25 + $0x360] sm:$0xf] }
  0x37   : > { %228 = vst [vmem:[%s3384_s26 + $0x158] sm:$0xff] %v227_v37  ;;  %v2450_v37 = vld [vmem:[%s3379_s25 + $0x37c] sm:$0xf] }
  0x38   : > { %230 = vst [vmem:[%s3384_s26 + $0x160] sm:$0xff] %v229_v38  ;;  %v2452_v38 = vld [vmem:[%s3379_s25 + $0x398] sm:$0xf] }
  0x39   : > { %232 = vst [vmem:[%s3384_s26 + $0x16c] sm:$0xff] %v231_v39  ;;  %v2454_v39 = vld [vmem:[%s3379_s25 + $0x3b4] sm:$0xf] }
  0x3a   : > { %234 = vst [vmem:[%s3384_s26 + $0x174] sm:$0xff] %v233_v40  ;;  %v2456_v40 = vld [vmem:[%s3379_s25 + $0x3d0] sm:$0xf] }
  0x3b   : > { %236 = vst [vmem:[%s3384_s26 + $0x17c] sm:$0xff] %v235_v41  ;;  %v2458_v41 = vld [vmem:[%s3379_s25 + $0x4b0] sm:$0xf] }
  0x3c   : > { %238 = vst [vmem:[%s3384_s26 + $0x188] sm:$0xff] %v237_v42  ;;  %v2460_v42 = vld [vmem:[%s3379_s25 + $0x4cc] sm:$0xf] }
  0x3d   : > { %240 = vst [vmem:[%s3384_s26 + $0x190] sm:$0xff] %v239_v43  ;;  %v2462_v43 = vld [vmem:[%s3379_s25 + $0x4e8] sm:$0xf] }
  0x3e   : > { %242 = vst [vmem:[%s3384_s26 + $0x198] sm:$0xff] %v241_v44  ;;  %v2464_v44 = vld [vmem:[%s3379_s25 + $0x504] sm:$0xf] }
  0x3f   : > { %244 = vst [vmem:[%s3384_s26 + $0x1a4] sm:$0xff] %v243_v45  ;;  %v2466_v45 = vld [vmem:[%s3379_s25 + $0x520] sm:$0xf] }
  0x40   : > { %246 = vst [vmem:[%s3384_s26 + $0x1ac] sm:$0xff] %v245_v46  ;;  %v2468_v46 = vld [vmem:[%s3379_s25 + $0x53c] sm:$0xf] }
  0x41   : > { %248 = vst [vmem:[%s3384_s26 + $0x1b4] sm:$0xff] %v247_v47  ;;  %v2470_v47 = vld [vmem:[%s3379_s25 + $0x558] sm:$0xf] }
  0x42   : > { %250 = vst [vmem:[%s3384_s26 + $0x1c0] sm:$0xff] %v249_v48 }
  0x43   : > { %252 = vst [vmem:[%s3384_s26 + $0x1c8] sm:$0xff] %v251_v49 }
  0x44   : > { %254 = vst [vmem:[%s3384_s26 + $0x1d0] sm:$0xff] %v253_v50 }
  0x45   : > { %256 = vst [vmem:[%s3384_s26 + $0x1dc] sm:$0xff] %v255_v51 }
  0x46   : > { %258 = vst [vmem:[%s3384_s26 + $0x1e4] sm:$0xff] %v257_v52 }
  0x47   : > { %260 = vst [vmem:[%s3384_s26 + $0x1ec] sm:$0xff] %v259_v53 }
  0x48   : > { %262 = vst [vmem:[%s3384_s26 + $0x1f8] sm:$0xff] %v261_v54 }
  0x49   : > { %264 = vst [vmem:[%s3384_s26 + $0x200] sm:$0xff] %v263_v55 }
  0x4a   : > { %266 = vst [vmem:[%s3384_s26 + $0x208] sm:$0xff] %v265_v56 }
  0x4b   : > { %268 = vst [vmem:[%s3384_s26 + $0x214] sm:$0xff] %v267_v57 }
  0x4c   : > { %270 = vst [vmem:[%s3384_s26 + $0x21c] sm:$0xff] %v269_v58 }
  0x4d   : > { %272 = vst [vmem:[%s3384_s26 + $0x224] sm:$0xff] %v271_v59 }
  0x4e   : > { %274 = vst [vmem:[%s3384_s26 + $0x230] sm:$0xff] %v273_v60 }
  0x4f   : > { %276 = vst [vmem:[%s3384_s26 + $0x238] sm:$0xff] %v275_v61 }
  0x50   : > { %278 = vst [vmem:[%s3384_s26 + $0x240] sm:$0xff] %v277_v62 }
  0x51   : > { %280 = vst [vmem:[%s3384_s26 + $0x24c] sm:$0xff] %v279_v63 }
  0x52   : > { %282 = vst [vmem:[%s3384_s26 + $0x254] sm:$0xff] %v281_v0 }
  0x53   : > { %284 = vst [vmem:[%s3384_s26 + $0x25c] sm:$0xff] %v283_v1 }
  0x54   : > { %286 = vst [vmem:[%s3384_s26 + $0x268] sm:$0xff] %v285_v2 }
  0x55   : > { %288 = vst [vmem:[%s3384_s26 + $0x270] sm:$0xff] %v287_v3 }
  0x56   : > { %290 = vst [vmem:[%s3384_s26 + $0x278] sm:$0xff] %v289_v4 }
  0x57   : > { %292 = vst [vmem:[%s3384_s26 + $0x284] sm:$0xff] %v291_v5 }
  0x58   : > { %294 = vst [vmem:[%s3384_s26 + $0x28c] sm:$0xff] %v293_v6 }
  0x59   : > { %296 = vst [vmem:[%s3384_s26 + $0x294] sm:$0xff] %v295_v7 }
  0x5a   : > { %298 = vst [vmem:[%s3384_s26 + $0x2a0] sm:$0xff] %v297_v8 }
  0x5b   : > { %300 = vst [vmem:[%s3384_s26 + $0x2a8] sm:$0xff] %v299_v9 }
  0x5c   : > { %302 = vst [vmem:[%s3384_s26 + $0x2b0] sm:$0xff] %v301_v10 }
  0x5d   : > { %304 = vst [vmem:[%s3384_s26 + $0x2bc] sm:$0xff] %v303_v11 }
  0x5e   : > { %306 = vst [vmem:[%s3384_s26 + $0x2c4] sm:$0xff] %v305_v12 }
  0x5f   : > { %308 = vst [vmem:[%s3384_s26 + $0x2cc] sm:$0xff] %v307_v13 }
  0x60   : > { %310 = vst [vmem:[%s3384_s26 + $0x2d8] sm:$0xff] %v309_v14 }
  0x61   : > { %312 = vst [vmem:[%s3384_s26 + $0x2e0] sm:$0xff] %v311_v15 }
  0x62   : > { %314 = vst [vmem:[%s3384_s26 + $0x2e8] sm:$0xff] %v313_v16 }
  0x63   : > { %316 = vst [vmem:[%s3384_s26 + $0x2f4] sm:$0xff] %v315_v17 }
  0x64   : > { %318 = vst [vmem:[%s3384_s26 + $0x2fc] sm:$0xff] %v317_v18 }
  0x65   : > { %320 = vst [vmem:[%s3384_s26 + $0x304] sm:$0xff] %v319_v19 }
  0x66   : > { %2417 = vst [vmem:[%s3384_s26 + $0x18] sm:$0xf] %v2416_v20 }
  0x67   : > { %2419 = vst [vmem:[%s3384_s26 + $0x34] sm:$0xf] %v2418_v21 }
  0x68   : > { %2421 = vst [vmem:[%s3384_s26 + $0x50] sm:$0xf] %v2420_v22 }
  0x69   : > { %2423 = vst [vmem:[%s3384_s26 + $0x6c] sm:$0xf] %v2422_v23 }
  0x6a   : > { %2425 = vst [vmem:[%s3384_s26 + $0x88] sm:$0xf] %v2424_v24 }
  0x6b   : > { %2427 = vst [vmem:[%s3384_s26 + $0xa4] sm:$0xf] %v2426_v25 }
  0x6c   : > { %2429 = vst [vmem:[%s3384_s26 + $0xc0] sm:$0xf] %v2428_v26 }
  0x6d   : > { %2431 = vst [vmem:[%s3384_s26 + $0xdc] sm:$0xf] %v2430_v27 }
  0x6e   : > { %2433 = vst [vmem:[%s3384_s26 + $0xf8] sm:$0xf] %v2432_v28 }
  0x6f   : > { %2435 = vst [vmem:[%s3384_s26 + $0x114] sm:$0xf] %v2434_v29 }
  0x70   : > { %2437 = vst [vmem:[%s3384_s26 + $0x130] sm:$0xf] %v2436_v30 }
  0x71   : > { %2439 = vst [vmem:[%s3384_s26 + $0x14c] sm:$0xf] %v2438_v31 }
  0x72   : > { %2441 = vst [vmem:[%s3384_s26 + $0x168] sm:$0xf] %v2440_v32 }
  0x73   : > { %2443 = vst [vmem:[%s3384_s26 + $0x184] sm:$0xf] %v2442_v33 }
  0x74   : > { %2445 = vst [vmem:[%s3384_s26 + $0x1a0] sm:$0xf] %v2444_v34 }
  0x75   : > { %2447 = vst [vmem:[%s3384_s26 + $0x1bc] sm:$0xf] %v2446_v35 }
  0x76   : > { %2449 = vst [vmem:[%s3384_s26 + $0x1d8] sm:$0xf] %v2448_v36 }
  0x77   : > { %2451 = vst [vmem:[%s3384_s26 + $0x1f4] sm:$0xf] %v2450_v37 }
  0x78   : > { %2453 = vst [vmem:[%s3384_s26 + $0x210] sm:$0xf] %v2452_v38 }
  0x79   : > { %2455 = vst [vmem:[%s3384_s26 + $0x22c] sm:$0xf] %v2454_v39 }
  0x7a   : > { %2457 = vst [vmem:[%s3384_s26 + $0x248] sm:$0xf] %v2456_v40 }
  0x7b   : > { %2459 = vst [vmem:[%s3384_s26 + $0x264] sm:$0xf] %v2458_v41 }
  0x7c   : > { %2461 = vst [vmem:[%s3384_s26 + $0x280] sm:$0xf] %v2460_v42 }
  0x7d   : > { %2463 = vst [vmem:[%s3384_s26 + $0x29c] sm:$0xf] %v2462_v43 }
  0x7e   : > { %2465 = vst [vmem:[%s3384_s26 + $0x2b8] sm:$0xf] %v2464_v44 }
  0x7f   : > { %2467 = vst [vmem:[%s3384_s26 + $0x2d4] sm:$0xf] %v2466_v45 }
  0x80   : > { %2469 = vst [vmem:[%s3384_s26 + $0x2f0] sm:$0xf] %v2468_v46 }
  0x81   : > { %2471 = vst [vmem:[%s3384_s26 + $0x30c] sm:$0xf] %v2470_v47 }
  0x82 PF: > { %p2472_p5 = scmp.ge.s32.totalorder %s3323_s14, 1  ;;  %p389_p6 = scmp.lt.s32.totalorder %s3323_s14, 3 }
  0x84   : > { %p390_p7 = pnand %p2472_p5, %p389_p6 }
  0x86   : > { %393 = sbr.rel (%p390_p7) target bundleno = 750 (0x2ee), region = 54 }
  0x8b   : > { %v3612_v48 = vld [vmem:[%s4583_s1 + $0x38] sm:$0xff]  ;;  %v3634_v52 = vld [vmem:[%s4583_s1 + $0x30] sm:$0xff]  ;;  %v3658_v56 = vld [vmem:[%s4583_s1 + $0x28] sm:$0xff]  ;;  %s396_s25 = sand.u32 1, %s3315_s12   ;;  %vm984_vm0 = vcmask 261120   ;;  %vm2337_vm1 = vcmask 519168  }
  0x8c   : > { %v3617_v49 = vld [vmem:[%s4583_s1 + $0x78] sm:$0xff]  ;;  %997 = vmatpush.bf16.msra.mxu0 %v3612_v48  ;;  %v3639_v53 = vld [vmem:[%s4583_s1 + $0x70] sm:$0xff]  ;;  %v3663_v57 = vld [vmem:[%s4583_s1 + $0x68] sm:$0xff]  ;;  %s3248_s30 = smul.u32 784, %s396_s25 }
  0x8d   : > { %v3622_v50 = vld [vmem:[%s4583_s1 + $0xb8] sm:$0xff]  ;;  %1025 = vmatpush.bf16.msra.mxu1 %v3617_v49  ;;  %v3646_v54 = vld [vmem:[%s4583_s1 + $0xb0] sm:$0xff]  ;;  %v3670_v58 = vld [vmem:[%s4583_s1 + $0xa8] sm:$0xff] }
  0x8e   : > { %v3627_v51 = vld [vmem:[%s4583_s1 + $0xf8] sm:$0xff]  ;;  %1053 = vmatpush.bf16.msra.mxu2 %v3622_v50  ;;  %v3651_v55 = vld [vmem:[%s4583_s1 + $0xf0] sm:$0xff]  ;;  %v3675_v59 = vld [vmem:[%s4583_s1 + $0xe8] sm:$0xff]  ;;  %s3794_s29 = scalar_lea.vmem [#allocation2], %s3248_s30 }
  0x8f   : > { %1081 = vmatpush.bf16.msra.mxu3 %v3627_v51  ;;  %v3682_v60 = vld [vmem:[%s4583_s1 + $0x20] sm:$0xff]  ;;  %v3706_v0 = vld [vmem:[%s4583_s1 + $0x18] sm:$0xff]  ;;  %v3731_v4 = vld [vmem:[%s4583_s1 + $0x10] sm:$0xff] }
  0x90   : > { %998 = vmatpush.bf16.msra.mxu0 %v3634_v52  ;;  %v3687_v61 = vld [vmem:[%s4583_s1 + $0x60] sm:$0xff]  ;;  %v3711_v1 = vld [vmem:[%s4583_s1 + $0x58] sm:$0xff]  ;;  %4592 = vst [vmem:[#allocation3_spill] sm:$0xff] %v3731_v4  ;;  %v3736_v5 = vld [vmem:[%s4583_s1 + $0x50] sm:$0xff] }
  0x91   : > { %1026 = vmatpush.bf16.msra.mxu1 %v3639_v53  ;;  %v3694_v62 = vld [vmem:[%s4583_s1 + $0xa0] sm:$0xff]  ;;  %v3718_v2 = vld [vmem:[%s4583_s1 + $0x98] sm:$0xff]  ;;  %4593 = vst [vmem:[#allocation4_spill] sm:$0xff] %v3736_v5  ;;  %v3743_v6 = vld [vmem:[%s4583_s1 + $0x90] sm:$0xff] }
  0x92   : > { %1054 = vmatpush.bf16.msra.mxu2 %v3646_v54  ;;  %v3699_v63 = vld [vmem:[%s4583_s1 + $0xe0] sm:$0xff]  ;;  %v3723_v3 = vld [vmem:[%s4583_s1 + $0xd8] sm:$0xff]  ;;  %v3748_v7 = vld [vmem:[%s4583_s1 + $0xd0] sm:$0xff] }
  0x93   : > { %1082 = vmatpush.bf16.msra.mxu3 %v3651_v55  ;;  %v3755_v8 = vld [vmem:[%s4583_s1 + $0x8] sm:$0xff]  ;;  %v3777_v12 = vld [vmem:[%s4583_s1] sm:$0xff]  ;;  %v3816_v25 = vld [vmem:[%s4583_s1 + $0x138] sm:$0xff] }
  0x94   : > { %999 = vmatpush.bf16.msra.mxu0 %v3658_v56  ;;  %4594 = vst [vmem:[#allocation5_spill] sm:$0xff] %v3755_v8  ;;  %v3760_v9 = vld [vmem:[%s4583_s1 + $0x48] sm:$0xff]  ;;  %v3782_v13 = vld [vmem:[%s4583_s1 + $0x40] sm:$0xff]  ;;  %v3825_v30 = vld [vmem:[%s4583_s1 + $0x178] sm:$0xff] }
  0x95   : > { %1027 = vmatpush.bf16.msra.mxu1 %v3663_v57  ;;  %4595 = vst [vmem:[#allocation6_spill] sm:$0xff] %v3760_v9  ;;  %v3767_v10 = vld [vmem:[%s4583_s1 + $0x88] sm:$0xff]  ;;  %v3787_v14 = vld [vmem:[%s4583_s1 + $0x80] sm:$0xff]  ;;  %v3832_v31 = vld [vmem:[%s4583_s1 + $0x130] sm:$0xff] }
  0x96   : > { %1055 = vmatpush.bf16.msra.mxu2 %v3670_v58  ;;  %v3772_v11 = vld [vmem:[%s4583_s1 + $0xc8] sm:$0xff]  ;;  %4596 = vst [vmem:[#allocation7_spill] sm:$0xff] %v3777_v12  ;;  %v3792_v15 = vld [vmem:[%s4583_s1 + $0xc0] sm:$0xff]  ;;  %v3844_v33 = vld [vmem:[%s4583_s1 + $0x170] sm:$0xff] }
  0x97   : > { %1083 = vmatpush.bf16.msra.mxu3 %v3675_v59  ;;  %4597 = vst [vmem:[#allocation8_spill] sm:$0xff] %v3782_v13  ;;  %v2476_v16 = vld [vmem:[%s3794_s29] sm:$0xf]  ;;  %v3165_v17 = vld [vmem:[%s3794_s29 + $0x18] sm:$0xf0] }
  0x98   : > { %1000 = vmatpush.bf16.msra.mxu0 %v3682_v60  ;;  %v3162_v18 = vld [vmem:[%s3794_s29 + $0x4] sm:$0xf]  ;;  %v2478_v19 = vld [vmem:[%s3794_s29 + $0x1c] sm:$0xf0]  ;;  %v2484_v20 = vld [vmem:[%s3794_s29 + $0x8] sm:$0xf]  ;;  %v2477_v26 = vor.u32 %v3165_v17, %v2476_v16 }
  0x99   : > { %1028 = vmatpush.bf16.msra.mxu1 %v3687_v61  ;;  %v3166_v21 = vld [vmem:[%s3794_s29 + $0x20] sm:$0xf0]  ;;  %v3163_v22 = vld [vmem:[%s3794_s29 + $0xc] sm:$0xf]  ;;  %v2486_v23 = vld [vmem:[%s3794_s29 + $0x24] sm:$0xf0]  ;;  %v2481_v27 = vor.u32 %v3162_v18, %v2478_v19 }
  0x9a   : > { %1056 = vmatpush.bf16.msra.mxu2 %v3694_v62  ;;  %v3811_v24 = vld [vmem:[%s4583_s1 + $0x188] sm:$0xff]  ;;  %v2485_v28 = vor.u32 %v3166_v21, %v2484_v20  ;;  %v2489_v29 = vor.u32 %v3163_v22, %v2486_v23  ;;  %v3837_v32 = vld [vmem:[%s4583_s1 + $0x180] sm:$0xff]  ;;  %v3887_v46 = vld [vmem:[%s4583_s1 + $0x118] sm:$0xff] }
  0x9b   : > { %1084 = vmatpush.bf16.msra.mxu3 %v3699_v63  ;;  %v3850_v34 = vld [vmem:[%s4583_s1 + $0x128] sm:$0xff]  ;;  %v3865_v36 = vld [vmem:[%s4583_s1 + $0x120] sm:$0xff]  ;;  %v3895_v19 = vld [vmem:[%s4583_s1 + $0x158] sm:$0xff] }
  0x9c   : > { %1001 = vmatpush.bf16.msra.mxu0 %v3706_v0  ;;  %v3859_v35 = vld [vmem:[%s4583_s1 + $0x168] sm:$0xff]  ;;  %v3172_v38 = vld [vmem:[%s3794_s29 + $0x50] sm:$0xf0]  ;;  %v2512_v41 = vld [vmem:[%s3794_s29 + $0x40] sm:$0xf] }
  0x9d   : > { %1029 = vmatpush.bf16.msra.mxu1 %v3711_v1  ;;  %v2504_v37 = vld [vmem:[%s3794_s29 + $0x38] sm:$0xf]  ;;  %v3169_v39 = vld [vmem:[%s3794_s29 + $0x3c] sm:$0xf]  ;;  %v3170_v43 = vld [vmem:[%s3794_s29 + $0x44] sm:$0xf] }
  0x9e   : > { %1057 = vmatpush.bf16.msra.mxu2 %v3718_v2  ;;  %v2506_v40 = vld [vmem:[%s3794_s29 + $0x54] sm:$0xf0]  ;;  %v3173_v42 = vld [vmem:[%s3794_s29 + $0x58] sm:$0xf0]  ;;  %v2514_v44 = vld [vmem:[%s3794_s29 + $0x5c] sm:$0xf0]  ;;  %v2505_v47 = vor.u32 %v3172_v38, %v2504_v37 }
  0x9f   : > { %1085 = vmatpush.bf16.msra.mxu3 %v3723_v3  ;;  %v3881_v45 = vld [vmem:[%s4583_s1 + $0x160] sm:$0xff]  ;;  %v2509_v16 = vor.u32 %v3169_v39, %v2506_v40  ;;  %v2513_v17 = vor.u32 %v3173_v42, %v2512_v41  ;;  %v2517_v18 = vor.u32 %v3170_v43, %v2514_v44  ;;  %v3901_v20 = vld [vmem:[%s4583_s1 + $0x110] sm:$0xff]  ;;  %v3914_v22 = vld [vmem:[%s4583_s1 + $0x108] sm:$0xff] }
  0xa0   : > { %1002 = vmatpush.bf16.msra.mxu0 %v3731_v4  ;;  %v3908_v21 = vld [vmem:[%s4583_s1 + $0x150] sm:$0xff]  ;;  %v3922_v23 = vld [vmem:[%s4583_s1 + $0x148] sm:$0xff]  ;;  %v3944_v42 = vld [vmem:[%s4583_s1 + $0x140] sm:$0xff] }
  0xa1   : > { %1030 = vmatpush.bf16.msra.mxu1 %v3736_v5  ;;  %v2534_v37 = vld [vmem:[%s3794_s29 + $0x8c] sm:$0xf0]  ;;  %v2540_v38 = vld [vmem:[%s3794_s29 + $0x78] sm:$0xf]  ;;  %v3180_v39 = vld [vmem:[%s3794_s29 + $0x90] sm:$0xf0] }
  0xa2   : > { %1058 = vmatpush.bf16.msra.mxu2 %v3743_v6  ;;  %v3177_v40 = vld [vmem:[%s3794_s29 + $0x7c] sm:$0xf]  ;;  %v2542_v41 = vld [vmem:[%s3794_s29 + $0x94] sm:$0xf0] }
  0xa3   : > { %1086 = vmatpush.bf16.msra.mxu3 %v3748_v7 }
  0xa4   : > { %1003 = vmatpush.bf16.msra.mxu0 %v3755_v8 }
  0xa5   : > { %1031 = vmatpush.bf16.msra.mxu1 %v3760_v9 }
  0xa6   : > { %1059 = vmatpush.bf16.msra.mxu2 %v3767_v10 }
  0xa7   : > { %1087 = vmatpush.bf16.msra.mxu3 %v3772_v11 }
  0xa8   : > { %1004 = vmatpush.bf16.msra.mxu0 %v3777_v12 }
  0xa9   : > { %1032 = vmatpush.bf16.msra.mxu1 %v3782_v13 }
  0xaa   : > { %1060 = vmatpush.bf16.msra.mxu2 %v3787_v14 }
  0xab   : > { %1088 = vmatpush.bf16.msra.mxu3 %v3792_v15  ;;  %1005 = vmatmul.bf16.vlgmr.msra.gmra.mxu0 %v2477_v26  ;;  %v3928_v26 = vld [vmem:[%s4583_s1 + $0x100] sm:$0xff] }
  0xac   : > { %1109 = vmatpush.bf16.msrb.mxu0 %v3816_v25  ;;  %1033 = vmatmul.bf16.vlgmr.msra.gmra.mxu1 %v2481_v27  ;;  %v2532_v27 = vld [vmem:[%s3794_s29 + $0x70] sm:$0xf] }
  0xad   : > { %1061 = vmatmul.bf16.vlgmr.msra.gmra.mxu2 %v2485_v28  ;;  %1137 = vmatpush.bf16.msrb.mxu1 %v3825_v30  ;;  %v3179_v28 = vld [vmem:[%s3794_s29 + $0x88] sm:$0xf0] }
  0xae   : > { %1171 = vmatpush.bf16.msrb.mxu2 %v3811_v24  ;;  %1089 = vmatmul.bf16.vlgmr.msra.gmra.mxu3 %v2489_v29  ;;  %v3176_v29 = vld [vmem:[%s3794_s29 + $0x74] sm:$0xf]  ;;  %v2533_v43 = vor.u32 %v3179_v28, %v2532_v27 }
  0xaf   : > { %1363 = vmatpush.bf16.msrb.mxu3 %v3612_v48  ;;  %v2537_v44 = vor.u32 %v3176_v29, %v2534_v37 }
  0xb0   : > { %1110 = vmatpush.bf16.msrb.mxu0 %v3832_v31 }
  0xb1   : > { %1138 = vmatpush.bf16.msrb.mxu1 %v3844_v33 }
  0xb2   : > { %1172 = vmatpush.bf16.msrb.mxu2 %v3837_v32 }
  0xb3   : > { %1364 = vmatpush.bf16.msrb.mxu3 %v3634_v52 }
  0xb4   : > { %1111 = vmatpush.bf16.msrb.mxu0 %v3850_v34 }
  0xb5   : > { %1139 = vmatpush.bf16.msrb.mxu1 %v3859_v35 }
  0xb6   : > { %1447 = vmatpush.bf16.msra.mxu2 %v3627_v51 }
  0xb7   : > { %1365 = vmatpush.bf16.msrb.mxu3 %v3658_v56 }
  0xb8   : > { %1112 = vmatpush.bf16.msrb.mxu0 %v3865_v36 }
  0xb9   : > { %1140 = vmatpush.bf16.msrb.mxu1 %v3881_v45 }
  0xba   : > { %1448 = vmatpush.bf16.msra.mxu2 %v3651_v55 }
  0xbb   : > { %1366 = vmatpush.bf16.msrb.mxu3 %v3682_v60  ;;  %1010 = vmatmul.bf16.gmra.mxu0 %v2505_v47  ;;  %v2541_v47 = vor.u32 %v3180_v39, %v2540_v38 }
  0xbc   : > { %1113 = vmatpush.bf16.msrb.mxu0 %v3887_v46  ;;  %1038 = vmatmul.bf16.gmra.mxu1 %v2509_v16  ;;  %v2545_v16 = vor.u32 %v3177_v40, %v2542_v41 }
  0xbd   : > { %1066 = vmatmul.bf16.gmra.mxu2 %v2513_v17  ;;  %1141 = vmatpush.bf16.msrb.mxu1 %v3895_v19  ;;  %v551_v17 = vld [vmem:[%s3794_s29 + $0xa8] sm:$0xff] }
  0xbe   : > { %1449 = vmatpush.bf16.msra.mxu2 %v3675_v59  ;;  %1094 = vmatmul.bf16.gmra.mxu3 %v2517_v18  ;;  %v552_v18 = vld [vmem:[%s3794_s29 + $0xb0] sm:$0xff]  ;;  %v625_v27 = vunpack.c.l.b16 %v551_v17  ;;  %v626_v28 = vunpack.c.h.b16 %v551_v17  ;;  %v2500_v17 = vld [vmem:[%s3794_s29 + $0x18] sm:$0xf] }
  0xbf   : > { %1367 = vmatpush.bf16.msrb.mxu3 %v3706_v0  ;;  %v627_v29 = vunpack.c.l.b16 %v552_v18  ;;  %v628_v37 = vunpack.c.h.b16 %v552_v18  ;;  %v3168_v18 = vld [vmem:[%s3794_s29 + $0x30] sm:$0xf0] }
  0xc0   : > { %1114 = vmatpush.bf16.msrb.mxu0 %v3901_v20  ;;  %v653_v38 = vpack.c.b16 %v625_v27, %v625_v27  ;;  %v654_v39 = vpack.c.b16 %v626_v28, %v626_v28  ;;  %v2792_v27 = vld [vmem:[%s3794_s29 + $0xc4] sm:$0xf]  ;;  %v3186_v28 = vld [vmem:[%s3794_s29 + $0xdc] sm:$0xf0] }
  0xc1   : > { %1142 = vmatpush.bf16.msrb.mxu1 %v3908_v21  ;;  %v655_v40 = vpack.c.b16 %v627_v29, %v627_v29  ;;  %v656_v41 = vpack.c.b16 %v628_v37, %v628_v37 }
  0xc2   : > { %1450 = vmatpush.bf16.msra.mxu2 %v3699_v63 }
  0xc3   : > { %1368 = vmatpush.bf16.msrb.mxu3 %v3731_v4 }
  0xc4   : > { %1115 = vmatpush.bf16.msrb.mxu0 %v3914_v22 }
  0xc5   : > { %1143 = vmatpush.bf16.msrb.mxu1 %v3922_v23 }
  0xc6   : > { %1451 = vmatpush.bf16.msra.mxu2 %v3723_v3 }
  0xc7   : > { %1369 = vmatpush.bf16.msrb.mxu3 %v3755_v8 }
  0xc8   : > { %1116 = vmatpush.bf16.msrb.mxu0 %v3928_v26 }
  0xc9   : > { %1144 = vmatpush.bf16.msrb.mxu1 %v3944_v42 }
  0xca   : > { %1452 = vmatpush.bf16.msra.mxu2 %v3748_v7 }
  0xcb   : > { %1370 = vmatpush.bf16.msrb.mxu3 %v3777_v12  ;;  %1015 = vmatmul.bf16.gmra.mxu0 %v2533_v43  ;;  %v2492_v43 = vld [vmem:[%s3794_s29 + $0x10] sm:$0xf] }
  0xcc   : > { %1391 = vmatpush.bf16.msra.mxu0 %v3617_v49  ;;  %1043 = vmatmul.bf16.gmra.mxu1 %v2537_v44  ;;  %v3167_v44 = vld [vmem:[%s3794_s29 + $0x28] sm:$0xf0] }
  0xcd   : > { %1419 = vmatpush.bf16.msra.mxu1 %v3622_v50  ;;  %1071 = vmatmul.bf16.gmra.mxu2 %v2541_v47  ;;  %v3164_v47 = vld [vmem:[%s3794_s29 + $0x14] sm:$0xf]  ;;  %v2493_v29 = vor.u32 %v3167_v44, %v2492_v43  ;;  %v3171_v43 = vld [vmem:[%s3794_s29 + $0x4c] sm:$0xf]  ;;  %v2522_v44 = vld [vmem:[%s3794_s29 + $0x64] sm:$0xf0] }
  0xce   : > { %1099 = vmatmul.bf16.gmra.mxu3 %v2545_v16  ;;  %1453 = vmatpush.bf16.msra.mxu2 %v3772_v11  ;;  %v2494_v16 = vld [vmem:[%s3794_s29 + $0x2c] sm:$0xf0] }
  0xcf   : > { %1475 = vmatpush.bf16.msra.mxu3 %v3816_v25  ;;  %v2497_v37 = vor.u32 %v3164_v47, %v2494_v16  ;;  %v2528_v47 = vld [vmem:[%s3794_s29 + $0x50] sm:$0xf]  ;;  %v3175_v16 = vld [vmem:[%s3794_s29 + $0x68] sm:$0xf0] }
  0xd0   : > { %1392 = vmatpush.bf16.msra.mxu0 %v3639_v53 }
  0xd1   : > { %1420 = vmatpush.bf16.msra.mxu1 %v3646_v54 }
  0xd2   : > { %1454 = vmatpush.bf16.msra.mxu2 %v3792_v15 }
  0xd3   : > { %1476 = vmatpush.bf16.msra.mxu3 %v3832_v31 }
  0xd4   : > { %1393 = vmatpush.bf16.msra.mxu0 %v3663_v57 }
  0xd5   : > { %1421 = vmatpush.bf16.msra.mxu1 %v3670_v58 }
  0xd7   : > { %1477 = vmatpush.bf16.msra.mxu3 %v3850_v34 }
  0xd8   : > { %1394 = vmatpush.bf16.msra.mxu0 %v3687_v61 }
  0xd9   : > { %1422 = vmatpush.bf16.msra.mxu1 %v3694_v62 }
  0xdb   : > { %1478 = vmatpush.bf16.msra.mxu3 %v3865_v36  ;;  %1020 = vmatmul.bf16.gmra.mxu0 %v653_v38  ;;  %v2501_v38 = vor.u32 %v3168_v18, %v2500_v17  ;;  %v2820_v17 = vld [vmem:[%s3794_s29 + $0xfc] sm:$0xf]  ;;  %v3193_v18 = vld [vmem:[%s3794_s29 + $0x114] sm:$0xf0] }
  0xdc   : > { %1395 = vmatpush.bf16.msra.mxu0 %v3711_v1  ;;  %1048 = vmatmul.bf16.gmra.mxu1 %v654_v39  ;;  %v2793_v39 = vor.u32 %v3186_v28, %v2792_v27  ;;  %v2525_v28 = vor.u32 %v3171_v43, %v2522_v44  ;;  %v2556_v43 = vld [vmem:[%s3794_s29 + $0x88] sm:$0xf]  ;;  %v3182_v44 = vld [vmem:[%s3794_s29 + $0xa0] sm:$0xf0] }
  0xdd   : > { %1423 = vmatpush.bf16.msra.mxu1 %v3718_v2  ;;  %1076 = vmatmul.bf16.gmra.mxu2 %v655_v40  ;;  %v2520_v40 = vld [vmem:[%s3794_s29 + $0x48] sm:$0xf] }
  0xde   : > { %1104 = vmatmul.bf16.gmra.mxu3 %v656_v41  ;;  %v3174_v41 = vld [vmem:[%s3794_s29 + $0x60] sm:$0xf0] }
  0xdf   : > { %1479 = vmatpush.bf16.msra.mxu3 %v3887_v46  ;;  %v2521_v27 = vor.u32 %v3174_v41, %v2520_v40  ;;  %v3178_v40 = vld [vmem:[%s3794_s29 + $0x84] sm:$0xf]  ;;  %v2550_v41 = vld [vmem:[%s3794_s29 + $0x9c] sm:$0xf0] }
  0xe0   : > { %1396 = vmatpush.bf16.msra.mxu0 %v3736_v5 }
  0xe1   : > { %1424 = vmatpush.bf16.msra.mxu1 %v3743_v6 }
  0xe3   : > { %1480 = vmatpush.bf16.msra.mxu3 %v3901_v20 }
  0xe4   : > { %1397 = vmatpush.bf16.msra.mxu0 %v3760_v9 }
  0xe5   : > { %1425 = vmatpush.bf16.msra.mxu1 %v3767_v10 }
  0xe7   : > { %1481 = vmatpush.bf16.msra.mxu3 %v3914_v22 }
  0xe8   : > { %1398 = vmatpush.bf16.msra.mxu0 %v3782_v13 }
  0xe9   : > { %1426 = vmatpush.bf16.msra.mxu1 %v3787_v14 }
  0xeb   : > { %1482 = vmatpush.bf16.msra.mxu3 %v3928_v26  ;;  %1117 = vmatmul.bf16.vlgmr.msrb.gmra.mxu0 %v2493_v29  ;;  %v2529_v29 = vor.u32 %v3175_v16, %v2528_v47  ;;  %v2848_v47 = vld [vmem:[%s3794_s29 + $0x134] sm:$0xf]  ;;  %v3200_v16 = vld [vmem:[%s3794_s29 + $0x14c] sm:$0xf0] }
  0xec   : > { %1145 = vmatmul.bf16.vlgmr.msrb.gmra.mxu1 %v2497_v37  ;;  %1503 = vmatpush.bf16.msrb.mxu0 %v3825_v30  ;;  %v2821_v37 = vor.u32 %v3193_v18, %v2820_v17  ;;  %v2553_v18 = vor.u32 %v3178_v40, %v2550_v41 }
  0xed   : > { %2758 = vmatmul.msk.bf16.vlgmr.msrb.gmra.mxu2 %vm984_vm0, %v2501_v38  ;;  %1537 = vmatpush.bf16.msrb.mxu1 %v3811_v24  ;;  %v2548_v38 = vld [vmem:[%s3794_s29 + $0x80] sm:$0xf] }
  0xee   : > { %1371 = vmatmul.bf16.vlgmr.msrb.gmra.mxu3 %v2793_v39  ;;  %1736 = vmatpush.bf16.msrb.mxu2 %v3612_v48  ;;  %v3181_v39 = vld [vmem:[%s3794_s29 + $0x98] sm:$0xf0] }
  0xef   : > { %1764 = vmatpush.bf16.msrb.mxu3 %v3617_v49  ;;  %v2549_v17 = vor.u32 %v3181_v39, %v2548_v38  ;;  %v4034_v38 = vld [vmem:[%s3794_s29 + $0x16c] sm:$0xff] }
  0xf0   : > { %1504 = vmatpush.bf16.msrb.mxu0 %v3844_v33 }
  0xf1   : > { %1538 = vmatpush.bf16.msrb.mxu1 %v3837_v32 }
  0xf2   : > { %1737 = vmatpush.bf16.msrb.mxu2 %v3634_v52 }
  0xf3   : > { %1765 = vmatpush.bf16.msrb.mxu3 %v3639_v53 }
  0xf4   : > { %1505 = vmatpush.bf16.msrb.mxu0 %v3859_v35 }
  0xf6   : > { %1738 = vmatpush.bf16.msrb.mxu2 %v3658_v56 }
  0xf7   : > { %1766 = vmatpush.bf16.msrb.mxu3 %v3663_v57 }
  0xf8   : > { %1506 = vmatpush.bf16.msrb.mxu0 %v3881_v45 }
  0xfa   : > { %1739 = vmatpush.bf16.msrb.mxu2 %v3682_v60 }
  0xfb   : > { %1767 = vmatpush.bf16.msrb.mxu3 %v3687_v61  ;;  %1122 = vmatmul.bf16.gmra.mxu0 %v2521_v27  ;;  %v2557_v27 = vor.u32 %v3182_v44, %v2556_v43  ;;  %v1292_v43 = vunpack.c.l.b16 %v4034_v38 }
  0xfc   : > { %1150 = vmatmul.bf16.gmra.mxu1 %v2525_v28  ;;  %1507 = vmatpush.bf16.msrb.mxu0 %v3895_v19  ;;  %v2849_v28 = vor.u32 %v3200_v16, %v2848_v47 }
  0xfd   : > { %2759 = vmatmul.msk.bf16.gmra.mxu2 %vm984_vm0, %v2529_v29  ;;  %v553_v29 = vld [vmem:[%s3794_s29 + $0xb8] sm:$0xff] }
  0xfe   : > { %1376 = vmatmul.bf16.gmra.mxu3 %v2821_v37  ;;  %1740 = vmatpush.bf16.msrb.mxu2 %v3706_v0  ;;  %v554_v37 = vld [vmem:[%s3794_s29 + $0xc0] sm:$0xf]  ;;  %v629_v39 = vunpack.c.l.b16 %v553_v29  ;;  %v630_v40 = vunpack.c.h.b16 %v553_v29  ;;  %v3184_v29 = vld [vmem:[%s3794_s29 + $0xd0] sm:$0xf] }
  0xff   : > { %1768 = vmatpush.bf16.msrb.mxu3 %v3711_v1  ;;  %v631_v41 = vunpack.c.l.b16 %v554_v37  ;;  %v2808_v37 = vld [vmem:[%s3794_s29 + $0xd4] sm:$0xf] }
 0x100   : > { %1508 = vmatpush.bf16.msrb.mxu0 %v3908_v21  ;;  %v657_v44 = vpack.c.b16 %v629_v39, %v629_v39  ;;  %v658_v47 = vpack.c.b16 %v630_v40, %v630_v40 }
 0x101   : > { %v659_v16 = vpack.c.b16 %v631_v41, %v631_v41 }
 0x102   : > { %1741 = vmatpush.bf16.msrb.mxu2 %v3731_v4 }
 0x103   : > { %1769 = vmatpush.bf16.msrb.mxu3 %v3736_v5 }
 0x104   : > { %1509 = vmatpush.bf16.msrb.mxu0 %v3922_v23 }
 0x106   : > { %1742 = vmatpush.bf16.msrb.mxu2 %v3755_v8  ;;  %v3188_v8 = vld [vmem:[%s3794_s29 + $0xec] sm:$0xf0] }
 0x107   : > { %1770 = vmatpush.bf16.msrb.mxu3 %v3760_v9  ;;  %v2809_v41 = vor.u32 %v3188_v8, %v2808_v37 }
 0x108   : > { %1510 = vmatpush.bf16.msrb.mxu0 %v3944_v42 }
 0x10a   : > { %1743 = vmatpush.bf16.msrb.mxu2 %v3777_v12  ;;  %v3187_v12 = vld [vmem:[%s3794_s29 + $0xe4] sm:$0xf0] }
 0x10b   : > { %1771 = vmatpush.bf16.msrb.mxu3 %v3782_v13  ;;  %1127 = vmatmul.bf16.gmra.mxu0 %v2549_v17  ;;  %v1320_v17 = vpack.c.b16 %v1292_v43, %v1292_v43  ;;  %v2802_v13 = vld [vmem:[%s3794_s29 + $0xe8] sm:$0xf0] }
 0x10c   : > { %1155 = vmatmul.bf16.gmra.mxu1 %v2553_v18  ;;  %v3183_v18 = vld [vmem:[%s3794_s29 + $0xc8] sm:$0xf]  ;;  %v2805_v40 = vor.u32 %v3184_v29, %v2802_v13 }
 0x10d   : > { %2760 = vmatmul.msk.bf16.gmra.mxu2 %vm984_vm0, %v2557_v27  ;;  %v2794_v27 = vld [vmem:[%s3794_s29 + $0xe0] sm:$0xf0] }
 0x10e   : > { %1381 = vmatmul.bf16.gmra.mxu3 %v2849_v28  ;;  %v2800_v28 = vld [vmem:[%s3794_s29 + $0xcc] sm:$0xf]  ;;  %v2797_v9 = vor.u32 %v3183_v18, %v2794_v27  ;;  %v3195_v27 = vld [vmem:[%s3794_s29 + $0x124] sm:$0xf0] }
 0x10f   : > { %v2801_v4 = vor.u32 %v3187_v12, %v2800_v28  ;;  %v2836_v18 = vld [vmem:[%s3794_s29 + $0x10c] sm:$0xf] }
 0x11b   : > { %1132 = vmatmul.bf16.gmra.mxu0 %v657_v44  ;;  %v2828_v44 = vld [vmem:[%s3794_s29 + $0x104] sm:$0xf] }
 0x11c   : > { %1160 = vmatmul.bf16.gmra.mxu1 %v658_v47  ;;  %v3194_v47 = vld [vmem:[%s3794_s29 + $0x11c] sm:$0xf0] }
 0x11d   : > { %2761 = vmatmul.msk.bf16.gmra.mxu2 %vm984_vm0, %v659_v16  ;;  %v3191_v16 = vld [vmem:[%s3794_s29 + $0x108] sm:$0xf] }
 0x11e   : > { %1386 = vmatmul.bf16.gmra.mxu3 %v1320_v17  ;;  %v2830_v17 = vld [vmem:[%s3794_s29 + $0x120] sm:$0xf0] }
 0x128   : > { %v1006_v5 = vpop.f32.mrf.mxu0 }
 0x129   : > { %v1034_v39 = vpop.f32.mrf.mxu1 }
 0x12a   : > { %v1035_v43 = vadd.f32 %v1034_v39, %v1006_v5 }
 0x12b   : > { %1399 = vmatmul.bf16.vlgmr.msra.gmra.mxu0 %v2797_v9 }
 0x12c   : > { %1427 = vmatmul.bf16.vlgmr.msra.gmra.mxu1 %v2801_v4  ;;  %1792 = vmatpush.bf16.msra.mxu0 %v3622_v50 }
 0x12d   : > { %1455 = vmatmul.bf16.vlgmr.msra.gmra.mxu2 %v2805_v40  ;;  %1820 = vmatpush.bf16.msra.mxu1 %v3627_v51  ;;  %v3190_v51 = vld [vmem:[%s3794_s29 + $0x100] sm:$0xf]  ;;  %v2833_v40 = vor.u32 %v3191_v16, %v2830_v17 }
 0x12e   : > { %1483 = vmatmul.bf16.vlgmr.msra.gmra.mxu3 %v2809_v41  ;;  %1848 = vmatpush.bf16.msra.mxu2 %v3816_v25  ;;  %v2837_v41 = vor.u32 %v3195_v27, %v2836_v18 }
 0x12f   : > { %1876 = vmatpush.bf16.msra.mxu3 %v3825_v30  ;;  %v2822_v30 = vld [vmem:[%s3794_s29 + $0x118] sm:$0xf0] }
 0x130   : > { %v1062_v12 = vpop.f32.mrf.mxu2  ;;  %v1008_v8 = vpop.f32.mrf.mxu0  ;;  %1793 = vmatpush.bf16.msra.mxu0 %v3646_v54  ;;  %v2825_v28 = vor.u32 %v3190_v51, %v2822_v30  ;;  %v2864_v51 = vld [vmem:[%s3794_s29 + $0x144] sm:$0xf]  ;;  %v3202_v30 = vld [vmem:[%s3794_s29 + $0x15c] sm:$0xf0] }
 0x131   : > { %v1090_v5 = vpop.f32.mrf.mxu3  ;;  %v1063_v4 = vadd.f32 %v1062_v12, %v1035_v43  ;;  %v1036_v9 = vpop.f32.mrf.mxu1  ;;  %1821 = vmatpush.bf16.msra.mxu1 %v3651_v55  ;;  %v2829_v55 = vor.u32 %v3194_v47, %v2828_v44  ;;  %v2865_v27 = vor.u32 %v3202_v30, %v2864_v51 }
 0x132   : > { %v1037_v13 = vadd.f32 %v1036_v9, %v1008_v8  ;;  %1849 = vmatpush.bf16.msra.mxu2 %v3832_v31  ;;  %v3201_v8 = vld [vmem:[%s3794_s29 + $0x154] sm:$0xf0]  ;;  %v3198_v9 = vld [vmem:[%s3794_s29 + $0x140] sm:$0xf] }
 0x133   : > { %v4052_v25 = vadd.f32 %v1090_v5, %v1063_v4  ;;  %1877 = vmatpush.bf16.msra.mxu3 %v3844_v33  ;;  %v2856_v4 = vld [vmem:[%s3794_s29 + $0x13c] sm:$0xf] }
 0x134   : > { %1794 = vmatpush.bf16.msra.mxu0 %v3670_v58 }
 0x135   : > { %1822 = vmatpush.bf16.msra.mxu1 %v3675_v59 }
 0x136   : > { %1850 = vmatpush.bf16.msra.mxu2 %v3850_v34 }
 0x137   : > { %1878 = vmatpush.bf16.msra.mxu3 %v3859_v35 }
 0x138   : > { %v1064_v31 = vpop.f32.mrf.mxu2  ;;  %v1011_v37 = vpop.f32.mrf.mxu0  ;;  %1795 = vmatpush.bf16.msra.mxu0 %v3694_v62 }
 0x139   : > { %v1092_v33 = vpop.f32.mrf.mxu3  ;;  %v1065_v29 = vadd.f32 %v1064_v31, %v1037_v13  ;;  %v1039_v39 = vpop.f32.mrf.mxu1  ;;  %1823 = vmatpush.bf16.msra.mxu1 %v3699_v63  ;;  %v2858_v13 = vld [vmem:[%s3794_s29 + $0x158] sm:$0xf0] }
 0x13a   : > { %v1040_v43 = vadd.f32 %v1039_v39, %v1011_v37  ;;  %1851 = vmatpush.bf16.msra.mxu2 %v3865_v36  ;;  %v2861_v18 = vor.u32 %v3198_v9, %v2858_v13  ;;  %v1293_v39 = vunpack.c.h.b16 %v4034_v38 }
 0x13b   : > { %v4070_v34 = vadd.f32 %v1092_v33, %v1065_v29  ;;  %1879 = vmatpush.bf16.msra.mxu3 %v3881_v45  ;;  %1404 = vmatmul.bf16.gmra.mxu0 %v2825_v28  ;;  %v4104_v29 = vld [vmem:[%s3794_s29 + $0x17c] sm:$0xff] }
 0x13c   : > { %1432 = vmatmul.bf16.gmra.mxu1 %v2829_v55  ;;  %1796 = vmatpush.bf16.msra.mxu0 %v3718_v2  ;;  %v2787_v55 = vld [vmem:[%s3794_s29 + $0x174] sm:$0xff] }
 0x13d   : > { %1460 = vmatmul.bf16.gmra.mxu2 %v2833_v40  ;;  %1824 = vmatpush.bf16.msra.mxu1 %v3723_v3  ;;  %v1295_v40 = vunpack.c.h.b16 %v2787_v55 }
 0x13e   : > { %1488 = vmatmul.bf16.gmra.mxu3 %v2837_v41  ;;  %1852 = vmatpush.bf16.msra.mxu2 %v3887_v46  ;;  %v3197_v46 = vld [vmem:[%s3794_s29 + $0x138] sm:$0xf]  ;;  %v1296_v41 = vunpack.c.l.b16 %v4104_v29 }
 0x13f   : > { %1880 = vmatpush.bf16.msra.mxu3 %v3895_v19  ;;  %v2850_v19 = vld [vmem:[%s3794_s29 + $0x150] sm:$0xf0] }
 0x140   : > { %v1067_v59 = vpop.f32.mrf.mxu2  ;;  %v1013_v45 = vpop.f32.mrf.mxu0  ;;  %1797 = vmatpush.bf16.msra.mxu0 %v3743_v6  ;;  %v2853_v44 = vor.u32 %v3197_v46, %v2850_v19  ;;  %v1324_v46 = vpack.c.b16 %v1296_v41, %v1296_v41 }
 0x141   : > { %v1095_v35 = vpop.f32.mrf.mxu3  ;;  %v1068_v36 = vadd.f32 %v1067_v59, %v1040_v43  ;;  %v1041_v12 = vpop.f32.mrf.mxu1  ;;  %1825 = vmatpush.bf16.msra.mxu1 %v3748_v7 }
 0x142   : > { %v1042_v5 = vadd.f32 %v1041_v12, %v1013_v45  ;;  %1853 = vmatpush.bf16.msra.mxu2 %v3901_v20 }
 0x143   : > { %v4079_v63 = vadd.f32 %v1095_v35, %v1068_v36  ;;  %1881 = vmatpush.bf16.msra.mxu3 %v3908_v21  ;;  %v2857_v21 = vor.u32 %v3201_v8, %v2856_v4 }
 0x144   : > { %1798 = vmatpush.bf16.msra.mxu0 %v3767_v10 }
 0x145   : > { %1826 = vmatpush.bf16.msra.mxu1 %v3772_v11 }
 0x146   : > { %1854 = vmatpush.bf16.msra.mxu2 %v3914_v22 }
 0x147   : > { %1882 = vmatpush.bf16.msra.mxu3 %v3922_v23 }
 0x148   : > { %v1069_v3 = vpop.f32.mrf.mxu2  ;;  %v1016_v16 = vpop.f32.mrf.mxu0  ;;  %1799 = vmatpush.bf16.msra.mxu0 %v3787_v14 }
 0x149   : > { %v1097_v20 = vpop.f32.mrf.mxu3  ;;  %v1070_v47 = vadd.f32 %v1069_v3, %v1042_v5  ;;  %v1044_v17 = vpop.f32.mrf.mxu1  ;;  %1827 = vmatpush.bf16.msra.mxu1 %v3792_v15  ;;  %v1321_v15 = vpack.c.b16 %v1293_v39, %v1293_v39  ;;  %v1323_v5 = vpack.c.b16 %v1295_v40, %v1295_v40  ;;  %v3185_v3 = vld [vmem:[%s3794_s29 + $0xd8] sm:$0xf] }
 0x14a   : > { %v1045_v31 = vadd.f32 %v1044_v17, %v1016_v16  ;;  %1855 = vmatpush.bf16.msra.mxu2 %v3928_v26  ;;  %v3207_v16 = vld [vmem:[%s3794_s29 + $0x1a0] sm:$0xf0]  ;;  %v3204_v17 = vld [vmem:[%s3794_s29 + $0x18c] sm:$0xf] }
 0x14b   : > { %v4097_v7 = vadd.f32 %v1097_v20, %v1070_v47  ;;  %1883 = vmatpush.bf16.msra.mxu3 %v3944_v42  ;;  %1409 = vmatmul.bf16.gmra.mxu0 %v2853_v44  ;;  %v1294_v42 = vunpack.c.l.b16 %v2787_v55  ;;  %v2810_v20 = vld [vmem:[%s3794_s29 + $0xf0] sm:$0xf0]  ;;  %v2816_v44 = vld [vmem:[%s3794_s29 + $0xdc] sm:$0xf]  ;;  %v2908_v47 = vld [vmem:[%s3794_s29 + $0x188] sm:$0xf] }
 0x14c   : > { %1437 = vmatmul.bf16.gmra.mxu1 %v2857_v21  ;;  %v3189_v21 = vld [vmem:[%s3794_s29 + $0xf4] sm:$0xf0] }
 0x14d   : > { %1465 = vmatmul.bf16.gmra.mxu2 %v2861_v18  ;;  %v1322_v35 = vpack.c.b16 %v1294_v42, %v1294_v42  ;;  %v2910_v18 = vld [vmem:[%s3794_s29 + $0x1a4] sm:$0xf0] }
 0x14e   : > { %1493 = vmatmul.bf16.gmra.mxu3 %v2865_v27  ;;  %v2913_v55 = vor.u32 %v3204_v17, %v2910_v18  ;;  %v4600_v17 = vld [vmem:[#allocation6_spill] sm:$0xff] }
 0x150   : > { %v1072_v22 = vpop.f32.mrf.mxu2  ;;  %v1018_v28 = vpop.f32.mrf.mxu0 }
 0x151   : > { %v1100_v23 = vpop.f32.mrf.mxu3  ;;  %v1073_v33 = vadd.f32 %v1072_v22, %v1045_v31  ;;  %v1046_v11 = vpop.f32.mrf.mxu1  ;;  %v2813_v22 = vor.u32 %v3185_v3, %v2810_v20  ;;  %v3203_v3 = vld [vmem:[%s3794_s29 + $0x164] sm:$0xf0]  ;;  %v2964_v20 = vld [vmem:[%s3794_s29 + $0x1f8] sm:$0xf] }
 0x152   : > { %v1047_v26 = vadd.f32 %v1046_v11, %v1018_v28  ;;  %v2909_v11 = vor.u32 %v3207_v16, %v2908_v47  ;;  %v2966_v47 = vld [vmem:[%s3794_s29 + $0x214] sm:$0xf0]  ;;  %v4599_v16 = vld [vmem:[#allocation3_spill] sm:$0xff] }
 0x153   : > { %v4106_v37 = vadd.f32 %v1100_v23, %v1073_v33  ;;  %v2817_v23 = vor.u32 %v3189_v21, %v2816_v44  ;;  %v3221_v44 = vld [vmem:[%s3794_s29 + $0x210] sm:$0xf0]  ;;  %v3218_v21 = vld [vmem:[%s3794_s29 + $0x1fc] sm:$0xf] }
 0x158   : > { %v1074_v43 = vpop.f32.mrf.mxu2  ;;  %v1021_v45 = vpop.f32.mrf.mxu0 }
 0x159   : > { %v1102_v59 = vpop.f32.mrf.mxu3  ;;  %v1075_v36 = vadd.f32 %v1074_v43, %v1047_v26  ;;  %v1049_v12 = vpop.f32.mrf.mxu1 }
 0x15a   : > { %v1050_v19 = vadd.f32 %v1049_v12, %v1021_v45  ;;  %v3211_v45 = vld [vmem:[%s3794_s29 + $0x1c4] sm:$0xf]  ;;  %v2938_v12 = vld [vmem:[%s3794_s29 + $0x1dc] sm:$0xf0] }
 0x15b   : > { %v4110_v38 = vadd.f32 %v1102_v59, %v1075_v36  ;;  %1414 = vmatmul.bf16.gmra.mxu0 %v1321_v15  ;;  %v2844_v59 = vld [vmem:[%s3794_s29 + $0x114] sm:$0xf]  ;;  %v3196_v15 = vld [vmem:[%s3794_s29 + $0x12c] sm:$0xf0]  ;;  %v3214_v36 = vld [vmem:[%s3794_s29 + $0x1d8] sm:$0xf0] }
 0x15c   : > { %1442 = vmatmul.bf16.gmra.mxu1 %v1322_v35  ;;  %v2936_v35 = vld [vmem:[%s3794_s29 + $0x1c0] sm:$0xf] }
 0x15d   : > { %1470 = vmatmul.bf16.gmra.mxu2 %v1323_v5 }
 0x15e   : > { %1498 = vmatmul.bf16.gmra.mxu3 %v1324_v46 }
 0x160   : > { %v1077_v4 = vpop.f32.mrf.mxu2  ;;  %v1023_v13 = vpop.f32.mrf.mxu0 }
 0x161   : > { %v1105_v8 = vpop.f32.mrf.mxu3  ;;  %v1078_v9 = vadd.f32 %v1077_v4, %v1050_v19  ;;  %v1051_v51 = vpop.f32.mrf.mxu1  ;;  %v2937_v19 = vor.u32 %v3214_v36, %v2936_v35  ;;  %v2941_v4 = vor.u32 %v3211_v45, %v2938_v12  ;;  %v2866_v13 = vld [vmem:[%s3794_s29 + $0x160] sm:$0xf0] }
 0x162   : > { %v2872_v51 = vld [vmem:[%s3794_s29 + $0x14c] sm:$0xf] }
 0x163   : > { %v4112_v30 = vadd.f32 %v1105_v8, %v1078_v9 }
 0x168   : > { %v1079_v27 = vpop.f32.mrf.mxu2  ;;  %v1118_v33 = vpop.f32.mrf.mxu0 }
 0x169   : > { %v1107_v31 = vpop.f32.mrf.mxu3  ;;  %v1146_v28 = vpop.f32.mrf.mxu1  ;;  %v1119_v26 = vadd.f32 %v1118_v33, %v4052_v25  ;;  %v2969_v33 = vor.u32 %v3218_v21, %v2966_v47 }
 0x16b   : > { %v1147_v39 = vadd.f32 %v1146_v28, %v1119_v26  ;;  %1511 = vmatmul.bf16.vlgmr.msrb.gmra.mxu0 %v2813_v22  ;;  %v4603_v26 = vld [vmem:[#allocation7_spill] sm:$0xff] }
 0x16c   : > { %2874 = vmatmul.msk.bf16.vlgmr.msrb.gmra.mxu1 %vm984_vm0, %v2817_v23  ;;  %1910 = vmatpush.bf16.msrb.mxu0 %v3811_v24  ;;  %v2838_v24 = vld [vmem:[%s3794_s29 + $0x128] sm:$0xf0]  ;;  %v2965_v23 = vor.u32 %v3221_v44, %v2964_v20 }
 0x16d   : > { %1744 = vmatmul.bf16.vlgmr.msrb.gmra.mxu2 %v2909_v11  ;;  %2109 = vmatpush.bf16.msrb.mxu1 %v3612_v48  ;;  %v4601_v11 = vld [vmem:[#allocation5_spill] sm:$0xff] }
 0x16e   : > { %1772 = vmatmul.bf16.vlgmr.msrb.gmra.mxu3 %v2913_v55  ;;  %2137 = vmatpush.bf16.msrb.mxu2 %v3617_v49  ;;  %v4602_v55 = vld [vmem:[#allocation8_spill] sm:$0xff] }
 0x16f   : > { %2165 = vmatpush.bf16.msrb.mxu3 %v3622_v50  ;;  %v3192_v50 = vld [vmem:[%s3794_s29 + $0x110] sm:$0xf] }
 0x170   : > { %v1174_v25 = vpop.f32.mrf.mxu2  ;;  %v1120_v41 = vpop.f32.mrf.mxu0  ;;  %1911 = vmatpush.bf16.msrb.mxu0 %v3837_v32 }
 0x171   : > { %v4128_v42 = vpop.f32.mrf.mxu3  ;;  %v4130_v40 = vadd.f32 %v1174_v25, %v1147_v39  ;;  %v1148_v49 = vpop.f32.mrf.mxu1  ;;  %v1121_v43 = vadd.f32 %v1120_v41, %v4070_v34  ;;  %2110 = vmatpush.bf16.msrb.mxu1 %v3634_v52  ;;  %v2845_v52 = vor.u32 %v3196_v15, %v2844_v59 }
 0x172   : > { %2138 = vmatpush.bf16.msrb.mxu2 %v3639_v53 }
 0x173   : > { %2166 = vmatpush.bf16.msrb.mxu3 %v3646_v54  ;;  %v1149_v48 = vadd.f32 %v1148_v49, %v1121_v43  ;;  %v2841_v54 = vor.u32 %v3192_v50, %v2838_v24  ;;  %v2789_v43 = vld [vmem:[%s3794_s29 + $0x184] sm:$0xf]  ;;  %v2902_v50 = vld [vmem:[%s3794_s29 + $0x230] sm:$0xff] }
 0x174   : > { %v1298_v59 = vunpack.c.l.b16 %v2789_v43  ;;  %v1665_v15 = vunpack.c.l.b16 %v2902_v50  ;;  %v1666_v35 = vunpack.c.h.b16 %v2902_v50  ;;  %v3281_v43 = vld [vmem:[%s4583_s1 + $0x130] sm:$0xff]  ;;  %v2944_v50 = vld [vmem:[%s3794_s29 + $0x1c8] sm:$0xf] }
 0x175   : > { %2111 = vmatpush.bf16.msrb.mxu1 %v3658_v56 }
 0x176   : > { %2139 = vmatpush.bf16.msrb.mxu2 %v3663_v57 }
 0x177   : > { %2167 = vmatpush.bf16.msrb.mxu3 %v3670_v58 }
 0x178   : > { %v1176_v53 = vpop.f32.mrf.mxu2  ;;  %v1123_v5 = vpop.f32.mrf.mxu0 }
 0x179   : > { %v4148_v32 = vpop.f32.mrf.mxu3  ;;  %v4150_v34 = vadd.f32 %v1176_v53, %v1149_v48  ;;  %v1151_v46 = vpop.f32.mrf.mxu1  ;;  %v1124_v8 = vadd.f32 %v1123_v5, %v4079_v63  ;;  %2112 = vmatpush.bf16.msrb.mxu1 %v3682_v60  ;;  %v4598_v60 = vld [vmem:[#allocation4_spill] sm:$0xff]  ;;  %v1326_v53 = vpack.c.b16 %v1298_v59, %v1298_v59 }
 0x17a   : > { %2140 = vmatpush.bf16.msrb.mxu2 %v3687_v61  ;;  %v2946_v59 = vld [vmem:[%s3794_s29 + $0x1e4] sm:$0xf0] }
 0x17b   : > { %2168 = vmatpush.bf16.msrb.mxu3 %v3694_v62  ;;  %v1152_v57 = vadd.f32 %v1151_v46, %v1124_v8  ;;  %1516 = vmatmul.bf16.gmra.mxu0 %v2841_v54  ;;  %v1694_v46 = vpack.c.b16 %v1666_v35, %v1666_v35  ;;  %v3216_v35 = vld [vmem:[%s3794_s29 + $0x1e8] sm:$0xf0] }
 0x17c   : > { %2875 = vmatmul.msk.bf16.gmra.mxu1 %vm984_vm0, %v2845_v52 }
 0x17d   : > { %1749 = vmatmul.bf16.gmra.mxu2 %v2937_v19  ;;  %2113 = vmatpush.bf16.msrb.mxu1 %v3706_v0 }
 0x17e   : > { %1777 = vmatmul.bf16.gmra.mxu3 %v2941_v4  ;;  %2141 = vmatpush.bf16.msrb.mxu2 %v3711_v1 }
 0x17f   : > { %2169 = vmatpush.bf16.msrb.mxu3 %v3718_v2  ;;  %v3199_v2 = vld [vmem:[%s3794_s29 + $0x148] sm:$0xf] }
 0x180   : > { %v1179_v56 = vpop.f32.mrf.mxu2  ;;  %v1125_v62 = vpop.f32.mrf.mxu0  ;;  %v2869_v18 = vor.u32 %v3199_v2, %v2866_v13  ;;  %v3209_v2 = vld [vmem:[%s3794_s29 + $0x1b0] sm:$0xf0]  ;;  %v3206_v13 = vld [vmem:[%s3794_s29 + $0x19c] sm:$0xf] }
 0x181   : > { %v4159_v58 = vpop.f32.mrf.mxu3  ;;  %v4161_v61 = vadd.f32 %v1179_v56, %v1152_v57  ;;  %v1153_v63 = vpop.f32.mrf.mxu1  ;;  %v1126_v9 = vadd.f32 %v1125_v62, %v4097_v7  ;;  %2114 = vmatpush.bf16.msrb.mxu1 %v4599_v16 }
 0x182   : > { %2142 = vmatpush.bf16.msrb.mxu2 %v4598_v60  ;;  %v3205_v60 = vld [vmem:[%s3794_s29 + $0x194] sm:$0xf] }
 0x183   : > { %2170 = vmatpush.bf16.msrb.mxu3 %v3743_v6  ;;  %v1154_v1 = vadd.f32 %v1153_v63, %v1126_v9  ;;  %v2873_v6 = vor.u32 %v3203_v3, %v2872_v51  ;;  %v2916_v63 = vld [vmem:[%s3794_s29 + $0x190] sm:$0xf]  ;;  %v3208_v9 = vld [vmem:[%s3794_s29 + $0x1a8] sm:$0xf0]  ;;  %v2926_v51 = vld [vmem:[%s3794_s29 + $0x1b4] sm:$0xf0] }
 0x184   : > { %v2917_v44 = vor.u32 %v3208_v9, %v2916_v63 }
 0x185   : > { %2115 = vmatpush.bf16.msrb.mxu1 %v4601_v11 }
 0x186   : > { %2143 = vmatpush.bf16.msrb.mxu2 %v4600_v17 }
 0x187   : > { %2171 = vmatpush.bf16.msrb.mxu3 %v3767_v10 }
 0x188   : > { %v1181_v0 = vpop.f32.mrf.mxu2  ;;  %v1128_v31 = vpop.f32.mrf.mxu0 }
 0x189   : > { %v4178_v7 = vpop.f32.mrf.mxu3  ;;  %v4180_v27 = vadd.f32 %v1181_v0, %v1154_v1  ;;  %v1156_v22 = vpop.f32.mrf.mxu1  ;;  %v1129_v28 = vadd.f32 %v1128_v31, %v4106_v37  ;;  %2116 = vmatpush.bf16.msrb.mxu1 %v4603_v26  ;;  %v2924_v1 = vld [vmem:[%s3794_s29 + $0x198] sm:$0xf]  ;;  %v2929_v0 = vor.u32 %v3206_v13, %v2926_v51  ;;  %v3288_v13 = vld [vmem:[%s4583_s1 + $0x120] sm:$0xff] }
 0x18a   : > { %2144 = vmatpush.bf16.msrb.mxu2 %v4602_v55  ;;  %v2925_v17 = vor.u32 %v3209_v2, %v2924_v1  ;;  %v3275_v31 = vld [vmem:[%s4583_s1 + $0x178] sm:$0xff]  ;;  %v3287_v1 = vld [vmem:[%s4583_s1 + $0xe0] sm:$0xff] }
 0x18b   : > { %2172 = vmatpush.bf16.msrb.mxu3 %v3787_v14  ;;  %v1157_v10 = vadd.f32 %v1156_v22, %v1129_v28  ;;  %1521 = vmatmul.bf16.gmra.mxu0 %v2869_v18  ;;  %v1297_v14 = vunpack.c.h.b16 %v4104_v29  ;;  %v3276_v22 = vld [vmem:[%s4583_s1 + $0xf8] sm:$0xff] }
 0x18c   : > { %2876 = vmatmul.msk.bf16.gmra.mxu1 %vm984_vm0, %v2873_v6 }
 0x18d   : > { %1754 = vmatmul.bf16.gmra.mxu2 %v2965_v23  ;;  %v1325_v12 = vpack.c.b16 %v1297_v14, %v1297_v14  ;;  %v3277_v23 = vld [vmem:[%s4583_s1 + $0x188] sm:$0xff]  ;;  %v3215_v14 = vld [vmem:[%s3794_s29 + $0x1e0] sm:$0xf0] }
 0x18e   : > { %1782 = vmatmul.bf16.gmra.mxu3 %v2969_v33 }
 0x190   : > { %v1184_v39 = vpop.f32.mrf.mxu2  ;;  %v1130_v37 = vpop.f32.mrf.mxu0 }
 0x191   : > { %v4188_v25 = vpop.f32.mrf.mxu3  ;;  %v4190_v41 = vadd.f32 %v1184_v39, %v1157_v10  ;;  %v1158_v49 = vpop.f32.mrf.mxu1  ;;  %v1131_v48 = vadd.f32 %v1130_v37, %v4110_v38  ;;  %v1693_v38 = vpack.c.b16 %v1665_v15, %v1665_v15  ;;  %v3279_v39 = vld [vmem:[%s4583_s1 + $0x170] sm:$0xff] }
 0x192   : > { %v3280_v37 = vld [vmem:[%s4583_s1 + $0xf0] sm:$0xff] }
 0x193   : > { %v1159_v24 = vadd.f32 %v1158_v49, %v1131_v48  ;;  %v2952_v15 = vld [vmem:[%s3794_s29 + $0x1d0] sm:$0xf] }
 0x194   : > { %v2953_v63 = vor.u32 %v3216_v35, %v2952_v15 }
 0x198   : > { %v1186_v36 = vpop.f32.mrf.mxu2  ;;  %v1133_v52 = vpop.f32.mrf.mxu0 }
 0x199   : > { %v4196_v45 = vpop.f32.mrf.mxu3  ;;  %v4198_v54 = vadd.f32 %v1186_v36, %v1159_v24  ;;  %v1161_v5 = vpop.f32.mrf.mxu1  ;;  %v1134_v29 = vadd.f32 %v1133_v52, %v4112_v30  ;;  %v2918_v30 = vld [vmem:[%s3794_s29 + $0x1ac] sm:$0xf0]  ;;  %v3212_v24 = vld [vmem:[%s3794_s29 + $0x1cc] sm:$0xf]  ;;  %v3213_v36 = vld [vmem:[%s3794_s29 + $0x1d4] sm:$0xf] }
 0x19a   : > { %v2921_v21 = vor.u32 %v3205_v60, %v2918_v30  ;;  %v3284_v52 = vld [vmem:[%s4583_s1 + $0xe8] sm:$0xff]  ;;  %v3286_v30 = vld [vmem:[%s4583_s1 + $0x160] sm:$0xff] }
 0x19b   : > { %v1162_v19 = vadd.f32 %v1161_v5, %v1134_v29  ;;  %1526 = vmatmul.bf16.gmra.mxu0 %v1325_v12  ;;  %v2954_v12 = vld [vmem:[%s3794_s29 + $0x1ec] sm:$0xf0]  ;;  %v3285_v5 = vld [vmem:[%s4583_s1 + $0x128] sm:$0xff]  ;;  %v2945_v29 = vor.u32 %v3215_v14, %v2944_v50 }
 0x19c   : > { %2877 = vmatmul.msk.bf16.gmra.mxu1 %vm984_vm0, %v1326_v53  ;;  %v3283_v53 = vld [vmem:[%s4583_s1 + $0x168] sm:$0xff]  ;;  %v2957_v9 = vor.u32 %v3213_v36, %v2954_v12 }
 0x19d   : > { %1759 = vmatmul.bf16.gmra.mxu2 %v1693_v38 }
 0x19e   : > { %1787 = vmatmul.bf16.gmra.mxu3 %v1694_v46 }
 0x1a0   : > { %v1189_v4 = vpop.f32.mrf.mxu2  ;;  %v1135_v56 = vpop.f32.mrf.mxu0 }
 0x1a1   : > { %v4202_v8 = vpop.f32.mrf.mxu3  ;;  %v4204_v57 = vadd.f32 %v1189_v4, %v1162_v19  ;;  %v1163_v62 = vpop.f32.mrf.mxu1  ;;  %v2949_v19 = vor.u32 %v3212_v24, %v2946_v59 }
 0x1a8   : > { %v1191_v3 = vpop.f32.mrf.mxu2  ;;  %v1400_v47 = vpop.f32.mrf.mxu0 }
 0x1a9   : > { %v1389_v20 = vpop.f32.mrf.mxu3  ;;  %v1428_v16 = vpop.f32.mrf.mxu1  ;;  %v1401_v18 = vadd.f32 %v1400_v47, %v4128_v42  ;;  %v3278_v42 = vld [vmem:[%s4583_s1 + $0x138] sm:$0xff] }
 0x1aa   : > { %v3290_v3 = vld [vmem:[%s4583_s1 + $0xd8] sm:$0xff] }
 0x1ab   : > { %v1429_v6 = vadd.f32 %v1428_v16, %v1401_v18  ;;  %1800 = vmatmul.bf16.vlgmr.msra.gmra.mxu0 %v2917_v44  ;;  %v3291_v20 = vld [vmem:[%s4583_s1 + $0x118] sm:$0xff]  ;;  %v3292_v18 = vld [vmem:[%s4583_s1 + $0x150] sm:$0xff] }
 0x1ac   : > { %1828 = vmatmul.bf16.vlgmr.msra.gmra.mxu1 %v2921_v21  ;;  %2193 = vmatpush.bf16.msra.mxu0 %v3276_v22  ;;  %v3294_v22 = vld [vmem:[%s4583_s1 + $0x110] sm:$0xff] }
 0x1ad   : > { %1856 = vmatmul.bf16.vlgmr.msra.gmra.mxu2 %v2925_v17  ;;  %2221 = vmatpush.bf16.msra.mxu1 %v3278_v42  ;;  %v3222_v42 = vld [vmem:[%s3794_s29 + $0x218] sm:$0xf0] }
 0x1ae   : > { %1884 = vmatmul.bf16.vlgmr.msra.gmra.mxu3 %v2929_v0  ;;  %2249 = vmatpush.bf16.msra.mxu2 %v3275_v31 }
 0x1af   : > { %2283 = vmatpush.bf16.msra.mxu3 %v3277_v23 }
 0x1b0   : > { %v1456_v33 = vpop.f32.mrf.mxu2  ;;  %v1402_v55 = vpop.f32.mrf.mxu0  ;;  %2194 = vmatpush.bf16.msra.mxu0 %v3280_v37  ;;  %v3296_v37 = vld [vmem:[%s4583_s1 + $0xc8] sm:$0xff] }
 0x1b1   : > { %v1484_v28 = vpop.f32.mrf.mxu3  ;;  %v1457_v11 = vadd.f32 %v1456_v33, %v1429_v6  ;;  %v1430_v10 = vpop.f32.mrf.mxu1  ;;  %v1403_v26 = vadd.f32 %v1402_v55, %v4148_v32  ;;  %2222 = vmatpush.bf16.msra.mxu1 %v3281_v43  ;;  %v3282_v32 = vld [vmem:[%s4583_s1 + $0x180] sm:$0xff]  ;;  %v3293_v6 = vld [vmem:[%s4583_s1 + $0xd0] sm:$0xff]  ;;  %v3297_v43 = vld [vmem:[%s4583_s1 + $0x108] sm:$0xff] }
 0x1b2   : > { %2250 = vmatpush.bf16.msra.mxu2 %v3279_v39  ;;  %v3219_v33 = vld [vmem:[%s3794_s29 + $0x204] sm:$0xf]  ;;  %v3295_v39 = vld [vmem:[%s4583_s1 + $0x148] sm:$0xff] }
 0x1b3   : > { %v4234_v49 = vadd.f32 %v1484_v28, %v1457_v11  ;;  %2284 = vmatpush.bf16.msra.mxu3 %v3282_v32  ;;  %v1431_v48 = vadd.f32 %v1430_v10, %v1403_v26  ;;  %v2974_v28 = vld [vmem:[%s3794_s29 + $0x21c] sm:$0xf0]  ;;  %v2980_v11 = vld [vmem:[%s3794_s29 + $0x208] sm:$0xf]  ;;  %v3223_v55 = vld [vmem:[%s3794_s29 + $0x220] sm:$0xf0] }
 0x1b4   : > { %2195 = vmatpush.bf16.msra.mxu0 %v3284_v52  ;;  %v3220_v10 = vld [vmem:[%s3794_s29 + $0x20c] sm:$0xf]  ;;  %v2982_v26 = vld [vmem:[%s3794_s29 + $0x224] sm:$0xf0]  ;;  %v2977_v14 = vor.u32 %v3219_v33, %v2974_v28  ;;  %v2981_v35 = vor.u32 %v3223_v55, %v2980_v11  ;;  %v3299_v52 = vld [vmem:[%s4583_s1 + $0xc0] sm:$0xff] }
 0x1b5   : > { %2223 = vmatpush.bf16.msra.mxu1 %v3285_v5  ;;  %v2985_v36 = vor.u32 %v3220_v10, %v2982_v26  ;;  %v3210_v55 = vld [vmem:[%s3794_s29 + $0x1b8] sm:$0xf0]  ;;  %v3024_v10 = vld [vmem:[%s3794_s29 + $0x24c] sm:$0xf]  ;;  %v3228_v26 = vld [vmem:[%s3794_s29 + $0x264] sm:$0xf0] }
 0x1b6   : > { %2251 = vmatpush.bf16.msra.mxu2 %v3283_v53  ;;  %v3298_v53 = vld [vmem:[%s4583_s1 + $0x140] sm:$0xff] }
 0x1b8   : > { %v1458_v38 = vpop.f32.mrf.mxu2  ;;  %v1405_v56 = vpop.f32.mrf.mxu0  ;;  %2196 = vmatpush.bf16.msra.mxu0 %v3287_v1 }
 0x1b9   : > { %v1486_v46 = vpop.f32.mrf.mxu3  ;;  %v1459_v4 = vadd.f32 %v1458_v38, %v1431_v48  ;;  %v1433_v62 = vpop.f32.mrf.mxu1  ;;  %v1406_v60 = vadd.f32 %v1405_v56, %v4159_v58  ;;  %2224 = vmatpush.bf16.msra.mxu1 %v3288_v13  ;;  %v3289_v58 = vld [vmem:[%s4583_s1 + $0x158] sm:$0xff]  ;;  %v3300_v38 = vld [vmem:[%s4583_s1 + $0x100] sm:$0xff] }
 0x1ba   : > { %2252 = vmatpush.bf16.msra.mxu2 %v3286_v30 }
 0x1bb   : > { %v4266_v2 = vadd.f32 %v1486_v46, %v1459_v4  ;;  %v1434_v51 = vadd.f32 %v1433_v62, %v1406_v60  ;;  %1805 = vmatmul.bf16.gmra.mxu0 %v2945_v29  ;;  %v2903_v62 = vld [vmem:[%s3794_s29 + $0x238] sm:$0xff] }
 0x1bc   : > { %1833 = vmatmul.bf16.gmra.mxu1 %v2949_v19  ;;  %2197 = vmatpush.bf16.msra.mxu0 %v3290_v3  ;;  %v1667_v1 = vunpack.c.l.b16 %v2903_v62  ;;  %v1668_v13 = vunpack.c.h.b16 %v2903_v62  ;;  %v3217_v62 = vld [vmem:[%s3794_s29 + $0x1f0] sm:$0xf0] }
 0x1bd   : > { %1861 = vmatmul.bf16.gmra.mxu2 %v2953_v63  ;;  %2225 = vmatpush.bf16.msra.mxu1 %v3291_v20 }
 0x1be   : > { %1889 = vmatmul.bf16.gmra.mxu3 %v2957_v9  ;;  %2253 = vmatpush.bf16.msra.mxu2 %v3289_v58  ;;  %v2904_v9 = vld [vmem:[%s3794_s29 + $0x240] sm:$0xff] }
 0x1bf   : > { %v1670_v58 = vunpack.c.h.b16 %v2904_v9 }
 0x1c0   : > { %v1461_v44 = vpop.f32.mrf.mxu2  ;;  %v1407_v16 = vpop.f32.mrf.mxu0  ;;  %2198 = vmatpush.bf16.msra.mxu0 %v3293_v6 }
 0x1c1   : > { %v1489_v21 = vpop.f32.mrf.mxu3  ;;  %v1462_v47 = vadd.f32 %v1461_v44, %v1434_v51  ;;  %v1435_v17 = vpop.f32.mrf.mxu1  ;;  %v1408_v0 = vadd.f32 %v1407_v16, %v4178_v7  ;;  %2226 = vmatpush.bf16.msra.mxu1 %v3294_v22  ;;  %v2972_v7 = vld [vmem:[%s3794_s29 + $0x200] sm:$0xf]  ;;  %v1669_v51 = vunpack.c.l.b16 %v2904_v9  ;;  %v1695_v44 = vpack.c.b16 %v1667_v1, %v1667_v1 }
 0x1c2   : > { %2254 = vmatpush.bf16.msra.mxu2 %v3292_v18  ;;  %v2973_v50 = vor.u32 %v3222_v42, %v2972_v7  ;;  %v1698_v18 = vpack.c.b16 %v1670_v58, %v1670_v58  ;;  %v3235_v9 = vld [vmem:[%s3794_s29 + $0x29c] sm:$0xf0]  ;;  %v3236_v58 = vld [vmem:[%s3794_s29 + $0x2a4] sm:$0xf0] }
 0x1c3   : > { %v4287_v31 = vadd.f32 %v1489_v21, %v1462_v47  ;;  %v1436_v23 = vadd.f32 %v1435_v17, %v1408_v0  ;;  %v1696_v21 = vpack.c.b16 %v1668_v13, %v1668_v13  ;;  %v1697_v0 = vpack.c.b16 %v1669_v51, %v1669_v51  ;;  %v3054_v13 = vld [vmem:[%s3794_s29 + $0x2a0] sm:$0xf0]  ;;  %v3060_v51 = vld [vmem:[%s3794_s29 + $0x28c] sm:$0xf] }
 0x1c4   : > { %2199 = vmatpush.bf16.msra.mxu0 %v3296_v37  ;;  %v3026_v37 = vld [vmem:[%s3794_s29 + $0x268] sm:$0xf0] }
 0x1c5   : > { %2227 = vmatpush.bf16.msra.mxu1 %v3297_v43  ;;  %v3032_v43 = vld [vmem:[%s3794_s29 + $0x254] sm:$0xf] }
 0x1c6   : > { %2255 = vmatpush.bf16.msra.mxu2 %v3295_v39  ;;  %v3225_v39 = vld [vmem:[%s3794_s29 + $0x250] sm:$0xf] }
 0x1c8   : > { %v1463_v32 = vpop.f32.mrf.mxu2  ;;  %v1410_v59 = vpop.f32.mrf.mxu0  ;;  %2200 = vmatpush.bf16.msra.mxu0 %v3299_v52 }
 0x1c9   : > { %v1491_v48 = vpop.f32.mrf.mxu3  ;;  %v1464_v24 = vadd.f32 %v1463_v32, %v1436_v23  ;;  %v1438_v15 = vpop.f32.mrf.mxu1  ;;  %v1411_v12 = vadd.f32 %v1410_v59, %v4188_v25  ;;  %2228 = vmatpush.bf16.msra.mxu1 %v3300_v38  ;;  %v3229_v32 = vld [vmem:[%s3794_s29 + $0x26c] sm:$0xf0] }
 0x1ca   : > { %2256 = vmatpush.bf16.msra.mxu2 %v3298_v53 }
 0x1cb   : > { %v4316_v5 = vadd.f32 %v1491_v48, %v1464_v24  ;;  %v1439_v25 = vadd.f32 %v1438_v15, %v1411_v12  ;;  %1810 = vmatmul.bf16.gmra.mxu0 %v2973_v50  ;;  %v3025_v24 = vor.u32 %v3228_v26, %v3024_v10  ;;  %v3224_v10 = vld [vmem:[%s3794_s29 + $0x228] sm:$0xf0]  ;;  %v3080_v26 = vld [vmem:[%s3794_s29 + $0x2bc] sm:$0xf] }
 0x1cc   : > { %1838 = vmatmul.bf16.gmra.mxu1 %v2977_v14 }
 0x1cd   : > { %1866 = vmatmul.bf16.gmra.mxu2 %v2981_v35  ;;  %v3029_v35 = vor.u32 %v3225_v39, %v3026_v37  ;;  %v3242_v39 = vld [vmem:[%s3794_s29 + $0x2d4] sm:$0xf0]  ;;  %v3239_v37 = vld [vmem:[%s3794_s29 + $0x2c0] sm:$0xf] }
 0x1ce   : > { %1894 = vmatmul.bf16.gmra.mxu3 %v2985_v36  ;;  %v3033_v36 = vor.u32 %v3229_v32, %v3032_v43  ;;  %v3082_v32 = vld [vmem:[%s3794_s29 + $0x2d8] sm:$0xf0] }
 0x1d0   : > { %v1466_v46 = vpop.f32.mrf.mxu2  ;;  %v1412_v4 = vpop.f32.mrf.mxu0 }
 0x1d1   : > { %v1494_v29 = vpop.f32.mrf.mxu3  ;;  %v1467_v19 = vadd.f32 %v1466_v46, %v1439_v25  ;;  %v1440_v56 = vpop.f32.mrf.mxu1  ;;  %v1413_v63 = vadd.f32 %v1412_v4, %v4196_v45 }
 0x1d3   : > { %v4324_v60 = vadd.f32 %v1494_v29, %v1467_v19  ;;  %v1441_v30 = vadd.f32 %v1440_v56, %v1413_v63  ;;  %v2960_v56 = vld [vmem:[%s3794_s29 + $0x1d8] sm:$0xf]  ;;  %v3052_v63 = vld [vmem:[%s3794_s29 + $0x284] sm:$0xf] }
 0x1d8   : > { %v1468_v3 = vpop.f32.mrf.mxu2  ;;  %v1415_v16 = vpop.f32.mrf.mxu0 }
 0x1d9   : > { %v1496_v20 = vpop.f32.mrf.mxu3  ;;  %v1469_v47 = vadd.f32 %v1468_v3, %v1441_v30  ;;  %v1443_v17 = vpop.f32.mrf.mxu1  ;;  %v1416_v45 = vadd.f32 %v1415_v16, %v4202_v8  ;;  %v2932_v8 = vld [vmem:[%s3794_s29 + $0x1a0] sm:$0xf]  ;;  %v3232_v30 = vld [vmem:[%s3794_s29 + $0x288] sm:$0xf] }
 0x1da   : > { %v2933_v14 = vor.u32 %v3210_v55, %v2932_v8  ;;  %v2988_v55 = vld [vmem:[%s3794_s29 + $0x210] sm:$0xf] }
 0x1db   : > { %v4327_v6 = vadd.f32 %v1496_v20, %v1469_v47  ;;  %v1444_v22 = vadd.f32 %v1443_v17, %v1416_v45  ;;  %1815 = vmatmul.bf16.gmra.mxu0 %v1695_v44  ;;  %v2961_v44 = vor.u32 %v3217_v62, %v2960_v56  ;;  %v3057_v17 = vor.u32 %v3232_v30, %v3054_v13  ;;  %v2905_v30 = vld [vmem:[%s3794_s29 + $0x248] sm:$0xf]  ;;  %v3018_v13 = vld [vmem:[%s3794_s29 + $0x2f4] sm:$0xff] }
 0x1dc   : > { %1843 = vmatmul.bf16.gmra.mxu1 %v1696_v21  ;;  %v3053_v21 = vor.u32 %v3235_v9, %v3052_v63 }
 0x1dd   : > { %1871 = vmatmul.bf16.gmra.mxu2 %v1697_v0  ;;  %v3061_v0 = vor.u32 %v3236_v58, %v3060_v51  ;;  %v4397_v51 = vld [vmem:[%s3794_s29 + $0x2fc] sm:$0xff] }
 0x1de   : > { %1899 = vmatmul.bf16.gmra.mxu3 %v1698_v18 }
 0x1e0   : > { %v1471_v23 = vpop.f32.mrf.mxu2  ;;  %v1417_v33 = vpop.f32.mrf.mxu0 }
 0x1e1   : > { %v1499_v7 = vpop.f32.mrf.mxu3  ;;  %v1472_v42 = vadd.f32 %v1471_v23, %v1444_v22  ;;  %v1445_v28 = vpop.f32.mrf.mxu1 }
 0x1e3   : > { %v4329_v11 = vadd.f32 %v1499_v7, %v1472_v42 }
 0x1e8   : > { %v1473_v48 = vpop.f32.mrf.mxu2  ;;  %v1512_v59 = vpop.f32.mrf.mxu0 }
 0x1e9   : > { %v1501_v50 = vpop.f32.mrf.mxu3  ;;  %v1540_v15 = vpop.f32.mrf.mxu1  ;;  %v1513_v12 = vadd.f32 %v1512_v59, %v4234_v49  ;;  %v3088_v48 = vld [vmem:[%s3794_s29 + $0x2c4] sm:$0xf]  ;;  %v2989_v59 = vor.u32 %v3224_v10, %v2988_v55 }
 0x1ea   : > { %v3243_v50 = vld [vmem:[%s3794_s29 + $0x2dc] sm:$0xf0] }
 0x1eb   : > { %v4340_v53 = vadd.f32 %v1540_v15, %v1513_v12  ;;  %2990 = vmatmul.msk.bf16.vlgmr.msrb.gmra.mxu0 %vm984_vm0, %v2933_v14  ;;  %v3081_v15 = vor.u32 %v3242_v39, %v3080_v26  ;;  %v3085_v12 = vor.u32 %v3239_v37, %v3082_v32 }
 0x1ec   : > { %2117 = vmatmul.bf16.vlgmr.msrb.gmra.mxu1 %v3025_v24 }
 0x1ed   : > { %2145 = vmatmul.bf16.vlgmr.msrb.gmra.mxu2 %v3029_v35  ;;  %v1559_v52 = vmax.f32 %v4130_v40, %v4340_v53 }
 0x1ee   : > { %2173 = vmatmul.bf16.vlgmr.msrb.gmra.mxu3 %v3033_v36 }
 0x1f0   : > { %v1745_v38 = vpop.f32.mrf.mxu2  ;;  %v1514_v49 = vpop.f32.mrf.mxu0 }
 0x1f1   : > { %v1773_v25 = vpop.f32.mrf.mxu3  ;;  %v1542_v29 = vpop.f32.mrf.mxu1  ;;  %v1515_v19 = vadd.f32 %v1514_v49, %v4266_v2 }
 0x1f2   : > { %v4345_v46 = vadd.f32 %v1773_v25, %v1745_v38  ;;  %v3089_v38 = vor.u32 %v3243_v50, %v3088_v48  ;;  %v3226_v48 = vld [vmem:[%s3794_s29 + $0x258] sm:$0xf]  ;;  %v3034_v50 = vld [vmem:[%s3794_s29 + $0x270] sm:$0xf0] }
 0x1f3   : > { %v4348_v4 = vadd.f32 %v1542_v29, %v1515_v19 }
 0x1f5   : > { %v1560_v1 = vmax.f32 %v4150_v34, %v4348_v4 }
 0x1f8   : > { %v1747_v3 = vpop.f32.mrf.mxu2  ;;  %v1517_v2 = vpop.f32.mrf.mxu0 }
 0x1f9   : > { %v1775_v20 = vpop.f32.mrf.mxu3  ;;  %v1545_v16 = vpop.f32.mrf.mxu1  ;;  %v1518_v18 = vadd.f32 %v1517_v2, %v4287_v31 }
 0x1fa   : > { %v4360_v47 = vadd.f32 %v1775_v20, %v1747_v3  ;;  %v1671_v3 = vunpack.c.l.b16 %v2905_v30  ;;  %v2038_v20 = vunpack.c.l.b16 %v3018_v13 }
 0x1fb   : > { %v4363_v45 = vadd.f32 %v1545_v16, %v1518_v18  ;;  %2991 = vmatmul.msk.bf16.gmra.mxu0 %vm984_vm0, %v2961_v44  ;;  %v2039_v44 = vunpack.c.h.b16 %v3018_v13 }
 0x1fc   : > { %2122 = vmatmul.bf16.gmra.mxu1 %v3053_v21  ;;  %v2040_v21 = vunpack.c.l.b16 %v4397_v51  ;;  %v2066_v18 = vpack.c.b16 %v2038_v20, %v2038_v20 }
 0x1fd   : > { %2150 = vmatmul.bf16.gmra.mxu2 %v3057_v17  ;;  %v1561_v22 = vmax.f32 %v4161_v61, %v4363_v45 }
 0x1fe   : > { %2178 = vmatmul.bf16.gmra.mxu3 %v3061_v0  ;;  %v1699_v0 = vpack.c.b16 %v1671_v3, %v1671_v3 }
 0x200   : > { %v1750_v23 = vpop.f32.mrf.mxu2  ;;  %v1519_v31 = vpop.f32.mrf.mxu0 }
 0x201   : > { %v1778_v7 = vpop.f32.mrf.mxu3  ;;  %v1547_v33 = vpop.f32.mrf.mxu1  ;;  %v1520_v28 = vadd.f32 %v1519_v31, %v4316_v5  ;;  %v2067_v31 = vpack.c.b16 %v2039_v44, %v2039_v44 }
 0x202   : > { %v4368_v42 = vadd.f32 %v1778_v7, %v1750_v23 }
 0x203   : > { %v4371_v8 = vadd.f32 %v1547_v33, %v1520_v28  ;;  %v2068_v33 = vpack.c.b16 %v2040_v21, %v2040_v21 }
 0x205   : > { %v1562_v43 = vmax.f32 %v4180_v27, %v4371_v8 }
 0x208   : > { %v1752_v14 = vpop.f32.mrf.mxu2  ;;  %v1522_v5 = vpop.f32.mrf.mxu0 }
 0x209   : > { %v1780_v24 = vpop.f32.mrf.mxu3  ;;  %v1550_v36 = vpop.f32.mrf.mxu1  ;;  %v1523_v25 = vadd.f32 %v1522_v5, %v4324_v60  ;;  %v3048_v5 = vld [vmem:[%s3794_s29 + $0x264] sm:$0xf] }
 0x20a   : > { %v4383_v35 = vadd.f32 %v1780_v24, %v1752_v14  ;;  %v3040_v14 = vld [vmem:[%s3794_s29 + $0x25c] sm:$0xf]  ;;  %v3230_v24 = vld [vmem:[%s3794_s29 + $0x274] sm:$0xf0] }
 0x20b   : > { %v4386_v49 = vadd.f32 %v1550_v36, %v1523_v25  ;;  %2992 = vmatmul.msk.bf16.gmra.mxu0 %vm984_vm0, %v2989_v59  ;;  %v3227_v59 = vld [vmem:[%s3794_s29 + $0x260] sm:$0xf]  ;;  %v3037_v25 = vor.u32 %v3226_v48, %v3034_v50 }
 0x20c   : > { %2127 = vmatmul.bf16.gmra.mxu1 %v3081_v15  ;;  %v3042_v15 = vld [vmem:[%s3794_s29 + $0x278] sm:$0xf0]  ;;  %v3231_v36 = vld [vmem:[%s3794_s29 + $0x27c] sm:$0xf0] }
 0x20d   : > { %2155 = vmatmul.bf16.gmra.mxu2 %v3085_v12  ;;  %v1563_v29 = vmax.f32 %v4190_v41, %v4386_v49  ;;  %v3049_v30 = vor.u32 %v3231_v36, %v3048_v5 }
 0x20e   : > { %2183 = vmatmul.bf16.gmra.mxu3 %v3089_v38 }
 0x210   : > { %v1755_v19 = vpop.f32.mrf.mxu2  ;;  %v1524_v63 = vpop.f32.mrf.mxu0 }
 0x211   : > { %v1783_v56 = vpop.f32.mrf.mxu3  ;;  %v1552_v9 = vpop.f32.mrf.mxu1  ;;  %v1525_v60 = vadd.f32 %v1524_v63, %v4327_v6 }
 0x212   : > { %v4391_v62 = vadd.f32 %v1783_v56, %v1755_v19  ;;  %v3041_v19 = vor.u32 %v3230_v24, %v3040_v14 }
 0x213   : > { %v4399_v58 = vadd.f32 %v1552_v9, %v1525_v60  ;;  %v3045_v9 = vor.u32 %v3227_v59, %v3042_v15 }
 0x215   : > { %v1564_v2 = vmax.f32 %v4198_v54, %v4399_v58 }
 0x218   : > { %v1757_v16 = vpop.f32.mrf.mxu2  ;;  %v1527_v7 = vpop.f32.mrf.mxu0 }
 0x219   : > { %v1785_v17 = vpop.f32.mrf.mxu3  ;;  %v1555_v6 = vpop.f32.mrf.mxu1  ;;  %v1528_v28 = vadd.f32 %v1527_v7, %v4329_v11  ;;  %v3062_v7 = vld [vmem:[%s3794_s29 + $0x2a8] sm:$0xf0] }
 0x21a   : > { %v4404_v23 = vadd.f32 %v1785_v17, %v1757_v16 }
 0x21b   : > { %v4407_v55 = vadd.f32 %v1555_v6, %v1528_v28  ;;  %2993 = vmatmul.msk.bf16.gmra.mxu0 %vm984_vm0, %v1699_v0  ;;  %v3068_v6 = vld [vmem:[%s3794_s29 + $0x294] sm:$0xf] }
 0x21c   : > { %2132 = vmatmul.bf16.gmra.mxu1 %v2066_v18  ;;  %v3233_v18 = vld [vmem:[%s3794_s29 + $0x290] sm:$0xf]  ;;  %v3070_v28 = vld [vmem:[%s3794_s29 + $0x2b0] sm:$0xf0] }
 0x21d   : > { %2160 = vmatmul.bf16.gmra.mxu2 %v2067_v31  ;;  %v1565_v10 = vmax.f32 %v4204_v57, %v4407_v55  ;;  %v3237_v31 = vld [vmem:[%s3794_s29 + $0x2ac] sm:$0xf0]  ;;  %v3065_v48 = vor.u32 %v3233_v18, %v3062_v7 }
 0x21e   : > { %2188 = vmatmul.bf16.gmra.mxu3 %v2068_v33  ;;  %v3234_v33 = vld [vmem:[%s3794_s29 + $0x298] sm:$0xf]  ;;  %v3069_v50 = vor.u32 %v3237_v31, %v3068_v6 }
 0x21f   : > { %v3073_v15 = vor.u32 %v3234_v33, %v3070_v28 }
 0x220   : > { %v1760_v26 = vpop.f32.mrf.mxu2  ;;  %v1529_v32 = vpop.f32.mrf.mxu0 }
 0x221   : > { %v1788_v39 = vpop.f32.mrf.mxu3  ;;  %v1557_v11 = vpop.f32.mrf.mxu1 }
 0x222   : > { %v4412_v37 = vadd.f32 %v1788_v39, %v1760_v26  ;;  %v3076_v26 = vld [vmem:[%s3794_s29 + $0x29c] sm:$0xf]  ;;  %v3238_v39 = vld [vmem:[%s3794_s29 + $0x2b4] sm:$0xf0] }
 0x228   : > { %v1762_v12 = vpop.f32.mrf.mxu2  ;;  %v1801_v56 = vpop.f32.mrf.mxu0 }
 0x229   : > { %v1790_v38 = vpop.f32.mrf.mxu3  ;;  %v1829_v63 = vpop.f32.mrf.mxu1  ;;  %v1802_v13 = vadd.f32 %v1801_v56, %v4345_v46 }
 0x22b   : > { %v1830_v60 = vadd.f32 %v1829_v63, %v1802_v13  ;;  %2201 = vmatmul.bf16.vlgmr.msra.gmra.mxu0 %v3037_v25  ;;  %v3240_v13 = vld [vmem:[%s3794_s29 + $0x2c8] sm:$0xf] }
 0x22c   : > { %2229 = vmatmul.bf16.vlgmr.msra.gmra.mxu1 %v3041_v19 }
 0x22d   : > { %2257 = vmatmul.bf16.vlgmr.msra.gmra.mxu2 %v3045_v9 }
 0x22e   : > { %3106 = vmatmul.msk.bf16.vlgmr.msra.gmra.mxu3 %vm984_vm0, %v3049_v30 }
 0x230   : > { %v1857_v3 = vpop.f32.mrf.mxu2  ;;  %v1803_v21 = vpop.f32.mrf.mxu0 }
 0x231   : > { %v1885_v20 = vpop.f32.mrf.mxu3  ;;  %v1858_v44 = vadd.f32 %v1857_v3, %v1830_v60  ;;  %v1831_v16 = vpop.f32.mrf.mxu1  ;;  %v1804_v17 = vadd.f32 %v1803_v21, %v4360_v47  ;;  %v3077_v47 = vor.u32 %v3238_v39, %v3076_v26  ;;  %v3090_v60 = vld [vmem:[%s3794_s29 + $0x2e0] sm:$0xf0]  ;;  %v3096_v3 = vld [vmem:[%s3794_s29 + $0x2cc] sm:$0xf] }
 0x232   : > { %v3098_v21 = vld [vmem:[%s3794_s29 + $0x2e8] sm:$0xf0]  ;;  %v3093_v7 = vor.u32 %v3240_v13, %v3090_v60 }
 0x233   : > { %v4425_v46 = vadd.f32 %v1885_v20, %v1858_v44  ;;  %v1832_v0 = vadd.f32 %v1831_v16, %v1804_v17  ;;  %v3244_v20 = vld [vmem:[%s3794_s29 + $0x2e4] sm:$0xf0]  ;;  %v3241_v44 = vld [vmem:[%s3794_s29 + $0x2d0] sm:$0xf]  ;;  %v3104_v16 = vld [vmem:[%s3794_s29 + $0x2d4] sm:$0xf] }
 0x234   : > { %v3245_v17 = vld [vmem:[%s3794_s29 + $0x2ec] sm:$0xf0]  ;;  %v3097_v6 = vor.u32 %v3244_v20, %v3096_v3 }
 0x235   : > { %v3105_v26 = vor.u32 %v3245_v17, %v3104_v16 }
 0x238   : > { %v1859_v32 = vpop.f32.mrf.mxu2  ;;  %v1806_v24 = vpop.f32.mrf.mxu0 }
 0x239   : > { %v1887_v11 = vpop.f32.mrf.mxu3  ;;  %v1860_v14 = vadd.f32 %v1859_v32, %v1832_v0  ;;  %v1834_v59 = vpop.f32.mrf.mxu1  ;;  %v1807_v5 = vadd.f32 %v1806_v24, %v4368_v42 }
 0x23b   : > { %v4436_v36 = vadd.f32 %v1887_v11, %v1860_v14  ;;  %v1835_v12 = vadd.f32 %v1834_v59, %v1807_v5  ;;  %2206 = vmatmul.bf16.gmra.mxu0 %v3065_v48  ;;  %v3021_v5 = vld [vmem:[%s3794_s29 + $0x30c] sm:$0xf] }
 0x23c   : > { %2234 = vmatmul.bf16.gmra.mxu1 %v3069_v50 }
 0x23d   : > { %2262 = vmatmul.bf16.gmra.mxu2 %v3073_v15  ;;  %v3020_v15 = vld [vmem:[%s3794_s29 + $0x304] sm:$0xff]  ;;  %s420_s29 = smul.u32 7, %s2411_s15 }
 0x23e   : > { %3107 = vmatmul.msk.bf16.gmra.mxu3 %vm984_vm0, %v3077_v47 }
 0x23f   : > { %p421_p8 = scmp.lt.s32.totalorder %s420_s29, 13 }
 0x240   : > { %v1862_v38 = vpop.f32.mrf.mxu2  ;;  %v1808_v56 = vpop.f32.mrf.mxu0 }
 0x241   : > { %v1890_v25 = vpop.f32.mrf.mxu3  ;;  %v1863_v19 = vadd.f32 %v1862_v38, %v1835_v12  ;;  %v1836_v42 = vpop.f32.mrf.mxu1  ;;  %v1809_v63 = vadd.f32 %v1808_v56, %v4383_v35  ;;  %v3101_v35 = vor.u32 %v3241_v44, %v3098_v21  ;;  %v2044_v56 = vunpack.c.l.b16 %v3021_v5  ;;  %s4608_s29 = smov (!%p421_p8, %s420_s29), 13 }
 0x242   : > { %s2473_s14 = sshll.u32 %s4608_s29, 2 }
 0x243   : > { %v4440_v9 = vadd.f32 %v1890_v25, %v1863_v19  ;;  %v1837_v30 = vadd.f32 %v1836_v42, %v1809_v63  ;;  %v2042_v25 = vunpack.c.l.b16 %v3020_v15  ;;  %v2043_v19 = vunpack.c.h.b16 %v3020_v15  ;;  %s4533_s9 = scalar_lea.vmem %s4585_s3, %s2473_s14 }
 0x244   : > { %v2072_v21 = vpack.c.b16 %v2044_v56, %v2044_v56 }
 0x245   : > { %v2070_v13 = vpack.c.b16 %v2042_v25, %v2042_v25  ;;  %v2071_v44 = vpack.c.b16 %v2043_v19, %v2043_v19 }
 0x248   : > { %v1864_v0 = vpop.f32.mrf.mxu2  ;;  %v1811_v33 = vpop.f32.mrf.mxu0 }
 0x249   : > { %v1892_v18 = vpop.f32.mrf.mxu3  ;;  %v1865_v31 = vadd.f32 %v1864_v0, %v1837_v30  ;;  %v1839_v28 = vpop.f32.mrf.mxu1  ;;  %v1812_v39 = vadd.f32 %v1811_v33, %v4391_v62  ;;  %v2041_v62 = vunpack.c.h.b16 %v4397_v51 }
 0x24b   : > { %v4451_v32 = vadd.f32 %v1892_v18, %v1865_v31  ;;  %v1840_v11 = vadd.f32 %v1839_v28, %v1812_v39  ;;  %2211 = vmatmul.bf16.gmra.mxu0 %v3093_v7  ;;  %v2069_v30 = vpack.c.b16 %v2041_v62, %v2041_v62 }
 0x24c   : > { %2239 = vmatmul.bf16.gmra.mxu1 %v3097_v6 }
 0x24d   : > { %2267 = vmatmul.bf16.gmra.mxu2 %v3101_v35 }
 0x24e   : > { %3108 = vmatmul.msk.bf16.gmra.mxu3 %vm984_vm0, %v3105_v26 }
 0x250   : > { %v1867_v48 = vpop.f32.mrf.mxu2  ;;  %v1813_v24 = vpop.f32.mrf.mxu0 }
 0x251   : > { %v1895_v50 = vpop.f32.mrf.mxu3  ;;  %v1868_v14 = vadd.f32 %v1867_v48, %v1840_v11  ;;  %v1841_v59 = vpop.f32.mrf.mxu1  ;;  %v1814_v47 = vadd.f32 %v1813_v24, %v4404_v23 }
 0x253   : > { %v1896_v12 = vadd.f32 %v1895_v50, %v1868_v14  ;;  %v1842_v38 = vadd.f32 %v1841_v59, %v1814_v47 }
 0x258   : > { %v1869_v42 = vpop.f32.mrf.mxu2  ;;  %v1816_v3 = vpop.f32.mrf.mxu0 }
 0x259   : > { %v1897_v63 = vpop.f32.mrf.mxu3  ;;  %v1870_v60 = vadd.f32 %v1869_v42, %v1842_v38  ;;  %v1844_v20 = vpop.f32.mrf.mxu1  ;;  %v1817_v16 = vadd.f32 %v1816_v3, %v4412_v37 }
 0x25b   : > { %v1898_v23 = vadd.f32 %v1897_v63, %v1870_v60  ;;  %v1845_v17 = vadd.f32 %v1844_v20, %v1817_v16  ;;  %2216 = vmatmul.bf16.gmra.mxu0 %v2069_v30 }
 0x25c   : > { %2244 = vmatmul.bf16.gmra.mxu1 %v2070_v13 }
 0x25d   : > { %2272 = vmatmul.bf16.gmra.mxu2 %v2071_v44 }
 0x25e   : > { %3109 = vmatmul.msk.bf16.gmra.mxu3 %vm984_vm0, %v2072_v21 }
 0x260   : > { %v1872_v51 = vpop.f32.mrf.mxu2  ;;  %v1818_v7 = vpop.f32.mrf.mxu0 }
 0x261   : > { %v1900_v0 = vpop.f32.mrf.mxu3  ;;  %v1873_v18 = vadd.f32 %v1872_v51, %v1845_v17  ;;  %v1846_v6 = vpop.f32.mrf.mxu1 }
 0x262   : > { %v4526_v6 = vld [vmem:[%s4584_s2] ss:$0 sm:$0xff] }
 0x263   : > { %v1901_v31 = vadd.f32 %v1900_v0, %v1873_v18 }
 0x268   : > { %v1874_v33 = vpop.f32.mrf.mxu2  ;;  %v1913_v35 = vpop.f32.mrf.mxu0 }
 0x269   : > { %v1902_v28 = vpop.f32.mrf.mxu3  ;;  %v2118_v26 = vpop.f32.mrf.mxu1  ;;  %v1914_v39 = vadd.f32 %v1913_v35, %v4425_v46 }
 0x26b   : > { %v4464_v37 = vmax.f32 %v1559_v52, %v1914_v39 }
 0x270   : > { %v2146_v11 = vpop.f32.mrf.mxu2  ;;  %v1915_v50 = vpop.f32.mrf.mxu0 }
 0x271   : > { %v2174_v48 = vpop.f32.mrf.mxu3  ;;  %v2120_v14 = vpop.f32.mrf.mxu1  ;;  %v1916_v24 = vadd.f32 %v1915_v50, %v4436_v36 }
 0x273   : > { %v4470_v59 = vmax.f32 %v1560_v1, %v1916_v24 }
 0x278   : > { %v2148_v15 = vpop.f32.mrf.mxu2  ;;  %v1918_v5 = vpop.f32.mrf.mxu0 }
 0x279   : > { %v2176_v47 = vpop.f32.mrf.mxu3  ;;  %v2123_v46 = vpop.f32.mrf.mxu1  ;;  %v1919_v38 = vadd.f32 %v1918_v5, %v4440_v9 }
 0x27b   : > { %v4476_v40 = vmax.f32 %v1561_v22, %v1919_v38 }
 0x280   : > { %v2151_v53 = vpop.f32.mrf.mxu2  ;;  %v1920_v62 = vpop.f32.mrf.mxu0 }
 0x281   : > { %v2179_v52 = vpop.f32.mrf.mxu3  ;;  %v4478_v36 = vpop.f32.mrf.mxu1  ;;  %v1921_v34 = vadd.f32 %v1920_v62, %v4451_v32  ;;  %v2152_v33 = vadd.f32 %v2151_v53, %v2123_v46 }
 0x283   : > { %v4484_v4 = vmax.f32 %v1562_v43, %v1921_v34 }
 0x288   : > { %v2153_v1 = vpop.f32.mrf.mxu2  ;;  %v1923_v9 = vpop.f32.mrf.mxu0 }
 0x289   : > { %v4486_v25 = vpop.f32.mrf.mxu3  ;;  %v4488_v19 = vpop.f32.mrf.mxu1  ;;  %v1924_v61 = vadd.f32 %v1923_v9, %v1896_v12  ;;  %v2154_v46 = vadd.f32 %v2153_v1, %v4478_v36 }
 0x28b   : > { %v4493_v45 = vmax.f32 %v1563_v29, %v1924_v61  ;;  %v2182_v9 = vadd.f32 %v4486_v25, %v2154_v46 }
 0x290   : > { %v4495_v22 = vpop.f32.mrf.mxu2  ;;  %v1925_v56 = vpop.f32.mrf.mxu0 }
 0x291   : > { %v4497_v32 = vpop.f32.mrf.mxu3  ;;  %v4499_v27 = vpop.f32.mrf.mxu1  ;;  %v1926_v8 = vadd.f32 %v1925_v56, %v1898_v23  ;;  %v2149_v23 = vadd.f32 %v2148_v15, %v2120_v14  ;;  %v2157_v36 = vadd.f32 %v4495_v22, %v4488_v19 }
 0x293   : > { %v4504_v43 = vmax.f32 %v1564_v2, %v1926_v8  ;;  %v2147_v2 = vadd.f32 %v2146_v11, %v2118_v26 }
 0x295   : > { %v2175_v20 = vadd.f32 %v2174_v48, %v2147_v2  ;;  %v2180_v48 = vadd.f32 %v2179_v52, %v2152_v33 }
 0x298   : > { %v4506_v42 = vpop.f32.mrf.mxu2  ;;  %v1928_v41 = vpop.f32.mrf.mxu0 }
 0x299   : > { %v4508_v12 = vpop.f32.mrf.mxu3  ;;  %v4510_v49 = vpop.f32.mrf.mxu1  ;;  %v1929_v29 = vadd.f32 %v1928_v41, %v1901_v31  ;;  %v2159_v19 = vadd.f32 %v4506_v42, %v4499_v27 }
 0x29b   : > { %v4515_v63 = vmax.f32 %v1565_v10, %v1929_v29  ;;  %v2177_v10 = vadd.f32 %v2176_v47, %v2149_v23 }
 0x2a0   : > { %v4517_v30 = vpop.f32.mrf.mxu2  ;;  %v1930_v54 = vpop.f32.mrf.mxu0 }
 0x2a1   : > { %v4519_v13 = vpop.f32.mrf.mxu3  ;;  %v2135_v58 = vpop.f32.mrf.mxu1  ;;  %v2162_v27 = vadd.f32 %v4517_v30, %v4510_v49 }
 0x2a8   : > { %v2163_v60 = vpop.f32.mrf.mxu2  ;;  %v2202_v44 = vpop.f32.mrf.mxu0 }
 0x2a9   : > { %v2191_v3 = vpop.f32.mrf.mxu3  ;;  %v2230_v21 = vpop.f32.mrf.mxu1  ;;  %v2203_v16 = vadd.f32 %v2202_v44, %v2175_v20 }
 0x2aa   : > { %v2185_v3 = vadd.f32 %v4497_v32, %v2157_v36 }
 0x2ab   : > { %v2231_v17 = vadd.f32 %v2230_v21, %v2203_v16 }
 0x2b0   : > { %v2258_v57 = vpop.f32.mrf.mxu2  ;;  %v2204_v0 = vpop.f32.mrf.mxu0 }
 0x2b1   : > { %v2286_v55 = vpop.f32.mrf.mxu3  ;;  %v2259_v51 = vadd.f32 %v2258_v57, %v2231_v17  ;;  %v2232_v18 = vpop.f32.mrf.mxu1  ;;  %v2205_v31 = vadd.f32 %v2204_v0, %v2177_v10 }
 0x2b3   : > { %v2287_v7 = vadd.f32 %v2286_v55, %v2259_v51  ;;  %v2233_v26 = vadd.f32 %v2232_v18, %v2205_v31  ;;  %v2187_v51 = vadd.f32 %v4508_v12, %v2159_v19 }
 0x2b5   : > { %v2305_v28 = vmax.f32 %v4464_v37, %v2287_v7 }
 0x2b7   : > { %v2316_v35 = vadd.f32 %v4526_v6, %v2305_v28 }
 0x2b8   : > { %v2260_v39 = vpop.f32.mrf.mxu2  ;;  %v2207_v24 = vpop.f32.mrf.mxu0 }
 0x2b9   : > { %v2288_v11 = vpop.f32.mrf.mxu3  ;;  %v2323_v50 = vmax.f32 %v2316_v35, 0.0  ;;  %v2261_v14 = vadd.f32 %v2260_v39, %v2233_v26  ;;  %v2235_v15 = vpop.f32.mrf.mxu1  ;;  %v2208_v5 = vadd.f32 %v2207_v24, %v2180_v48 }
 0x2bb   : > { %v2330_v47 = vpack.c.bf16 %v2323_v50, %v2323_v50  ;;  %v2289_v37 = vadd.f32 %v2288_v11, %v2261_v14  ;;  %v2236_v52 = vadd.f32 %v2235_v15, %v2208_v5  ;;  %v2190_v11 = vadd.f32 %v4519_v13, %v2162_v27 }
 0x2bd   : > { %2338 = vst.msk [vmem:[%s4533_s9] sm:$0xf] %vm2337_vm1, %v2330_v47  ;;  %v2306_v38 = vmax.f32 %v4470_v59, %v2289_v37 }
 0x2bf   : > { %v2317_v53 = vadd.f32 %v4526_v6, %v2306_v38 }
 0x2c0   : > { %v2263_v62 = vpop.f32.mrf.mxu2  ;;  %v2209_v8 = vpop.f32.mrf.mxu0 }
 0x2c1   : > { %v2291_v34 = vpop.f32.mrf.mxu3  ;;  %v2324_v61 = vmax.f32 %v2317_v53, 0.0  ;;  %v2264_v56 = vadd.f32 %v2263_v62, %v2236_v52  ;;  %v2237_v41 = vpop.f32.mrf.mxu1  ;;  %v2210_v58 = vadd.f32 %v2209_v8, %v2182_v9 }
 0x2c3   : > { %v2331_v29 = vpack.c.bf16 %v2324_v61, %v2324_v61  ;;  %v2292_v54 = vadd.f32 %v2291_v34, %v2264_v56  ;;  %v2238_v2 = vadd.f32 %v2237_v41, %v2210_v58 }
 0x2c5   : > { %2339 = vst.msk [vmem:[%s4533_s9 + $0x4] sm:$0xf] %vm2337_vm1, %v2331_v29  ;;  %v2307_v59 = vmax.f32 %v4476_v40, %v2292_v54 }
 0x2c7   : > { %v2318_v1 = vadd.f32 %v4526_v6, %v2307_v59 }
 0x2c8   : > { %v2265_v60 = vpop.f32.mrf.mxu2  ;;  %v2212_v21 = vpop.f32.mrf.mxu0 }
 0x2c9   : > { %v2293_v25 = vpop.f32.mrf.mxu3  ;;  %v2325_v20 = vmax.f32 %v2318_v1, 0.0  ;;  %v2266_v44 = vadd.f32 %v2265_v60, %v2238_v2  ;;  %v2240_v16 = vpop.f32.mrf.mxu1  ;;  %v2213_v57 = vadd.f32 %v2212_v21, %v2185_v3 }
 0x2cb   : > { %v2332_v23 = vpack.c.bf16 %v2325_v20, %v2325_v20  ;;  %v2294_v17 = vadd.f32 %v2293_v25, %v2266_v44  ;;  %v2241_v55 = vadd.f32 %v2240_v16, %v2213_v57 }
 0x2cd   : > { %2340 = vst.msk [vmem:[%s4533_s9 + $0x8] sm:$0xf] %vm2337_vm1, %v2332_v23  ;;  %v2308_v40 = vmax.f32 %v4484_v4, %v2294_v17 }
 0x2cf   : > { %v2319_v22 = vadd.f32 %v4526_v6, %v2308_v40 }
 0x2d0   : > { %v2268_v10 = vpop.f32.mrf.mxu2  ;;  %v2214_v7 = vpop.f32.mrf.mxu0 }
 0x2d1   : > { %v2296_v32 = vpop.f32.mrf.mxu3  ;;  %v2326_v0 = vmax.f32 %v2319_v22, 0.0  ;;  %v2269_v18 = vadd.f32 %v2268_v10, %v2241_v55  ;;  %v2242_v31 = vpop.f32.mrf.mxu1  ;;  %v2215_v35 = vadd.f32 %v2214_v7, %v2187_v51 }
 0x2d3   : > { %v2333_v33 = vpack.c.bf16 %v2326_v0, %v2326_v0  ;;  %v2297_v28 = vadd.f32 %v2296_v32, %v2269_v18  ;;  %v2243_v26 = vadd.f32 %v2242_v31, %v2215_v35 }
 0x2d5   : > { %2341 = vst.msk [vmem:[%s4533_s9 + $0xc] sm:$0xf] %vm2337_vm1, %v2333_v33  ;;  %v2309_v4 = vmax.f32 %v4493_v45, %v2297_v28 }
 0x2d7   : > { %v2320_v42 = vadd.f32 %v4526_v6, %v2309_v4 }
 0x2d8   : > { %v2270_v39 = vpop.f32.mrf.mxu2  ;;  %v2217_v14 = vpop.f32.mrf.mxu0 }
 0x2d9   : > { %v2298_v12 = vpop.f32.mrf.mxu3  ;;  %v2327_v48 = vmax.f32 %v2320_v42, 0.0  ;;  %v2271_v50 = vadd.f32 %v2270_v39, %v2243_v26  ;;  %v2245_v24 = vpop.f32.mrf.mxu1  ;;  %v2218_v37 = vadd.f32 %v2217_v14, %v2190_v11 }
 0x2db   : > { %v2334_v15 = vpack.c.bf16 %v2327_v48, %v2327_v48  ;;  %v2299_v47 = vadd.f32 %v2298_v12, %v2271_v50  ;;  %v2246_v30 = vadd.f32 %v2245_v24, %v2218_v37 }
 0x2dd   : > { %2342 = vst.msk [vmem:[%s4533_s9 + $0x10] sm:$0xf] %vm2337_vm1, %v2334_v15  ;;  %v2310_v49 = vmax.f32 %v4504_v43, %v2299_v47 }
 0x2df   : > { %v2321_v45 = vadd.f32 %v4526_v6, %v2310_v49 }
 0x2e0   : > { %v2273_v5 = vpop.f32.mrf.mxu2  ;;  %v2219_v53 = vpop.f32.mrf.mxu0 }
 0x2e1   : > { %v2301_v46 = vpop.f32.mrf.mxu3  ;;  %v2328_v38 = vmax.f32 %v2321_v45, 0.0  ;;  %v2274_v13 = vadd.f32 %v2273_v5, %v2246_v30  ;;  %v2247_v52 = vpop.f32.mrf.mxu1 }
 0x2e3   : > { %v2335_v62 = vpack.c.bf16 %v2328_v38, %v2328_v38  ;;  %v2302_v34 = vadd.f32 %v2301_v46, %v2274_v13 }
 0x2e5   : > { %2343 = vst.msk [vmem:[%s4533_s9 + $0x14] sm:$0xf] %vm2337_vm1, %v2335_v62  ;;  %v2311_v9 = vmax.f32 %v4515_v63, %v2302_v34 }
 0x2e7   : > { %v2322_v61 = vadd.f32 %v4526_v6, %v2311_v9 }
 0x2e8   : > { %v2275_v56 = vpop.f32.mrf.mxu2 }
 0x2e9   : > { %v2303_v43 = vpop.f32.mrf.mxu3  ;;  %v2329_v8 = vmax.f32 %v2322_v61, 0.0 }
 0x2eb   : > { %v2336_v41 = vpack.c.bf16 %v2329_v8, %v2329_v8 }
 0x2ed   : > { %2344 = vst.msk [vmem:[%s4533_s9 + $0x18] sm:$0xf] %vm2337_vm1, %v2336_v41 }
 0x2ee PF: > { %p10_p9 = scmp.ge.s32.totalorder %s3362_s16, 4   ;;  %s4604_s12 = smov %s3319_s13 }
 0x2ef   : > { %s4605_s13 = smov %s3371_s19  ;;  %s4606_s14 = smov %s3362_s16 }
 0x2f0   :  { %12 = sbr.rel (!%p10_p9) target bundleno = 2 (0x2), region = 102 }

// kernel: simple_cnn_forward.7
= control target key start
LH: loop header
LB: loop body
LE: loop exit
PB: predicated region body
PF: predicated region fallthrough
CT: control target
= control target key end

     0   :  { %s1241_s0 = inlined_call_operand.vmem [shape: bf16[2,1024], index: 0, kind: input, shape index: {}]   ;;  %s1242_s1 = inlined_call_operand.vmem [shape: bf16[1024,128], index: 1, kind: input, shape index: {}]   ;;  %s1243_s2 = inlined_call_operand.vmem [shape: f32[1,128], index: 2, kind: input, shape index: {}]   ;;  %s1244_s3 = inlined_call_operand.hbm [shape: f32[2,128], index: 3, kind: output, shape index: {}]  }
   0x1   :  { %v934_v0 = vld [vmem:[%s1242_s1 + $0x38] sm:$0xff]  ;;  %v933_v4 = vld [vmem:[%s1242_s1 + $0x30] sm:$0xff]  ;;  %v932_v8 = vld [vmem:[%s1242_s1 + $0x28] sm:$0xff] }
   0x2   :  { %v942_v1 = vld [vmem:[%s1242_s1 + $0x78] sm:$0xff]  ;;  %550 = vmatpush.bf16.msra.mxu0 %v934_v0  ;;  %v941_v5 = vld [vmem:[%s1242_s1 + $0x70] sm:$0xff]  ;;  %v940_v9 = vld [vmem:[%s1242_s1 + $0x68] sm:$0xff] }
   0x3   :  { %v950_v2 = vld [vmem:[%s1242_s1 + $0xb8] sm:$0xff]  ;;  %563 = vmatpush.bf16.msra.mxu1 %v942_v1  ;;  %v949_v6 = vld [vmem:[%s1242_s1 + $0xb0] sm:$0xff]  ;;  %v948_v10 = vld [vmem:[%s1242_s1 + $0xa8] sm:$0xff] }
   0x4   :  { %v958_v3 = vld [vmem:[%s1242_s1 + $0xf8] sm:$0xff]  ;;  %576 = vmatpush.bf16.msra.mxu2 %v950_v2  ;;  %v957_v7 = vld [vmem:[%s1242_s1 + $0xf0] sm:$0xff]  ;;  %v956_v11 = vld [vmem:[%s1242_s1 + $0xe8] sm:$0xff] }
   0x5   :  { %589 = vmatpush.bf16.msra.mxu3 %v958_v3  ;;  %v931_v12 = vld [vmem:[%s1242_s1 + $0x20] sm:$0xff]  ;;  %v930_v17 = vld [vmem:[%s1242_s1 + $0x18] sm:$0xff]  ;;  %v929_v21 = vld [vmem:[%s1242_s1 + $0x10] sm:$0xff] }
   0x6   :  { %551 = vmatpush.bf16.msra.mxu0 %v933_v4  ;;  %v939_v13 = vld [vmem:[%s1242_s1 + $0x60] sm:$0xff]  ;;  %v938_v18 = vld [vmem:[%s1242_s1 + $0x58] sm:$0xff]  ;;  %v937_v22 = vld [vmem:[%s1242_s1 + $0x50] sm:$0xff] }
   0x7   :  { %564 = vmatpush.bf16.msra.mxu1 %v941_v5  ;;  %v947_v14 = vld [vmem:[%s1242_s1 + $0xa0] sm:$0xff]  ;;  %v946_v19 = vld [vmem:[%s1242_s1 + $0x98] sm:$0xff] }
   0x8   :  { %577 = vmatpush.bf16.msra.mxu2 %v949_v6  ;;  %v955_v15 = vld [vmem:[%s1242_s1 + $0xe0] sm:$0xff]  ;;  %v954_v20 = vld [vmem:[%s1242_s1 + $0xd8] sm:$0xff] }
   0x9   :  { %590 = vmatpush.bf16.msra.mxu3 %v957_v7  ;;  %v15_v16 = vld [vmem:[%s1241_s0] sm:$0xff] }
   0xa   :  { %552 = vmatpush.bf16.msra.mxu0 %v932_v8  ;;  %149 = vst [vmem:[#allocation1] ss:$9 sm:$0xff] %v15_v16 }
   0xb   :  { %565 = vmatpush.bf16.msra.mxu1 %v940_v9 }
   0xc   :  { %578 = vmatpush.bf16.msra.mxu2 %v948_v10 }
   0xd   :  { %591 = vmatpush.bf16.msra.mxu3 %v956_v11 }
   0xe   :  { %553 = vmatpush.bf16.msra.mxu0 %v931_v12 }
   0xf   :  { %566 = vmatpush.bf16.msra.mxu1 %v939_v13 }
  0x10   :  { %579 = vmatpush.bf16.msra.mxu2 %v947_v14 }
  0x11   :  { %592 = vmatpush.bf16.msra.mxu3 %v955_v15 }
  0x12   :  { %554 = vmatpush.bf16.msra.mxu0 %v930_v17 }
  0x13   :  { %567 = vmatpush.bf16.msra.mxu1 %v938_v18 }
  0x14   :  { %8 = vsyncpa [#allocation3], 0  ;;  %580 = vmatpush.bf16.msra.mxu2 %v946_v19  ;;  %v945_v23 = vld [vmem:[%s1242_s1 + $0x90] sm:$0xff]  ;;  %v928_v25 = vld [vmem:[%s1242_s1 + $0x8] sm:$0xff]  ;;  %s1019_s4 = smov [#allocation2]   ;;  %s662_s8 = sshll.u32 %s1244_s3, 4  ;;  %s663_s8 = int_to_ptr.hbm [resolvable:$true] %s662_s8 }
  0x15   :  { %593 = vmatpush.bf16.msra.mxu3 %v954_v20  ;;  %v953_v24 = vld [vmem:[%s1242_s1 + $0xd0] sm:$0xff]  ;;  %v936_v26 = vld [vmem:[%s1242_s1 + $0x48] sm:$0xff]  ;;  %v927_v29 = vld [vmem:[%s1242_s1] sm:$0xff]  ;;  %s660_s5 = sshll.u32 %s1019_s4, 4  ;;  %s661_s5 = int_to_ptr.vmem [resolvable:$true] %s660_s5 }
  0x16   :  { %555 = vmatpush.bf16.msra.mxu0 %v929_v21  ;;  %v944_v27 = vld [vmem:[%s1242_s1 + $0x88] sm:$0xff]  ;;  %v935_v30 = vld [vmem:[%s1242_s1 + $0x40] sm:$0xff]  ;;  %v966_v33 = vld [vmem:[%s1242_s1 + $0x138] sm:$0xff] }
  0x17   :  { %568 = vmatpush.bf16.msra.mxu1 %v937_v22  ;;  %v952_v28 = vld [vmem:[%s1242_s1 + $0xc8] sm:$0xff]  ;;  %v943_v31 = vld [vmem:[%s1242_s1 + $0x80] sm:$0xff]  ;;  %v974_v34 = vld [vmem:[%s1242_s1 + $0x178] sm:$0xff] }
  0x18   :  { %581 = vmatpush.bf16.msra.mxu2 %v945_v23  ;;  %v951_v32 = vld [vmem:[%s1242_s1 + $0xc0] sm:$0xff]  ;;  %v982_v35 = vld [vmem:[%s1242_s1 + $0x1b8] sm:$0xff]  ;;  %v965_v37 = vld [vmem:[%s1242_s1 + $0x130] sm:$0xff] }
  0x19   :  { %594 = vmatpush.bf16.msra.mxu3 %v953_v24  ;;  %v990_v36 = vld [vmem:[%s1242_s1 + $0x1f8] sm:$0xff]  ;;  %v973_v40 = vld [vmem:[%s1242_s1 + $0x170] sm:$0xff]  ;;  %v150_v41 = vld [vmem:[#allocation1] sm:$0xff] }
  0x1a   :  { %556 = vmatpush.bf16.msra.mxu0 %v928_v25  ;;  %v152_v38 = vld [vmem:[#allocation1 + $0x12] sm:$0xff]  ;;  %v153_v39 = vld [vmem:[#allocation1 + $0x1b] sm:$0xff]  ;;  %v151_v42 = vld [vmem:[#allocation1 + $0x9] sm:$0xff] }
  0x1b   :  { %569 = vmatpush.bf16.msra.mxu1 %v936_v26  ;;  %v981_v43 = vld [vmem:[%s1242_s1 + $0x1b0] sm:$0xff]  ;;  %v964_v45 = vld [vmem:[%s1242_s1 + $0x128] sm:$0xff]  ;;  %v963_v49 = vld [vmem:[%s1242_s1 + $0x120] sm:$0xff] }
  0x1c   :  { %582 = vmatpush.bf16.msra.mxu2 %v944_v27  ;;  %v989_v44 = vld [vmem:[%s1242_s1 + $0x1f0] sm:$0xff]  ;;  %v972_v46 = vld [vmem:[%s1242_s1 + $0x168] sm:$0xff]  ;;  %v971_v50 = vld [vmem:[%s1242_s1 + $0x160] sm:$0xff] }
  0x1d   :  { %595 = vmatpush.bf16.msra.mxu3 %v952_v28  ;;  %v980_v47 = vld [vmem:[%s1242_s1 + $0x1a8] sm:$0xff]  ;;  %v979_v51 = vld [vmem:[%s1242_s1 + $0x1a0] sm:$0xff]  ;;  %v962_v53 = vld [vmem:[%s1242_s1 + $0x118] sm:$0xff] }
  0x1e   :  { %557 = vmatpush.bf16.msra.mxu0 %v927_v29  ;;  %v988_v48 = vld [vmem:[%s1242_s1 + $0x1e8] sm:$0xff]  ;;  %v987_v52 = vld [vmem:[%s1242_s1 + $0x1e0] sm:$0xff]  ;;  %v970_v54 = vld [vmem:[%s1242_s1 + $0x158] sm:$0xff] }
  0x1f   :  { %570 = vmatpush.bf16.msra.mxu1 %v935_v30  ;;  %v978_v55 = vld [vmem:[%s1242_s1 + $0x198] sm:$0xff]  ;;  %v961_v57 = vld [vmem:[%s1242_s1 + $0x110] sm:$0xff]  ;;  %v960_v61 = vld [vmem:[%s1242_s1 + $0x108] sm:$0xff] }
  0x20   :  { %583 = vmatpush.bf16.msra.mxu2 %v943_v31  ;;  %v986_v56 = vld [vmem:[%s1242_s1 + $0x1d8] sm:$0xff]  ;;  %v969_v58 = vld [vmem:[%s1242_s1 + $0x150] sm:$0xff]  ;;  %v968_v62 = vld [vmem:[%s1242_s1 + $0x148] sm:$0xff] }
  0x21   :  { %596 = vmatpush.bf16.msra.mxu3 %v951_v32  ;;  %558 = vmatmul.bf16.vlgmr.msra.gmra.mxu0 %v150_v41  ;;  %v977_v59 = vld [vmem:[%s1242_s1 + $0x190] sm:$0xff]  ;;  %v976_v63 = vld [vmem:[%s1242_s1 + $0x188] sm:$0xff]  ;;  %v959_v1 = vld [vmem:[%s1242_s1 + $0x100] sm:$0xff] }
  0x22   :  { %602 = vmatpush.bf16.msrb.mxu0 %v966_v33  ;;  %571 = vmatmul.bf16.vlgmr.msra.gmra.mxu1 %v151_v42  ;;  %v985_v60 = vld [vmem:[%s1242_s1 + $0x1d0] sm:$0xff]  ;;  %v984_v0 = vld [vmem:[%s1242_s1 + $0x1c8] sm:$0xff]  ;;  %v967_v2 = vld [vmem:[%s1242_s1 + $0x140] sm:$0xff] }
  0x23   :  { %615 = vmatpush.bf16.msrb.mxu1 %v974_v34  ;;  %584 = vmatmul.bf16.vlgmr.msra.gmra.mxu2 %v152_v38  ;;  %v975_v3 = vld [vmem:[%s1242_s1 + $0x180] sm:$0xff]  ;;  %v155_v6 = vld [vmem:[#allocation1 + $0x2d] sm:$0xff]  ;;  %v156_v7 = vld [vmem:[#allocation1 + $0x36] sm:$0xff] }
  0x24   :  { %628 = vmatpush.bf16.msrb.mxu2 %v982_v35  ;;  %597 = vmatmul.bf16.vlgmr.msra.gmra.mxu3 %v153_v39  ;;  %v983_v4 = vld [vmem:[%s1242_s1 + $0x1c0] sm:$0xff] }
  0x25   :  { %641 = vmatpush.bf16.msrb.mxu3 %v990_v36  ;;  %v154_v5 = vld [vmem:[#allocation1 + $0x24] sm:$0xff]  ;;  %v992_v15 = vld [vmem:[%s1243_s2] ss:$0 sm:$0xff] }
  0x26   :  { %603 = vmatpush.bf16.msrb.mxu0 %v965_v37  ;;  %v157_v8 = vld [vmem:[#allocation1 + $0x3f] sm:$0xff] }
  0x27   :  { %616 = vmatpush.bf16.msrb.mxu1 %v973_v40 }
  0x28   :  { %629 = vmatpush.bf16.msrb.mxu2 %v981_v43 }
  0x29   :  { %642 = vmatpush.bf16.msrb.mxu3 %v989_v44 }
  0x2a   :  { %604 = vmatpush.bf16.msrb.mxu0 %v964_v45 }
  0x2b   :  { %617 = vmatpush.bf16.msrb.mxu1 %v972_v46 }
  0x2c   :  { %630 = vmatpush.bf16.msrb.mxu2 %v980_v47 }
  0x2d   :  { %643 = vmatpush.bf16.msrb.mxu3 %v988_v48 }
  0x2e   :  { %605 = vmatpush.bf16.msrb.mxu0 %v963_v49 }
  0x2f   :  { %618 = vmatpush.bf16.msrb.mxu1 %v971_v50 }
  0x30   :  { %631 = vmatpush.bf16.msrb.mxu2 %v979_v51 }
  0x31   :  { %644 = vmatpush.bf16.msrb.mxu3 %v987_v52 }
  0x32   :  { %606 = vmatpush.bf16.msrb.mxu0 %v962_v53 }
  0x33   :  { %619 = vmatpush.bf16.msrb.mxu1 %v970_v54 }
  0x34   :  { %632 = vmatpush.bf16.msrb.mxu2 %v978_v55 }
  0x35   :  { %645 = vmatpush.bf16.msrb.mxu3 %v986_v56 }
  0x36   :  { %607 = vmatpush.bf16.msrb.mxu0 %v961_v57 }
  0x37   :  { %620 = vmatpush.bf16.msrb.mxu1 %v969_v58 }
  0x38   :  { %633 = vmatpush.bf16.msrb.mxu2 %v977_v59 }
  0x39   :  { %646 = vmatpush.bf16.msrb.mxu3 %v985_v60 }
  0x3a   :  { %608 = vmatpush.bf16.msrb.mxu0 %v960_v61 }
  0x3b   :  { %621 = vmatpush.bf16.msrb.mxu1 %v968_v62 }
  0x3c   :  { %634 = vmatpush.bf16.msrb.mxu2 %v976_v63 }
  0x3d   :  { %647 = vmatpush.bf16.msrb.mxu3 %v984_v0 }
  0x3e   :  { %609 = vmatpush.bf16.msrb.mxu0 %v959_v1 }
  0x3f   :  { %622 = vmatpush.bf16.msrb.mxu1 %v967_v2 }
  0x40   :  { %635 = vmatpush.bf16.msrb.mxu2 %v975_v3 }
  0x41   :  { %648 = vmatpush.bf16.msrb.mxu3 %v983_v4  ;;  %610 = vmatmul.bf16.vlgmr.msrb.gmra.mxu0 %v154_v5 }
  0x42   :  { %623 = vmatmul.bf16.vlgmr.msrb.gmra.mxu1 %v155_v6 }
  0x43   :  { %636 = vmatmul.bf16.vlgmr.msrb.gmra.mxu2 %v156_v7 }
  0x44   :  { %649 = vmatmul.bf16.vlgmr.msrb.gmra.mxu3 %v157_v8 }
  0x9e   :  { %v559_v9 = vpop.f32.mrf.mxu0 }
  0x9f   :  { %v572_v10 = vpop.f32.mrf.mxu1  ;;  %v560_v18 = vadd.f32 %v992_v15, %v559_v9 }
  0xa1   :  { %v573_v19 = vadd.f32 %v572_v10, %v560_v18 }
  0xa6   :  { %v585_v11 = vpop.f32.mrf.mxu2  ;;  %v561_v13 = vpop.f32.mrf.mxu0 }
  0xa7   :  { %v598_v12 = vpop.f32.mrf.mxu3  ;;  %v574_v14 = vpop.f32.mrf.mxu1  ;;  %v586_v20 = vadd.f32 %v585_v11, %v573_v19 }
  0xa9   :  { %v599_v21 = vadd.f32 %v598_v12, %v586_v20 }
  0xae   :  { %v587_v16 = vpop.f32.mrf.mxu2 }
  0xaf   :  { %v600_v17 = vpop.f32.mrf.mxu3 }
  0xbe   :  { %v611_v22 = vpop.f32.mrf.mxu0 }
  0xbf   :  { %v624_v23 = vpop.f32.mrf.mxu1  ;;  %v612_v24 = vadd.f32 %v611_v22, %v599_v21 }
  0xc1   :  { %v625_v25 = vadd.f32 %v624_v23, %v612_v24 }
  0xc6   :  { %v637_v26 = vpop.f32.mrf.mxu2  ;;  %v613_v29 = vpop.f32.mrf.mxu0 }
  0xc7   :  { %v650_v27 = vpop.f32.mrf.mxu3  ;;  %v638_v28 = vadd.f32 %v637_v26, %v625_v25  ;;  %v626_v30 = vpop.f32.mrf.mxu1 }
  0xc9   :  { %v651_v31 = vadd.f32 %v650_v27, %v638_v28 }
  0xcb   :  { %654 = vst [vmem:[#allocation2] sm:$0x3] %v651_v31 }
  0xcc   :  { %665 = dma.vmem_to_hbm [thread:$0]  %s661_s5, 32, %s663_s8, [#allocation3]  }
  0xce   :  { %v639_v32 = vpop.f32.mrf.mxu2 }
  0xcf   :  { %v652_v33 = vpop.f32.mrf.mxu3 }
  0xd0   :  { %1017 = dma.done.wait [#allocation3], 32  }
  0xd1   :  { %1018 = vsyncadd [#allocation3], 4294967264 }
  0xd2   :  { %670 = vsyncpa [#allocation3], 1 }

// kernel: simple_cnn_forward.6
= control target key start
LH: loop header
LB: loop body
LE: loop exit
PB: predicated region body
PF: predicated region fallthrough
CT: control target
= control target key end

     0   :  { %s8710_s12 = smov 0   ;;  %s8712_s13 = smov 0   ;;  %s10498_s0 = inlined_call_operand.vmem [shape: bf16[2,3136], index: 0, kind: input, shape index: {}]   ;;  %s10499_s1 = inlined_call_operand.vmem [shape: bf16[3136,1024], index: 1, kind: input, shape index: {}]   ;;  %s10500_s2 = inlined_call_operand.vmem [shape: f32[1,1024], index: 2, kind: input, shape index: {}]   ;;  %s10501_s3 = inlined_call_operand.vmem [shape: bf16[2,1024], index: 3, kind: output, shape index: {}]  }
   0x1   :  { %s8714_s14 = smov 0   ;;  %s8716_s15 = smov 0  }
   0x2   :  { %s8718_s16 = smov 0  }
   0x3 LB: > { %s22_s17 = sadd.s32 1, %s8684_s15  ;;  %p65_p1 = scmp.ne.s32.totalorder %s8676_s13, %s8672_s12  ;;  %s8688_s16 = sphi %s8718_s16, %s13_s16   ;;  %s8684_s15 = sphi %s8716_s15, %s10506_s15   ;;  %s8680_s14 = sphi %s8714_s14, %s10505_s14   ;;  %s8676_s13 = sphi %s8712_s13, %s10504_s13   ;;  %s8672_s12 = sphi %s8710_s12, %s10503_s12  }
   0x4   : > { %p23_p0 = scmp.ge.s32.totalorder %s22_s17, 4  ;;  %p66_p2 = scmp.eq.s32.totalorder %s8688_s16, 0 }
   0x5   : > { %s58_s19 = sadd.s32 1, %s8676_s13  ;;  %p6635_p5 = scmp.ge.s32.totalorder %s8688_s16, 4 }
   0x6   : > { %s10508_s17 = smov (%p23_p0, %s22_s17), 0  ;;  %p67_p3 = por %p66_p2, %p65_p1 }
   0x7   : > { %s55_s18 = ssub.s32 %s8684_s15, %s10508_s17  ;;  %152 = sbr.rel (%p6635_p5) target bundleno = 408 (0x198), region = 20 }
   0x8   : > { %p56_p4 = scmp.eq.s32.totalorder %s55_s18, 0 }
   0xa   : > { %s8745_s20 = scalar_select %p56_p4, %s8676_s13, %s58_s19  }
   0xc   : > { %155 = sbr.rel (!%p67_p3) target bundleno = 408 (0x198), region = 24  ;;  %s157_s21 = sand.u32 (%p67_p3), 1, %s8676_s13  }
   0xd   : > { %s8213_s22 = sshll.u32 (%p67_p3), %s8684_s15, 3  ;;  %s8606_s23 = smul.u32 (%p67_p3), 3136, %s157_s21 }
   0xe   : > { %s8753_s26 = scalar_lea.vmem (%p67_p3), %s10499_s1, %s8213_s22 }
   0xf   : > { %v974_v0 = vld [vmem:[%s8753_s26] sm:$0xff] (%p67_p3)  ;;  %s8758_s27 = scalar_lea.vmem (%p67_p3), [#allocation2], %s8606_s23 }
  0x10   : > { %v976_v1 = vld [vmem:[%s8753_s26 + $0x20] sm:$0xff] (%p67_p3)  ;;  %975 = vst [vmem:[%s8758_s27] sm:$0xff] (%p67_p3), %v974_v0 }
  0x11   : > { %v978_v2 = vld [vmem:[%s8753_s26 + $0x40] sm:$0xff]  ;;  %977 = vst [vmem:[%s8758_s27 + $0x8] sm:$0xff] %v976_v1 }
  0x12   : > { %v980_v3 = vld [vmem:[%s8753_s26 + $0x60] sm:$0xff]  ;;  %979 = vst [vmem:[%s8758_s27 + $0x10] sm:$0xff] %v978_v2 }
  0x13   : > { %v982_v4 = vld [vmem:[%s8753_s26 + $0x80] sm:$0xff]  ;;  %981 = vst [vmem:[%s8758_s27 + $0x18] sm:$0xff] %v980_v3 }
  0x14   : > { %v984_v5 = vld [vmem:[%s8753_s26 + $0xa0] sm:$0xff]  ;;  %983 = vst [vmem:[%s8758_s27 + $0x20] sm:$0xff] %v982_v4 }
  0x15   : > { %v986_v6 = vld [vmem:[%s8753_s26 + $0xc0] sm:$0xff]  ;;  %985 = vst [vmem:[%s8758_s27 + $0x28] sm:$0xff] %v984_v5 }
  0x16   : > { %v988_v7 = vld [vmem:[%s8753_s26 + $0xe0] sm:$0xff]  ;;  %987 = vst [vmem:[%s8758_s27 + $0x30] sm:$0xff] %v986_v6 }
  0x17   : > { %v990_v8 = vld [vmem:[%s8753_s26 + $0x100] sm:$0xff]  ;;  %989 = vst [vmem:[%s8758_s27 + $0x38] sm:$0xff] %v988_v7 }
  0x18   : > { %v992_v9 = vld [vmem:[%s8753_s26 + $0x120] sm:$0xff]  ;;  %991 = vst [vmem:[%s8758_s27 + $0x40] sm:$0xff] %v990_v8 }
  0x19   : > { %v994_v10 = vld [vmem:[%s8753_s26 + $0x140] sm:$0xff]  ;;  %993 = vst [vmem:[%s8758_s27 + $0x48] sm:$0xff] %v992_v9 }
  0x1a   : > { %v996_v11 = vld [vmem:[%s8753_s26 + $0x160] sm:$0xff]  ;;  %995 = vst [vmem:[%s8758_s27 + $0x50] sm:$0xff] %v994_v10 }
  0x1b   : > { %v998_v12 = vld [vmem:[%s8753_s26 + $0x180] sm:$0xff]  ;;  %997 = vst [vmem:[%s8758_s27 + $0x58] sm:$0xff] %v996_v11 }
  0x1c   : > { %v1000_v13 = vld [vmem:[%s8753_s26 + $0x1a0] sm:$0xff]  ;;  %999 = vst [vmem:[%s8758_s27 + $0x60] sm:$0xff] %v998_v12 }
  0x1d   : > { %v1002_v14 = vld [vmem:[%s8753_s26 + $0x1c0] sm:$0xff]  ;;  %1001 = vst [vmem:[%s8758_s27 + $0x68] sm:$0xff] %v1000_v13 }
  0x1e   : > { %v1004_v15 = vld [vmem:[%s8753_s26 + $0x1e0] sm:$0xff]  ;;  %1003 = vst [vmem:[%s8758_s27 + $0x70] sm:$0xff] %v1002_v14 }
  0x1f   : > { %v1006_v16 = vld [vmem:[%s8753_s26 + $0x200] sm:$0xff]  ;;  %1005 = vst [vmem:[%s8758_s27 + $0x78] sm:$0xff] %v1004_v15 }
  0x20   : > { %v1008_v17 = vld [vmem:[%s8753_s26 + $0x220] sm:$0xff]  ;;  %1007 = vst [vmem:[%s8758_s27 + $0x80] sm:$0xff] %v1006_v16 }
  0x21   : > { %v1010_v18 = vld [vmem:[%s8753_s26 + $0x240] sm:$0xff]  ;;  %1009 = vst [vmem:[%s8758_s27 + $0x88] sm:$0xff] %v1008_v17 }
  0x22   : > { %v1012_v19 = vld [vmem:[%s8753_s26 + $0x260] sm:$0xff]  ;;  %1011 = vst [vmem:[%s8758_s27 + $0x90] sm:$0xff] %v1010_v18 }
  0x23   : > { %v1014_v20 = vld [vmem:[%s8753_s26 + $0x280] sm:$0xff]  ;;  %1013 = vst [vmem:[%s8758_s27 + $0x98] sm:$0xff] %v1012_v19 }
  0x24   : > { %v1016_v21 = vld [vmem:[%s8753_s26 + $0x2a0] sm:$0xff]  ;;  %1015 = vst [vmem:[%s8758_s27 + $0xa0] sm:$0xff] %v1014_v20 }
  0x25   : > { %v1018_v22 = vld [vmem:[%s8753_s26 + $0x2c0] sm:$0xff]  ;;  %1017 = vst [vmem:[%s8758_s27 + $0xa8] sm:$0xff] %v1016_v21 }
  0x26   : > { %v1020_v23 = vld [vmem:[%s8753_s26 + $0x2e0] sm:$0xff]  ;;  %1019 = vst [vmem:[%s8758_s27 + $0xb0] sm:$0xff] %v1018_v22 }
  0x27   : > { %v1022_v24 = vld [vmem:[%s8753_s26 + $0x300] sm:$0xff]  ;;  %1021 = vst [vmem:[%s8758_s27 + $0xb8] sm:$0xff] %v1020_v23 }
  0x28   : > { %v1024_v25 = vld [vmem:[%s8753_s26 + $0x320] sm:$0xff]  ;;  %1023 = vst [vmem:[%s8758_s27 + $0xc0] sm:$0xff] %v1022_v24 }
  0x29   : > { %v1026_v26 = vld [vmem:[%s8753_s26 + $0x340] sm:$0xff]  ;;  %1025 = vst [vmem:[%s8758_s27 + $0xc8] sm:$0xff] %v1024_v25 }
  0x2a   : > { %v1028_v27 = vld [vmem:[%s8753_s26 + $0x360] sm:$0xff]  ;;  %1027 = vst [vmem:[%s8758_s27 + $0xd0] sm:$0xff] %v1026_v26 }
  0x2b   : > { %v1030_v28 = vld [vmem:[%s8753_s26 + $0x380] sm:$0xff]  ;;  %1029 = vst [vmem:[%s8758_s27 + $0xd8] sm:$0xff] %v1028_v27 }
  0x2c   : > { %v1032_v29 = vld [vmem:[%s8753_s26 + $0x3a0] sm:$0xff]  ;;  %1031 = vst [vmem:[%s8758_s27 + $0xe0] sm:$0xff] %v1030_v28 }
  0x2d   : > { %v1034_v30 = vld [vmem:[%s8753_s26 + $0x3c0] sm:$0xff]  ;;  %1033 = vst [vmem:[%s8758_s27 + $0xe8] sm:$0xff] %v1032_v29 }
  0x2e   : > { %v1036_v31 = vld [vmem:[%s8753_s26 + $0x3e0] sm:$0xff]  ;;  %1035 = vst [vmem:[%s8758_s27 + $0xf0] sm:$0xff] %v1034_v30 }
  0x2f   : > { %v1038_v32 = vld [vmem:[%s8753_s26 + $0x400] sm:$0xff]  ;;  %1037 = vst [vmem:[%s8758_s27 + $0xf8] sm:$0xff] %v1036_v31 }
  0x30   : > { %v1040_v33 = vld [vmem:[%s8753_s26 + $0x420] sm:$0xff]  ;;  %1039 = vst [vmem:[%s8758_s27 + $0x100] sm:$0xff] %v1038_v32 }
  0x31   : > { %v1042_v34 = vld [vmem:[%s8753_s26 + $0x440] sm:$0xff]  ;;  %1041 = vst [vmem:[%s8758_s27 + $0x108] sm:$0xff] %v1040_v33 }
  0x32   : > { %v1044_v35 = vld [vmem:[%s8753_s26 + $0x460] sm:$0xff]  ;;  %1043 = vst [vmem:[%s8758_s27 + $0x110] sm:$0xff] %v1042_v34 }
  0x33   : > { %v1046_v36 = vld [vmem:[%s8753_s26 + $0x480] sm:$0xff]  ;;  %1045 = vst [vmem:[%s8758_s27 + $0x118] sm:$0xff] %v1044_v35 }
  0x34   : > { %v1048_v37 = vld [vmem:[%s8753_s26 + $0x4a0] sm:$0xff]  ;;  %1047 = vst [vmem:[%s8758_s27 + $0x120] sm:$0xff] %v1046_v36 }
  0x35   : > { %v1050_v38 = vld [vmem:[%s8753_s26 + $0x4c0] sm:$0xff]  ;;  %1049 = vst [vmem:[%s8758_s27 + $0x128] sm:$0xff] %v1048_v37 }
  0x36   : > { %v1052_v39 = vld [vmem:[%s8753_s26 + $0x4e0] sm:$0xff]  ;;  %1051 = vst [vmem:[%s8758_s27 + $0x130] sm:$0xff] %v1050_v38 }
  0x37   : > { %v1054_v40 = vld [vmem:[%s8753_s26 + $0x500] sm:$0xff]  ;;  %1053 = vst [vmem:[%s8758_s27 + $0x138] sm:$0xff] %v1052_v39 }
  0x38   : > { %v1056_v41 = vld [vmem:[%s8753_s26 + $0x520] sm:$0xff]  ;;  %1055 = vst [vmem:[%s8758_s27 + $0x140] sm:$0xff] %v1054_v40 }
  0x39   : > { %v1058_v42 = vld [vmem:[%s8753_s26 + $0x540] sm:$0xff]  ;;  %1057 = vst [vmem:[%s8758_s27 + $0x148] sm:$0xff] %v1056_v41 }
  0x3a   : > { %v1060_v43 = vld [vmem:[%s8753_s26 + $0x560] sm:$0xff]  ;;  %1059 = vst [vmem:[%s8758_s27 + $0x150] sm:$0xff] %v1058_v42 }
  0x3b   : > { %v1062_v44 = vld [vmem:[%s8753_s26 + $0x580] sm:$0xff]  ;;  %1061 = vst [vmem:[%s8758_s27 + $0x158] sm:$0xff] %v1060_v43 }
  0x3c   : > { %v1064_v45 = vld [vmem:[%s8753_s26 + $0x5a0] sm:$0xff]  ;;  %1063 = vst [vmem:[%s8758_s27 + $0x160] sm:$0xff] %v1062_v44 }
  0x3d   : > { %v1066_v46 = vld [vmem:[%s8753_s26 + $0x5c0] sm:$0xff]  ;;  %1065 = vst [vmem:[%s8758_s27 + $0x168] sm:$0xff] %v1064_v45 }
  0x3e   : > { %v1068_v47 = vld [vmem:[%s8753_s26 + $0x5e0] sm:$0xff]  ;;  %1067 = vst [vmem:[%s8758_s27 + $0x170] sm:$0xff] %v1066_v46 }
  0x3f   : > { %v1070_v48 = vld [vmem:[%s8753_s26 + $0x600] sm:$0xff]  ;;  %1069 = vst [vmem:[%s8758_s27 + $0x178] sm:$0xff] %v1068_v47 }
  0x40   : > { %v1072_v49 = vld [vmem:[%s8753_s26 + $0x620] sm:$0xff]  ;;  %1071 = vst [vmem:[%s8758_s27 + $0x180] sm:$0xff] %v1070_v48 }
  0x41   : > { %v1074_v50 = vld [vmem:[%s8753_s26 + $0x640] sm:$0xff]  ;;  %1073 = vst [vmem:[%s8758_s27 + $0x188] sm:$0xff] %v1072_v49 }
  0x42   : > { %v1076_v51 = vld [vmem:[%s8753_s26 + $0x660] sm:$0xff]  ;;  %1075 = vst [vmem:[%s8758_s27 + $0x190] sm:$0xff] %v1074_v50 }
  0x43   : > { %v1078_v52 = vld [vmem:[%s8753_s26 + $0x680] sm:$0xff]  ;;  %1077 = vst [vmem:[%s8758_s27 + $0x198] sm:$0xff] %v1076_v51 }
  0x44   : > { %v1080_v53 = vld [vmem:[%s8753_s26 + $0x6a0] sm:$0xff]  ;;  %1079 = vst [vmem:[%s8758_s27 + $0x1a0] sm:$0xff] %v1078_v52 }
  0x45   : > { %v1082_v54 = vld [vmem:[%s8753_s26 + $0x6c0] sm:$0xff]  ;;  %1081 = vst [vmem:[%s8758_s27 + $0x1a8] sm:$0xff] %v1080_v53 }
  0x46   : > { %v1084_v55 = vld [vmem:[%s8753_s26 + $0x6e0] sm:$0xff]  ;;  %1083 = vst [vmem:[%s8758_s27 + $0x1b0] sm:$0xff] %v1082_v54 }
  0x47   : > { %v1086_v56 = vld [vmem:[%s8753_s26 + $0x700] sm:$0xff]  ;;  %1085 = vst [vmem:[%s8758_s27 + $0x1b8] sm:$0xff] %v1084_v55 }
  0x48   : > { %v1088_v57 = vld [vmem:[%s8753_s26 + $0x720] sm:$0xff]  ;;  %1087 = vst [vmem:[%s8758_s27 + $0x1c0] sm:$0xff] %v1086_v56 }
  0x49   : > { %v1090_v58 = vld [vmem:[%s8753_s26 + $0x740] sm:$0xff]  ;;  %1089 = vst [vmem:[%s8758_s27 + $0x1c8] sm:$0xff] %v1088_v57 }
  0x4a   : > { %v1092_v59 = vld [vmem:[%s8753_s26 + $0x760] sm:$0xff]  ;;  %1091 = vst [vmem:[%s8758_s27 + $0x1d0] sm:$0xff] %v1090_v58 }
  0x4b   : > { %v1094_v60 = vld [vmem:[%s8753_s26 + $0x780] sm:$0xff]  ;;  %1093 = vst [vmem:[%s8758_s27 + $0x1d8] sm:$0xff] %v1092_v59 }
  0x4c   : > { %v1096_v61 = vld [vmem:[%s8753_s26 + $0x7a0] sm:$0xff]  ;;  %1095 = vst [vmem:[%s8758_s27 + $0x1e0] sm:$0xff] %v1094_v60 }
  0x4d   : > { %v1098_v62 = vld [vmem:[%s8753_s26 + $0x7c0] sm:$0xff]  ;;  %1097 = vst [vmem:[%s8758_s27 + $0x1e8] sm:$0xff] %v1096_v61 }
  0x4e   : > { %v1100_v63 = vld [vmem:[%s8753_s26 + $0x7e0] sm:$0xff]  ;;  %1099 = vst [vmem:[%s8758_s27 + $0x1f0] sm:$0xff] %v1098_v62 }
  0x4f   : > { %v1102_v0 = vld [vmem:[%s8753_s26 + $0x800] sm:$0xff]  ;;  %1101 = vst [vmem:[%s8758_s27 + $0x1f8] sm:$0xff] %v1100_v63 }
  0x50   : > { %v1104_v1 = vld [vmem:[%s8753_s26 + $0x820] sm:$0xff]  ;;  %1103 = vst [vmem:[%s8758_s27 + $0x200] sm:$0xff] %v1102_v0 }
  0x51   : > { %v1106_v2 = vld [vmem:[%s8753_s26 + $0x840] sm:$0xff]  ;;  %1105 = vst [vmem:[%s8758_s27 + $0x208] sm:$0xff] %v1104_v1 }
  0x52   : > { %v1108_v3 = vld [vmem:[%s8753_s26 + $0x860] sm:$0xff]  ;;  %1107 = vst [vmem:[%s8758_s27 + $0x210] sm:$0xff] %v1106_v2 }
  0x53   : > { %v1110_v4 = vld [vmem:[%s8753_s26 + $0x880] sm:$0xff]  ;;  %1109 = vst [vmem:[%s8758_s27 + $0x218] sm:$0xff] %v1108_v3 }
  0x54   : > { %v1112_v5 = vld [vmem:[%s8753_s26 + $0x8a0] sm:$0xff]  ;;  %1111 = vst [vmem:[%s8758_s27 + $0x220] sm:$0xff] %v1110_v4 }
  0x55   : > { %v1114_v6 = vld [vmem:[%s8753_s26 + $0x8c0] sm:$0xff]  ;;  %1113 = vst [vmem:[%s8758_s27 + $0x228] sm:$0xff] %v1112_v5 }
  0x56   : > { %v1116_v7 = vld [vmem:[%s8753_s26 + $0x8e0] sm:$0xff]  ;;  %1115 = vst [vmem:[%s8758_s27 + $0x230] sm:$0xff] %v1114_v6 }
  0x57   : > { %v1118_v8 = vld [vmem:[%s8753_s26 + $0x900] sm:$0xff]  ;;  %1117 = vst [vmem:[%s8758_s27 + $0x238] sm:$0xff] %v1116_v7 }
  0x58   : > { %v1120_v9 = vld [vmem:[%s8753_s26 + $0x920] sm:$0xff]  ;;  %1119 = vst [vmem:[%s8758_s27 + $0x240] sm:$0xff] %v1118_v8 }
  0x59   : > { %v1122_v10 = vld [vmem:[%s8753_s26 + $0x940] sm:$0xff]  ;;  %1121 = vst [vmem:[%s8758_s27 + $0x248] sm:$0xff] %v1120_v9 }
  0x5a   : > { %v1124_v11 = vld [vmem:[%s8753_s26 + $0x960] sm:$0xff]  ;;  %1123 = vst [vmem:[%s8758_s27 + $0x250] sm:$0xff] %v1122_v10 }
  0x5b   : > { %v1126_v12 = vld [vmem:[%s8753_s26 + $0x980] sm:$0xff]  ;;  %1125 = vst [vmem:[%s8758_s27 + $0x258] sm:$0xff] %v1124_v11 }
  0x5c   : > { %v1128_v13 = vld [vmem:[%s8753_s26 + $0x9a0] sm:$0xff]  ;;  %1127 = vst [vmem:[%s8758_s27 + $0x260] sm:$0xff] %v1126_v12 }
  0x5d   : > { %v1130_v14 = vld [vmem:[%s8753_s26 + $0x9c0] sm:$0xff]  ;;  %1129 = vst [vmem:[%s8758_s27 + $0x268] sm:$0xff] %v1128_v13 }
  0x5e   : > { %v1132_v15 = vld [vmem:[%s8753_s26 + $0x9e0] sm:$0xff]  ;;  %1131 = vst [vmem:[%s8758_s27 + $0x270] sm:$0xff] %v1130_v14 }
  0x5f   : > { %v1134_v16 = vld [vmem:[%s8753_s26 + $0xa00] sm:$0xff]  ;;  %1133 = vst [vmem:[%s8758_s27 + $0x278] sm:$0xff] %v1132_v15 }
  0x60   : > { %v1136_v17 = vld [vmem:[%s8753_s26 + $0xa20] sm:$0xff]  ;;  %1135 = vst [vmem:[%s8758_s27 + $0x280] sm:$0xff] %v1134_v16 }
  0x61   : > { %v1138_v18 = vld [vmem:[%s8753_s26 + $0xa40] sm:$0xff]  ;;  %1137 = vst [vmem:[%s8758_s27 + $0x288] sm:$0xff] %v1136_v17 }
  0x62   : > { %v1140_v19 = vld [vmem:[%s8753_s26 + $0xa60] sm:$0xff]  ;;  %1139 = vst [vmem:[%s8758_s27 + $0x290] sm:$0xff] %v1138_v18 }
  0x63   : > { %v1142_v20 = vld [vmem:[%s8753_s26 + $0xa80] sm:$0xff]  ;;  %1141 = vst [vmem:[%s8758_s27 + $0x298] sm:$0xff] %v1140_v19 }
  0x64   : > { %v1144_v21 = vld [vmem:[%s8753_s26 + $0xaa0] sm:$0xff]  ;;  %1143 = vst [vmem:[%s8758_s27 + $0x2a0] sm:$0xff] %v1142_v20 }
  0x65   : > { %v1146_v22 = vld [vmem:[%s8753_s26 + $0xac0] sm:$0xff]  ;;  %1145 = vst [vmem:[%s8758_s27 + $0x2a8] sm:$0xff] %v1144_v21 }
  0x66   : > { %v1148_v23 = vld [vmem:[%s8753_s26 + $0xae0] sm:$0xff]  ;;  %1147 = vst [vmem:[%s8758_s27 + $0x2b0] sm:$0xff] %v1146_v22 }
  0x67   : > { %v1150_v24 = vld [vmem:[%s8753_s26 + $0xb00] sm:$0xff]  ;;  %1149 = vst [vmem:[%s8758_s27 + $0x2b8] sm:$0xff] %v1148_v23 }
  0x68   : > { %v1152_v25 = vld [vmem:[%s8753_s26 + $0xb20] sm:$0xff]  ;;  %1151 = vst [vmem:[%s8758_s27 + $0x2c0] sm:$0xff] %v1150_v24 }
  0x69   : > { %v1154_v26 = vld [vmem:[%s8753_s26 + $0xb40] sm:$0xff]  ;;  %1153 = vst [vmem:[%s8758_s27 + $0x2c8] sm:$0xff] %v1152_v25 }
  0x6a   : > { %v1156_v27 = vld [vmem:[%s8753_s26 + $0xb60] sm:$0xff]  ;;  %1155 = vst [vmem:[%s8758_s27 + $0x2d0] sm:$0xff] %v1154_v26 }
  0x6b   : > { %v1158_v28 = vld [vmem:[%s8753_s26 + $0xb80] sm:$0xff]  ;;  %1157 = vst [vmem:[%s8758_s27 + $0x2d8] sm:$0xff] %v1156_v27 }
  0x6c   : > { %v1160_v29 = vld [vmem:[%s8753_s26 + $0xba0] sm:$0xff]  ;;  %1159 = vst [vmem:[%s8758_s27 + $0x2e0] sm:$0xff] %v1158_v28 }
  0x6d   : > { %v1162_v30 = vld [vmem:[%s8753_s26 + $0xbc0] sm:$0xff]  ;;  %1161 = vst [vmem:[%s8758_s27 + $0x2e8] sm:$0xff] %v1160_v29 }
  0x6e   : > { %v1164_v31 = vld [vmem:[%s8753_s26 + $0xbe0] sm:$0xff]  ;;  %1163 = vst [vmem:[%s8758_s27 + $0x2f0] sm:$0xff] %v1162_v30 }
  0x6f   : > { %v1166_v32 = vld [vmem:[%s8753_s26 + $0xc00] sm:$0xff]  ;;  %1165 = vst [vmem:[%s8758_s27 + $0x2f8] sm:$0xff] %v1164_v31 }
  0x70   : > { %v1168_v33 = vld [vmem:[%s8753_s26 + $0xc20] sm:$0xff]  ;;  %1167 = vst [vmem:[%s8758_s27 + $0x300] sm:$0xff] %v1166_v32 }
  0x71   : > { %v1170_v34 = vld [vmem:[%s8753_s26 + $0xc40] sm:$0xff]  ;;  %1169 = vst [vmem:[%s8758_s27 + $0x308] sm:$0xff] %v1168_v33 }
  0x72   : > { %v1172_v35 = vld [vmem:[%s8753_s26 + $0xc60] sm:$0xff]  ;;  %1171 = vst [vmem:[%s8758_s27 + $0x310] sm:$0xff] %v1170_v34 }
  0x73   : > { %v1174_v36 = vld [vmem:[%s8753_s26 + $0xc80] sm:$0xff]  ;;  %1173 = vst [vmem:[%s8758_s27 + $0x318] sm:$0xff] %v1172_v35 }
  0x74   : > { %v1176_v37 = vld [vmem:[%s8753_s26 + $0xca0] sm:$0xff]  ;;  %1175 = vst [vmem:[%s8758_s27 + $0x320] sm:$0xff] %v1174_v36 }
  0x75   : > { %v1178_v38 = vld [vmem:[%s8753_s26 + $0xcc0] sm:$0xff]  ;;  %1177 = vst [vmem:[%s8758_s27 + $0x328] sm:$0xff] %v1176_v37 }
  0x76   : > { %v1180_v39 = vld [vmem:[%s8753_s26 + $0xce0] sm:$0xff]  ;;  %1179 = vst [vmem:[%s8758_s27 + $0x330] sm:$0xff] %v1178_v38 }
  0x77   : > { %v1182_v40 = vld [vmem:[%s8753_s26 + $0xd00] sm:$0xff]  ;;  %1181 = vst [vmem:[%s8758_s27 + $0x338] sm:$0xff] %v1180_v39 }
  0x78   : > { %v1184_v41 = vld [vmem:[%s8753_s26 + $0xd20] sm:$0xff]  ;;  %1183 = vst [vmem:[%s8758_s27 + $0x340] sm:$0xff] %v1182_v40 }
  0x79   : > { %v1186_v42 = vld [vmem:[%s8753_s26 + $0xd40] sm:$0xff]  ;;  %1185 = vst [vmem:[%s8758_s27 + $0x348] sm:$0xff] %v1184_v41 }
  0x7a   : > { %v1188_v43 = vld [vmem:[%s8753_s26 + $0xd60] sm:$0xff]  ;;  %1187 = vst [vmem:[%s8758_s27 + $0x350] sm:$0xff] %v1186_v42 }
  0x7b   : > { %v1190_v44 = vld [vmem:[%s8753_s26 + $0xd80] sm:$0xff]  ;;  %1189 = vst [vmem:[%s8758_s27 + $0x358] sm:$0xff] %v1188_v43 }
  0x7c   : > { %v1192_v45 = vld [vmem:[%s8753_s26 + $0xda0] sm:$0xff]  ;;  %1191 = vst [vmem:[%s8758_s27 + $0x360] sm:$0xff] %v1190_v44 }
  0x7d   : > { %v1194_v46 = vld [vmem:[%s8753_s26 + $0xdc0] sm:$0xff]  ;;  %1193 = vst [vmem:[%s8758_s27 + $0x368] sm:$0xff] %v1192_v45 }
  0x7e   : > { %v1196_v47 = vld [vmem:[%s8753_s26 + $0xde0] sm:$0xff]  ;;  %1195 = vst [vmem:[%s8758_s27 + $0x370] sm:$0xff] %v1194_v46 }
  0x7f   : > { %v1198_v48 = vld [vmem:[%s8753_s26 + $0xe00] sm:$0xff]  ;;  %1197 = vst [vmem:[%s8758_s27 + $0x378] sm:$0xff] %v1196_v47 }
  0x80   : > { %v1200_v49 = vld [vmem:[%s8753_s26 + $0xe20] sm:$0xff]  ;;  %1199 = vst [vmem:[%s8758_s27 + $0x380] sm:$0xff] %v1198_v48 }
  0x81   : > { %v1202_v50 = vld [vmem:[%s8753_s26 + $0xe40] sm:$0xff]  ;;  %1201 = vst [vmem:[%s8758_s27 + $0x388] sm:$0xff] %v1200_v49 }
  0x82   : > { %v1204_v51 = vld [vmem:[%s8753_s26 + $0xe60] sm:$0xff]  ;;  %1203 = vst [vmem:[%s8758_s27 + $0x390] sm:$0xff] %v1202_v50 }
  0x83   : > { %v1206_v52 = vld [vmem:[%s8753_s26 + $0xe80] sm:$0xff]  ;;  %1205 = vst [vmem:[%s8758_s27 + $0x398] sm:$0xff] %v1204_v51 }
  0x84   : > { %v1208_v53 = vld [vmem:[%s8753_s26 + $0xea0] sm:$0xff]  ;;  %1207 = vst [vmem:[%s8758_s27 + $0x3a0] sm:$0xff] %v1206_v52 }
  0x85   : > { %v1210_v54 = vld [vmem:[%s8753_s26 + $0xec0] sm:$0xff]  ;;  %1209 = vst [vmem:[%s8758_s27 + $0x3a8] sm:$0xff] %v1208_v53 }
  0x86   : > { %v1212_v55 = vld [vmem:[%s8753_s26 + $0xee0] sm:$0xff]  ;;  %1211 = vst [vmem:[%s8758_s27 + $0x3b0] sm:$0xff] %v1210_v54 }
  0x87   : > { %v1214_v56 = vld [vmem:[%s8753_s26 + $0xf00] sm:$0xff]  ;;  %1213 = vst [vmem:[%s8758_s27 + $0x3b8] sm:$0xff] %v1212_v55 }
  0x88   : > { %v1216_v57 = vld [vmem:[%s8753_s26 + $0xf20] sm:$0xff]  ;;  %1215 = vst [vmem:[%s8758_s27 + $0x3c0] sm:$0xff] %v1214_v56 }
  0x89   : > { %v1218_v58 = vld [vmem:[%s8753_s26 + $0xf40] sm:$0xff]  ;;  %1217 = vst [vmem:[%s8758_s27 + $0x3c8] sm:$0xff] %v1216_v57 }
  0x8a   : > { %v1220_v59 = vld [vmem:[%s8753_s26 + $0xf60] sm:$0xff]  ;;  %1219 = vst [vmem:[%s8758_s27 + $0x3d0] sm:$0xff] %v1218_v58 }
  0x8b   : > { %v1222_v60 = vld [vmem:[%s8753_s26 + $0xf80] sm:$0xff]  ;;  %1221 = vst [vmem:[%s8758_s27 + $0x3d8] sm:$0xff] %v1220_v59 }
  0x8c   : > { %v1224_v61 = vld [vmem:[%s8753_s26 + $0xfa0] sm:$0xff]  ;;  %1223 = vst [vmem:[%s8758_s27 + $0x3e0] sm:$0xff] %v1222_v60 }
  0x8d   : > { %v1226_v62 = vld [vmem:[%s8753_s26 + $0xfc0] sm:$0xff]  ;;  %1225 = vst [vmem:[%s8758_s27 + $0x3e8] sm:$0xff] %v1224_v61 }
  0x8e   : > { %v1228_v63 = vld [vmem:[%s8753_s26 + $0xfe0] sm:$0xff]  ;;  %1227 = vst [vmem:[%s8758_s27 + $0x3f0] sm:$0xff] %v1226_v62 }
  0x8f   : > { %v1230_v0 = vld [vmem:[%s8753_s26 + $0x1000] sm:$0xff]  ;;  %1229 = vst [vmem:[%s8758_s27 + $0x3f8] sm:$0xff] %v1228_v63 }
  0x90   : > { %v1232_v1 = vld [vmem:[%s8753_s26 + $0x1020] sm:$0xff]  ;;  %1231 = vst [vmem:[%s8758_s27 + $0x400] sm:$0xff] %v1230_v0 }
  0x91   : > { %v1234_v2 = vld [vmem:[%s8753_s26 + $0x1040] sm:$0xff]  ;;  %1233 = vst [vmem:[%s8758_s27 + $0x408] sm:$0xff] %v1232_v1 }
  0x92   : > { %v1236_v3 = vld [vmem:[%s8753_s26 + $0x1060] sm:$0xff]  ;;  %1235 = vst [vmem:[%s8758_s27 + $0x410] sm:$0xff] %v1234_v2 }
  0x93   : > { %v1238_v4 = vld [vmem:[%s8753_s26 + $0x1080] sm:$0xff]  ;;  %1237 = vst [vmem:[%s8758_s27 + $0x418] sm:$0xff] %v1236_v3 }
  0x94   : > { %v1240_v5 = vld [vmem:[%s8753_s26 + $0x10a0] sm:$0xff]  ;;  %1239 = vst [vmem:[%s8758_s27 + $0x420] sm:$0xff] %v1238_v4 }
  0x95   : > { %v1242_v6 = vld [vmem:[%s8753_s26 + $0x10c0] sm:$0xff]  ;;  %1241 = vst [vmem:[%s8758_s27 + $0x428] sm:$0xff] %v1240_v5 }
  0x96   : > { %v1244_v7 = vld [vmem:[%s8753_s26 + $0x10e0] sm:$0xff]  ;;  %1243 = vst [vmem:[%s8758_s27 + $0x430] sm:$0xff] %v1242_v6 }
  0x97   : > { %v1246_v8 = vld [vmem:[%s8753_s26 + $0x1100] sm:$0xff]  ;;  %1245 = vst [vmem:[%s8758_s27 + $0x438] sm:$0xff] %v1244_v7 }
  0x98   : > { %v1248_v9 = vld [vmem:[%s8753_s26 + $0x1120] sm:$0xff]  ;;  %1247 = vst [vmem:[%s8758_s27 + $0x440] sm:$0xff] %v1246_v8 }
  0x99   : > { %v1250_v10 = vld [vmem:[%s8753_s26 + $0x1140] sm:$0xff]  ;;  %1249 = vst [vmem:[%s8758_s27 + $0x448] sm:$0xff] %v1248_v9 }
  0x9a   : > { %v1252_v11 = vld [vmem:[%s8753_s26 + $0x1160] sm:$0xff]  ;;  %1251 = vst [vmem:[%s8758_s27 + $0x450] sm:$0xff] %v1250_v10 }
  0x9b   : > { %v1254_v12 = vld [vmem:[%s8753_s26 + $0x1180] sm:$0xff]  ;;  %1253 = vst [vmem:[%s8758_s27 + $0x458] sm:$0xff] %v1252_v11 }
  0x9c   : > { %v1256_v13 = vld [vmem:[%s8753_s26 + $0x11a0] sm:$0xff]  ;;  %1255 = vst [vmem:[%s8758_s27 + $0x460] sm:$0xff] %v1254_v12 }
  0x9d   : > { %v1258_v14 = vld [vmem:[%s8753_s26 + $0x11c0] sm:$0xff]  ;;  %1257 = vst [vmem:[%s8758_s27 + $0x468] sm:$0xff] %v1256_v13 }
  0x9e   : > { %v1260_v15 = vld [vmem:[%s8753_s26 + $0x11e0] sm:$0xff]  ;;  %1259 = vst [vmem:[%s8758_s27 + $0x470] sm:$0xff] %v1258_v14 }
  0x9f   : > { %v1262_v16 = vld [vmem:[%s8753_s26 + $0x1200] sm:$0xff]  ;;  %1261 = vst [vmem:[%s8758_s27 + $0x478] sm:$0xff] %v1260_v15 }
  0xa0   : > { %v1264_v17 = vld [vmem:[%s8753_s26 + $0x1220] sm:$0xff]  ;;  %1263 = vst [vmem:[%s8758_s27 + $0x480] sm:$0xff] %v1262_v16 }
  0xa1   : > { %v1266_v18 = vld [vmem:[%s8753_s26 + $0x1240] sm:$0xff]  ;;  %1265 = vst [vmem:[%s8758_s27 + $0x488] sm:$0xff] %v1264_v17 }
  0xa2   : > { %v1268_v19 = vld [vmem:[%s8753_s26 + $0x1260] sm:$0xff]  ;;  %1267 = vst [vmem:[%s8758_s27 + $0x490] sm:$0xff] %v1266_v18 }
  0xa3   : > { %v1270_v20 = vld [vmem:[%s8753_s26 + $0x1280] sm:$0xff]  ;;  %1269 = vst [vmem:[%s8758_s27 + $0x498] sm:$0xff] %v1268_v19 }
  0xa4   : > { %v1272_v21 = vld [vmem:[%s8753_s26 + $0x12a0] sm:$0xff]  ;;  %1271 = vst [vmem:[%s8758_s27 + $0x4a0] sm:$0xff] %v1270_v20 }
  0xa5   : > { %v1274_v22 = vld [vmem:[%s8753_s26 + $0x12c0] sm:$0xff]  ;;  %1273 = vst [vmem:[%s8758_s27 + $0x4a8] sm:$0xff] %v1272_v21 }
  0xa6   : > { %v1276_v23 = vld [vmem:[%s8753_s26 + $0x12e0] sm:$0xff]  ;;  %1275 = vst [vmem:[%s8758_s27 + $0x4b0] sm:$0xff] %v1274_v22 }
  0xa7   : > { %v1278_v24 = vld [vmem:[%s8753_s26 + $0x1300] sm:$0xff]  ;;  %1277 = vst [vmem:[%s8758_s27 + $0x4b8] sm:$0xff] %v1276_v23 }
  0xa8   : > { %v1280_v25 = vld [vmem:[%s8753_s26 + $0x1320] sm:$0xff]  ;;  %1279 = vst [vmem:[%s8758_s27 + $0x4c0] sm:$0xff] %v1278_v24 }
  0xa9   : > { %v1282_v26 = vld [vmem:[%s8753_s26 + $0x1340] sm:$0xff]  ;;  %1281 = vst [vmem:[%s8758_s27 + $0x4c8] sm:$0xff] %v1280_v25 }
  0xaa   : > { %v1284_v27 = vld [vmem:[%s8753_s26 + $0x1360] sm:$0xff]  ;;  %1283 = vst [vmem:[%s8758_s27 + $0x4d0] sm:$0xff] %v1282_v26 }
  0xab   : > { %v1286_v28 = vld [vmem:[%s8753_s26 + $0x1380] sm:$0xff]  ;;  %1285 = vst [vmem:[%s8758_s27 + $0x4d8] sm:$0xff] %v1284_v27 }
  0xac   : > { %v1288_v29 = vld [vmem:[%s8753_s26 + $0x13a0] sm:$0xff]  ;;  %1287 = vst [vmem:[%s8758_s27 + $0x4e0] sm:$0xff] %v1286_v28 }
  0xad   : > { %v1290_v30 = vld [vmem:[%s8753_s26 + $0x13c0] sm:$0xff]  ;;  %1289 = vst [vmem:[%s8758_s27 + $0x4e8] sm:$0xff] %v1288_v29 }
  0xae   : > { %v1292_v31 = vld [vmem:[%s8753_s26 + $0x13e0] sm:$0xff]  ;;  %1291 = vst [vmem:[%s8758_s27 + $0x4f0] sm:$0xff] %v1290_v30 }
  0xaf   : > { %v1294_v32 = vld [vmem:[%s8753_s26 + $0x1400] sm:$0xff]  ;;  %1293 = vst [vmem:[%s8758_s27 + $0x4f8] sm:$0xff] %v1292_v31 }
  0xb0   : > { %v1296_v33 = vld [vmem:[%s8753_s26 + $0x1420] sm:$0xff]  ;;  %1295 = vst [vmem:[%s8758_s27 + $0x500] sm:$0xff] %v1294_v32 }
  0xb1   : > { %v1298_v34 = vld [vmem:[%s8753_s26 + $0x1440] sm:$0xff]  ;;  %1297 = vst [vmem:[%s8758_s27 + $0x508] sm:$0xff] %v1296_v33 }
  0xb2   : > { %v1300_v35 = vld [vmem:[%s8753_s26 + $0x1460] sm:$0xff]  ;;  %1299 = vst [vmem:[%s8758_s27 + $0x510] sm:$0xff] %v1298_v34 }
  0xb3   : > { %v1302_v36 = vld [vmem:[%s8753_s26 + $0x1480] sm:$0xff]  ;;  %1301 = vst [vmem:[%s8758_s27 + $0x518] sm:$0xff] %v1300_v35 }
  0xb4   : > { %v1304_v37 = vld [vmem:[%s8753_s26 + $0x14a0] sm:$0xff]  ;;  %1303 = vst [vmem:[%s8758_s27 + $0x520] sm:$0xff] %v1302_v36 }
  0xb5   : > { %v1306_v38 = vld [vmem:[%s8753_s26 + $0x14c0] sm:$0xff]  ;;  %1305 = vst [vmem:[%s8758_s27 + $0x528] sm:$0xff] %v1304_v37 }
  0xb6   : > { %v1308_v39 = vld [vmem:[%s8753_s26 + $0x14e0] sm:$0xff]  ;;  %1307 = vst [vmem:[%s8758_s27 + $0x530] sm:$0xff] %v1306_v38 }
  0xb7   : > { %v1310_v40 = vld [vmem:[%s8753_s26 + $0x1500] sm:$0xff]  ;;  %1309 = vst [vmem:[%s8758_s27 + $0x538] sm:$0xff] %v1308_v39 }
  0xb8   : > { %v1312_v41 = vld [vmem:[%s8753_s26 + $0x1520] sm:$0xff]  ;;  %1311 = vst [vmem:[%s8758_s27 + $0x540] sm:$0xff] %v1310_v40 }
  0xb9   : > { %v1314_v42 = vld [vmem:[%s8753_s26 + $0x1540] sm:$0xff]  ;;  %1313 = vst [vmem:[%s8758_s27 + $0x548] sm:$0xff] %v1312_v41 }
  0xba   : > { %v1316_v43 = vld [vmem:[%s8753_s26 + $0x1560] sm:$0xff]  ;;  %1315 = vst [vmem:[%s8758_s27 + $0x550] sm:$0xff] %v1314_v42 }
  0xbb   : > { %v1318_v44 = vld [vmem:[%s8753_s26 + $0x1580] sm:$0xff]  ;;  %1317 = vst [vmem:[%s8758_s27 + $0x558] sm:$0xff] %v1316_v43 }
  0xbc   : > { %v1320_v45 = vld [vmem:[%s8753_s26 + $0x15a0] sm:$0xff]  ;;  %1319 = vst [vmem:[%s8758_s27 + $0x560] sm:$0xff] %v1318_v44 }
  0xbd   : > { %v1322_v46 = vld [vmem:[%s8753_s26 + $0x15c0] sm:$0xff]  ;;  %1321 = vst [vmem:[%s8758_s27 + $0x568] sm:$0xff] %v1320_v45 }
  0xbe   : > { %v1324_v47 = vld [vmem:[%s8753_s26 + $0x15e0] sm:$0xff]  ;;  %1323 = vst [vmem:[%s8758_s27 + $0x570] sm:$0xff] %v1322_v46 }
  0xbf   : > { %v1326_v48 = vld [vmem:[%s8753_s26 + $0x1600] sm:$0xff]  ;;  %1325 = vst [vmem:[%s8758_s27 + $0x578] sm:$0xff] %v1324_v47 }
  0xc0   : > { %v1328_v49 = vld [vmem:[%s8753_s26 + $0x1620] sm:$0xff]  ;;  %1327 = vst [vmem:[%s8758_s27 + $0x580] sm:$0xff] %v1326_v48 }
  0xc1   : > { %v1330_v50 = vld [vmem:[%s8753_s26 + $0x1640] sm:$0xff]  ;;  %1329 = vst [vmem:[%s8758_s27 + $0x588] sm:$0xff] %v1328_v49 }
  0xc2   : > { %v1332_v51 = vld [vmem:[%s8753_s26 + $0x1660] sm:$0xff]  ;;  %1331 = vst [vmem:[%s8758_s27 + $0x590] sm:$0xff] %v1330_v50 }
  0xc3   : > { %v1334_v52 = vld [vmem:[%s8753_s26 + $0x1680] sm:$0xff]  ;;  %1333 = vst [vmem:[%s8758_s27 + $0x598] sm:$0xff] %v1332_v51 }
  0xc4   : > { %v1336_v53 = vld [vmem:[%s8753_s26 + $0x16a0] sm:$0xff]  ;;  %1335 = vst [vmem:[%s8758_s27 + $0x5a0] sm:$0xff] %v1334_v52 }
  0xc5   : > { %v1338_v54 = vld [vmem:[%s8753_s26 + $0x16c0] sm:$0xff]  ;;  %1337 = vst [vmem:[%s8758_s27 + $0x5a8] sm:$0xff] %v1336_v53 }
  0xc6   : > { %v1340_v55 = vld [vmem:[%s8753_s26 + $0x16e0] sm:$0xff]  ;;  %1339 = vst [vmem:[%s8758_s27 + $0x5b0] sm:$0xff] %v1338_v54 }
  0xc7   : > { %v1342_v56 = vld [vmem:[%s8753_s26 + $0x1700] sm:$0xff]  ;;  %1341 = vst [vmem:[%s8758_s27 + $0x5b8] sm:$0xff] %v1340_v55 }
  0xc8   : > { %v1344_v57 = vld [vmem:[%s8753_s26 + $0x1720] sm:$0xff]  ;;  %1343 = vst [vmem:[%s8758_s27 + $0x5c0] sm:$0xff] %v1342_v56 }
  0xc9   : > { %v1346_v58 = vld [vmem:[%s8753_s26 + $0x1740] sm:$0xff]  ;;  %1345 = vst [vmem:[%s8758_s27 + $0x5c8] sm:$0xff] %v1344_v57 }
  0xca   : > { %v1348_v59 = vld [vmem:[%s8753_s26 + $0x1760] sm:$0xff]  ;;  %1347 = vst [vmem:[%s8758_s27 + $0x5d0] sm:$0xff] %v1346_v58 }
  0xcb   : > { %v1350_v60 = vld [vmem:[%s8753_s26 + $0x1780] sm:$0xff]  ;;  %1349 = vst [vmem:[%s8758_s27 + $0x5d8] sm:$0xff] %v1348_v59 }
  0xcc   : > { %v1352_v61 = vld [vmem:[%s8753_s26 + $0x17a0] sm:$0xff]  ;;  %1351 = vst [vmem:[%s8758_s27 + $0x5e0] sm:$0xff] %v1350_v60 }
  0xcd   : > { %v1354_v62 = vld [vmem:[%s8753_s26 + $0x17c0] sm:$0xff]  ;;  %1353 = vst [vmem:[%s8758_s27 + $0x5e8] sm:$0xff] %v1352_v61 }
  0xce   : > { %v1356_v63 = vld [vmem:[%s8753_s26 + $0x17e0] sm:$0xff]  ;;  %1355 = vst [vmem:[%s8758_s27 + $0x5f0] sm:$0xff] %v1354_v62 }
  0xcf   : > { %v1358_v0 = vld [vmem:[%s8753_s26 + $0x1800] sm:$0xff]  ;;  %1357 = vst [vmem:[%s8758_s27 + $0x5f8] sm:$0xff] %v1356_v63 }
  0xd0   : > { %v1360_v1 = vld [vmem:[%s8753_s26 + $0x1820] sm:$0xff]  ;;  %1359 = vst [vmem:[%s8758_s27 + $0x600] sm:$0xff] %v1358_v0 }
  0xd1   : > { %v1362_v2 = vld [vmem:[%s8753_s26 + $0x1840] sm:$0xff]  ;;  %1361 = vst [vmem:[%s8758_s27 + $0x608] sm:$0xff] %v1360_v1 }
  0xd2   : > { %v1364_v3 = vld [vmem:[%s8753_s26 + $0x1860] sm:$0xff]  ;;  %1363 = vst [vmem:[%s8758_s27 + $0x610] sm:$0xff] %v1362_v2 }
  0xd3   : > { %v1366_v4 = vld [vmem:[%s8753_s26 + $0x1880] sm:$0xff]  ;;  %1365 = vst [vmem:[%s8758_s27 + $0x618] sm:$0xff] %v1364_v3 }
  0xd4   : > { %v1368_v5 = vld [vmem:[%s8753_s26 + $0x18a0] sm:$0xff]  ;;  %1367 = vst [vmem:[%s8758_s27 + $0x620] sm:$0xff] %v1366_v4 }
  0xd5   : > { %v1370_v6 = vld [vmem:[%s8753_s26 + $0x18c0] sm:$0xff]  ;;  %1369 = vst [vmem:[%s8758_s27 + $0x628] sm:$0xff] %v1368_v5 }
  0xd6   : > { %v1372_v7 = vld [vmem:[%s8753_s26 + $0x18e0] sm:$0xff]  ;;  %1371 = vst [vmem:[%s8758_s27 + $0x630] sm:$0xff] %v1370_v6 }
  0xd7   : > { %v1374_v8 = vld [vmem:[%s8753_s26 + $0x1900] sm:$0xff]  ;;  %1373 = vst [vmem:[%s8758_s27 + $0x638] sm:$0xff] %v1372_v7 }
  0xd8   : > { %v1376_v9 = vld [vmem:[%s8753_s26 + $0x1920] sm:$0xff]  ;;  %1375 = vst [vmem:[%s8758_s27 + $0x640] sm:$0xff] %v1374_v8 }
  0xd9   : > { %v1378_v10 = vld [vmem:[%s8753_s26 + $0x1940] sm:$0xff]  ;;  %1377 = vst [vmem:[%s8758_s27 + $0x648] sm:$0xff] %v1376_v9 }
  0xda   : > { %v1380_v11 = vld [vmem:[%s8753_s26 + $0x1960] sm:$0xff]  ;;  %1379 = vst [vmem:[%s8758_s27 + $0x650] sm:$0xff] %v1378_v10 }
  0xdb   : > { %v1382_v12 = vld [vmem:[%s8753_s26 + $0x1980] sm:$0xff]  ;;  %1381 = vst [vmem:[%s8758_s27 + $0x658] sm:$0xff] %v1380_v11 }
  0xdc   : > { %v1384_v13 = vld [vmem:[%s8753_s26 + $0x19a0] sm:$0xff]  ;;  %1383 = vst [vmem:[%s8758_s27 + $0x660] sm:$0xff] %v1382_v12 }
  0xdd   : > { %v1386_v14 = vld [vmem:[%s8753_s26 + $0x19c0] sm:$0xff]  ;;  %1385 = vst [vmem:[%s8758_s27 + $0x668] sm:$0xff] %v1384_v13 }
  0xde   : > { %v1388_v15 = vld [vmem:[%s8753_s26 + $0x19e0] sm:$0xff]  ;;  %1387 = vst [vmem:[%s8758_s27 + $0x670] sm:$0xff] %v1386_v14 }
  0xdf   : > { %v1390_v16 = vld [vmem:[%s8753_s26 + $0x1a00] sm:$0xff]  ;;  %1389 = vst [vmem:[%s8758_s27 + $0x678] sm:$0xff] %v1388_v15 }
  0xe0   : > { %v1392_v17 = vld [vmem:[%s8753_s26 + $0x1a20] sm:$0xff]  ;;  %1391 = vst [vmem:[%s8758_s27 + $0x680] sm:$0xff] %v1390_v16 }
  0xe1   : > { %v1394_v18 = vld [vmem:[%s8753_s26 + $0x1a40] sm:$0xff]  ;;  %1393 = vst [vmem:[%s8758_s27 + $0x688] sm:$0xff] %v1392_v17 }
  0xe2   : > { %v1396_v19 = vld [vmem:[%s8753_s26 + $0x1a60] sm:$0xff]  ;;  %1395 = vst [vmem:[%s8758_s27 + $0x690] sm:$0xff] %v1394_v18 }
  0xe3   : > { %v1398_v20 = vld [vmem:[%s8753_s26 + $0x1a80] sm:$0xff]  ;;  %1397 = vst [vmem:[%s8758_s27 + $0x698] sm:$0xff] %v1396_v19 }
  0xe4   : > { %v1400_v21 = vld [vmem:[%s8753_s26 + $0x1aa0] sm:$0xff]  ;;  %1399 = vst [vmem:[%s8758_s27 + $0x6a0] sm:$0xff] %v1398_v20 }
  0xe5   : > { %v1402_v22 = vld [vmem:[%s8753_s26 + $0x1ac0] sm:$0xff]  ;;  %1401 = vst [vmem:[%s8758_s27 + $0x6a8] sm:$0xff] %v1400_v21 }
  0xe6   : > { %v1404_v23 = vld [vmem:[%s8753_s26 + $0x1ae0] sm:$0xff]  ;;  %1403 = vst [vmem:[%s8758_s27 + $0x6b0] sm:$0xff] %v1402_v22 }
  0xe7   : > { %v1406_v24 = vld [vmem:[%s8753_s26 + $0x1b00] sm:$0xff]  ;;  %1405 = vst [vmem:[%s8758_s27 + $0x6b8] sm:$0xff] %v1404_v23 }
  0xe8   : > { %v1408_v25 = vld [vmem:[%s8753_s26 + $0x1b20] sm:$0xff]  ;;  %1407 = vst [vmem:[%s8758_s27 + $0x6c0] sm:$0xff] %v1406_v24 }
  0xe9   : > { %v1410_v26 = vld [vmem:[%s8753_s26 + $0x1b40] sm:$0xff]  ;;  %1409 = vst [vmem:[%s8758_s27 + $0x6c8] sm:$0xff] %v1408_v25 }
  0xea   : > { %v1412_v27 = vld [vmem:[%s8753_s26 + $0x1b60] sm:$0xff]  ;;  %1411 = vst [vmem:[%s8758_s27 + $0x6d0] sm:$0xff] %v1410_v26 }
  0xeb   : > { %v1414_v28 = vld [vmem:[%s8753_s26 + $0x1b80] sm:$0xff]  ;;  %1413 = vst [vmem:[%s8758_s27 + $0x6d8] sm:$0xff] %v1412_v27 }
  0xec   : > { %v1416_v29 = vld [vmem:[%s8753_s26 + $0x1ba0] sm:$0xff]  ;;  %1415 = vst [vmem:[%s8758_s27 + $0x6e0] sm:$0xff] %v1414_v28 }
  0xed   : > { %v1418_v30 = vld [vmem:[%s8753_s26 + $0x1bc0] sm:$0xff]  ;;  %1417 = vst [vmem:[%s8758_s27 + $0x6e8] sm:$0xff] %v1416_v29 }
  0xee   : > { %v1420_v31 = vld [vmem:[%s8753_s26 + $0x1be0] sm:$0xff]  ;;  %1419 = vst [vmem:[%s8758_s27 + $0x6f0] sm:$0xff] %v1418_v30 }
  0xef   : > { %v1422_v32 = vld [vmem:[%s8753_s26 + $0x1c00] sm:$0xff]  ;;  %1421 = vst [vmem:[%s8758_s27 + $0x6f8] sm:$0xff] %v1420_v31 }
  0xf0   : > { %v1424_v33 = vld [vmem:[%s8753_s26 + $0x1c20] sm:$0xff]  ;;  %1423 = vst [vmem:[%s8758_s27 + $0x700] sm:$0xff] %v1422_v32 }
  0xf1   : > { %v1426_v34 = vld [vmem:[%s8753_s26 + $0x1c40] sm:$0xff]  ;;  %1425 = vst [vmem:[%s8758_s27 + $0x708] sm:$0xff] %v1424_v33 }
  0xf2   : > { %v1428_v35 = vld [vmem:[%s8753_s26 + $0x1c60] sm:$0xff]  ;;  %1427 = vst [vmem:[%s8758_s27 + $0x710] sm:$0xff] %v1426_v34 }
  0xf3   : > { %v1430_v36 = vld [vmem:[%s8753_s26 + $0x1c80] sm:$0xff]  ;;  %1429 = vst [vmem:[%s8758_s27 + $0x718] sm:$0xff] %v1428_v35 }
  0xf4   : > { %v1432_v37 = vld [vmem:[%s8753_s26 + $0x1ca0] sm:$0xff]  ;;  %1431 = vst [vmem:[%s8758_s27 + $0x720] sm:$0xff] %v1430_v36 }
  0xf5   : > { %v1434_v38 = vld [vmem:[%s8753_s26 + $0x1cc0] sm:$0xff]  ;;  %1433 = vst [vmem:[%s8758_s27 + $0x728] sm:$0xff] %v1432_v37 }
  0xf6   : > { %v1436_v39 = vld [vmem:[%s8753_s26 + $0x1ce0] sm:$0xff]  ;;  %1435 = vst [vmem:[%s8758_s27 + $0x730] sm:$0xff] %v1434_v38 }
  0xf7   : > { %v1438_v40 = vld [vmem:[%s8753_s26 + $0x1d00] sm:$0xff]  ;;  %1437 = vst [vmem:[%s8758_s27 + $0x738] sm:$0xff] %v1436_v39 }
  0xf8   : > { %v1440_v41 = vld [vmem:[%s8753_s26 + $0x1d20] sm:$0xff]  ;;  %1439 = vst [vmem:[%s8758_s27 + $0x740] sm:$0xff] %v1438_v40 }
  0xf9   : > { %v1442_v42 = vld [vmem:[%s8753_s26 + $0x1d40] sm:$0xff]  ;;  %1441 = vst [vmem:[%s8758_s27 + $0x748] sm:$0xff] %v1440_v41 }
  0xfa   : > { %v1444_v43 = vld [vmem:[%s8753_s26 + $0x1d60] sm:$0xff]  ;;  %1443 = vst [vmem:[%s8758_s27 + $0x750] sm:$0xff] %v1442_v42 }
  0xfb   : > { %v1446_v44 = vld [vmem:[%s8753_s26 + $0x1d80] sm:$0xff]  ;;  %1445 = vst [vmem:[%s8758_s27 + $0x758] sm:$0xff] %v1444_v43 }
  0xfc   : > { %v1448_v45 = vld [vmem:[%s8753_s26 + $0x1da0] sm:$0xff]  ;;  %1447 = vst [vmem:[%s8758_s27 + $0x760] sm:$0xff] %v1446_v44 }
  0xfd   : > { %v1450_v46 = vld [vmem:[%s8753_s26 + $0x1dc0] sm:$0xff]  ;;  %1449 = vst [vmem:[%s8758_s27 + $0x768] sm:$0xff] %v1448_v45 }
  0xfe   : > { %v1452_v47 = vld [vmem:[%s8753_s26 + $0x1de0] sm:$0xff]  ;;  %1451 = vst [vmem:[%s8758_s27 + $0x770] sm:$0xff] %v1450_v46 }
  0xff   : > { %v1454_v48 = vld [vmem:[%s8753_s26 + $0x1e00] sm:$0xff]  ;;  %1453 = vst [vmem:[%s8758_s27 + $0x778] sm:$0xff] %v1452_v47 }
 0x100   : > { %v1456_v49 = vld [vmem:[%s8753_s26 + $0x1e20] sm:$0xff]  ;;  %1455 = vst [vmem:[%s8758_s27 + $0x780] sm:$0xff] %v1454_v48 }
 0x101   : > { %v1458_v50 = vld [vmem:[%s8753_s26 + $0x1e40] sm:$0xff]  ;;  %1457 = vst [vmem:[%s8758_s27 + $0x788] sm:$0xff] %v1456_v49 }
 0x102   : > { %v1460_v51 = vld [vmem:[%s8753_s26 + $0x1e60] sm:$0xff]  ;;  %1459 = vst [vmem:[%s8758_s27 + $0x790] sm:$0xff] %v1458_v50 }
 0x103   : > { %v1462_v52 = vld [vmem:[%s8753_s26 + $0x1e80] sm:$0xff]  ;;  %1461 = vst [vmem:[%s8758_s27 + $0x798] sm:$0xff] %v1460_v51 }
 0x104   : > { %v1464_v53 = vld [vmem:[%s8753_s26 + $0x1ea0] sm:$0xff]  ;;  %1463 = vst [vmem:[%s8758_s27 + $0x7a0] sm:$0xff] %v1462_v52 }
 0x105   : > { %v1466_v54 = vld [vmem:[%s8753_s26 + $0x1ec0] sm:$0xff]  ;;  %1465 = vst [vmem:[%s8758_s27 + $0x7a8] sm:$0xff] %v1464_v53 }
 0x106   : > { %v1468_v55 = vld [vmem:[%s8753_s26 + $0x1ee0] sm:$0xff]  ;;  %1467 = vst [vmem:[%s8758_s27 + $0x7b0] sm:$0xff] %v1466_v54 }
 0x107   : > { %v1470_v56 = vld [vmem:[%s8753_s26 + $0x1f00] sm:$0xff]  ;;  %1469 = vst [vmem:[%s8758_s27 + $0x7b8] sm:$0xff] %v1468_v55 }
 0x108   : > { %v1472_v57 = vld [vmem:[%s8753_s26 + $0x1f20] sm:$0xff]  ;;  %1471 = vst [vmem:[%s8758_s27 + $0x7c0] sm:$0xff] %v1470_v56 }
 0x109   : > { %v1474_v58 = vld [vmem:[%s8753_s26 + $0x1f40] sm:$0xff]  ;;  %1473 = vst [vmem:[%s8758_s27 + $0x7c8] sm:$0xff] %v1472_v57 }
 0x10a   : > { %v1476_v59 = vld [vmem:[%s8753_s26 + $0x1f60] sm:$0xff]  ;;  %1475 = vst [vmem:[%s8758_s27 + $0x7d0] sm:$0xff] %v1474_v58 }
 0x10b   : > { %v1478_v60 = vld [vmem:[%s8753_s26 + $0x1f80] sm:$0xff]  ;;  %1477 = vst [vmem:[%s8758_s27 + $0x7d8] sm:$0xff] %v1476_v59 }
 0x10c   : > { %v1480_v61 = vld [vmem:[%s8753_s26 + $0x1fa0] sm:$0xff]  ;;  %1479 = vst [vmem:[%s8758_s27 + $0x7e0] sm:$0xff] %v1478_v60 }
 0x10d   : > { %v1482_v62 = vld [vmem:[%s8753_s26 + $0x1fc0] sm:$0xff]  ;;  %1481 = vst [vmem:[%s8758_s27 + $0x7e8] sm:$0xff] %v1480_v61 }
 0x10e   : > { %v1484_v63 = vld [vmem:[%s8753_s26 + $0x1fe0] sm:$0xff]  ;;  %1483 = vst [vmem:[%s8758_s27 + $0x7f0] sm:$0xff] %v1482_v62 }
 0x10f   : > { %v1486_v0 = vld [vmem:[%s8753_s26 + $0x2000] sm:$0xff]  ;;  %1485 = vst [vmem:[%s8758_s27 + $0x7f8] sm:$0xff] %v1484_v63 }
 0x110   : > { %v1488_v1 = vld [vmem:[%s8753_s26 + $0x2020] sm:$0xff]  ;;  %1487 = vst [vmem:[%s8758_s27 + $0x800] sm:$0xff] %v1486_v0 }
 0x111   : > { %v1490_v2 = vld [vmem:[%s8753_s26 + $0x2040] sm:$0xff]  ;;  %1489 = vst [vmem:[%s8758_s27 + $0x808] sm:$0xff] %v1488_v1 }
 0x112   : > { %v1492_v3 = vld [vmem:[%s8753_s26 + $0x2060] sm:$0xff]  ;;  %1491 = vst [vmem:[%s8758_s27 + $0x810] sm:$0xff] %v1490_v2 }
 0x113   : > { %v1494_v4 = vld [vmem:[%s8753_s26 + $0x2080] sm:$0xff]  ;;  %1493 = vst [vmem:[%s8758_s27 + $0x818] sm:$0xff] %v1492_v3 }
 0x114   : > { %v1496_v5 = vld [vmem:[%s8753_s26 + $0x20a0] sm:$0xff]  ;;  %1495 = vst [vmem:[%s8758_s27 + $0x820] sm:$0xff] %v1494_v4 }
 0x115   : > { %v1498_v6 = vld [vmem:[%s8753_s26 + $0x20c0] sm:$0xff]  ;;  %1497 = vst [vmem:[%s8758_s27 + $0x828] sm:$0xff] %v1496_v5 }
 0x116   : > { %v1500_v7 = vld [vmem:[%s8753_s26 + $0x20e0] sm:$0xff]  ;;  %1499 = vst [vmem:[%s8758_s27 + $0x830] sm:$0xff] %v1498_v6 }
 0x117   : > { %v1502_v8 = vld [vmem:[%s8753_s26 + $0x2100] sm:$0xff]  ;;  %1501 = vst [vmem:[%s8758_s27 + $0x838] sm:$0xff] %v1500_v7 }
 0x118   : > { %v1504_v9 = vld [vmem:[%s8753_s26 + $0x2120] sm:$0xff]  ;;  %1503 = vst [vmem:[%s8758_s27 + $0x840] sm:$0xff] %v1502_v8 }
 0x119   : > { %v1506_v10 = vld [vmem:[%s8753_s26 + $0x2140] sm:$0xff]  ;;  %1505 = vst [vmem:[%s8758_s27 + $0x848] sm:$0xff] %v1504_v9 }
 0x11a   : > { %v1508_v11 = vld [vmem:[%s8753_s26 + $0x2160] sm:$0xff]  ;;  %1507 = vst [vmem:[%s8758_s27 + $0x850] sm:$0xff] %v1506_v10 }
 0x11b   : > { %v1510_v12 = vld [vmem:[%s8753_s26 + $0x2180] sm:$0xff]  ;;  %1509 = vst [vmem:[%s8758_s27 + $0x858] sm:$0xff] %v1508_v11 }
 0x11c   : > { %v1512_v13 = vld [vmem:[%s8753_s26 + $0x21a0] sm:$0xff]  ;;  %1511 = vst [vmem:[%s8758_s27 + $0x860] sm:$0xff] %v1510_v12 }
 0x11d   : > { %v1514_v14 = vld [vmem:[%s8753_s26 + $0x21c0] sm:$0xff]  ;;  %1513 = vst [vmem:[%s8758_s27 + $0x868] sm:$0xff] %v1512_v13 }
 0x11e   : > { %v1516_v15 = vld [vmem:[%s8753_s26 + $0x21e0] sm:$0xff]  ;;  %1515 = vst [vmem:[%s8758_s27 + $0x870] sm:$0xff] %v1514_v14 }
 0x11f   : > { %v1518_v16 = vld [vmem:[%s8753_s26 + $0x2200] sm:$0xff]  ;;  %1517 = vst [vmem:[%s8758_s27 + $0x878] sm:$0xff] %v1516_v15 }
 0x120   : > { %v1520_v17 = vld [vmem:[%s8753_s26 + $0x2220] sm:$0xff]  ;;  %1519 = vst [vmem:[%s8758_s27 + $0x880] sm:$0xff] %v1518_v16 }
 0x121   : > { %v1522_v18 = vld [vmem:[%s8753_s26 + $0x2240] sm:$0xff]  ;;  %1521 = vst [vmem:[%s8758_s27 + $0x888] sm:$0xff] %v1520_v17 }
 0x122   : > { %v1524_v19 = vld [vmem:[%s8753_s26 + $0x2260] sm:$0xff]  ;;  %1523 = vst [vmem:[%s8758_s27 + $0x890] sm:$0xff] %v1522_v18 }
 0x123   : > { %v1526_v20 = vld [vmem:[%s8753_s26 + $0x2280] sm:$0xff]  ;;  %1525 = vst [vmem:[%s8758_s27 + $0x898] sm:$0xff] %v1524_v19 }
 0x124   : > { %v1528_v21 = vld [vmem:[%s8753_s26 + $0x22a0] sm:$0xff]  ;;  %1527 = vst [vmem:[%s8758_s27 + $0x8a0] sm:$0xff] %v1526_v20 }
 0x125   : > { %v1530_v22 = vld [vmem:[%s8753_s26 + $0x22c0] sm:$0xff]  ;;  %1529 = vst [vmem:[%s8758_s27 + $0x8a8] sm:$0xff] %v1528_v21 }
 0x126   : > { %v1532_v23 = vld [vmem:[%s8753_s26 + $0x22e0] sm:$0xff]  ;;  %1531 = vst [vmem:[%s8758_s27 + $0x8b0] sm:$0xff] %v1530_v22 }
 0x127   : > { %v1534_v24 = vld [vmem:[%s8753_s26 + $0x2300] sm:$0xff]  ;;  %1533 = vst [vmem:[%s8758_s27 + $0x8b8] sm:$0xff] %v1532_v23 }
 0x128   : > { %v1536_v25 = vld [vmem:[%s8753_s26 + $0x2320] sm:$0xff]  ;;  %1535 = vst [vmem:[%s8758_s27 + $0x8c0] sm:$0xff] %v1534_v24 }
 0x129   : > { %v1538_v26 = vld [vmem:[%s8753_s26 + $0x2340] sm:$0xff]  ;;  %1537 = vst [vmem:[%s8758_s27 + $0x8c8] sm:$0xff] %v1536_v25 }
 0x12a   : > { %v1540_v27 = vld [vmem:[%s8753_s26 + $0x2360] sm:$0xff]  ;;  %1539 = vst [vmem:[%s8758_s27 + $0x8d0] sm:$0xff] %v1538_v26 }
 0x12b   : > { %v1542_v28 = vld [vmem:[%s8753_s26 + $0x2380] sm:$0xff]  ;;  %1541 = vst [vmem:[%s8758_s27 + $0x8d8] sm:$0xff] %v1540_v27 }
 0x12c   : > { %v1544_v29 = vld [vmem:[%s8753_s26 + $0x23a0] sm:$0xff]  ;;  %1543 = vst [vmem:[%s8758_s27 + $0x8e0] sm:$0xff] %v1542_v28 }
 0x12d   : > { %v1546_v30 = vld [vmem:[%s8753_s26 + $0x23c0] sm:$0xff]  ;;  %1545 = vst [vmem:[%s8758_s27 + $0x8e8] sm:$0xff] %v1544_v29 }
 0x12e   : > { %v1548_v31 = vld [vmem:[%s8753_s26 + $0x23e0] sm:$0xff]  ;;  %1547 = vst [vmem:[%s8758_s27 + $0x8f0] sm:$0xff] %v1546_v30 }
 0x12f   : > { %v1550_v32 = vld [vmem:[%s8753_s26 + $0x2400] sm:$0xff]  ;;  %1549 = vst [vmem:[%s8758_s27 + $0x8f8] sm:$0xff] %v1548_v31 }
 0x130   : > { %v1552_v33 = vld [vmem:[%s8753_s26 + $0x2420] sm:$0xff]  ;;  %1551 = vst [vmem:[%s8758_s27 + $0x900] sm:$0xff] %v1550_v32 }
 0x131   : > { %v1554_v34 = vld [vmem:[%s8753_s26 + $0x2440] sm:$0xff]  ;;  %1553 = vst [vmem:[%s8758_s27 + $0x908] sm:$0xff] %v1552_v33 }
 0x132   : > { %v1556_v35 = vld [vmem:[%s8753_s26 + $0x2460] sm:$0xff]  ;;  %1555 = vst [vmem:[%s8758_s27 + $0x910] sm:$0xff] %v1554_v34 }
 0x133   : > { %v1558_v36 = vld [vmem:[%s8753_s26 + $0x2480] sm:$0xff]  ;;  %1557 = vst [vmem:[%s8758_s27 + $0x918] sm:$0xff] %v1556_v35 }
 0x134   : > { %v1560_v37 = vld [vmem:[%s8753_s26 + $0x24a0] sm:$0xff]  ;;  %1559 = vst [vmem:[%s8758_s27 + $0x920] sm:$0xff] %v1558_v36 }
 0x135   : > { %v1562_v38 = vld [vmem:[%s8753_s26 + $0x24c0] sm:$0xff]  ;;  %1561 = vst [vmem:[%s8758_s27 + $0x928] sm:$0xff] %v1560_v37 }
 0x136   : > { %v1564_v39 = vld [vmem:[%s8753_s26 + $0x24e0] sm:$0xff]  ;;  %1563 = vst [vmem:[%s8758_s27 + $0x930] sm:$0xff] %v1562_v38 }
 0x137   : > { %v1566_v40 = vld [vmem:[%s8753_s26 + $0x2500] sm:$0xff]  ;;  %1565 = vst [vmem:[%s8758_s27 + $0x938] sm:$0xff] %v1564_v39 }
 0x138   : > { %v1568_v41 = vld [vmem:[%s8753_s26 + $0x2520] sm:$0xff]  ;;  %1567 = vst [vmem:[%s8758_s27 + $0x940] sm:$0xff] %v1566_v40 }
 0x139   : > { %v1570_v42 = vld [vmem:[%s8753_s26 + $0x2540] sm:$0xff]  ;;  %1569 = vst [vmem:[%s8758_s27 + $0x948] sm:$0xff] %v1568_v41 }
 0x13a   : > { %v1572_v43 = vld [vmem:[%s8753_s26 + $0x2560] sm:$0xff]  ;;  %1571 = vst [vmem:[%s8758_s27 + $0x950] sm:$0xff] %v1570_v42 }
 0x13b   : > { %v1574_v44 = vld [vmem:[%s8753_s26 + $0x2580] sm:$0xff]  ;;  %1573 = vst [vmem:[%s8758_s27 + $0x958] sm:$0xff] %v1572_v43 }
 0x13c   : > { %v1576_v45 = vld [vmem:[%s8753_s26 + $0x25a0] sm:$0xff]  ;;  %1575 = vst [vmem:[%s8758_s27 + $0x960] sm:$0xff] %v1574_v44 }
 0x13d   : > { %v1578_v46 = vld [vmem:[%s8753_s26 + $0x25c0] sm:$0xff]  ;;  %1577 = vst [vmem:[%s8758_s27 + $0x968] sm:$0xff] %v1576_v45 }
 0x13e   : > { %v1580_v47 = vld [vmem:[%s8753_s26 + $0x25e0] sm:$0xff]  ;;  %1579 = vst [vmem:[%s8758_s27 + $0x970] sm:$0xff] %v1578_v46 }
 0x13f   : > { %v1582_v48 = vld [vmem:[%s8753_s26 + $0x2600] sm:$0xff]  ;;  %1581 = vst [vmem:[%s8758_s27 + $0x978] sm:$0xff] %v1580_v47 }
 0x140   : > { %v1584_v49 = vld [vmem:[%s8753_s26 + $0x2620] sm:$0xff]  ;;  %1583 = vst [vmem:[%s8758_s27 + $0x980] sm:$0xff] %v1582_v48 }
 0x141   : > { %v1586_v50 = vld [vmem:[%s8753_s26 + $0x2640] sm:$0xff]  ;;  %1585 = vst [vmem:[%s8758_s27 + $0x988] sm:$0xff] %v1584_v49 }
 0x142   : > { %v1588_v51 = vld [vmem:[%s8753_s26 + $0x2660] sm:$0xff]  ;;  %1587 = vst [vmem:[%s8758_s27 + $0x990] sm:$0xff] %v1586_v50 }
 0x143   : > { %v1590_v52 = vld [vmem:[%s8753_s26 + $0x2680] sm:$0xff]  ;;  %1589 = vst [vmem:[%s8758_s27 + $0x998] sm:$0xff] %v1588_v51 }
 0x144   : > { %v1592_v53 = vld [vmem:[%s8753_s26 + $0x26a0] sm:$0xff]  ;;  %1591 = vst [vmem:[%s8758_s27 + $0x9a0] sm:$0xff] %v1590_v52 }
 0x145   : > { %v1594_v54 = vld [vmem:[%s8753_s26 + $0x26c0] sm:$0xff]  ;;  %1593 = vst [vmem:[%s8758_s27 + $0x9a8] sm:$0xff] %v1592_v53 }
 0x146   : > { %v1596_v55 = vld [vmem:[%s8753_s26 + $0x26e0] sm:$0xff]  ;;  %1595 = vst [vmem:[%s8758_s27 + $0x9b0] sm:$0xff] %v1594_v54 }
 0x147   : > { %v1598_v56 = vld [vmem:[%s8753_s26 + $0x2700] sm:$0xff]  ;;  %1597 = vst [vmem:[%s8758_s27 + $0x9b8] sm:$0xff] %v1596_v55 }
 0x148   : > { %v1600_v57 = vld [vmem:[%s8753_s26 + $0x2720] sm:$0xff]  ;;  %1599 = vst [vmem:[%s8758_s27 + $0x9c0] sm:$0xff] %v1598_v56 }
 0x149   : > { %v1602_v58 = vld [vmem:[%s8753_s26 + $0x2740] sm:$0xff]  ;;  %1601 = vst [vmem:[%s8758_s27 + $0x9c8] sm:$0xff] %v1600_v57 }
 0x14a   : > { %v1604_v59 = vld [vmem:[%s8753_s26 + $0x2760] sm:$0xff]  ;;  %1603 = vst [vmem:[%s8758_s27 + $0x9d0] sm:$0xff] %v1602_v58 }
 0x14b   : > { %v1606_v60 = vld [vmem:[%s8753_s26 + $0x2780] sm:$0xff]  ;;  %1605 = vst [vmem:[%s8758_s27 + $0x9d8] sm:$0xff] %v1604_v59 }
 0x14c   : > { %v1608_v61 = vld [vmem:[%s8753_s26 + $0x27a0] sm:$0xff]  ;;  %1607 = vst [vmem:[%s8758_s27 + $0x9e0] sm:$0xff] %v1606_v60 }
 0x14d   : > { %v1610_v62 = vld [vmem:[%s8753_s26 + $0x27c0] sm:$0xff]  ;;  %1609 = vst [vmem:[%s8758_s27 + $0x9e8] sm:$0xff] %v1608_v61 }
 0x14e   : > { %v1612_v63 = vld [vmem:[%s8753_s26 + $0x27e0] sm:$0xff]  ;;  %1611 = vst [vmem:[%s8758_s27 + $0x9f0] sm:$0xff] %v1610_v62 }
 0x14f   : > { %v1614_v0 = vld [vmem:[%s8753_s26 + $0x2800] sm:$0xff]  ;;  %1613 = vst [vmem:[%s8758_s27 + $0x9f8] sm:$0xff] %v1612_v63 }
 0x150   : > { %v1616_v1 = vld [vmem:[%s8753_s26 + $0x2820] sm:$0xff]  ;;  %1615 = vst [vmem:[%s8758_s27 + $0xa00] sm:$0xff] %v1614_v0 }
 0x151   : > { %v1618_v2 = vld [vmem:[%s8753_s26 + $0x2840] sm:$0xff]  ;;  %1617 = vst [vmem:[%s8758_s27 + $0xa08] sm:$0xff] %v1616_v1 }
 0x152   : > { %v1620_v3 = vld [vmem:[%s8753_s26 + $0x2860] sm:$0xff]  ;;  %1619 = vst [vmem:[%s8758_s27 + $0xa10] sm:$0xff] %v1618_v2 }
 0x153   : > { %v1622_v4 = vld [vmem:[%s8753_s26 + $0x2880] sm:$0xff]  ;;  %1621 = vst [vmem:[%s8758_s27 + $0xa18] sm:$0xff] %v1620_v3 }
 0x154   : > { %v1624_v5 = vld [vmem:[%s8753_s26 + $0x28a0] sm:$0xff]  ;;  %1623 = vst [vmem:[%s8758_s27 + $0xa20] sm:$0xff] %v1622_v4 }
 0x155   : > { %v1626_v6 = vld [vmem:[%s8753_s26 + $0x28c0] sm:$0xff]  ;;  %1625 = vst [vmem:[%s8758_s27 + $0xa28] sm:$0xff] %v1624_v5 }
 0x156   : > { %v1628_v7 = vld [vmem:[%s8753_s26 + $0x28e0] sm:$0xff]  ;;  %1627 = vst [vmem:[%s8758_s27 + $0xa30] sm:$0xff] %v1626_v6 }
 0x157   : > { %v1630_v8 = vld [vmem:[%s8753_s26 + $0x2900] sm:$0xff]  ;;  %1629 = vst [vmem:[%s8758_s27 + $0xa38] sm:$0xff] %v1628_v7 }
 0x158   : > { %v1632_v9 = vld [vmem:[%s8753_s26 + $0x2920] sm:$0xff]  ;;  %1631 = vst [vmem:[%s8758_s27 + $0xa40] sm:$0xff] %v1630_v8 }
 0x159   : > { %v1634_v10 = vld [vmem:[%s8753_s26 + $0x2940] sm:$0xff]  ;;  %1633 = vst [vmem:[%s8758_s27 + $0xa48] sm:$0xff] %v1632_v9 }
 0x15a   : > { %v1636_v11 = vld [vmem:[%s8753_s26 + $0x2960] sm:$0xff]  ;;  %1635 = vst [vmem:[%s8758_s27 + $0xa50] sm:$0xff] %v1634_v10 }
 0x15b   : > { %v1638_v12 = vld [vmem:[%s8753_s26 + $0x2980] sm:$0xff]  ;;  %1637 = vst [vmem:[%s8758_s27 + $0xa58] sm:$0xff] %v1636_v11 }
 0x15c   : > { %v1640_v13 = vld [vmem:[%s8753_s26 + $0x29a0] sm:$0xff]  ;;  %1639 = vst [vmem:[%s8758_s27 + $0xa60] sm:$0xff] %v1638_v12 }
 0x15d   : > { %v1642_v14 = vld [vmem:[%s8753_s26 + $0x29c0] sm:$0xff]  ;;  %1641 = vst [vmem:[%s8758_s27 + $0xa68] sm:$0xff] %v1640_v13 }
 0x15e   : > { %v1644_v15 = vld [vmem:[%s8753_s26 + $0x29e0] sm:$0xff]  ;;  %1643 = vst [vmem:[%s8758_s27 + $0xa70] sm:$0xff] %v1642_v14 }
 0x15f   : > { %v1646_v16 = vld [vmem:[%s8753_s26 + $0x2a00] sm:$0xff]  ;;  %1645 = vst [vmem:[%s8758_s27 + $0xa78] sm:$0xff] %v1644_v15 }
 0x160   : > { %v1648_v17 = vld [vmem:[%s8753_s26 + $0x2a20] sm:$0xff]  ;;  %1647 = vst [vmem:[%s8758_s27 + $0xa80] sm:$0xff] %v1646_v16 }
 0x161   : > { %v1650_v18 = vld [vmem:[%s8753_s26 + $0x2a40] sm:$0xff]  ;;  %1649 = vst [vmem:[%s8758_s27 + $0xa88] sm:$0xff] %v1648_v17 }
 0x162   : > { %v1652_v19 = vld [vmem:[%s8753_s26 + $0x2a60] sm:$0xff]  ;;  %1651 = vst [vmem:[%s8758_s27 + $0xa90] sm:$0xff] %v1650_v18 }
 0x163   : > { %v1654_v20 = vld [vmem:[%s8753_s26 + $0x2a80] sm:$0xff]  ;;  %1653 = vst [vmem:[%s8758_s27 + $0xa98] sm:$0xff] %v1652_v19 }
 0x164   : > { %v1656_v21 = vld [vmem:[%s8753_s26 + $0x2aa0] sm:$0xff]  ;;  %1655 = vst [vmem:[%s8758_s27 + $0xaa0] sm:$0xff] %v1654_v20 }
 0x165   : > { %v1658_v22 = vld [vmem:[%s8753_s26 + $0x2ac0] sm:$0xff]  ;;  %1657 = vst [vmem:[%s8758_s27 + $0xaa8] sm:$0xff] %v1656_v21 }
 0x166   : > { %v1660_v23 = vld [vmem:[%s8753_s26 + $0x2ae0] sm:$0xff]  ;;  %1659 = vst [vmem:[%s8758_s27 + $0xab0] sm:$0xff] %v1658_v22 }
 0x167   : > { %v1662_v24 = vld [vmem:[%s8753_s26 + $0x2b00] sm:$0xff]  ;;  %1661 = vst [vmem:[%s8758_s27 + $0xab8] sm:$0xff] %v1660_v23 }
 0x168   : > { %v1664_v25 = vld [vmem:[%s8753_s26 + $0x2b20] sm:$0xff]  ;;  %1663 = vst [vmem:[%s8758_s27 + $0xac0] sm:$0xff] %v1662_v24 }
 0x169   : > { %v1666_v26 = vld [vmem:[%s8753_s26 + $0x2b40] sm:$0xff]  ;;  %1665 = vst [vmem:[%s8758_s27 + $0xac8] sm:$0xff] %v1664_v25 }
 0x16a   : > { %v1668_v27 = vld [vmem:[%s8753_s26 + $0x2b60] sm:$0xff]  ;;  %1667 = vst [vmem:[%s8758_s27 + $0xad0] sm:$0xff] %v1666_v26 }
 0x16b   : > { %v1670_v28 = vld [vmem:[%s8753_s26 + $0x2b80] sm:$0xff]  ;;  %1669 = vst [vmem:[%s8758_s27 + $0xad8] sm:$0xff] %v1668_v27 }
 0x16c   : > { %v1672_v29 = vld [vmem:[%s8753_s26 + $0x2ba0] sm:$0xff]  ;;  %1671 = vst [vmem:[%s8758_s27 + $0xae0] sm:$0xff] %v1670_v28 }
 0x16d   : > { %v1674_v30 = vld [vmem:[%s8753_s26 + $0x2bc0] sm:$0xff]  ;;  %1673 = vst [vmem:[%s8758_s27 + $0xae8] sm:$0xff] %v1672_v29 }
 0x16e   : > { %v1676_v31 = vld [vmem:[%s8753_s26 + $0x2be0] sm:$0xff]  ;;  %1675 = vst [vmem:[%s8758_s27 + $0xaf0] sm:$0xff] %v1674_v30 }
 0x16f   : > { %v1678_v32 = vld [vmem:[%s8753_s26 + $0x2c00] sm:$0xff]  ;;  %1677 = vst [vmem:[%s8758_s27 + $0xaf8] sm:$0xff] %v1676_v31 }
 0x170   : > { %v1680_v33 = vld [vmem:[%s8753_s26 + $0x2c20] sm:$0xff]  ;;  %1679 = vst [vmem:[%s8758_s27 + $0xb00] sm:$0xff] %v1678_v32 }
 0x171   : > { %v1682_v34 = vld [vmem:[%s8753_s26 + $0x2c40] sm:$0xff]  ;;  %1681 = vst [vmem:[%s8758_s27 + $0xb08] sm:$0xff] %v1680_v33 }
 0x172   : > { %v1684_v35 = vld [vmem:[%s8753_s26 + $0x2c60] sm:$0xff]  ;;  %1683 = vst [vmem:[%s8758_s27 + $0xb10] sm:$0xff] %v1682_v34 }
 0x173   : > { %v1686_v36 = vld [vmem:[%s8753_s26 + $0x2c80] sm:$0xff]  ;;  %1685 = vst [vmem:[%s8758_s27 + $0xb18] sm:$0xff] %v1684_v35 }
 0x174   : > { %v1688_v37 = vld [vmem:[%s8753_s26 + $0x2ca0] sm:$0xff]  ;;  %1687 = vst [vmem:[%s8758_s27 + $0xb20] sm:$0xff] %v1686_v36 }
 0x175   : > { %v1690_v38 = vld [vmem:[%s8753_s26 + $0x2cc0] sm:$0xff]  ;;  %1689 = vst [vmem:[%s8758_s27 + $0xb28] sm:$0xff] %v1688_v37 }
 0x176   : > { %v1692_v39 = vld [vmem:[%s8753_s26 + $0x2ce0] sm:$0xff]  ;;  %1691 = vst [vmem:[%s8758_s27 + $0xb30] sm:$0xff] %v1690_v38 }
 0x177   : > { %v1694_v40 = vld [vmem:[%s8753_s26 + $0x2d00] sm:$0xff]  ;;  %1693 = vst [vmem:[%s8758_s27 + $0xb38] sm:$0xff] %v1692_v39 }
 0x178   : > { %v1696_v41 = vld [vmem:[%s8753_s26 + $0x2d20] sm:$0xff]  ;;  %1695 = vst [vmem:[%s8758_s27 + $0xb40] sm:$0xff] %v1694_v40 }
 0x179   : > { %v1698_v42 = vld [vmem:[%s8753_s26 + $0x2d40] sm:$0xff]  ;;  %1697 = vst [vmem:[%s8758_s27 + $0xb48] sm:$0xff] %v1696_v41 }
 0x17a   : > { %v1700_v43 = vld [vmem:[%s8753_s26 + $0x2d60] sm:$0xff]  ;;  %1699 = vst [vmem:[%s8758_s27 + $0xb50] sm:$0xff] %v1698_v42 }
 0x17b   : > { %v1702_v44 = vld [vmem:[%s8753_s26 + $0x2d80] sm:$0xff]  ;;  %1701 = vst [vmem:[%s8758_s27 + $0xb58] sm:$0xff] %v1700_v43 }
 0x17c   : > { %v1704_v45 = vld [vmem:[%s8753_s26 + $0x2da0] sm:$0xff]  ;;  %1703 = vst [vmem:[%s8758_s27 + $0xb60] sm:$0xff] %v1702_v44 }
 0x17d   : > { %v1706_v46 = vld [vmem:[%s8753_s26 + $0x2dc0] sm:$0xff]  ;;  %1705 = vst [vmem:[%s8758_s27 + $0xb68] sm:$0xff] %v1704_v45 }
 0x17e   : > { %v1708_v47 = vld [vmem:[%s8753_s26 + $0x2de0] sm:$0xff]  ;;  %1707 = vst [vmem:[%s8758_s27 + $0xb70] sm:$0xff] %v1706_v46 }
 0x17f   : > { %v1710_v48 = vld [vmem:[%s8753_s26 + $0x2e00] sm:$0xff]  ;;  %1709 = vst [vmem:[%s8758_s27 + $0xb78] sm:$0xff] %v1708_v47 }
 0x180   : > { %v1712_v49 = vld [vmem:[%s8753_s26 + $0x2e20] sm:$0xff]  ;;  %1711 = vst [vmem:[%s8758_s27 + $0xb80] sm:$0xff] %v1710_v48 }
 0x181   : > { %v1714_v50 = vld [vmem:[%s8753_s26 + $0x2e40] sm:$0xff]  ;;  %1713 = vst [vmem:[%s8758_s27 + $0xb88] sm:$0xff] %v1712_v49 }
 0x182   : > { %v1716_v51 = vld [vmem:[%s8753_s26 + $0x2e60] sm:$0xff]  ;;  %1715 = vst [vmem:[%s8758_s27 + $0xb90] sm:$0xff] %v1714_v50 }
 0x183   : > { %v1718_v52 = vld [vmem:[%s8753_s26 + $0x2e80] sm:$0xff]  ;;  %1717 = vst [vmem:[%s8758_s27 + $0xb98] sm:$0xff] %v1716_v51 }
 0x184   : > { %v1720_v53 = vld [vmem:[%s8753_s26 + $0x2ea0] sm:$0xff]  ;;  %1719 = vst [vmem:[%s8758_s27 + $0xba0] sm:$0xff] %v1718_v52 }
 0x185   : > { %v1722_v54 = vld [vmem:[%s8753_s26 + $0x2ec0] sm:$0xff]  ;;  %1721 = vst [vmem:[%s8758_s27 + $0xba8] sm:$0xff] %v1720_v53 }
 0x186   : > { %v1724_v55 = vld [vmem:[%s8753_s26 + $0x2ee0] sm:$0xff]  ;;  %1723 = vst [vmem:[%s8758_s27 + $0xbb0] sm:$0xff] %v1722_v54 }
 0x187   : > { %v1726_v56 = vld [vmem:[%s8753_s26 + $0x2f00] sm:$0xff]  ;;  %1725 = vst [vmem:[%s8758_s27 + $0xbb8] sm:$0xff] %v1724_v55 }
 0x188   : > { %v1728_v57 = vld [vmem:[%s8753_s26 + $0x2f20] sm:$0xff]  ;;  %1727 = vst [vmem:[%s8758_s27 + $0xbc0] sm:$0xff] %v1726_v56 }
 0x189   : > { %v1730_v58 = vld [vmem:[%s8753_s26 + $0x2f40] sm:$0xff]  ;;  %1729 = vst [vmem:[%s8758_s27 + $0xbc8] sm:$0xff] %v1728_v57 }
 0x18a   : > { %v1732_v59 = vld [vmem:[%s8753_s26 + $0x2f60] sm:$0xff]  ;;  %1731 = vst [vmem:[%s8758_s27 + $0xbd0] sm:$0xff] %v1730_v58 }
 0x18b   : > { %v1734_v60 = vld [vmem:[%s8753_s26 + $0x2f80] sm:$0xff]  ;;  %1733 = vst [vmem:[%s8758_s27 + $0xbd8] sm:$0xff] %v1732_v59 }
 0x18c   : > { %v1736_v61 = vld [vmem:[%s8753_s26 + $0x2fa0] sm:$0xff]  ;;  %1735 = vst [vmem:[%s8758_s27 + $0xbe0] sm:$0xff] %v1734_v60 }
 0x18d   : > { %v1738_v62 = vld [vmem:[%s8753_s26 + $0x2fc0] sm:$0xff]  ;;  %1737 = vst [vmem:[%s8758_s27 + $0xbe8] sm:$0xff] %v1736_v61 }
 0x18e   : > { %v1740_v63 = vld [vmem:[%s8753_s26 + $0x2fe0] sm:$0xff]  ;;  %1739 = vst [vmem:[%s8758_s27 + $0xbf0] sm:$0xff] %v1738_v62 }
 0x18f   : > { %v1742_v0 = vld [vmem:[%s8753_s26 + $0x3000] sm:$0xff]  ;;  %1741 = vst [vmem:[%s8758_s27 + $0xbf8] sm:$0xff] %v1740_v63 }
 0x190   : > { %v1744_v1 = vld [vmem:[%s8753_s26 + $0x3020] sm:$0xff]  ;;  %1743 = vst [vmem:[%s8758_s27 + $0xc00] sm:$0xff] %v1742_v0 }
 0x191   : > { %v1746_v2 = vld [vmem:[%s8753_s26 + $0x3040] sm:$0xff]  ;;  %1745 = vst [vmem:[%s8758_s27 + $0xc08] sm:$0xff] %v1744_v1 }
 0x192   : > { %v1748_v3 = vld [vmem:[%s8753_s26 + $0x3060] sm:$0xff]  ;;  %1747 = vst [vmem:[%s8758_s27 + $0xc10] sm:$0xff] %v1746_v2 }
 0x193   : > { %v1750_v4 = vld [vmem:[%s8753_s26 + $0x3080] sm:$0xff]  ;;  %1749 = vst [vmem:[%s8758_s27 + $0xc18] sm:$0xff] %v1748_v3 }
 0x194   : > { %v1752_v5 = vld [vmem:[%s8753_s26 + $0x30a0] sm:$0xff]  ;;  %1751 = vst [vmem:[%s8758_s27 + $0xc20] sm:$0xff] %v1750_v4 }
 0x195   : > { %v1754_v6 = vld [vmem:[%s8753_s26 + $0x30c0] sm:$0xff]  ;;  %1753 = vst [vmem:[%s8758_s27 + $0xc28] sm:$0xff] %v1752_v5 }
 0x196   : > { %v1756_v7 = vld [vmem:[%s8753_s26 + $0x30e0] sm:$0xff]  ;;  %1755 = vst [vmem:[%s8758_s27 + $0xc30] sm:$0xff] %v1754_v6 }
 0x197   : > { %1757 = vst [vmem:[%s8758_s27 + $0xc38] sm:$0xff] %v1756_v7 }
 0x198 PF: > { %p6638_p6 = scmp.ge.s32.totalorder %s8688_s16, 1  ;;  %p3373_p7 = scmp.lt.s32.totalorder %s8688_s16, 5 }
 0x19a   : > { %p3374_p8 = pnand %p6638_p6, %p3373_p7 }
 0x19b   : > { %s3380_s28 = sand.u32 (!%p3374_p8), 1, %s8672_s12   ;;  %s6639_s10 = sshll.u32 (!%p3374_p8), %s8680_s14, 1 }
 0x19c   : > { %3377 = sbr.rel (%p3374_p8) target bundleno = 957 (0x3bd), region = 80  ;;  %p9944_p9 = scmp.lt.s32.totalorder (!%p3374_p8), %s6639_s10, 7 }
 0x19d   : > { %s8607_s29 = smul.u32 (!%p3374_p8), 3136, %s3380_s28 }
 0x19f   : > { %s9544_s30 = scalar_lea.vmem (!%p3374_p8), [#allocation2], %s8607_s29 }
 0x1a1   : > { %v6699_v8 = vld [vmem:[%s9544_s30 + $0x70] sm:$0xf]  ;;  %v8229_v9 = vld [vmem:[%s9544_s30 + $0x74] sm:$0xf0]  ;;  %v6691_v19 = vld [vmem:[%s9544_s30 + $0x60] sm:$0xf] }
 0x1a2   : > { %v6763_v10 = vld [vmem:[%s9544_s30 + $0xf0] sm:$0xf]  ;;  %v6700_v11 = vor.u32 %v8229_v9, %v6699_v8  ;;  %v8245_v12 = vld [vmem:[%s9544_s30 + $0xf4] sm:$0xf0]  ;;  %v8227_v21 = vld [vmem:[%s9544_s30 + $0x64] sm:$0xf0] }
 0x1a3   : > { %v6827_v13 = vld [vmem:[%s9544_s30 + $0x170] sm:$0xf]  ;;  %v8261_v14 = vld [vmem:[%s9544_s30 + $0x174] sm:$0xf0]  ;;  %v6764_v15 = vor.u32 %v8245_v12, %v6763_v10  ;;  %v6755_v22 = vld [vmem:[%s9544_s30 + $0xe0] sm:$0xf]  ;;  %v6692_v24 = vor.u32 %v8227_v21, %v6691_v19 }
 0x1a4   : > { %v6828_v16 = vor.u32 %v8261_v14, %v6827_v13  ;;  %v6891_v17 = vld [vmem:[%s9544_s30 + $0x1f0] sm:$0xf]  ;;  %v8277_v18 = vld [vmem:[%s9544_s30 + $0x1f4] sm:$0xf0]  ;;  %5856 = vmatpush.bf16.msra.mxu0 %v6700_v11  ;;  %v8243_v23 = vld [vmem:[%s9544_s30 + $0xe4] sm:$0xf0] }
 0x1a5   : > { %v6892_v20 = vor.u32 %v8277_v18, %v6891_v17  ;;  %5869 = vmatpush.bf16.msra.mxu1 %v6764_v15  ;;  %v6756_v25 = vor.u32 %v8243_v23, %v6755_v22  ;;  %v6819_v26 = vld [vmem:[%s9544_s30 + $0x160] sm:$0xf]  ;;  %v8259_v27 = vld [vmem:[%s9544_s30 + $0x164] sm:$0xf0]  ;;  %v6683_v31 = vld [vmem:[%s9544_s30 + $0x50] sm:$0xf] }
 0x1a6   : > { %5882 = vmatpush.bf16.msra.mxu2 %v6828_v16  ;;  %v6883_v28 = vld [vmem:[%s9544_s30 + $0x1e0] sm:$0xf]  ;;  %v6820_v29 = vor.u32 %v8259_v27, %v6819_v26  ;;  %v8275_v30 = vld [vmem:[%s9544_s30 + $0x1e4] sm:$0xf0]  ;;  %v8225_v32 = vld [vmem:[%s9544_s30 + $0x54] sm:$0xf0] }
 0x1a7   : > { %5895 = vmatpush.bf16.msra.mxu3 %v6892_v20  ;;  %v6884_v33 = vor.u32 %v8275_v30, %v6883_v28  ;;  %v6747_v34 = vld [vmem:[%s9544_s30 + $0xd0] sm:$0xf]  ;;  %v8241_v35 = vld [vmem:[%s9544_s30 + $0xd4] sm:$0xf0]  ;;  %v6684_v37 = vor.u32 %v8225_v32, %v6683_v31  ;;  %v6675_v43 = vld [vmem:[%s9544_s30 + $0x40] sm:$0xf] }
 0x1a8   : > { %v6811_v36 = vld [vmem:[%s9544_s30 + $0x150] sm:$0xf]  ;;  %5857 = vmatpush.bf16.msra.mxu0 %v6692_v24  ;;  %v8257_v38 = vld [vmem:[%s9544_s30 + $0x154] sm:$0xf0]  ;;  %v6748_v41 = vor.u32 %v8241_v35, %v6747_v34  ;;  %v8223_v44 = vld [vmem:[%s9544_s30 + $0x44] sm:$0xf0] }
 0x1a9   : > { %v6875_v39 = vld [vmem:[%s9544_s30 + $0x1d0] sm:$0xf]  ;;  %v8273_v40 = vld [vmem:[%s9544_s30 + $0x1d4] sm:$0xf0]  ;;  %5870 = vmatpush.bf16.msra.mxu1 %v6756_v25  ;;  %v6812_v42 = vor.u32 %v8257_v38, %v6811_v36  ;;  %v6739_v45 = vld [vmem:[%s9544_s30 + $0xc0] sm:$0xf]  ;;  %v6676_v52 = vor.u32 %v8223_v44, %v6675_v43 }
 0x1aa   : > { %5883 = vmatpush.bf16.msra.mxu2 %v6820_v29  ;;  %v6876_v46 = vor.u32 %v8273_v40, %v6875_v39  ;;  %v8239_v47 = vld [vmem:[%s9544_s30 + $0xc4] sm:$0xf0]  ;;  %v6803_v48 = vld [vmem:[%s9544_s30 + $0x140] sm:$0xf]  ;;  %v6667_v55 = vld [vmem:[%s9544_s30 + $0x30] sm:$0xf] }
 0x1ab   : > { %5896 = vmatpush.bf16.msra.mxu3 %v6884_v33  ;;  %v8255_v49 = vld [vmem:[%s9544_s30 + $0x144] sm:$0xf0]  ;;  %v6867_v50 = vld [vmem:[%s9544_s30 + $0x1c0] sm:$0xf]  ;;  %v6740_v53 = vor.u32 %v8239_v47, %v6739_v45  ;;  %v8221_v56 = vld [vmem:[%s9544_s30 + $0x34] sm:$0xf0] }
 0x1ac   : > { %v8271_v51 = vld [vmem:[%s9544_s30 + $0x1c4] sm:$0xf0]  ;;  %5858 = vmatpush.bf16.msra.mxu0 %v6684_v37  ;;  %v6804_v54 = vor.u32 %v8255_v49, %v6803_v48  ;;  %v6731_v57 = vld [vmem:[%s9544_s30 + $0xb0] sm:$0xf]  ;;  %v8237_v59 = vld [vmem:[%s9544_s30 + $0xb4] sm:$0xf0]  ;;  %v6668_v0 = vor.u32 %v8221_v56, %v6667_v55 }
 0x1ad   : > { %5871 = vmatpush.bf16.msra.mxu1 %v6748_v41  ;;  %v6868_v58 = vor.u32 %v8271_v51, %v6867_v50  ;;  %v6795_v60 = vld [vmem:[%s9544_s30 + $0x130] sm:$0xf]  ;;  %v8253_v61 = vld [vmem:[%s9544_s30 + $0x134] sm:$0xf0]  ;;  %v6732_v1 = vor.u32 %v8237_v59, %v6731_v57  ;;  %v6659_v3 = vld [vmem:[%s9544_s30 + $0x20] sm:$0xf] }
 0x1ae   : > { %5884 = vmatpush.bf16.msra.mxu2 %v6812_v42  ;;  %v6859_v62 = vld [vmem:[%s9544_s30 + $0x1b0] sm:$0xf]  ;;  %v8269_v63 = vld [vmem:[%s9544_s30 + $0x1b4] sm:$0xf0]  ;;  %v6796_v2 = vor.u32 %v8253_v61, %v6795_v60  ;;  %v8219_v4 = vld [vmem:[%s9544_s30 + $0x24] sm:$0xf0] }
 0x1af   : > { %5897 = vmatpush.bf16.msra.mxu3 %v6876_v46  ;;  %v6723_v5 = vld [vmem:[%s9544_s30 + $0xa0] sm:$0xf]  ;;  %v6860_v6 = vor.u32 %v8269_v63, %v6859_v62  ;;  %v8235_v7 = vld [vmem:[%s9544_s30 + $0xa4] sm:$0xf0]  ;;  %v6660_v12 = vor.u32 %v8219_v4, %v6659_v3  ;;  %v6651_v15 = vld [vmem:[%s9544_s30 + $0x10] sm:$0xf] }
 0x1b0   : > { %5859 = vmatpush.bf16.msra.mxu0 %v6676_v52  ;;  %v6787_v8 = vld [vmem:[%s9544_s30 + $0x120] sm:$0xf]  ;;  %v8251_v9 = vld [vmem:[%s9544_s30 + $0x124] sm:$0xf0]  ;;  %v6724_v13 = vor.u32 %v8235_v7, %v6723_v5  ;;  %v8217_v16 = vld [vmem:[%s9544_s30 + $0x14] sm:$0xf0] }
 0x1b1   : > { %5872 = vmatpush.bf16.msra.mxu1 %v6740_v53  ;;  %v6851_v10 = vld [vmem:[%s9544_s30 + $0x1a0] sm:$0xf]  ;;  %v8267_v11 = vld [vmem:[%s9544_s30 + $0x1a4] sm:$0xf0]  ;;  %v6788_v14 = vor.u32 %v8251_v9, %v6787_v8  ;;  %v6715_v17 = vld [vmem:[%s9544_s30 + $0x90] sm:$0xf]  ;;  %v6652_v24 = vor.u32 %v8217_v16, %v6651_v15 }
 0x1b2   : > { %5885 = vmatpush.bf16.msra.mxu2 %v6804_v54  ;;  %v6852_v18 = vor.u32 %v8267_v11, %v6851_v10  ;;  %v8233_v19 = vld [vmem:[%s9544_s30 + $0x94] sm:$0xf0]  ;;  %v6779_v20 = vld [vmem:[%s9544_s30 + $0x110] sm:$0xf]  ;;  %v6643_v25 = vld [vmem:[%s9544_s30] sm:$0xf] }
 0x1b3   : > { %5898 = vmatpush.bf16.msra.mxu3 %v6868_v58  ;;  %v8249_v21 = vld [vmem:[%s9544_s30 + $0x114] sm:$0xf0]  ;;  %v6843_v22 = vld [vmem:[%s9544_s30 + $0x190] sm:$0xf]  ;;  %v8215_v26 = vld [vmem:[%s9544_s30 + $0x4] sm:$0xf0]  ;;  %v6716_v27 = vor.u32 %v8233_v19, %v6715_v17 }
 0x1b4   : > { %5860 = vmatpush.bf16.msra.mxu0 %v6668_v0  ;;  %v8265_v23 = vld [vmem:[%s9544_s30 + $0x194] sm:$0xf0]  ;;  %v6780_v28 = vor.u32 %v8249_v21, %v6779_v20  ;;  %v6707_v29 = vld [vmem:[%s9544_s30 + $0x80] sm:$0xf]  ;;  %v8231_v30 = vld [vmem:[%s9544_s30 + $0x84] sm:$0xf0]  ;;  %v6644_v39 = vor.u32 %v8215_v26, %v6643_v25 }
 0x1b5   : > { %5873 = vmatpush.bf16.msra.mxu1 %v6732_v1  ;;  %v6771_v31 = vld [vmem:[%s9544_s30 + $0x100] sm:$0xf]  ;;  %v6844_v32 = vor.u32 %v8265_v23, %v6843_v22  ;;  %v8247_v33 = vld [vmem:[%s9544_s30 + $0x104] sm:$0xf0]  ;;  %v6955_v36 = vld [vmem:[%s9544_s30 + $0x270] sm:$0xf]  ;;  %v6708_v43 = vor.u32 %v8231_v30, %v6707_v29 }
 0x1b6   : > { %5886 = vmatpush.bf16.msra.mxu2 %v6796_v2  ;;  %v6835_v34 = vld [vmem:[%s9544_s30 + $0x180] sm:$0xf]  ;;  %v8263_v35 = vld [vmem:[%s9544_s30 + $0x184] sm:$0xf0]  ;;  %v8293_v37 = vld [vmem:[%s9544_s30 + $0x274] sm:$0xf0]  ;;  %v6772_v44 = vor.u32 %v8247_v33, %v6771_v31 }
 0x1b7   : > { %5899 = vmatpush.bf16.msra.mxu3 %v6860_v6  ;;  %v7019_v38 = vld [vmem:[%s9544_s30 + $0x2f0] sm:$0xf]  ;;  %v8309_v40 = vld [vmem:[%s9544_s30 + $0x2f4] sm:$0xf0]  ;;  %v6836_v47 = vor.u32 %v8263_v35, %v6835_v34  ;;  %v6956_v48 = vor.u32 %v8293_v37, %v6955_v36  ;;  %v6947_v51 = vld [vmem:[%s9544_s30 + $0x260] sm:$0xf] }
 0x1b8   : > { %5861 = vmatpush.bf16.msra.mxu0 %v6660_v12  ;;  %v7083_v41 = vld [vmem:[%s9544_s30 + $0x370] sm:$0xf]  ;;  %v8325_v42 = vld [vmem:[%s9544_s30 + $0x374] sm:$0xf0]  ;;  %v7020_v49 = vor.u32 %v8309_v40, %v7019_v38  ;;  %v8291_v52 = vld [vmem:[%s9544_s30 + $0x264] sm:$0xf0] }
 0x1b9   : > { %5874 = vmatpush.bf16.msra.mxu1 %v6724_v13  ;;  %v7147_v45 = vld [vmem:[%s9544_s30 + $0x3f0] sm:$0xf]  ;;  %v8341_v46 = vld [vmem:[%s9544_s30 + $0x3f4] sm:$0xf0]  ;;  %v7084_v50 = vor.u32 %v8325_v42, %v7083_v41  ;;  %v7011_v53 = vld [vmem:[%s9544_s30 + $0x2e0] sm:$0xf]  ;;  %v6948_v60 = vor.u32 %v8291_v52, %v6947_v51 }
 0x1ba   : > { %5887 = vmatpush.bf16.msra.mxu2 %v6788_v14  ;;  %v7148_v54 = vor.u32 %v8341_v46, %v7147_v45  ;;  %v8307_v55 = vld [vmem:[%s9544_s30 + $0x2e4] sm:$0xf0]  ;;  %v7075_v56 = vld [vmem:[%s9544_s30 + $0x360] sm:$0xf]  ;;  %v6939_v61 = vld [vmem:[%s9544_s30 + $0x250] sm:$0xf] }
 0x1bb   : > { %5900 = vmatpush.bf16.msra.mxu3 %v6852_v18  ;;  %v8323_v57 = vld [vmem:[%s9544_s30 + $0x364] sm:$0xf0]  ;;  %v7139_v58 = vld [vmem:[%s9544_s30 + $0x3e0] sm:$0xf]  ;;  %v8289_v62 = vld [vmem:[%s9544_s30 + $0x254] sm:$0xf0]  ;;  %v7012_v63 = vor.u32 %v8307_v55, %v7011_v53 }
 0x1bc   : > { %5862 = vmatpush.bf16.msra.mxu0 %v6652_v24  ;;  %v8339_v59 = vld [vmem:[%s9544_s30 + $0x3e4] sm:$0xf0]  ;;  %v7076_v0 = vor.u32 %v8323_v57, %v7075_v56  ;;  %v7003_v1 = vld [vmem:[%s9544_s30 + $0x2d0] sm:$0xf]  ;;  %v8305_v2 = vld [vmem:[%s9544_s30 + $0x2d4] sm:$0xf0]  ;;  %v6940_v9 = vor.u32 %v8289_v62, %v6939_v61 }
 0x1bd   : > { %5875 = vmatpush.bf16.msra.mxu1 %v6716_v27  ;;  %v3434_v3 = vld [vmem:[%s10498_s0] sm:$0xff]  ;;  %v7140_v4 = vor.u32 %v8339_v59, %v7139_v58  ;;  %v7067_v5 = vld [vmem:[%s9544_s30 + $0x350] sm:$0xf]  ;;  %v7004_v10 = vor.u32 %v8305_v2, %v7003_v1  ;;  %v6931_v12 = vld [vmem:[%s9544_s30 + $0x240] sm:$0xf]  ;;  %s10510_s10 = smov (!%p9944_p9, %s6639_s10), 7 }
 0x1be   : > { %5888 = vmatpush.bf16.msra.mxu2 %v6780_v28  ;;  %v8321_v6 = vld [vmem:[%s9544_s30 + $0x354] sm:$0xf0]  ;;  %3837 = vst [vmem:[#allocation1] ss:$9 sm:$0xff] %v3434_v3  ;;  %v7131_v7 = vld [vmem:[%s9544_s30 + $0x3d0] sm:$0xf]  ;;  %s9986_s18 = scalar_lea.vmem %s10500_s2, %s10510_s10  ;;  %s3431_s24 = scalar_lea.vmem %s10501_s3, %s10510_s10 }
 0x1bf   : > { %5901 = vmatpush.bf16.msra.mxu3 %v6844_v32  ;;  %v8337_v8 = vld [vmem:[%s9544_s30 + $0x3d4] sm:$0xf0]  ;;  %v7068_v11 = vor.u32 %v8321_v6, %v7067_v5  ;;  %v8287_v13 = vld [vmem:[%s9544_s30 + $0x244] sm:$0xf0]  ;;  %v6995_v14 = vld [vmem:[%s9544_s30 + $0x2c0] sm:$0xf] }
 0x1c0   : > { %5863 = vmatpush.bf16.msra.mxu0 %v6644_v39  ;;  %v7132_v15 = vor.u32 %v8337_v8, %v7131_v7  ;;  %v8303_v16 = vld [vmem:[%s9544_s30 + $0x2c4] sm:$0xf0]  ;;  %v7059_v17 = vld [vmem:[%s9544_s30 + $0x340] sm:$0xf]  ;;  %v6923_v21 = vld [vmem:[%s9544_s30 + $0x230] sm:$0xf]  ;;  %v6932_v22 = vor.u32 %v8287_v13, %v6931_v12 }
 0x1c1   : > { %5876 = vmatpush.bf16.msra.mxu1 %v6708_v43  ;;  %v8319_v18 = vld [vmem:[%s9544_s30 + $0x344] sm:$0xf0]  ;;  %v7123_v19 = vld [vmem:[%s9544_s30 + $0x3c0] sm:$0xf]  ;;  %v8285_v23 = vld [vmem:[%s9544_s30 + $0x234] sm:$0xf0]  ;;  %v6996_v26 = vor.u32 %v8303_v16, %v6995_v14 }
 0x1c2   : > { %5889 = vmatpush.bf16.msra.mxu2 %v6772_v44  ;;  %v8335_v20 = vld [vmem:[%s9544_s30 + $0x3c4] sm:$0xf0]  ;;  %v6987_v24 = vld [vmem:[%s9544_s30 + $0x2b0] sm:$0xf]  ;;  %v8301_v25 = vld [vmem:[%s9544_s30 + $0x2b4] sm:$0xf0]  ;;  %v7060_v27 = vor.u32 %v8319_v18, %v7059_v17  ;;  %v6924_v37 = vor.u32 %v8285_v23, %v6923_v21 }
 0x1c3   : > { %5902 = vmatpush.bf16.msra.mxu3 %v6836_v47  ;;  %v7124_v31 = vor.u32 %v8335_v20, %v7123_v19  ;;  %v7051_v32 = vld [vmem:[%s9544_s30 + $0x330] sm:$0xf]  ;;  %v8317_v33 = vld [vmem:[%s9544_s30 + $0x334] sm:$0xf0]  ;;  %v6915_v38 = vld [vmem:[%s9544_s30 + $0x220] sm:$0xf]  ;;  %v6988_v39 = vor.u32 %v8301_v25, %v6987_v24 }
 0x1c4   : > { %5908 = vmatpush.bf16.msrb.mxu0 %v6956_v48  ;;  %v7115_v35 = vld [vmem:[%s9544_s30 + $0x3b0] sm:$0xf]  ;;  %v8333_v36 = vld [vmem:[%s9544_s30 + $0x3b4] sm:$0xf0]  ;;  %v7052_v40 = vor.u32 %v8317_v33, %v7051_v32  ;;  %v8283_v41 = vld [vmem:[%s9544_s30 + $0x224] sm:$0xf0] }
 0x1c5   : > { %5921 = vmatpush.bf16.msrb.mxu1 %v7020_v49  ;;  %v9649_v28 = vld [vmem:[#allocation1 + $0x12] sm:$0xff]  ;;  %v9651_v29 = vld [vmem:[#allocation1] sm:$0xff]  ;;  %v9658_v34 = vld [vmem:[#allocation1 + $0x9] sm:$0xff]  ;;  %v7116_v44 = vor.u32 %v8333_v36, %v7115_v35  ;;  %v6916_v51 = vor.u32 %v8283_v41, %v6915_v38  ;;  %vm5853_vm0 = vcmask 523264   ;;  %vm6511_vm1 = vcmask 1040384  }
 0x1c6   : > { %5934 = vmatpush.bf16.msrb.mxu2 %v7084_v50  ;;  %v9653_v30 = vld [vmem:[#allocation1 + $0x1b] sm:$0xff]  ;;  %5864 = vmatmul.bf16.vlgmr.msra.gmra.mxu0 %v9651_v29  ;;  %v6979_v42 = vld [vmem:[%s9544_s30 + $0x2a0] sm:$0xf]  ;;  %v8299_v43 = vld [vmem:[%s9544_s30 + $0x2a4] sm:$0xf0] }
 0x1c7   : > { %5947 = vmatpush.bf16.msrb.mxu3 %v7148_v54  ;;  %5890 = vmatmul.bf16.vlgmr.msra.gmra.mxu2 %v9649_v28  ;;  %v7043_v45 = vld [vmem:[%s9544_s30 + $0x320] sm:$0xf]  ;;  %v8315_v46 = vld [vmem:[%s9544_s30 + $0x324] sm:$0xf0]  ;;  %v6907_v49 = vld [vmem:[%s9544_s30 + $0x210] sm:$0xf]  ;;  %v6980_v55 = vor.u32 %v8299_v43, %v6979_v42 }
 0x1c8   : > { %5909 = vmatpush.bf16.msrb.mxu0 %v6948_v60  ;;  %5903 = vmatmul.bf16.vlgmr.msra.gmra.mxu3 %v9653_v30  ;;  %v7107_v47 = vld [vmem:[%s9544_s30 + $0x3a0] sm:$0xf]  ;;  %v8331_v48 = vld [vmem:[%s9544_s30 + $0x3a4] sm:$0xf0]  ;;  %v8281_v50 = vld [vmem:[%s9544_s30 + $0x214] sm:$0xf0]  ;;  %v7044_v56 = vor.u32 %v8315_v46, %v7043_v45 }
 0x1c9   : > { %5922 = vmatpush.bf16.msrb.mxu1 %v7012_v63  ;;  %v6971_v52 = vld [vmem:[%s9544_s30 + $0x290] sm:$0xf]  ;;  %v8297_v53 = vld [vmem:[%s9544_s30 + $0x294] sm:$0xf0]  ;;  %v9681_v59 = vld [vmem:[#allocation1 + $0x24] sm:$0xff]  ;;  %v7108_v60 = vor.u32 %v8331_v48, %v7107_v47  ;;  %v6908_v2 = vor.u32 %v8281_v50, %v6907_v49 }
 0x1ca   : > { %5935 = vmatpush.bf16.msrb.mxu2 %v7076_v0  ;;  %5877 = vmatmul.bf16.vlgmr.msra.gmra.mxu1 %v9658_v34  ;;  %v7035_v54 = vld [vmem:[%s9544_s30 + $0x310] sm:$0xf]  ;;  %v8313_v57 = vld [vmem:[%s9544_s30 + $0x314] sm:$0xf0]  ;;  %v3435_v62 = vld [vmem:[%s10498_s0 + $0x8] sm:$0xff]  ;;  %v6972_v5 = vor.u32 %v8297_v53, %v6971_v52 }
 0x1cb   : > { %5948 = vmatpush.bf16.msrb.mxu3 %v7140_v4  ;;  %v9679_v58 = vld [vmem:[#allocation1 + $0x36] sm:$0xff]  ;;  %v9683_v61 = vld [vmem:[#allocation1 + $0x3f] sm:$0xff]  ;;  %v9688_v63 = vld [vmem:[#allocation1 + $0x2d] sm:$0xff]  ;;  %v7036_v6 = vor.u32 %v8313_v57, %v7035_v54 }
 0x1cc   : > { %5910 = vmatpush.bf16.msrb.mxu0 %v6940_v9  ;;  %v7099_v0 = vld [vmem:[%s9544_s30 + $0x390] sm:$0xf]  ;;  %v8329_v1 = vld [vmem:[%s9544_s30 + $0x394] sm:$0xf0]  ;;  %3847 = vst [vmem:[#allocation1] ss:$9 sm:$0xff] %v3435_v62 }
 0x1cd   : > { %5923 = vmatpush.bf16.msrb.mxu1 %v7004_v10  ;;  %v6899_v3 = vld [vmem:[%s9544_s30 + $0x200] sm:$0xf]  ;;  %v8279_v4 = vld [vmem:[%s9544_s30 + $0x204] sm:$0xf0]  ;;  %v7100_v10 = vor.u32 %v8329_v1, %v7099_v0  ;;  %v7211_v14 = vld [vmem:[%s9544_s30 + $0x470] sm:$0xf] }
 0x1ce   : > { %5936 = vmatpush.bf16.msrb.mxu2 %v7068_v11  ;;  %v6963_v7 = vld [vmem:[%s9544_s30 + $0x280] sm:$0xf]  ;;  %v8295_v8 = vld [vmem:[%s9544_s30 + $0x284] sm:$0xf0]  ;;  %v7275_v16 = vld [vmem:[%s9544_s30 + $0x4f0] sm:$0xf]  ;;  %v6900_v17 = vor.u32 %v8279_v4, %v6899_v3 }
 0x1cf   : > { %5949 = vmatpush.bf16.msrb.mxu3 %v7132_v15  ;;  %v7027_v9 = vld [vmem:[%s9544_s30 + $0x300] sm:$0xf]  ;;  %v8311_v11 = vld [vmem:[%s9544_s30 + $0x304] sm:$0xf0]  ;;  %v8357_v15 = vld [vmem:[%s9544_s30 + $0x474] sm:$0xf0]  ;;  %v6964_v21 = vor.u32 %v8295_v8, %v6963_v7 }
 0x1d0   : > { %5911 = vmatpush.bf16.msrb.mxu0 %v6932_v22  ;;  %v7091_v12 = vld [vmem:[%s9544_s30 + $0x380] sm:$0xf]  ;;  %v8327_v13 = vld [vmem:[%s9544_s30 + $0x384] sm:$0xf0]  ;;  %v8373_v18 = vld [vmem:[%s9544_s30 + $0x4f4] sm:$0xf0]  ;;  %v7028_v22 = vor.u32 %v8311_v11, %v7027_v9 }
 0x1d1   : > { %5924 = vmatpush.bf16.msrb.mxu1 %v6996_v26  ;;  %v7339_v19 = vld [vmem:[%s9544_s30 + $0x570] sm:$0xf]  ;;  %v8389_v20 = vld [vmem:[%s9544_s30 + $0x574] sm:$0xf0]  ;;  %v7092_v25 = vor.u32 %v8327_v13, %v7091_v12  ;;  %v7212_v26 = vor.u32 %v8357_v15, %v7211_v14  ;;  %v7203_v32 = vld [vmem:[%s9544_s30 + $0x460] sm:$0xf] }
 0x1d2   : > { %5937 = vmatpush.bf16.msrb.mxu2 %v7060_v27  ;;  %v7403_v23 = vld [vmem:[%s9544_s30 + $0x5f0] sm:$0xf]  ;;  %v8405_v24 = vld [vmem:[%s9544_s30 + $0x5f4] sm:$0xf0]  ;;  %v7276_v27 = vor.u32 %v8373_v18, %v7275_v16  ;;  %v8355_v33 = vld [vmem:[%s9544_s30 + $0x464] sm:$0xf0] }
 0x1d3   : > { %5950 = vmatpush.bf16.msrb.mxu3 %v7124_v31  ;;  %v7340_v31 = vor.u32 %v8389_v20, %v7339_v19  ;;  %v7267_v35 = vld [vmem:[%s9544_s30 + $0x4e0] sm:$0xf]  ;;  %v7404_v36 = vor.u32 %v8405_v24, %v7403_v23  ;;  %v8403_v41 = vld [vmem:[%s9544_s30 + $0x5e4] sm:$0xf0]  ;;  %v7204_v42 = vor.u32 %v8355_v33, %v7203_v32  ;;  %v7195_v45 = vld [vmem:[%s9544_s30 + $0x450] sm:$0xf] }
 0x1d4   : > { %5912 = vmatpush.bf16.msrb.mxu0 %v6924_v37  ;;  %v8371_v37 = vld [vmem:[%s9544_s30 + $0x4e4] sm:$0xf0]  ;;  %v7331_v38 = vld [vmem:[%s9544_s30 + $0x560] sm:$0xf]  ;;  %v8353_v46 = vld [vmem:[%s9544_s30 + $0x454] sm:$0xf0] }
 0x1d5   : > { %5925 = vmatpush.bf16.msrb.mxu1 %v6988_v39  ;;  %v8387_v39 = vld [vmem:[%s9544_s30 + $0x564] sm:$0xf0]  ;;  %v7268_v43 = vor.u32 %v8371_v37, %v7267_v35  ;;  %v7259_v47 = vld [vmem:[%s9544_s30 + $0x4d0] sm:$0xf]  ;;  %v8369_v49 = vld [vmem:[%s9544_s30 + $0x4d4] sm:$0xf0]  ;;  %v7196_v54 = vor.u32 %v8353_v46, %v7195_v45 }
 0x1d6   : > { %5938 = vmatpush.bf16.msrb.mxu2 %v7052_v40  ;;  %v7395_v40 = vld [vmem:[%s9544_s30 + $0x5e0] sm:$0xf]  ;;  %v7323_v50 = vld [vmem:[%s9544_s30 + $0x550] sm:$0xf]  ;;  %v8401_v53 = vld [vmem:[%s9544_s30 + $0x5d4] sm:$0xf0] }
 0x1d7   : > { %5951 = vmatpush.bf16.msrb.mxu3 %v7116_v44  ;;  %v7332_v44 = vor.u32 %v8387_v39, %v7331_v38  ;;  %v7396_v48 = vor.u32 %v8403_v41, %v7395_v40  ;;  %v7387_v52 = vld [vmem:[%s9544_s30 + $0x5d0] sm:$0xf]  ;;  %v7187_v57 = vld [vmem:[%s9544_s30 + $0x440] sm:$0xf]  ;;  %v8367_v1 = vld [vmem:[%s9544_s30 + $0x4c4] sm:$0xf0] }
 0x1d8   : > { %5913 = vmatpush.bf16.msrb.mxu0 %v6916_v51  ;;  %v8385_v51 = vld [vmem:[%s9544_s30 + $0x554] sm:$0xf0]  ;;  %v7251_v62 = vld [vmem:[%s9544_s30 + $0x4c0] sm:$0xf]  ;;  %v7388_v0 = vor.u32 %v8401_v53, %v7387_v52  ;;  %v8383_v3 = vld [vmem:[%s9544_s30 + $0x544] sm:$0xf0] }
 0x1d9   : > { %5926 = vmatpush.bf16.msrb.mxu1 %v6980_v55  ;;  %v7260_v55 = vor.u32 %v8369_v49, %v7259_v47  ;;  %v7379_v4 = vld [vmem:[%s9544_s30 + $0x5c0] sm:$0xf]  ;;  %v7252_v7 = vor.u32 %v8367_v1, %v7251_v62  ;;  %v7179_v9 = vld [vmem:[%s9544_s30 + $0x430] sm:$0xf]  ;;  %v8365_v13 = vld [vmem:[%s9544_s30 + $0x4b4] sm:$0xf0] }
 0x1da   : > { %5939 = vmatpush.bf16.msrb.mxu2 %v7044_v56  ;;  %v7324_v56 = vor.u32 %v8385_v51, %v7323_v50  ;;  %v7243_v11 = vld [vmem:[%s9544_s30 + $0x4b0] sm:$0xf]  ;;  %v8381_v15 = vld [vmem:[%s9544_s30 + $0x534] sm:$0xf0]  ;;  %v7235_v23 = vld [vmem:[%s9544_s30 + $0x4a0] sm:$0xf] }
 0x1db   : > { %5952 = vmatpush.bf16.msrb.mxu3 %v7108_v60  ;;  %v8351_v60 = vld [vmem:[%s9544_s30 + $0x444] sm:$0xf0]  ;;  %v7307_v14 = vld [vmem:[%s9544_s30 + $0x530] sm:$0xf]  ;;  %v7244_v19 = vor.u32 %v8365_v13, %v7243_v11  ;;  %v8345_v38 = vld [vmem:[%s9544_s30 + $0x414] sm:$0xf0] }
 0x1dc   : > { %5914 = vmatpush.bf16.msrb.mxu0 %v6908_v2  ;;  %v7315_v2 = vld [vmem:[%s9544_s30 + $0x540] sm:$0xf]  ;;  %v7371_v16 = vld [vmem:[%s9544_s30 + $0x5b0] sm:$0xf]  ;;  %v7308_v20 = vor.u32 %v8381_v15, %v7307_v14  ;;  %v8395_v32 = vld [vmem:[%s9544_s30 + $0x5a4] sm:$0xf0] }
 0x1dd   : > { %5927 = vmatpush.bf16.msrb.mxu1 %v6972_v5  ;;  %v8399_v5 = vld [vmem:[%s9544_s30 + $0x5c4] sm:$0xf0]  ;;  %v7316_v8 = vor.u32 %v8383_v3, %v7315_v2  ;;  %v7163_v37 = vld [vmem:[%s9544_s30 + $0x410] sm:$0xf]  ;;  %v8361_v41 = vld [vmem:[%s9544_s30 + $0x494] sm:$0xf0] }
 0x1de   : > { %5940 = vmatpush.bf16.msrb.mxu2 %v7036_v6  ;;  %v7188_v6 = vor.u32 %v8351_v60, %v7187_v57  ;;  %v7380_v12 = vor.u32 %v8399_v5, %v7379_v4  ;;  %v7227_v39 = vld [vmem:[%s9544_s30 + $0x490] sm:$0xf]  ;;  %v8393_v45 = vld [vmem:[%s9544_s30 + $0x594] sm:$0xf0]  ;;  %v7164_v46 = vor.u32 %v8345_v38, %v7163_v37  ;;  %v7155_v47 = vld [vmem:[%s9544_s30 + $0x400] sm:$0xf] }
 0x1df   : > { %5953 = vmatpush.bf16.msrb.mxu3 %v7100_v10  ;;  %v8349_v10 = vld [vmem:[%s9544_s30 + $0x434] sm:$0xf0]  ;;  %v7228_v49 = vor.u32 %v8361_v41, %v7227_v39  ;;  %v7219_v51 = vld [vmem:[%s9544_s30 + $0x480] sm:$0xf]  ;;  %v8359_v52 = vld [vmem:[%s9544_s30 + $0x484] sm:$0xf0] }
 0x1e0   : > { %5915 = vmatpush.bf16.msrb.mxu0 %v6900_v17  ;;  %v8397_v17 = vld [vmem:[%s9544_s30 + $0x5b4] sm:$0xf0]  ;;  %v7180_v18 = vor.u32 %v8349_v10, %v7179_v9  ;;  %v7283_v53 = vld [vmem:[%s9544_s30 + $0x500] sm:$0xf]  ;;  %v8391_v57 = vld [vmem:[%s9544_s30 + $0x584] sm:$0xf0]  ;;  %v7220_v5 = vor.u32 %v8359_v52, %v7219_v51 }
 0x1e1   : > { %5928 = vmatpush.bf16.msrb.mxu1 %v6964_v21  ;;  %v7171_v21 = vld [vmem:[%s9544_s30 + $0x420] sm:$0xf]  ;;  %v7372_v24 = vor.u32 %v8397_v17, %v7371_v16  ;;  %v7467_v60 = vld [vmem:[%s9544_s30 + $0x670] sm:$0xf]  ;;  %v8421_v62 = vld [vmem:[%s9544_s30 + $0x674] sm:$0xf0] }
 0x1e2   : > { %5941 = vmatpush.bf16.msrb.mxu2 %v7028_v22  ;;  %v8347_v22 = vld [vmem:[%s9544_s30 + $0x424] sm:$0xf0]  ;;  %v8437_v2 = vld [vmem:[%s9544_s30 + $0x6f4] sm:$0xf0]  ;;  %v7595_v3 = vld [vmem:[%s9544_s30 + $0x770] sm:$0xf]  ;;  %v7468_v10 = vor.u32 %v8421_v62, %v7467_v60 }
 0x1e3   : > { %5954 = vmatpush.bf16.msrb.mxu3 %v7092_v25  ;;  %5916 = vmatmul.bf16.vlgmr.msrb.gmra.mxu0 %v9681_v59  ;;  %v8363_v25 = vld [vmem:[%s9544_s30 + $0x4a4] sm:$0xf0]  ;;  %v7172_v33 = vor.u32 %v8347_v22, %v7171_v21  ;;  %v8453_v4 = vld [vmem:[%s9544_s30 + $0x774] sm:$0xf0]  ;;  %v7459_v13 = vld [vmem:[%s9544_s30 + $0x660] sm:$0xf] }
 0x1e4   : > { %5960 = vmatpush.bf16.msra.mxu0 %v7212_v26  ;;  %5929 = vmatmul.bf16.vlgmr.msrb.gmra.mxu1 %v9688_v63  ;;  %v7299_v26 = vld [vmem:[%s9544_s30 + $0x520] sm:$0xf]  ;;  %v7236_v35 = vor.u32 %v8363_v25, %v7235_v23  ;;  %v8419_v14 = vld [vmem:[%s9544_s30 + $0x664] sm:$0xf0]  ;;  %v9790_v25 = vld [vmem:[#allocation1 + $0x1b] sm:$0xff] }
 0x1e5   : > { %5973 = vmatpush.bf16.msra.mxu1 %v7276_v27  ;;  %5942 = vmatmul.bf16.vlgmr.msrb.gmra.mxu2 %v9679_v58  ;;  %v8379_v27 = vld [vmem:[%s9544_s30 + $0x524] sm:$0xf0]  ;;  %v7523_v15 = vld [vmem:[%s9544_s30 + $0x6e0] sm:$0xf]  ;;  %v8433_v37 = vld [vmem:[%s9544_s30 + $0x6d4] sm:$0xf0] }
 0x1e6   : > { %5986 = vmatpush.bf16.msra.mxu2 %v7340_v31  ;;  %5955 = vmatmul.bf16.vlgmr.msrb.gmra.mxu3 %v9683_v61  ;;  %v7363_v31 = vld [vmem:[%s9544_s30 + $0x5a0] sm:$0xf]  ;;  %v8435_v17 = vld [vmem:[%s9544_s30 + $0x6e4] sm:$0xf0]  ;;  %v7579_v38 = vld [vmem:[%s9544_s30 + $0x750] sm:$0xf] }
 0x1e7   : > { %5999 = vmatpush.bf16.msra.mxu3 %v7404_v36  ;;  %v7300_v36 = vor.u32 %v8379_v27, %v7299_v26  ;;  %v7364_v40 = vor.u32 %v8395_v32, %v7363_v31  ;;  %v7651_v21 = vld [vmem:[%s9544_s30 + $0x7e0] sm:$0xf]  ;;  %v8467_v22 = vld [vmem:[%s9544_s30 + $0x7e4] sm:$0xf0]  ;;  %v7460_v26 = vor.u32 %v8419_v14, %v7459_v13  ;;  %v7524_v27 = vor.u32 %v8435_v17, %v7523_v15  ;;  %v7451_v32 = vld [vmem:[%s9544_s30 + $0x650] sm:$0xf] }
 0x1e8   : > { %5961 = vmatpush.bf16.msra.mxu0 %v7204_v42  ;;  %v7291_v42 = vld [vmem:[%s9544_s30 + $0x510] sm:$0xf]  ;;  %v8449_v39 = vld [vmem:[%s9544_s30 + $0x754] sm:$0xf0]  ;;  %v8447_v51 = vld [vmem:[%s9544_s30 + $0x744] sm:$0xf0] }
 0x1e9   : > { %5974 = vmatpush.bf16.msra.mxu1 %v7268_v43  ;;  %v8377_v43 = vld [vmem:[%s9544_s30 + $0x514] sm:$0xf0]  ;;  %v9786_v23 = vld [vmem:[#allocation1 + $0x12] sm:$0xff]  ;;  %v7635_v52 = vld [vmem:[%s9544_s30 + $0x7c0] sm:$0xf] }
 0x1ea   : > { %5987 = vmatpush.bf16.msra.mxu2 %v7332_v44  ;;  %v7355_v44 = vld [vmem:[%s9544_s30 + $0x590] sm:$0xf]  ;;  %v7292_v50 = vor.u32 %v8377_v43, %v7291_v42  ;;  %v8465_v41 = vld [vmem:[%s9544_s30 + $0x7d4] sm:$0xf0]  ;;  %v8427_v13 = vld [vmem:[%s9544_s30 + $0x6a4] sm:$0xf0] }
 0x1eb   : > { %6000 = vmatpush.bf16.msra.mxu3 %v7396_v48  ;;  %v8343_v48 = vld [vmem:[%s9544_s30 + $0x404] sm:$0xf0]  ;;  %v8413_v60 = vld [vmem:[%s9544_s30 + $0x634] sm:$0xf0]  ;;  %v7499_v62 = vld [vmem:[%s9544_s30 + $0x6b0] sm:$0xf] }
 0x1ec   : > { %5962 = vmatpush.bf16.msra.mxu0 %v7196_v54  ;;  %v7356_v54 = vor.u32 %v8393_v45, %v7355_v44  ;;  %v7156_v1 = vor.u32 %v8343_v48, %v7155_v47  ;;  %v7580_v44 = vor.u32 %v8449_v39, %v7579_v38  ;;  %v7443_v45 = vld [vmem:[%s9544_s30 + $0x640] sm:$0xf]  ;;  %v8443_v15 = vld [vmem:[%s9544_s30 + $0x724] sm:$0xf0] }
 0x1ed   : > { %5975 = vmatpush.bf16.msra.mxu1 %v7260_v55  ;;  %v8375_v55 = vld [vmem:[%s9544_s30 + $0x504] sm:$0xf0]  ;;  %v7507_v47 = vld [vmem:[%s9544_s30 + $0x6c0] sm:$0xf] }
 0x1ee   : > { %5988 = vmatpush.bf16.msra.mxu2 %v7324_v56  ;;  %v7347_v56 = vld [vmem:[%s9544_s30 + $0x580] sm:$0xf]  ;;  %v8459_v17 = vld [vmem:[%s9544_s30 + $0x7a4] sm:$0xf0] }
 0x1ef   : > { %6001 = vmatpush.bf16.msra.mxu3 %v7388_v0  ;;  %v7531_v0 = vld [vmem:[%s9544_s30 + $0x6f0] sm:$0xf]  ;;  %v7348_v9 = vor.u32 %v8391_v57, %v7347_v56  ;;  %v7555_v14 = vld [vmem:[%s9544_s30 + $0x720] sm:$0xf]  ;;  %v8407_v39 = vld [vmem:[%s9544_s30 + $0x604] sm:$0xf0] }
 0x1f0   : > { %5963 = vmatpush.bf16.msra.mxu0 %v7188_v6  ;;  %v7284_v6 = vor.u32 %v8375_v55, %v7283_v53  ;;  %v7532_v11 = vor.u32 %v8437_v2, %v7531_v0  ;;  %v8463_v53 = vld [vmem:[%s9544_s30 + $0x7c4] sm:$0xf0]  ;;  %v7435_v57 = vld [vmem:[%s9544_s30 + $0x630] sm:$0xf]  ;;  %v7411_v38 = vld [vmem:[%s9544_s30 + $0x600] sm:$0xf] }
 0x1f1   : > { %5976 = vmatpush.bf16.msra.mxu1 %v7252_v7  ;;  %v7659_v7 = vld [vmem:[%s9544_s30 + $0x7f0] sm:$0xf]  ;;  %v7636_v0 = vor.u32 %v8463_v53, %v7635_v52  ;;  %v8501_v53 = vld [vmem:[%s9544_s30 + $0x8f4] sm:$0xf0] }
 0x1f2   : > { %5989 = vmatpush.bf16.msra.mxu2 %v7316_v8  ;;  %v8469_v8 = vld [vmem:[%s9544_s30 + $0x7f4] sm:$0xf0]  ;;  %v7563_v2 = vld [vmem:[%s9544_s30 + $0x730] sm:$0xf] }
 0x1f3   : > { %6002 = vmatpush.bf16.msra.mxu3 %v7380_v12  ;;  %v7596_v12 = vor.u32 %v8453_v4, %v7595_v3  ;;  %v7660_v16 = vor.u32 %v8469_v8, %v7659_v7  ;;  %v8445_v3 = vld [vmem:[%s9544_s30 + $0x734] sm:$0xf0]  ;;  %v7627_v4 = vld [vmem:[%s9544_s30 + $0x7b0] sm:$0xf] }
 0x1f4   : > { %5964 = vmatpush.bf16.msra.mxu0 %v7180_v18  ;;  %v7587_v18 = vld [vmem:[%s9544_s30 + $0x760] sm:$0xf]  ;;  %v7564_v8 = vor.u32 %v8445_v3, %v7563_v2  ;;  %v7787_v52 = vld [vmem:[%s9544_s30 + $0x8f0] sm:$0xf] }
 0x1f5   : > { %5977 = vmatpush.bf16.msra.mxu1 %v7244_v19  ;;  %v8451_v19 = vld [vmem:[%s9544_s30 + $0x764] sm:$0xf0] }
 0x1f6   : > { %5990 = vmatpush.bf16.msra.mxu2 %v7308_v20  ;;  %v9782_v20 = vld [vmem:[#allocation1] sm:$0xff]  ;;  %v7588_v31 = vor.u32 %v8451_v19, %v7587_v18  ;;  %v7419_v19 = vld [vmem:[%s9544_s30 + $0x610] sm:$0xf] }
 0x1f7   : > { %6003 = vmatpush.bf16.msra.mxu3 %v7372_v24  ;;  %v9788_v24 = vld [vmem:[#allocation1 + $0x9] sm:$0xff] }
 0x1f8   : > { %5965 = vmatpush.bf16.msra.mxu0 %v7172_v33  ;;  %v8417_v33 = vld [vmem:[%s9544_s30 + $0x654] sm:$0xf0] }
 0x1f9   : > { %5978 = vmatpush.bf16.msra.mxu1 %v7236_v35  ;;  %v7515_v35 = vld [vmem:[%s9544_s30 + $0x6d0] sm:$0xf]  ;;  %v7452_v42 = vor.u32 %v8417_v33, %v7451_v32 }
 0x1fa   : > { %5991 = vmatpush.bf16.msra.mxu2 %v7300_v36  ;;  %v7652_v36 = vor.u32 %v8467_v22, %v7651_v21  ;;  %v7516_v43 = vor.u32 %v8433_v37, %v7515_v35  ;;  %v7556_v22 = vor.u32 %v8443_v15, %v7555_v14  ;;  %v7547_v33 = vld [vmem:[%s9544_s30 + $0x710] sm:$0xf]  ;;  %v8441_v35 = vld [vmem:[%s9544_s30 + $0x714] sm:$0xf0]  ;;  %v8499_v14 = vld [vmem:[%s9544_s30 + $0x8e4] sm:$0xf0] }
 0x1fb   : > { %6004 = vmatpush.bf16.msra.mxu3 %v7364_v40  ;;  %v7643_v40 = vld [vmem:[%s9544_s30 + $0x7d0] sm:$0xf]  ;;  %v8457_v37 = vld [vmem:[%s9544_s30 + $0x794] sm:$0xf0]  ;;  %v7843_v15 = vld [vmem:[%s9544_s30 + $0x960] sm:$0xf] }
 0x1fc   : > { %5966 = vmatpush.bf16.msra.mxu0 %v7164_v46  ;;  %v8415_v46 = vld [vmem:[%s9544_s30 + $0x644] sm:$0xf0]  ;;  %v7644_v48 = vor.u32 %v8465_v41, %v7643_v40  ;;  %v7475_v41 = vld [vmem:[%s9544_s30 + $0x680] sm:$0xf] }
 0x1fd   : > { %5979 = vmatpush.bf16.msra.mxu1 %v7228_v49  ;;  %v8431_v49 = vld [vmem:[%s9544_s30 + $0x6c4] sm:$0xf0] }
 0x1fe   : > { %5992 = vmatpush.bf16.msra.mxu2 %v7292_v50  ;;  %v7571_v50 = vld [vmem:[%s9544_s30 + $0x740] sm:$0xf]  ;;  %v7508_v55 = vor.u32 %v8431_v49, %v7507_v47  ;;  %v7723_v49 = vld [vmem:[%s9544_s30 + $0x870] sm:$0xf] }
 0x1ff   : > { %6005 = vmatpush.bf16.msra.mxu3 %v7356_v54  ;;  %v7444_v54 = vor.u32 %v8415_v46, %v7443_v45  ;;  %v7572_v56 = vor.u32 %v8447_v51, %v7571_v50  ;;  %v7548_v46 = vor.u32 %v8441_v35, %v7547_v33  ;;  %v7603_v47 = vld [vmem:[%s9544_s30 + $0x780] sm:$0xf]  ;;  %v8485_v50 = vld [vmem:[%s9544_s30 + $0x874] sm:$0xf0]  ;;  %v7835_v35 = vld [vmem:[%s9544_s30 + $0x950] sm:$0xf] }
 0x200   : > { %5967 = vmatpush.bf16.msra.mxu0 %v7156_v1  ;;  %v8429_v1 = vld [vmem:[%s9544_s30 + $0x6b4] sm:$0xf0] }
 0x201   : > { %5980 = vmatpush.bf16.msra.mxu1 %v7220_v5  ;;  %v8461_v5 = vld [vmem:[%s9544_s30 + $0x7b4] sm:$0xf0]  ;;  %v7500_v7 = vor.u32 %v8429_v1, %v7499_v62  ;;  %v7412_v62 = vor.u32 %v8407_v39, %v7411_v38 }
 0x202   : > { %5993 = vmatpush.bf16.msra.mxu2 %v7284_v6  ;;  %v7436_v6 = vor.u32 %v8413_v60, %v7435_v57  ;;  %v9854_v57 = vld [vmem:[#allocation1 + $0x3f] sm:$0xff]  ;;  %v3436_v60 = vld [vmem:[%s10498_s0 + $0x10] sm:$0xff] }
 0x203   : > { %6006 = vmatpush.bf16.msra.mxu3 %v7348_v9  ;;  %5968 = vmatmul.bf16.vlgmr.msra.gmra.mxu0 %v9782_v20  ;;  %v7427_v9 = vld [vmem:[%s9544_s30 + $0x620] sm:$0xf]  ;;  %v8517_v1 = vld [vmem:[%s9544_s30 + $0x974] sm:$0xf0] }
 0x204   : > { %6012 = vmatpush.bf16.msrb.mxu0 %v7468_v10  ;;  %5981 = vmatmul.bf16.vlgmr.msra.gmra.mxu1 %v9788_v24  ;;  %v8411_v10 = vld [vmem:[%s9544_s30 + $0x624] sm:$0xf0]  ;;  %v8497_v33 = vld [vmem:[%s9544_s30 + $0x8d4] sm:$0xf0] }
 0x205   : > { %6025 = vmatpush.bf16.msrb.mxu1 %v7532_v11  ;;  %5994 = vmatmul.bf16.vlgmr.msra.gmra.mxu2 %v9786_v23  ;;  %v7491_v11 = vld [vmem:[%s9544_s30 + $0x6a0] sm:$0xf]  ;;  %v7428_v18 = vor.u32 %v8411_v10, %v7427_v9  ;;  %v8529_v38 = vld [vmem:[%s9544_s30 + $0x9d4] sm:$0xf0] }
 0x206   : > { %6038 = vmatpush.bf16.msrb.mxu2 %v7596_v12  ;;  %6007 = vmatmul.bf16.vlgmr.msra.gmra.mxu3 %v9790_v25  ;;  %v7628_v12 = vor.u32 %v8461_v5, %v7627_v4  ;;  %v7492_v21 = vor.u32 %v8427_v13, %v7491_v11  ;;  %v7915_v4 = vld [vmem:[%s9544_s30 + $0x9f0] sm:$0xf]  ;;  %v8533_v5 = vld [vmem:[%s9544_s30 + $0x9f4] sm:$0xf0]  ;;  %v7715_v10 = vld [vmem:[%s9544_s30 + $0x860] sm:$0xf] }
 0x207   : > { %6051 = vmatpush.bf16.msrb.mxu3 %v7660_v16  ;;  %v7619_v16 = vld [vmem:[%s9544_s30 + $0x7a0] sm:$0xf]  ;;  %v8483_v11 = vld [vmem:[%s9544_s30 + $0x864] sm:$0xf0]  ;;  %v7916_v13 = vor.u32 %v8533_v5, %v7915_v4  ;;  %v8509_v4 = vld [vmem:[%s9544_s30 + $0x934] sm:$0xf0] }
 0x208   : > { %6013 = vmatpush.bf16.msrb.mxu0 %v7460_v26  ;;  %v8409_v26 = vld [vmem:[%s9544_s30 + $0x614] sm:$0xf0]  ;;  %v7620_v32 = vor.u32 %v8459_v17, %v7619_v16  ;;  %v8515_v16 = vld [vmem:[%s9544_s30 + $0x964] sm:$0xf0]  ;;  %v7907_v17 = vld [vmem:[%s9544_s30 + $0x9e0] sm:$0xf] }
 0x209   : > { %6026 = vmatpush.bf16.msrb.mxu1 %v7524_v27  ;;  %v7483_v27 = vld [vmem:[%s9544_s30 + $0x690] sm:$0xf]  ;;  %v7420_v40 = vor.u32 %v8409_v26, %v7419_v19  ;;  %v7716_v19 = vor.u32 %v8483_v11, %v7715_v10  ;;  %v7683_v10 = vld [vmem:[%s9544_s30 + $0x820] sm:$0xf]  ;;  %v8475_v11 = vld [vmem:[%s9544_s30 + $0x824] sm:$0xf0] }
 0x20a   : > { %6039 = vmatpush.bf16.msrb.mxu2 %v7588_v31  ;;  %v8425_v31 = vld [vmem:[%s9544_s30 + $0x694] sm:$0xf0]  ;;  %v7707_v26 = vld [vmem:[%s9544_s30 + $0x850] sm:$0xf] }
 0x20b   : > { %6052 = vmatpush.bf16.msrb.mxu3 %v7652_v36  ;;  %v7611_v36 = vld [vmem:[%s9544_s30 + $0x790] sm:$0xf]  ;;  %v7484_v45 = vor.u32 %v8425_v31, %v7483_v27  ;;  %v8481_v27 = vld [vmem:[%s9544_s30 + $0x854] sm:$0xf0] }
 0x20c   : > { %6014 = vmatpush.bf16.msrb.mxu0 %v7452_v42  ;;  %v8423_v42 = vld [vmem:[%s9544_s30 + $0x684] sm:$0xf0]  ;;  %v7612_v51 = vor.u32 %v8457_v37, %v7611_v36  ;;  %v7771_v31 = vld [vmem:[%s9544_s30 + $0x8d0] sm:$0xf]  ;;  %v8513_v36 = vld [vmem:[%s9544_s30 + $0x954] sm:$0xf0]  ;;  %v7708_v39 = vor.u32 %v8481_v27, %v7707_v26 }
 0x20d   : > { %6027 = vmatpush.bf16.msrb.mxu1 %v7516_v43  ;;  %v7539_v43 = vld [vmem:[%s9544_s30 + $0x700] sm:$0xf]  ;;  %v7476_v2 = vor.u32 %v8423_v42, %v7475_v41  ;;  %v7899_v37 = vld [vmem:[%s9544_s30 + $0x9d0] sm:$0xf]  ;;  %v7836_v41 = vor.u32 %v8513_v36, %v7835_v35  ;;  %v8473_v27 = vld [vmem:[%s9544_s30 + $0x814] sm:$0xf0] }
 0x20e   : > { %6040 = vmatpush.bf16.msrb.mxu2 %v7580_v44  ;;  %v8439_v44 = vld [vmem:[%s9544_s30 + $0x704] sm:$0xf0]  ;;  %v7699_v42 = vld [vmem:[%s9544_s30 + $0x840] sm:$0xf]  ;;  %v7883_v5 = vld [vmem:[%s9544_s30 + $0x9b0] sm:$0xf] }
 0x20f   : > { %6053 = vmatpush.bf16.msrb.mxu3 %v7644_v48  ;;  %v8455_v48 = vld [vmem:[%s9544_s30 + $0x784] sm:$0xf0]  ;;  %v7540_v3 = vor.u32 %v8439_v44, %v7539_v43  ;;  %v7763_v44 = vld [vmem:[%s9544_s30 + $0x8c0] sm:$0xf]  ;;  %v7675_v26 = vld [vmem:[%s9544_s30 + $0x810] sm:$0xf] }
 0x210   : > { %6015 = vmatpush.bf16.msrb.mxu0 %v7444_v54  ;;  %v9848_v54 = vld [vmem:[#allocation1 + $0x24] sm:$0xff]  ;;  %v8479_v43 = vld [vmem:[%s9544_s30 + $0x844] sm:$0xf0]  ;;  %v7803_v35 = vld [vmem:[%s9544_s30 + $0x910] sm:$0xf] }
 0x211   : > { %6028 = vmatpush.bf16.msrb.mxu1 %v7508_v55  ;;  %v9850_v55 = vld [vmem:[#allocation1 + $0x36] sm:$0xff]  ;;  %v8505_v36 = vld [vmem:[%s9544_s30 + $0x914] sm:$0xf0] }
 0x212   : > { %6041 = vmatpush.bf16.msrb.mxu2 %v7572_v56  ;;  %v9852_v56 = vld [vmem:[#allocation1 + $0x2d] sm:$0xff] }
 0x213   : > { %6054 = vmatpush.bf16.msrb.mxu3 %v7636_v0  ;;  %v7851_v0 = vld [vmem:[%s9544_s30 + $0x970] sm:$0xf]  ;;  %3857 = vst [vmem:[#allocation1] ss:$9 sm:$0xff] %v3436_v60 }
 0x214   : > { %6016 = vmatpush.bf16.msrb.mxu0 %v7436_v6  ;;  %v7604_v6 = vor.u32 %v8455_v48, %v7603_v47  ;;  %v7852_v9 = vor.u32 %v8517_v1, %v7851_v0  ;;  %v7827_v47 = vld [vmem:[%s9544_s30 + $0x940] sm:$0xf]  ;;  %v8511_v48 = vld [vmem:[%s9544_s30 + $0x944] sm:$0xf0]  ;;  %v7691_v60 = vld [vmem:[%s9544_s30 + $0x830] sm:$0xf] }
 0x215   : > { %6029 = vmatpush.bf16.msrb.mxu1 %v7500_v7  ;;  %v7724_v7 = vor.u32 %v8485_v50, %v7723_v49  ;;  %v7891_v49 = vld [vmem:[%s9544_s30 + $0x9c0] sm:$0xf]  ;;  %v8527_v50 = vld [vmem:[%s9544_s30 + $0x9c4] sm:$0xf0]  ;;  %v7755_v0 = vld [vmem:[%s9544_s30 + $0x8b0] sm:$0xf] }
 0x216   : > { %6042 = vmatpush.bf16.msrb.mxu2 %v7564_v8  ;;  %v7788_v8 = vor.u32 %v8501_v53, %v7787_v52  ;;  %v7828_v53 = vor.u32 %v8511_v48, %v7827_v47  ;;  %v7892_v1 = vor.u32 %v8527_v50, %v7891_v49  ;;  %v8503_v48 = vld [vmem:[%s9544_s30 + $0x904] sm:$0xf0]  ;;  %v7859_v49 = vld [vmem:[%s9544_s30 + $0x980] sm:$0xf] }
 0x217   : > { %6055 = vmatpush.bf16.msrb.mxu3 %v7628_v12  ;;  %v7779_v12 = vld [vmem:[%s9544_s30 + $0x8e0] sm:$0xf]  ;;  %v8519_v50 = vld [vmem:[%s9544_s30 + $0x984] sm:$0xf0] }
 0x218   : > { %6017 = vmatpush.bf16.msrb.mxu0 %v7428_v18  ;;  %v8531_v18 = vld [vmem:[%s9544_s30 + $0x9e4] sm:$0xf0] }
 0x219   : > { %6030 = vmatpush.bf16.msrb.mxu1 %v7492_v21  ;;  %v7780_v21 = vor.u32 %v8499_v14, %v7779_v12  ;;  %v7747_v12 = vld [vmem:[%s9544_s30 + $0x8a0] sm:$0xf]  ;;  %v8491_v14 = vld [vmem:[%s9544_s30 + $0x8a4] sm:$0xf0] }
 0x21a   : > { %6043 = vmatpush.bf16.msrb.mxu2 %v7556_v22  ;;  %v7844_v22 = vor.u32 %v8515_v16, %v7843_v15  ;;  %v7811_v15 = vld [vmem:[%s9544_s30 + $0x920] sm:$0xf]  ;;  %v8507_v16 = vld [vmem:[%s9544_s30 + $0x924] sm:$0xf0] }
 0x21b   : > { %6056 = vmatpush.bf16.msrb.mxu3 %v7620_v32  ;;  %v7908_v32 = vor.u32 %v8531_v18, %v7907_v17  ;;  %v7875_v17 = vld [vmem:[%s9544_s30 + $0x9a0] sm:$0xf]  ;;  %v8523_v18 = vld [vmem:[%s9544_s30 + $0x9a4] sm:$0xf0] }
 0x21c   : > { %6018 = vmatpush.bf16.msrb.mxu0 %v7420_v40  ;;  %v7772_v40 = vor.u32 %v8497_v33, %v7771_v31  ;;  %v7739_v31 = vld [vmem:[%s9544_s30 + $0x890] sm:$0xf]  ;;  %v8489_v33 = vld [vmem:[%s9544_s30 + $0x894] sm:$0xf0] }
 0x21d   : > { %6031 = vmatpush.bf16.msrb.mxu1 %v7484_v45  ;;  %v7900_v45 = vor.u32 %v8529_v38, %v7899_v37  ;;  %v7867_v37 = vld [vmem:[%s9544_s30 + $0x990] sm:$0xf]  ;;  %v8521_v38 = vld [vmem:[%s9544_s30 + $0x994] sm:$0xf0] }
 0x21e   : > { %6044 = vmatpush.bf16.msrb.mxu2 %v7548_v46  ;;  %v8495_v46 = vld [vmem:[%s9544_s30 + $0x8c4] sm:$0xf0]  ;;  %v7868_v47 = vor.u32 %v8521_v38, %v7867_v37  ;;  %v8561_v38 = vld [vmem:[%s9544_s30 + $0xad4] sm:$0xf0] }
 0x21f   : > { %6057 = vmatpush.bf16.msrb.mxu3 %v7612_v51  ;;  %v7700_v51 = vor.u32 %v8479_v43, %v7699_v42  ;;  %v7764_v52 = vor.u32 %v8495_v46, %v7763_v44  ;;  %v7740_v42 = vor.u32 %v8489_v33, %v7739_v31  ;;  %v7804_v43 = vor.u32 %v8505_v36, %v7803_v35  ;;  %v7731_v44 = vld [vmem:[%s9544_s30 + $0x880] sm:$0xf]  ;;  %v7963_v33 = vld [vmem:[%s9544_s30 + $0xa50] sm:$0xf]  ;;  %v8545_v35 = vld [vmem:[%s9544_s30 + $0xa54] sm:$0xf0] }
 0x220   : > { %6019 = vmatpush.bf16.msrb.mxu0 %v7412_v62  ;;  %v8477_v62 = vld [vmem:[%s9544_s30 + $0x834] sm:$0xf0]  ;;  %v7795_v46 = vld [vmem:[%s9544_s30 + $0x900] sm:$0xf]  ;;  %v8027_v36 = vld [vmem:[%s9544_s30 + $0xad0] sm:$0xf] }
 0x221   : > { %6032 = vmatpush.bf16.msrb.mxu1 %v7476_v2  ;;  %v8493_v2 = vld [vmem:[%s9544_s30 + $0x8b4] sm:$0xf0] }
 0x222   : > { %6045 = vmatpush.bf16.msrb.mxu2 %v7540_v3  ;;  %v7819_v3 = vld [vmem:[%s9544_s30 + $0x930] sm:$0xf] }
 0x223   : > { %6058 = vmatpush.bf16.msrb.mxu3 %v7604_v6  ;;  %6020 = vmatmul.bf16.vlgmr.msrb.gmra.mxu0 %v9848_v54  ;;  %v8525_v6 = vld [vmem:[%s9544_s30 + $0x9b4] sm:$0xf0] }
 0x224   : > { %6064 = vmatpush.bf16.msra.mxu0 %v7724_v7  ;;  %6033 = vmatmul.bf16.vlgmr.msrb.gmra.mxu1 %v9852_v56  ;;  %v7692_v7 = vor.u32 %v8477_v62, %v7691_v60  ;;  %v8565_v62 = vld [vmem:[%s9544_s30 + $0xaf4] sm:$0xf0] }
 0x225   : > { %6077 = vmatpush.bf16.msra.mxu1 %v7788_v8  ;;  %6046 = vmatmul.bf16.vlgmr.msrb.gmra.mxu2 %v9850_v55  ;;  %v7756_v8 = vor.u32 %v8493_v2, %v7755_v0  ;;  %v8107_v0 = vld [vmem:[%s9544_s30 + $0xb70] sm:$0xf] }
 0x226   : > { %6090 = vmatpush.bf16.msra.mxu2 %v7852_v9  ;;  %6059 = vmatmul.bf16.vlgmr.msrb.gmra.mxu3 %v9854_v57  ;;  %v7820_v9 = vor.u32 %v8509_v4, %v7819_v3  ;;  %v7796_v3 = vor.u32 %v8503_v48, %v7795_v46  ;;  %v8171_v4 = vld [vmem:[%s9544_s30 + $0xbf0] sm:$0xf]  ;;  %v8019_v48 = vld [vmem:[%s9544_s30 + $0xac0] sm:$0xf] }
 0x227   : > { %6103 = vmatpush.bf16.msra.mxu3 %v7916_v13  ;;  %v7884_v13 = vor.u32 %v8525_v6, %v7883_v5  ;;  %v8597_v5 = vld [vmem:[%s9544_s30 + $0xbf4] sm:$0xf0]  ;;  %v7860_v6 = vor.u32 %v8519_v50, %v7859_v49  ;;  %v8559_v49 = vld [vmem:[%s9544_s30 + $0xac4] sm:$0xf0] }
 0x228   : > { %6065 = vmatpush.bf16.msra.mxu0 %v7716_v19  ;;  %v7684_v19 = vor.u32 %v8475_v11, %v7683_v10  ;;  %v7971_v10 = vld [vmem:[%s9544_s30 + $0xa60] sm:$0xf]  ;;  %v8547_v11 = vld [vmem:[%s9544_s30 + $0xa64] sm:$0xf0] }
 0x229   : > { %6078 = vmatpush.bf16.msra.mxu1 %v7780_v21  ;;  %v7748_v21 = vor.u32 %v8491_v14, %v7747_v12  ;;  %v8035_v12 = vld [vmem:[%s9544_s30 + $0xae0] sm:$0xf]  ;;  %v8563_v14 = vld [vmem:[%s9544_s30 + $0xae4] sm:$0xf0] }
 0x22a   : > { %6091 = vmatpush.bf16.msra.mxu2 %v7844_v22  ;;  %v7812_v22 = vor.u32 %v8507_v16, %v7811_v15  ;;  %v8099_v15 = vld [vmem:[%s9544_s30 + $0xb60] sm:$0xf]  ;;  %v8579_v16 = vld [vmem:[%s9544_s30 + $0xb64] sm:$0xf0]  ;;  %v8036_v31 = vor.u32 %v8563_v14, %v8035_v12 }
 0x22b   : > { %6104 = vmatpush.bf16.msra.mxu3 %v7908_v32  ;;  %v7876_v32 = vor.u32 %v8523_v18, %v7875_v17  ;;  %v9938_v17 = vld [vmem:[#allocation1] sm:$0xff]  ;;  %v8163_v18 = vld [vmem:[%s9544_s30 + $0xbe0] sm:$0xf]  ;;  %v9999_v14 = vld [vmem:[#allocation1 + $0x2d] sm:$0xff] }
 0x22c   : > { %6066 = vmatpush.bf16.msra.mxu0 %v7708_v39  ;;  %v7676_v39 = vor.u32 %v8473_v27, %v7675_v26  ;;  %v9952_v26 = vld [vmem:[#allocation1 + $0x1b] sm:$0xff]  ;;  %v7972_v27 = vor.u32 %v8547_v11, %v7971_v10  ;;  %v9995_v12 = vld [vmem:[#allocation1 + $0x24] sm:$0xff] }
 0x22d   : > { %6079 = vmatpush.bf16.msra.mxu1 %v7772_v40  ;;  %v7667_v40 = vld [vmem:[%s9544_s30 + $0x800] sm:$0xf]  ;;  %v3830_v11 = vld [vmem:[%s9986_s18] sm:$0x3] }
 0x22e   : > { %6092 = vmatpush.bf16.msra.mxu2 %v7836_v41  ;;  %v8471_v41 = vld [vmem:[%s9544_s30 + $0x804] sm:$0xf0] }
 0x22f   : > { %6105 = vmatpush.bf16.msra.mxu3 %v7900_v45  ;;  %v8487_v45 = vld [vmem:[%s9544_s30 + $0x884] sm:$0xf0]  ;;  %v7668_v60 = vor.u32 %v8471_v41, %v7667_v40  ;;  %v8577_v40 = vld [vmem:[%s9544_s30 + $0xb54] sm:$0xf0]  ;;  %v8155_v41 = vld [vmem:[%s9544_s30 + $0xbd0] sm:$0xf] }
 0x230   : > { %6067 = vmatpush.bf16.msra.mxu0 %v7700_v51  ;;  %v7979_v51 = vld [vmem:[%s9544_s30 + $0xa70] sm:$0xf]  ;;  %v7732_v2 = vor.u32 %v8487_v45, %v7731_v44  ;;  %v7955_v44 = vld [vmem:[%s9544_s30 + $0xa40] sm:$0xf]  ;;  %v8028_v45 = vor.u32 %v8561_v38, %v8027_v36 }
 0x231   : > { %6080 = vmatpush.bf16.msra.mxu1 %v7764_v52  ;;  %v8549_v52 = vld [vmem:[%s9544_s30 + $0xa74] sm:$0xf0]  ;;  %v8067_v38 = vld [vmem:[%s9544_s30 + $0xb20] sm:$0xf] }
 0x232   : > { %6093 = vmatpush.bf16.msra.mxu2 %v7828_v53  ;;  %v8043_v53 = vld [vmem:[%s9544_s30 + $0xaf0] sm:$0xf] }
 0x233   : > { %6106 = vmatpush.bf16.msra.mxu3 %v7892_v1  ;;  %v8581_v1 = vld [vmem:[%s9544_s30 + $0xb74] sm:$0xf0] }
 0x234   : > { %6068 = vmatpush.bf16.msra.mxu0 %v7692_v7  ;;  %v7980_v7 = vor.u32 %v8549_v52, %v7979_v51  ;;  %v8083_v51 = vld [vmem:[%s9544_s30 + $0xb40] sm:$0xf]  ;;  %v8575_v52 = vld [vmem:[%s9544_s30 + $0xb44] sm:$0xf0] }
 0x235   : > { %6081 = vmatpush.bf16.msra.mxu1 %v7756_v8  ;;  %v8044_v8 = vor.u32 %v8565_v62, %v8043_v53  ;;  %v8147_v53 = vld [vmem:[%s9544_s30 + $0xbc0] sm:$0xf]  ;;  %v7947_v62 = vld [vmem:[%s9544_s30 + $0xa30] sm:$0xf] }
 0x236   : > { %6094 = vmatpush.bf16.msra.mxu2 %v7820_v9  ;;  %v8108_v9 = vor.u32 %v8581_v1, %v8107_v0  ;;  %v8541_v0 = vld [vmem:[%s9544_s30 + $0xa34] sm:$0xf0] }
 0x237   : > { %6107 = vmatpush.bf16.msra.mxu3 %v7884_v13  ;;  %v8172_v13 = vor.u32 %v8597_v5, %v8171_v4  ;;  %v8075_v4 = vld [vmem:[%s9544_s30 + $0xb30] sm:$0xf]  ;;  %v8020_v5 = vor.u32 %v8559_v49, %v8019_v48 }
 0x238   : > { %6069 = vmatpush.bf16.msra.mxu0 %v7684_v19  ;;  %v8595_v19 = vld [vmem:[%s9544_s30 + $0xbe4] sm:$0xf0]  ;;  %v7995_v48 = vld [vmem:[%s9544_s30 + $0xa90] sm:$0xf] }
 0x239   : > { %6082 = vmatpush.bf16.msra.mxu1 %v7748_v21  ;;  %v9948_v21 = vld [vmem:[#allocation1 + $0x12] sm:$0xff]  ;;  %v8164_v37 = vor.u32 %v8595_v19, %v8163_v18  ;;  %v7948_v18 = vor.u32 %v8541_v0, %v7947_v62  ;;  %v7939_v19 = vld [vmem:[%s9544_s30 + $0xa20] sm:$0xf]  ;;  %v8585_v0 = vld [vmem:[%s9544_s30 + $0xb94] sm:$0xf0] }
 0x23a   : > { %6095 = vmatpush.bf16.msra.mxu2 %v7812_v22  ;;  %v9950_v22 = vld [vmem:[#allocation1 + $0x9] sm:$0xff]  ;;  %v8123_v62 = vld [vmem:[%s9544_s30 + $0xb90] sm:$0xf] }
 0x23b   : > { %6108 = vmatpush.bf16.msra.mxu3 %v7876_v32  ;;  %v8100_v32 = vor.u32 %v8579_v16, %v8099_v15  ;;  %v10001_v15 = vld [vmem:[#allocation1 + $0x3f] sm:$0xff]  ;;  %v3437_v16 = vld [vmem:[%s10498_s0 + $0x18] sm:$0x1] }
 0x23c   : > { %6070 = vmatpush.bf16.msra.mxu0 %v7676_v39  ;;  %v8091_v39 = vld [vmem:[%s9544_s30 + $0xb50] sm:$0xf] }
 0x23d   : > { %6083 = vmatpush.bf16.msra.mxu1 %v7740_v42  ;;  %v8593_v42 = vld [vmem:[%s9544_s30 + $0xbd4] sm:$0xf0]  ;;  %v8092_v46 = vor.u32 %v8577_v40, %v8091_v39  ;;  %v8571_v39 = vld [vmem:[%s9544_s30 + $0xb24] sm:$0xf0]  ;;  %v8131_v40 = vld [vmem:[%s9544_s30 + $0xba0] sm:$0xf] }
 0x23e   : > { %6096 = vmatpush.bf16.msra.mxu2 %v7804_v43  ;;  %v7964_v43 = vor.u32 %v8545_v35, %v7963_v33  ;;  %v8156_v50 = vor.u32 %v8593_v42, %v8155_v41  ;;  %v8003_v33 = vld [vmem:[%s9544_s30 + $0xaa0] sm:$0xf]  ;;  %v3832_v35 = vperm.slane %v3830_v11, 0  ;;  %v8587_v41 = vld [vmem:[%s9544_s30 + $0xba4] sm:$0xf0]  ;;  %v8124_v11 = vor.u32 %v8585_v0, %v8123_v62 }
 0x23f   : > { %6109 = vmatpush.bf16.msra.mxu3 %v7868_v47  ;;  %v8543_v47 = vld [vmem:[%s9544_s30 + $0xa44] sm:$0xf0]  ;;  %v6693_v62 = vld [vmem:[%s9544_s30 + $0x68] sm:$0xf0]  ;;  %v8242_v0 = vld [vmem:[%s9544_s30 + $0xe4] sm:$0xf] }
 0x240   : > { %6071 = vmatpush.bf16.msra.mxu0 %v7668_v60  ;;  %v8591_v60 = vld [vmem:[%s9544_s30 + $0xbc4] sm:$0xf0]  ;;  %v7956_v1 = vor.u32 %v8543_v47, %v7955_v44  ;;  %v8537_v47 = vld [vmem:[%s9544_s30 + $0xa14] sm:$0xf0] }
 0x241   : > { %6084 = vmatpush.bf16.msra.mxu1 %v7732_v2  ;;  %v8011_v2 = vld [vmem:[%s9544_s30 + $0xab0] sm:$0xf]  ;;  %v8148_v10 = vor.u32 %v8591_v60, %v8147_v53  ;;  %v8569_v60 = vld [vmem:[%s9544_s30 + $0xb14] sm:$0xf0] }
 0x242   : > { %6097 = vmatpush.bf16.msra.mxu2 %v7796_v3  ;;  %v8557_v3 = vld [vmem:[%s9544_s30 + $0xab4] sm:$0xf0]  ;;  %v8059_v53 = vld [vmem:[%s9544_s30 + $0xb10] sm:$0xf] }
 0x243   : > { %6110 = vmatpush.bf16.msra.mxu3 %v7860_v6  ;;  %6072 = vmatmul.bf16.vlgmr.msra.gmra.mxu0 %v9938_v17  ;;  %v8084_v6 = vor.u32 %v8575_v52, %v8083_v51  ;;  %v8132_v51 = vor.u32 %v8587_v41, %v8131_v40  ;;  %v8553_v52 = vld [vmem:[%s9544_s30 + $0xa94] sm:$0xf0] }
 0x244   : > { %6116 = vmatpush.bf16.msrb.mxu0 %v7980_v7  ;;  %6085 = vmatmul.bf16.vlgmr.msra.gmra.mxu1 %v9950_v22  ;;  %v8573_v7 = vld [vmem:[%s9544_s30 + $0xb34] sm:$0xf0] }
 0x245   : > { %6129 = vmatpush.bf16.msrb.mxu1 %v8044_v8  ;;  %6098 = vmatmul.bf16.vlgmr.msra.gmra.mxu2 %v9948_v21  ;;  %v8139_v8 = vld [vmem:[%s9544_s30 + $0xbb0] sm:$0xf] }
 0x246   : > { %6142 = vmatpush.bf16.msrb.mxu2 %v8108_v9  ;;  %6111 = vmatmul.bf16.vlgmr.msra.gmra.mxu3 %v9952_v26  ;;  %v8589_v9 = vld [vmem:[%s9544_s30 + $0xbb4] sm:$0xf0] }
 0x247   : > { %6155 = vmatpush.bf16.msrb.mxu3 %v8172_v13  ;;  %v9997_v13 = vld [vmem:[#allocation1 + $0x36] sm:$0xff]  ;;  %v8140_v36 = vor.u32 %v8589_v9, %v8139_v8  ;;  %v8551_v8 = vld [vmem:[%s9544_s30 + $0xa84] sm:$0xf0]  ;;  %v8051_v9 = vld [vmem:[%s9544_s30 + $0xb00] sm:$0xf] }
 0x248   : > { %6117 = vmatpush.bf16.msrb.mxu0 %v7972_v27  ;;  %3867 = vst [vmem:[#allocation1] ss:$9 sm:$0xff] %v3437_v16  ;;  %v8012_v27 = vor.u32 %v8557_v3, %v8011_v2  ;;  %v7923_v3 = vld [vmem:[%s9544_s30 + $0xa00] sm:$0xf]  ;;  %v8567_v16 = vld [vmem:[%s9544_s30 + $0xb04] sm:$0xf0] }
 0x249   : > { %6130 = vmatpush.bf16.msrb.mxu1 %v8036_v31  ;;  %v8076_v31 = vor.u32 %v8573_v7, %v8075_v4  ;;  %v8535_v4 = vld [vmem:[%s9544_s30 + $0xa04] sm:$0xf0]  ;;  %v7987_v7 = vld [vmem:[%s9544_s30 + $0xa80] sm:$0xf] }
 0x24a   : > { %6143 = vmatpush.bf16.msrb.mxu2 %v8100_v32  ;;  %v8539_v32 = vld [vmem:[%s9544_s30 + $0xa24] sm:$0xf0] }
 0x24b   : > { %6156 = vmatpush.bf16.msrb.mxu3 %v8164_v37  ;;  %v8555_v37 = vld [vmem:[%s9544_s30 + $0xaa4] sm:$0xf0]  ;;  %v7940_v42 = vor.u32 %v8539_v32, %v7939_v19  ;;  %v8203_v32 = vld [vmem:[%s9544_s30 + $0xc30] sm:$0xf] }
 0x24c   : > { %6118 = vmatpush.bf16.msrb.mxu0 %v7964_v43  ;;  %v5865_v43 = vpop.f32.mrf.mxu0  ;;  %v8004_v44 = vor.u32 %v8555_v37, %v8003_v33  ;;  %v8583_v19 = vld [vmem:[%s9544_s30 + $0xb84] sm:$0xf0]  ;;  %v8605_v33 = vld [vmem:[%s9544_s30 + $0xc34] sm:$0xf0]  ;;  %v6701_v37 = vld [vmem:[%s9544_s30 + $0x78] sm:$0xf0] }
 0x24d   : > { %6131 = vmatpush.bf16.msrb.mxu1 %v8028_v45  ;;  %v8068_v45 = vor.u32 %v8571_v39, %v8067_v38  ;;  %v5866_v49 = vadd.f32 %v5865_v43, %v3832_v35  ;;  %v8228_v35 = vld [vmem:[%s9544_s30 + $0x74] sm:$0xf]  ;;  %v6765_v39 = vld [vmem:[%s9544_s30 + $0xf8] sm:$0xf0]  ;;  %v8052_v43 = vor.u32 %v8567_v16, %v8051_v9  ;;  %v8187_v9 = vld [vmem:[%s9544_s30 + $0xc10] sm:$0xf] }
 0x24e   : > { %6144 = vmatpush.bf16.msrb.mxu2 %v8092_v46  ;;  %v7931_v46 = vld [vmem:[%s9544_s30 + $0xa10] sm:$0xf]  ;;  %v8244_v38 = vld [vmem:[%s9544_s30 + $0xf4] sm:$0xf] }
 0x24f   : > { %6157 = vmatpush.bf16.msrb.mxu3 %v8156_v50  ;;  %v5878_v50 = vpop.f32.mrf.mxu1  ;;  %v7932_v2 = vor.u32 %v8537_v47, %v7931_v46 }
 0x250   : > { %6119 = vmatpush.bf16.msrb.mxu0 %v7956_v1  ;;  %v5879_v1 = vadd.f32 %v5878_v50, %v5866_v49  ;;  %v6704_v49 = vor.u32 %v8228_v35, %v6701_v37  ;;  %v6768_v50 = vor.u32 %v8244_v38, %v6765_v39  ;;  %v8179_v35 = vld [vmem:[%s9544_s30 + $0xc00] sm:$0xf]  ;;  %v8599_v38 = vld [vmem:[%s9544_s30 + $0xc04] sm:$0xf0]  ;;  %v8222_v39 = vld [vmem:[%s9544_s30 + $0x44] sm:$0xf] }
 0x251   : > { %6132 = vmatpush.bf16.msrb.mxu1 %v8020_v5  ;;  %v7996_v5 = vor.u32 %v8553_v52, %v7995_v48  ;;  %v8204_v48 = vor.u32 %v8605_v33, %v8203_v32  ;;  %v8603_v52 = vld [vmem:[%s9544_s30 + $0xc24] sm:$0xf0]  ;;  %v6813_v32 = vld [vmem:[%s9544_s30 + $0x158] sm:$0xf0] }
 0x252   : > { %6145 = vmatpush.bf16.msrb.mxu2 %v8084_v6  ;;  %v8060_v6 = vor.u32 %v8569_v60, %v8059_v53  ;;  %v8226_v53 = vld [vmem:[%s9544_s30 + $0x64] sm:$0xf] }
 0x253   : > { %6158 = vmatpush.bf16.msrb.mxu3 %v8148_v10  ;;  %v5891_v10 = vpop.f32.mrf.mxu2 }
 0x254   : > { %6120 = vmatpush.bf16.msrb.mxu0 %v7948_v18  ;;  %v8115_v18 = vld [vmem:[%s9544_s30 + $0xb80] sm:$0xf]  ;;  %v5867_v41 = vpop.f32.mrf.mxu0 }
 0x255   : > { %6133 = vmatpush.bf16.msrb.mxu1 %v8012_v27  ;;  %v5892_v27 = vadd.f32 %v5891_v10, %v5879_v1  ;;  %v8116_v47 = vor.u32 %v8583_v19, %v8115_v18  ;;  %v6757_v1 = vld [vmem:[%s9544_s30 + $0xe8] sm:$0xf0]  ;;  %v8601_v10 = vld [vmem:[%s9544_s30 + $0xc14] sm:$0xf0]  ;;  %v6685_v18 = vld [vmem:[%s9544_s30 + $0x58] sm:$0xf0] }
 0x256   : > { %6146 = vmatpush.bf16.msrb.mxu2 %v8076_v31  ;;  %v5904_v31 = vpop.f32.mrf.mxu3  ;;  %v8240_v19 = vld [vmem:[%s9544_s30 + $0xd4] sm:$0xf]  ;;  %v8188_v33 = vor.u32 %v8601_v10, %v8187_v9  ;;  %v6677_v41 = vld [vmem:[%s9544_s30 + $0x48] sm:$0xf0] }
 0x257   : > { %6159 = vmatpush.bf16.msrb.mxu3 %v8140_v36  ;;  %v7924_v36 = vor.u32 %v8535_v4, %v7923_v3  ;;  %v10036_v40 = vadd.f32 %v5904_v31, %v5892_v27  ;;  %v5880_v46 = vpop.f32.mrf.mxu1  ;;  %v6821_v3 = vld [vmem:[%s9544_s30 + $0x168] sm:$0xf0]  ;;  %v6749_v27 = vld [vmem:[%s9544_s30 + $0xd8] sm:$0xf0]  ;;  %v8256_v31 = vld [vmem:[%s9544_s30 + $0x154] sm:$0xf] }
 0x258   : > { %6121 = vmatpush.bf16.msrb.mxu0 %v7940_v42  ;;  %v7988_v42 = vor.u32 %v8551_v8, %v7987_v7  ;;  %v6696_v7 = vor.u32 %v8226_v53, %v6693_v62  ;;  %v6760_v8 = vor.u32 %v8242_v0, %v6757_v1  ;;  %v6752_v37 = vor.u32 %v8240_v19, %v6749_v27  ;;  %v6805_v46 = vld [vmem:[%s9544_s30 + $0x148] sm:$0xf0]  ;;  %v6669_v62 = vld [vmem:[%s9544_s30 + $0x38] sm:$0xf0] }
 0x259   : > { %6134 = vmatpush.bf16.msrb.mxu1 %v8004_v44  ;;  %v8260_v44 = vld [vmem:[%s9544_s30 + $0x174] sm:$0xf]  ;;  %v6885_v9 = vld [vmem:[%s9544_s30 + $0x1e8] sm:$0xf0] }
 0x25a   : > { %6147 = vmatpush.bf16.msrb.mxu2 %v8068_v45  ;;  %v6829_v45 = vld [vmem:[%s9544_s30 + $0x178] sm:$0xf0] }
 0x25b   : > { %6160 = vmatpush.bf16.msrb.mxu3 %v8132_v51  ;;  %v8195_v51 = vld [vmem:[%s9544_s30 + $0xc20] sm:$0xf]  ;;  %v6832_v60 = vor.u32 %v8260_v44, %v6829_v45  ;;  %v5893_v4 = vpop.f32.mrf.mxu2  ;;  %v6741_v44 = vld [vmem:[%s9544_s30 + $0xc8] sm:$0xf0]  ;;  %v8254_v45 = vld [vmem:[%s9544_s30 + $0x144] sm:$0xf] }
 0x25c   : > { %6122 = vmatpush.bf16.msrb.mxu0 %v7932_v2  ;;  %v8258_v2 = vld [vmem:[%s9544_s30 + $0x164] sm:$0xf]  ;;  %v6808_v1 = vor.u32 %v8254_v45, %v6805_v46  ;;  %v6733_v4 = vld [vmem:[%s9544_s30 + $0xb8] sm:$0xf0]  ;;  %v8216_v46 = vld [vmem:[%s9544_s30 + $0x14] sm:$0xf] }
 0x25d   : > { %6135 = vmatpush.bf16.msrb.mxu1 %v7996_v5  ;;  %v8196_v5 = vor.u32 %v8603_v52, %v8195_v51  ;;  %v6824_v16 = vor.u32 %v8258_v2, %v6821_v3  ;;  %v6680_v51 = vor.u32 %v8222_v39, %v6677_v41  ;;  %v8236_v3 = vld [vmem:[%s9544_s30 + $0xb4] sm:$0xf]  ;;  %v6877_v39 = vld [vmem:[%s9544_s30 + $0x1d8] sm:$0xf0] }
 0x25e   : > { %6148 = vmatpush.bf16.msrb.mxu2 %v8060_v6  ;;  %v5906_v6 = vpop.f32.mrf.mxu3  ;;  %v6736_v10 = vor.u32 %v8236_v3, %v6733_v4  ;;  %v3868_v41 = vld [vmem:[#allocation1] sm:$0xff]  ;;  %v8214_v3 = vld [vmem:[%s9544_s30 + $0x4] sm:$0xf]  ;;  %v6645_v4 = vld [vmem:[%s9544_s30 + $0x8] sm:$0xf0] }
 0x25f   : > { %6161 = vmatpush.bf16.msrb.mxu3 %v8124_v11  ;;  %v8224_v11 = vld [vmem:[%s9544_s30 + $0x54] sm:$0xf]  ;;  %v6797_v6 = vld [vmem:[%s9544_s30 + $0x138] sm:$0xf0] }
 0x260   : > { %6123 = vmatpush.bf16.msrb.mxu0 %v7924_v36  ;;  %v6688_v36 = vor.u32 %v8224_v11, %v6685_v18  ;;  %v6661_v18 = vld [vmem:[%s9544_s30 + $0x28] sm:$0xf0] }
 0x261   : > { %6136 = vmatpush.bf16.msrb.mxu1 %v7988_v42  ;;  %v6816_v42 = vor.u32 %v8256_v31, %v6813_v32  ;;  %v5930_v0 = vpop.f32.mrf.mxu1  ;;  %v8234_v32 = vld [vmem:[%s9544_s30 + $0xa4] sm:$0xf] }
 0x262   : > { %6149 = vmatpush.bf16.msrb.mxu2 %v8052_v43  ;;  %v8238_v43 = vld [vmem:[%s9544_s30 + $0xc4] sm:$0xf] }
 0x263   : > { %6162 = vmatpush.bf16.msrb.mxu3 %v8116_v47  ;;  %6124 = vmatmul.bf16.vlgmr.msrb.gmra.mxu0 %v9995_v12  ;;  %v8276_v47 = vld [vmem:[%s9544_s30 + $0x1f4] sm:$0xf]  ;;  %v6744_v52 = vor.u32 %v8238_v43, %v6741_v44 }
 0x264   : > { %6172 = vmatpush.bf16.msra.mxu0 %v8204_v48  ;;  %6137 = vmatmul.bf16.vlgmr.msrb.gmra.mxu1 %v9999_v14  ;;  %v6893_v48 = vld [vmem:[%s9544_s30 + $0x1f8] sm:$0xf0] }
 0x265   : > { %6181 = vmatpush.bf16.msra.mxu1 %v6704_v49  ;;  %6150 = vmatmul.bf16.vlgmr.msrb.gmra.mxu2 %v9997_v13  ;;  %v8180_v49 = vor.u32 %v8599_v38, %v8179_v35  ;;  %v6896_v2 = vor.u32 %v8276_v47, %v6893_v48  ;;  %v8250_v35 = vld [vmem:[%s9544_s30 + $0x124] sm:$0xf]  ;;  %v8272_v38 = vld [vmem:[%s9544_s30 + $0x1d4] sm:$0xf]  ;;  %v6653_v47 = vld [vmem:[%s9544_s30 + $0x18] sm:$0xf0] }
 0x266   : > { %6194 = vmatpush.bf16.msra.mxu2 %v6768_v50  ;;  %6163 = vmatmul.bf16.vlgmr.msrb.gmra.mxu3 %v10001_v15  ;;  %v5917_v50 = vpop.f32.mrf.mxu0 }
 0x267   : > { %6207 = vmatpush.bf16.msra.mxu3 %v6832_v60  ;;  %v5918_v53 = vadd.f32 %v5917_v50, %v10036_v40  ;;  %v8220_v60 = vld [vmem:[%s9544_s30 + $0x34] sm:$0xf]  ;;  %v6880_v50 = vor.u32 %v8272_v38, %v6877_v39 }
 0x268   : > { %6173 = vmatpush.bf16.msra.mxu0 %v8196_v5  ;;  %v8252_v5 = vld [vmem:[%s9544_s30 + $0x134] sm:$0xf]  ;;  %v6672_v40 = vor.u32 %v8220_v60, %v6669_v62  ;;  %v5943_v11 = vpop.f32.mrf.mxu2  ;;  %v6781_v60 = vld [vmem:[%s9544_s30 + $0x118] sm:$0xf0]  ;;  %v8270_v62 = vld [vmem:[%s9544_s30 + $0x1c4] sm:$0xf] }
 0x269   : > { %6182 = vmatpush.bf16.msra.mxu1 %v6696_v7  ;;  %v5931_v7 = vadd.f32 %v5930_v0, %v5918_v53  ;;  %v6800_v19 = vor.u32 %v8252_v5, %v6797_v6  ;;  %v5932_v48 = vpop.f32.mrf.mxu1  ;;  %v8248_v53 = vld [vmem:[%s9544_s30 + $0x114] sm:$0xf]  ;;  %v6869_v0 = vld [vmem:[%s9544_s30 + $0x1c8] sm:$0xf0]  ;;  %v8230_v5 = vld [vmem:[%s9544_s30 + $0x84] sm:$0xf] }
 0x26a   : > { %6195 = vmatpush.bf16.msra.mxu2 %v6760_v8  ;;  %v8274_v8 = vld [vmem:[%s9544_s30 + $0x1e4] sm:$0xf]  ;;  %v6949_v48 = vld [vmem:[%s9544_s30 + $0x268] sm:$0xf0] }
 0x26b   : > { %6208 = vmatpush.bf16.msra.mxu3 %v6824_v16  ;;  %v8218_v16 = vld [vmem:[%s9544_s30 + $0x24] sm:$0xf]  ;;  %v6888_v27 = vor.u32 %v8274_v8, %v6885_v9  ;;  %v5944_v31 = vadd.f32 %v5943_v11, %v5931_v7  ;;  %v6784_v7 = vor.u32 %v8248_v53, %v6781_v60  ;;  %v6872_v8 = vor.u32 %v8270_v62, %v6869_v0  ;;  %v6709_v9 = vld [vmem:[%s9544_s30 + $0x88] sm:$0xf0]  ;;  %v8264_v0 = vld [vmem:[%s9544_s30 + $0x194] sm:$0xf] }
 0x26c   : > { %6174 = vmatpush.bf16.msra.mxu0 %v8188_v33  ;;  %v6725_v33 = vld [vmem:[%s9544_s30 + $0xa8] sm:$0xf0]  ;;  %v6664_v44 = vor.u32 %v8218_v16, %v6661_v18  ;;  %v8268_v16 = vld [vmem:[%s9544_s30 + $0x1b4] sm:$0xf]  ;;  %v6861_v18 = vld [vmem:[%s9544_s30 + $0x1b8] sm:$0xf0] }
 0x26d   : > { %6183 = vmatpush.bf16.msra.mxu1 %v6688_v36  ;;  %v5956_v36 = vpop.f32.mrf.mxu3  ;;  %v6728_v45 = vor.u32 %v8234_v32, %v6725_v33  ;;  %v7021_v32 = vld [vmem:[%s9544_s30 + $0x2f8] sm:$0xf0]  ;;  %v6648_v33 = vor.u32 %v8214_v3, %v6645_v4  ;;  %v6864_v39 = vor.u32 %v8268_v16, %v6861_v18  ;;  %v8286_v16 = vld [vmem:[%s9544_s30 + $0x244] sm:$0xf]  ;;  %v6933_v18 = vld [vmem:[%s9544_s30 + $0x248] sm:$0xf0] }
 0x26e   : > { %6196 = vmatpush.bf16.msra.mxu2 %v6752_v37  ;;  %v6789_v37 = vld [vmem:[%s9544_s30 + $0x128] sm:$0xf0]  ;;  %v5919_v43 = vpop.f32.mrf.mxu0  ;;  %v6941_v4 = vld [vmem:[%s9544_s30 + $0x258] sm:$0xf0] }
 0x26f   : > { %6209 = vmatpush.bf16.msra.mxu3 %v6816_v42  ;;  %v10087_v42 = vadd.f32 %v5956_v36, %v5944_v31  ;;  %v8308_v31 = vld [vmem:[%s9544_s30 + $0x2f4] sm:$0xf] }
 0x270   : > { %6175 = vmatpush.bf16.msra.mxu0 %v8180_v49  ;;  %v6792_v49 = vor.u32 %v8250_v35, %v6789_v37  ;;  %v5945_v6 = vpop.f32.mrf.mxu2  ;;  %v6712_v35 = vor.u32 %v8230_v5, %v6709_v9  ;;  %v8324_v36 = vld [vmem:[%s9544_s30 + $0x374] sm:$0xf]  ;;  %v7085_v37 = vld [vmem:[%s9544_s30 + $0x378] sm:$0xf0]  ;;  %v7024_v43 = vor.u32 %v8308_v31, %v7021_v32  ;;  %v7061_v32 = vld [vmem:[%s9544_s30 + $0x348] sm:$0xf0] }
 0x271   : > { %6184 = vmatpush.bf16.msra.mxu1 %v6680_v51  ;;  %v8232_v51 = vld [vmem:[%s9544_s30 + $0x94] sm:$0xf]  ;;  %v7005_v6 = vld [vmem:[%s9544_s30 + $0x2d8] sm:$0xf0] }
 0x272   : > { %6197 = vmatpush.bf16.msra.mxu2 %v6744_v52  ;;  %v6717_v52 = vld [vmem:[%s9544_s30 + $0x98] sm:$0xf0]  ;;  %v8304_v5 = vld [vmem:[%s9544_s30 + $0x2d4] sm:$0xf] }
 0x273   : > { %6210 = vmatpush.bf16.msra.mxu3 %v6808_v1  ;;  %8209 = vmatmul.msk.bf16.vlgmr.msra.gmra.mxu0 %vm5853_vm0, %v3868_v41  ;;  %v6656_v1 = vor.u32 %v8216_v46, %v6653_v47  ;;  %v8290_v46 = vld [vmem:[%s9544_s30 + $0x264] sm:$0xf]  ;;  %v7088_v47 = vor.u32 %v8324_v36, %v7085_v37 }
 0x274   : > { %6220 = vmatpush.bf16.msrb.mxu0 %v6896_v2  ;;  %v6720_v2 = vor.u32 %v8232_v51, %v6717_v52  ;;  %v8322_v51 = vld [vmem:[%s9544_s30 + $0x364] sm:$0xf]  ;;  %v7077_v52 = vld [vmem:[%s9544_s30 + $0x368] sm:$0xf0]  ;;  %v6952_v60 = vor.u32 %v8290_v46, %v6949_v48  ;;  %v8300_v48 = vld [vmem:[%s9544_s30 + $0x2b4] sm:$0xf] }
 0x275   : > { %6185 = vmatpush.bf16.msra.mxu1 %v6672_v40  ;;  %v8246_v40 = vld [vmem:[%s9544_s30 + $0x104] sm:$0xf]  ;;  %v5958_v11 = vpop.f32.mrf.mxu3  ;;  %v7080_v3 = vor.u32 %v8322_v51, %v7077_v52  ;;  %v7141_v52 = vld [vmem:[%s9544_s30 + $0x3e8] sm:$0xf0] }
 0x276   : > { %6198 = vmatpush.bf16.msra.mxu2 %v6736_v10  ;;  %v6773_v10 = vld [vmem:[%s9544_s30 + $0x108] sm:$0xf0]  ;;  %v7008_v11 = vor.u32 %v8304_v5, %v7005_v6  ;;  %v8338_v51 = vld [vmem:[%s9544_s30 + $0x3e4] sm:$0xf] }
 0x277   : > { %6211 = vmatpush.bf16.msra.mxu3 %v6800_v19  ;;  %v8292_v19 = vld [vmem:[%s9544_s30 + $0x274] sm:$0xf]  ;;  %v6776_v38 = vor.u32 %v8246_v40, %v6773_v10  ;;  %v8262_v40 = vld [vmem:[%s9544_s30 + $0x184] sm:$0xf]  ;;  %v6981_v5 = vld [vmem:[%s9544_s30 + $0x2a8] sm:$0xf0] }
 0x278   : > { %6221 = vmatpush.bf16.msrb.mxu0 %v6888_v27  ;;  %v6957_v27 = vld [vmem:[%s9544_s30 + $0x278] sm:$0xf0]  ;;  %v8314_v6 = vld [vmem:[%s9544_s30 + $0x324] sm:$0xf] }
 0x279   : > { %6186 = vmatpush.bf16.msra.mxu1 %v6664_v44  ;;  %v6960_v41 = vor.u32 %v8292_v19, %v6957_v27  ;;  %v8266_v44 = vld [vmem:[%s9544_s30 + $0x1a4] sm:$0xf]  ;;  %v6997_v27 = vld [vmem:[%s9544_s30 + $0x2c8] sm:$0xf0] }
 0x27a   : > { %6199 = vmatpush.bf16.msra.mxu2 %v6728_v45  ;;  %v6853_v45 = vld [vmem:[%s9544_s30 + $0x1a8] sm:$0xf0] }
 0x27b   : > { %6212 = vmatpush.bf16.msra.mxu3 %v6792_v49  ;;  %v8306_v49 = vld [vmem:[%s9544_s30 + $0x2e4] sm:$0xf]  ;;  %v6856_v53 = vor.u32 %v8266_v44, %v6853_v45  ;;  %v6925_v44 = vld [vmem:[%s9544_s30 + $0x238] sm:$0xf0] }
 0x27c   : > { %6222 = vmatpush.bf16.msrb.mxu0 %v6880_v50  ;;  %v7013_v50 = vld [vmem:[%s9544_s30 + $0x2e8] sm:$0xf0] }
 0x27d   : > { %6187 = vmatpush.bf16.msra.mxu1 %v6656_v1  ;;  %v7016_v62 = vor.u32 %v8306_v49, %v7013_v50  ;;  %v6845_v1 = vld [vmem:[%s9544_s30 + $0x198] sm:$0xf0] }
 0x27e   : > { %6200 = vmatpush.bf16.msra.mxu2 %v6720_v2  ;;  %v8288_v2 = vld [vmem:[%s9544_s30 + $0x254] sm:$0xf]  ;;  %v6848_v9 = vor.u32 %v8264_v0, %v6845_v1  ;;  %v6989_v49 = vld [vmem:[%s9544_s30 + $0x2b8] sm:$0xf0]  ;;  %v6917_v0 = vld [vmem:[%s9544_s30 + $0x228] sm:$0xf0] }
 0x27f   : > { %6213 = vmatpush.bf16.msra.mxu3 %v6784_v7  ;;  %v8320_v7 = vld [vmem:[%s9544_s30 + $0x354] sm:$0xf]  ;;  %v6944_v10 = vor.u32 %v8288_v2, %v6941_v4  ;;  %v7053_v50 = vld [vmem:[%s9544_s30 + $0x338] sm:$0xf0]  ;;  %v8298_v4 = vld [vmem:[%s9544_s30 + $0x2a4] sm:$0xf] }
 0x280   : > { %6223 = vmatpush.bf16.msrb.mxu0 %v6872_v8  ;;  %v7069_v8 = vld [vmem:[%s9544_s30 + $0x358] sm:$0xf0]  ;;  %v5969_v31 = vpop.f32.mrf.mxu0 }
 0x281   : > { %6188 = vmatpush.bf16.msra.mxu1 %v6648_v33  ;;  %v7072_v19 = vor.u32 %v8320_v7, %v7069_v8  ;;  %v8340_v33 = vld [vmem:[%s9544_s30 + $0x3f4] sm:$0xf]  ;;  %v5970_v36 = vadd.f32 %v5969_v31, %v10087_v42 }
 0x282   : > { %6201 = vmatpush.bf16.msra.mxu2 %v6712_v35  ;;  %v7149_v35 = vld [vmem:[%s9544_s30 + $0x3f8] sm:$0xf0]  ;;  %v8316_v42 = vld [vmem:[%s9544_s30 + $0x334] sm:$0xf] }
 0x283   : > { %6214 = vmatpush.bf16.msra.mxu3 %v6776_v38  ;;  %v5982_v38 = vpop.f32.mrf.mxu1  ;;  %v7056_v1 = vor.u32 %v8316_v42, %v7053_v50  ;;  %v8296_v31 = vld [vmem:[%s9544_s30 + $0x294] sm:$0xf] }
 0x284   : > { %6224 = vmatpush.bf16.msrb.mxu0 %v6864_v39  ;;  %6189 = vmatmul.bf16.vlgmr.msra.gmra.mxu1 %v9651_v29  ;;  %v8318_v29 = vld [vmem:[%s9544_s30 + $0x344] sm:$0xf]  ;;  %v6936_v39 = vor.u32 %v8286_v16, %v6933_v18  ;;  %v5983_v46 = vadd.f32 %v5982_v38, %v5970_v36  ;;  %v8332_v50 = vld [vmem:[%s9544_s30 + $0x3b4] sm:$0xf] }
 0x285   : > { %6233 = vmatpush.bf16.msrb.mxu1 %v6960_v41  ;;  %6202 = vmatmul.bf16.vlgmr.msra.gmra.mxu2 %v9658_v34  ;;  %v6837_v34 = vld [vmem:[%s9544_s30 + $0x188] sm:$0xf0]  ;;  %v7064_v45 = vor.u32 %v8318_v29, %v7061_v32  ;;  %v6973_v32 = vld [vmem:[%s9544_s30 + $0x298] sm:$0xf0]  ;;  %v8334_v36 = vld [vmem:[%s9544_s30 + $0x3c4] sm:$0xf] }
 0x286   : > { %6246 = vmatpush.bf16.msrb.mxu2 %v7024_v43  ;;  %6215 = vmatmul.bf16.vlgmr.msra.gmra.mxu3 %v9649_v28  ;;  %v8302_v28 = vld [vmem:[%s9544_s30 + $0x2c4] sm:$0xf]  ;;  %v6840_v37 = vor.u32 %v8262_v40, %v6837_v34  ;;  %v8284_v43 = vld [vmem:[%s9544_s30 + $0x234] sm:$0xf] }
 0x287   : > { %6259 = vmatpush.bf16.msrb.mxu3 %v7088_v47  ;;  %v7000_v41 = vor.u32 %v8302_v28, %v6997_v27  ;;  %v7152_v47 = vor.u32 %v8340_v33, %v7149_v35  ;;  %v8336_v40 = vld [vmem:[%s9544_s30 + $0x3d4] sm:$0xf]  ;;  %v6909_v27 = vld [vmem:[%s9544_s30 + $0x218] sm:$0xf0] }
 0x288   : > { %6225 = vmatpush.bf16.msrb.mxu0 %v6856_v53  ;;  %v6928_v53 = vor.u32 %v8284_v43, %v6925_v44  ;;  %v5995_v2 = vpop.f32.mrf.mxu2  ;;  %v8280_v28 = vld [vmem:[%s9544_s30 + $0x214] sm:$0xf]  ;;  %v7037_v35 = vld [vmem:[%s9544_s30 + $0x318] sm:$0xf0]  ;;  %v6901_v43 = vld [vmem:[%s9544_s30 + $0x208] sm:$0xf0] }
 0x289   : > { %6234 = vmatpush.bf16.msrb.mxu1 %v6952_v60  ;;  %v6992_v60 = vor.u32 %v8300_v48, %v6989_v49  ;;  %v5996_v7 = vadd.f32 %v5995_v2, %v5983_v46  ;;  %v6008_v8 = vpop.f32.mrf.mxu3  ;;  %v8312_v33 = vld [vmem:[%s9544_s30 + $0x314] sm:$0xf]  ;;  %v6912_v38 = vor.u32 %v8280_v28, %v6909_v27  ;;  %v8294_v44 = vld [vmem:[%s9544_s30 + $0x284] sm:$0xf]  ;;  %v7029_v49 = vld [vmem:[%s9544_s30 + $0x308] sm:$0xf0] }
 0x28a   : > { %6247 = vmatpush.bf16.msrb.mxu2 %v7016_v62  ;;  %v8282_v62 = vld [vmem:[%s9544_s30 + $0x224] sm:$0xf]  ;;  %v7333_v27 = vld [vmem:[%s9544_s30 + $0x568] sm:$0xf0] }
 0x28b   : > { %6260 = vmatpush.bf16.msrb.mxu3 %v7080_v3  ;;  %v7144_v3 = vor.u32 %v8338_v51, %v7141_v52  ;;  %v5984_v34 = vpop.f32.mrf.mxu1  ;;  %v10159_v16 = vadd.f32 %v6008_v8, %v5996_v7  ;;  %v6920_v18 = vor.u32 %v8282_v62, %v6917_v0  ;;  %v8310_v48 = vld [vmem:[%s9544_s30 + $0x304] sm:$0xf]  ;;  %v7117_v51 = vld [vmem:[%s9544_s30 + $0x3b8] sm:$0xf0]  ;;  %v8356_v52 = vld [vmem:[%s9544_s30 + $0x474] sm:$0xf] }
 0x28c   : > { %6226 = vmatpush.bf16.msrb.mxu0 %v6848_v9  ;;  %v7045_v9 = vld [vmem:[%s9544_s30 + $0x328] sm:$0xf0]  ;;  %v8372_v62 = vld [vmem:[%s9544_s30 + $0x4f4] sm:$0xf]  ;;  %v7277_v0 = vld [vmem:[%s9544_s30 + $0x4f8] sm:$0xf0] }
 0x28d   : > { %6235 = vmatpush.bf16.msrb.mxu1 %v6944_v10  ;;  %v7133_v10 = vld [vmem:[%s9544_s30 + $0x3d8] sm:$0xf0]  ;;  %v7280_v8 = vor.u32 %v8372_v62, %v7277_v0  ;;  %v7205_v34 = vld [vmem:[%s9544_s30 + $0x468] sm:$0xf0]  ;;  %v8386_v28 = vld [vmem:[%s9544_s30 + $0x564] sm:$0xf] }
 0x28e   : > { %6248 = vmatpush.bf16.msrb.mxu2 %v7008_v11  ;;  %v5971_v11 = vpop.f32.mrf.mxu0  ;;  %v7136_v29 = vor.u32 %v8336_v40, %v7133_v10  ;;  %v7109_v40 = vld [vmem:[%s9544_s30 + $0x3a8] sm:$0xf0]  ;;  %v8354_v10 = vld [vmem:[%s9544_s30 + $0x464] sm:$0xf] }
 0x28f   : > { %6261 = vmatpush.bf16.msrb.mxu3 %v7072_v19  ;;  %v6984_v19 = vor.u32 %v8298_v4, %v6981_v5  ;;  %v7341_v4 = vld [vmem:[%s9544_s30 + $0x578] sm:$0xf0]  ;;  %v7032_v5 = vor.u32 %v8310_v48, %v7029_v49  ;;  %v8350_v48 = vld [vmem:[%s9544_s30 + $0x444] sm:$0xf] }
 0x290   : > { %6227 = vmatpush.bf16.msrb.mxu0 %v6840_v37  ;;  %v7125_v37 = vld [vmem:[%s9544_s30 + $0x3c8] sm:$0xf0]  ;;  %v5997_v42 = vpop.f32.mrf.mxu2 }
 0x291   : > { %6236 = vmatpush.bf16.msrb.mxu1 %v6936_v39  ;;  %v6976_v39 = vor.u32 %v8296_v31, %v6973_v32  ;;  %v7128_v46 = vor.u32 %v8334_v36, %v7125_v37  ;;  %v8328_v32 = vld [vmem:[%s9544_s30 + $0x394] sm:$0xf]  ;;  %v7336_v36 = vor.u32 %v8386_v28, %v7333_v27  ;;  %v7197_v37 = vld [vmem:[%s9544_s30 + $0x458] sm:$0xf0]  ;;  %v7253_v42 = vld [vmem:[%s9544_s30 + $0x4c8] sm:$0xf0] }
 0x292   : > { %6249 = vmatpush.bf16.msrb.mxu2 %v7000_v41  ;;  %v8278_v41 = vld [vmem:[%s9544_s30 + $0x204] sm:$0xf]  ;;  %v7173_v27 = vld [vmem:[%s9544_s30 + $0x428] sm:$0xf0] }
 0x293   : > { %6262 = vmatpush.bf16.msrb.mxu3 %v7064_v45  ;;  %6228 = vmatmul.bf16.vlgmr.msrb.gmra.mxu0 %v9653_v30  ;;  %v7048_v30 = vor.u32 %v8314_v6, %v7045_v9  ;;  %v7040_v45 = vor.u32 %v8312_v33, %v7037_v35  ;;  %v7120_v6 = vor.u32 %v8332_v50, %v7117_v51  ;;  %v8330_v9 = vld [vmem:[%s9544_s30 + $0x3a4] sm:$0xf]  ;;  %v7101_v33 = vld [vmem:[%s9544_s30 + $0x398] sm:$0xf0]  ;;  %v8352_v35 = vld [vmem:[%s9544_s30 + $0x454] sm:$0xf] }
 0x294   : > { %6272 = vmatpush.bf16.msra.mxu0 %v7152_v47  ;;  %v6965_v47 = vld [vmem:[%s9544_s30 + $0x288] sm:$0xf0]  ;;  %v8382_v50 = vld [vmem:[%s9544_s30 + $0x544] sm:$0xf] }
 0x295   : > { %6237 = vmatpush.bf16.msrb.mxu1 %v6928_v53  ;;  %v6010_v53 = vpop.f32.mrf.mxu3  ;;  %v6968_v2 = vor.u32 %v8294_v44, %v6965_v47  ;;  %v7104_v44 = vor.u32 %v8328_v32, %v7101_v33  ;;  %v7093_v47 = vld [vmem:[%s9544_s30 + $0x388] sm:$0xf0]  ;;  %v8346_v28 = vld [vmem:[%s9544_s30 + $0x424] sm:$0xf] }
 0x296   : > { %6250 = vmatpush.bf16.msrb.mxu2 %v6992_v60  ;;  %v7213_v60 = vld [vmem:[%s9544_s30 + $0x478] sm:$0xf0]  ;;  %v8404_v53 = vld [vmem:[%s9544_s30 + $0x5f4] sm:$0xf]  ;;  %v8362_v32 = vld [vmem:[%s9544_s30 + $0x4a4] sm:$0xf] }
 0x297   : > { %6263 = vmatpush.bf16.msrb.mxu3 %v7056_v1  ;;  %v6904_v1 = vor.u32 %v8278_v41, %v6901_v43  ;;  %v7216_v7 = vor.u32 %v8356_v52, %v7213_v60  ;;  %v8384_v41 = vld [vmem:[%s9544_s30 + $0x554] sm:$0xf]  ;;  %v7325_v43 = vld [vmem:[%s9544_s30 + $0x558] sm:$0xf0]  ;;  %v7317_v52 = vld [vmem:[%s9544_s30 + $0x548] sm:$0xf0] }
 0x298   : > { %6273 = vmatpush.bf16.msra.mxu0 %v7144_v3  ;;  %v8388_v3 = vld [vmem:[%s9544_s30 + $0x574] sm:$0xf]  ;;  %v7328_v49 = vor.u32 %v8384_v41, %v7325_v43  ;;  %v7405_v60 = vld [vmem:[%s9544_s30 + $0x5f8] sm:$0xf0]  ;;  %v7237_v33 = vld [vmem:[%s9544_s30 + $0x4a8] sm:$0xf0] }
 0x299   : > { %6238 = vmatpush.bf16.msrb.mxu1 %v6920_v18  ;;  %v7344_v11 = vor.u32 %v8388_v3, %v7341_v4  ;;  %v8370_v18 = vld [vmem:[%s9544_s30 + $0x4e4] sm:$0xf]  ;;  %v8348_v4 = vld [vmem:[%s9544_s30 + $0x434] sm:$0xf]  ;;  %v7389_v41 = vld [vmem:[%s9544_s30 + $0x5d8] sm:$0xf0] }
 0x29a   : > { %6251 = vmatpush.bf16.msrb.mxu2 %v6984_v19  ;;  %v7269_v19 = vld [vmem:[%s9544_s30 + $0x4e8] sm:$0xf0] }
 0x29b   : > { %6264 = vmatpush.bf16.msrb.mxu3 %v7048_v30  ;;  %v7112_v30 = vor.u32 %v8330_v9, %v7109_v40  ;;  %v7272_v31 = vor.u32 %v8370_v18, %v7269_v19  ;;  %v8364_v9 = vld [vmem:[%s9544_s30 + $0x4b4] sm:$0xf]  ;;  %v7245_v40 = vld [vmem:[%s9544_s30 + $0x4b8] sm:$0xf0] }
 0x29c   : > { %6274 = vmatpush.bf16.msra.mxu0 %v7136_v29  ;;  %v7208_v29 = vor.u32 %v8354_v10, %v7205_v34  ;;  %v7309_v10 = vld [vmem:[%s9544_s30 + $0x538] sm:$0xf0]  ;;  %v7397_v34 = vld [vmem:[%s9544_s30 + $0x5e8] sm:$0xf0]  ;;  %v7248_v19 = vor.u32 %v8364_v9, %v7245_v40  ;;  %v8420_v40 = vld [vmem:[%s9544_s30 + $0x674] sm:$0xf] }
 0x29d   : > { %6239 = vmatpush.bf16.msrb.mxu1 %v6912_v38  ;;  %v8368_v38 = vld [vmem:[%s9544_s30 + $0x4d4] sm:$0xf]  ;;  %v7373_v9 = vld [vmem:[%s9544_s30 + $0x5b8] sm:$0xf0] }
 0x29e   : > { %6252 = vmatpush.bf16.msrb.mxu2 %v6976_v39  ;;  %v7261_v39 = vld [vmem:[%s9544_s30 + $0x4d8] sm:$0xf0] }
 0x29f   : > { %6265 = vmatpush.bf16.msrb.mxu3 %v7040_v45  ;;  %v7200_v45 = vor.u32 %v8352_v35, %v7197_v37  ;;  %v8378_v35 = vld [vmem:[%s9544_s30 + $0x524] sm:$0xf] }
 0x2a0   : > { %6275 = vmatpush.bf16.msra.mxu0 %v7128_v46  ;;  %v7264_v46 = vor.u32 %v8368_v38, %v7261_v39  ;;  %v6021_v51 = vpop.f32.mrf.mxu0  ;;  %v7301_v38 = vld [vmem:[%s9544_s30 + $0x528] sm:$0xf0]  ;;  %v8400_v39 = vld [vmem:[%s9544_s30 + $0x5d4] sm:$0xf] }
 0x2a1   : > { %6240 = vmatpush.bf16.msrb.mxu1 %v6904_v1  ;;  %v6022_v62 = vadd.f32 %v6021_v51, %v10159_v16  ;;  %v6034_v1 = vpop.f32.mrf.mxu1  ;;  %v8380_v16 = vld [vmem:[%s9544_s30 + $0x534] sm:$0xf]  ;;  %v8398_v51 = vld [vmem:[%s9544_s30 + $0x5c4] sm:$0xf] }
 0x2a2   : > { %6253 = vmatpush.bf16.msrb.mxu2 %v6968_v2 }
 0x2a3   : > { %6266 = vmatpush.bf16.msrb.mxu3 %v7032_v5  ;;  %v7181_v5 = vld [vmem:[%s9544_s30 + $0x438] sm:$0xf0] }
 0x2a4   : > { %6276 = vmatpush.bf16.msra.mxu0 %v7120_v6  ;;  %6241 = vmatmul.bf16.vlgmr.msrb.gmra.mxu1 %v9681_v59  ;;  %v8366_v59 = vld [vmem:[%s9544_s30 + $0x4c4] sm:$0xf]  ;;  %v7320_v6 = vor.u32 %v8382_v50, %v7317_v52  ;;  %v7184_v18 = vor.u32 %v8348_v4, %v7181_v5  ;;  %v7293_v50 = vld [vmem:[%s9544_s30 + $0x518] sm:$0xf0]  ;;  %v7381_v52 = vld [vmem:[%s9544_s30 + $0x5c8] sm:$0xf0] }
 0x2a5   : > { %6285 = vmatpush.bf16.msra.mxu1 %v7216_v7  ;;  %6254 = vmatmul.bf16.vlgmr.msrb.gmra.mxu2 %v9688_v63  ;;  %v8326_v63 = vld [vmem:[%s9544_s30 + $0x384] sm:$0xf]  ;;  %v7256_v3 = vor.u32 %v8366_v59, %v7253_v42  ;;  %v6035_v7 = vadd.f32 %v6034_v1, %v6022_v62  ;;  %v7229_v59 = vld [vmem:[%s9544_s30 + $0x498] sm:$0xf0]  ;;  %v8376_v42 = vld [vmem:[%s9544_s30 + $0x514] sm:$0xf] }
 0x2a6   : > { %6298 = vmatpush.bf16.msra.mxu2 %v7280_v8  ;;  %6267 = vmatmul.bf16.vlgmr.msrb.gmra.mxu3 %v9679_v58  ;;  %v7189_v58 = vld [vmem:[%s9544_s30 + $0x448] sm:$0xf0]  ;;  %v7096_v0 = vor.u32 %v8326_v63, %v7093_v47  ;;  %v7408_v8 = vor.u32 %v8404_v53, %v7405_v60  ;;  %v7165_v47 = vld [vmem:[%s9544_s30 + $0x418] sm:$0xf0]  ;;  %v8342_v62 = vld [vmem:[%s9544_s30 + $0x404] sm:$0xf] }
 0x2a7   : > { %6311 = vmatpush.bf16.msra.mxu3 %v7344_v11  ;;  %v7192_v2 = vor.u32 %v8350_v48, %v7189_v58  ;;  %v8402_v11 = vld [vmem:[%s9544_s30 + $0x5e4] sm:$0xf]  ;;  %v7304_v48 = vor.u32 %v8378_v35, %v7301_v38  ;;  %v7392_v58 = vor.u32 %v8400_v39, %v7389_v41  ;;  %v7221_v4 = vld [vmem:[%s9544_s30 + $0x488] sm:$0xf0] }
 0x2a8   : > { %6277 = vmatpush.bf16.msra.mxu0 %v7112_v30  ;;  %v7312_v30 = vor.u32 %v8380_v16, %v7309_v10  ;;  %v6023_v43 = vpop.f32.mrf.mxu0  ;;  %v8358_v1 = vld [vmem:[%s9544_s30 + $0x484] sm:$0xf]  ;;  %v7469_v10 = vld [vmem:[%s9544_s30 + $0x678] sm:$0xf0]  ;;  %v7365_v35 = vld [vmem:[%s9544_s30 + $0x5a8] sm:$0xf0] }
 0x2a9   : > { %6286 = vmatpush.bf16.msra.mxu1 %v7208_v29  ;;  %v6047_v29 = vpop.f32.mrf.mxu2  ;;  %v6060_v37 = vpop.f32.mrf.mxu3  ;;  %v8374_v5 = vld [vmem:[%s9544_s30 + $0x504] sm:$0xf]  ;;  %v7461_v38 = vld [vmem:[%s9544_s30 + $0x668] sm:$0xf0] }
 0x2aa   : > { %6299 = vmatpush.bf16.msra.mxu2 %v7272_v31  ;;  %v7400_v31 = vor.u32 %v8402_v11, %v7397_v34  ;;  %v8436_v11 = vld [vmem:[%s9544_s30 + $0x6f4] sm:$0xf]  ;;  %v7533_v34 = vld [vmem:[%s9544_s30 + $0x6f8] sm:$0xf0]  ;;  %v8434_v39 = vld [vmem:[%s9544_s30 + $0x6e4] sm:$0xf] }
 0x2ab   : > { %6312 = vmatpush.bf16.msra.mxu3 %v7336_v36  ;;  %v6048_v36 = vadd.f32 %v6047_v29, %v6035_v7  ;;  %v7525_v41 = vld [vmem:[%s9544_s30 + $0x6e8] sm:$0xf0]  ;;  %v8450_v43 = vld [vmem:[%s9544_s30 + $0x764] sm:$0xf] }
 0x2ac   : > { %6278 = vmatpush.bf16.msra.mxu0 %v7104_v44  ;;  %v6036_v44 = vpop.f32.mrf.mxu1 }
 0x2ad   : > { %6287 = vmatpush.bf16.msra.mxu1 %v7200_v45  ;;  %v10230_v63 = vadd.f32 %v6060_v37, %v6048_v36  ;;  %v7176_v45 = vor.u32 %v8346_v28, %v7173_v27  ;;  %v8452_v28 = vld [vmem:[%s9544_s30 + $0x774] sm:$0xf]  ;;  %v7597_v27 = vld [vmem:[%s9544_s30 + $0x778] sm:$0xf0]  ;;  %v8418_v36 = vld [vmem:[%s9544_s30 + $0x664] sm:$0xf] }
 0x2ae   : > { %6300 = vmatpush.bf16.msra.mxu2 %v7264_v46  ;;  %v7240_v46 = vor.u32 %v8362_v32, %v7237_v33  ;;  %v7536_v32 = vor.u32 %v8436_v11, %v7533_v34  ;;  %v8394_v33 = vld [vmem:[%s9544_s30 + $0x5a4] sm:$0xf]  ;;  %v7600_v37 = vor.u32 %v8452_v28, %v7597_v27  ;;  %v7589_v44 = vld [vmem:[%s9544_s30 + $0x768] sm:$0xf0]  ;;  %v8412_v34 = vld [vmem:[%s9544_s30 + $0x634] sm:$0xf] }
 0x2af   : > { %6313 = vmatpush.bf16.msra.mxu3 %v7328_v49  ;;  %v8360_v49 = vld [vmem:[%s9544_s30 + $0x494] sm:$0xf] }
 0x2b0   : > { %6279 = vmatpush.bf16.msra.mxu0 %v7096_v0  ;;  %v7232_v60 = vor.u32 %v8360_v49, %v7229_v59  ;;  %v7157_v0 = vld [vmem:[%s9544_s30 + $0x408] sm:$0xf0]  ;;  %v7592_v49 = vor.u32 %v8450_v43, %v7589_v44  ;;  %v7453_v59 = vld [vmem:[%s9544_s30 + $0x658] sm:$0xf0]  ;;  %v8426_v44 = vld [vmem:[%s9544_s30 + $0x6a4] sm:$0xf] }
 0x2b1   : > { %6288 = vmatpush.bf16.msra.mxu1 %v7192_v2  ;;  %v7296_v2 = vor.u32 %v8376_v42, %v7293_v50  ;;  %v6049_v7 = vpop.f32.mrf.mxu2  ;;  %v6062_v16 = vpop.f32.mrf.mxu3  ;;  %v8432_v42 = vld [vmem:[%s9544_s30 + $0x6d4] sm:$0xf]  ;;  %v7517_v50 = vld [vmem:[%s9544_s30 + $0x6d8] sm:$0xf0] }
 0x2b2   : > { %6301 = vmatpush.bf16.msra.mxu2 %v7256_v3  ;;  %v7384_v3 = vor.u32 %v8398_v51, %v7381_v52  ;;  %v8448_v51 = vld [vmem:[%s9544_s30 + $0x754] sm:$0xf]  ;;  %v7581_v52 = vld [vmem:[%s9544_s30 + $0x758] sm:$0xf0] }
 0x2b3   : > { %6314 = vmatpush.bf16.msra.mxu3 %v7320_v6  ;;  %6280 = vmatmul.bf16.vlgmr.msra.gmra.mxu0 %v9683_v61  ;;  %v8344_v61 = vld [vmem:[%s9544_s30 + $0x414] sm:$0xf]  ;;  %v7285_v6 = vld [vmem:[%s9544_s30 + $0x508] sm:$0xf0] }
 0x2b4   : > { %6324 = vmatpush.bf16.msrb.mxu0 %v7408_v8  ;;  %v7168_v53 = vor.u32 %v8344_v61, %v7165_v47  ;;  %v8396_v8 = vld [vmem:[%s9544_s30 + $0x5b4] sm:$0xf]  ;;  %v7528_v61 = vor.u32 %v8434_v39, %v7525_v41 }
 0x2b5   : > { %6289 = vmatpush.bf16.msra.mxu1 %v7184_v18  ;;  %v7160_v18 = vor.u32 %v8342_v62, %v7157_v0  ;;  %v7376_v29 = vor.u32 %v8396_v8, %v7373_v9  ;;  %v8392_v47 = vld [vmem:[%s9544_s30 + $0x594] sm:$0xf]  ;;  %v7520_v62 = vor.u32 %v8432_v42, %v7517_v50  ;;  %v7349_v0 = vld [vmem:[%s9544_s30 + $0x588] sm:$0xf0]  ;;  %v7661_v8 = vld [vmem:[%s9544_s30 + $0x7f8] sm:$0xf0] }
 0x2b6   : > { %6302 = vmatpush.bf16.msra.mxu2 %v7248_v19  ;;  %v7224_v19 = vor.u32 %v8358_v1, %v7221_v4  ;;  %v8414_v1 = vld [vmem:[%s9544_s30 + $0x644] sm:$0xf]  ;;  %v8468_v7 = vld [vmem:[%s9544_s30 + $0x7f4] sm:$0xf] }
 0x2b7   : > { %6315 = vmatpush.bf16.msra.mxu3 %v7312_v30  ;;  %v7288_v30 = vor.u32 %v8374_v5, %v7285_v6  ;;  %v8446_v4 = vld [vmem:[%s9544_s30 + $0x744] sm:$0xf]  ;;  %v7573_v6 = vld [vmem:[%s9544_s30 + $0x748] sm:$0xf0]  ;;  %v7664_v27 = vor.u32 %v8468_v7, %v7661_v8 }
 0x2b8   : > { %6325 = vmatpush.bf16.msrb.mxu0 %v7400_v31  ;;  %v7472_v31 = vor.u32 %v8420_v40, %v7469_v10  ;;  %v8422_v7 = vld [vmem:[%s9544_s30 + $0x684] sm:$0xf] }
 0x2b9   : > { %6290 = vmatpush.bf16.msra.mxu1 %v7176_v45  ;;  %v7368_v45 = vor.u32 %v8394_v33, %v7365_v35  ;;  %v7653_v33 = vld [vmem:[%s9544_s30 + $0x7e8] sm:$0xf0] }
 0x2ba   : > { %6303 = vmatpush.bf16.msra.mxu2 %v7240_v46  ;;  %v7464_v46 = vor.u32 %v8418_v36, %v7461_v38  ;;  %v7429_v38 = vld [vmem:[%s9544_s30 + $0x628] sm:$0xf0] }
 0x2bb   : > { %6316 = vmatpush.bf16.msra.mxu3 %v7304_v48  ;;  %v7357_v48 = vld [vmem:[%s9544_s30 + $0x598] sm:$0xf0] }
 0x2bc   : > { %6326 = vmatpush.bf16.msrb.mxu0 %v7392_v58  ;;  %v8416_v58 = vld [vmem:[%s9544_s30 + $0x654] sm:$0xf] }
 0x2bd   : > { %6291 = vmatpush.bf16.msra.mxu1 %v7168_v53  ;;  %v7360_v53 = vor.u32 %v8392_v47, %v7357_v48  ;;  %v7557_v48 = vld [vmem:[%s9544_s30 + $0x728] sm:$0xf0] }
 0x2be   : > { %6304 = vmatpush.bf16.msra.mxu2 %v7232_v60  ;;  %v7456_v60 = vor.u32 %v8416_v58, %v7453_v59  ;;  %v8464_v58 = vld [vmem:[%s9544_s30 + $0x7d4] sm:$0xf] }
 0x2bf   : > { %6317 = vmatpush.bf16.msra.mxu3 %v7296_v2  ;;  %v7584_v2 = vor.u32 %v8448_v51, %v7581_v52 }
 0x2c0   : > { %6327 = vmatpush.bf16.msrb.mxu0 %v7384_v3  ;;  %v7509_v3 = vld [vmem:[%s9544_s30 + $0x6c8] sm:$0xf0]  ;;  %v6073_v5 = vpop.f32.mrf.mxu0 }
 0x2c1   : > { %6292 = vmatpush.bf16.msra.mxu1 %v7160_v18  ;;  %v6074_v9 = vadd.f32 %v6073_v5, %v10230_v63  ;;  %v6086_v16 = vpop.f32.mrf.mxu1  ;;  %v7437_v18 = vld [vmem:[%s9544_s30 + $0x638] sm:$0xf0]  ;;  %v8444_v63 = vld [vmem:[%s9544_s30 + $0x734] sm:$0xf]  ;;  %v8406_v5 = vld [vmem:[%s9544_s30 + $0x604] sm:$0xf] }
 0x2c2   : > { %6305 = vmatpush.bf16.msra.mxu2 %v7224_v19  ;;  %v7576_v19 = vor.u32 %v8446_v4, %v7573_v6  ;;  %v7440_v35 = vor.u32 %v8412_v34, %v7437_v18  ;;  %v7413_v6 = vld [vmem:[%s9544_s30 + $0x608] sm:$0xf0]  ;;  %v8460_v34 = vld [vmem:[%s9544_s30 + $0x7b4] sm:$0xf]  ;;  %v7629_v18 = vld [vmem:[%s9544_s30 + $0x7b8] sm:$0xf0] }
 0x2c3   : > { %6318 = vmatpush.bf16.msra.mxu3 %v7288_v30  ;;  %v6087_v28 = vadd.f32 %v6086_v16, %v6074_v9  ;;  %v8428_v30 = vld [vmem:[%s9544_s30 + $0x6b4] sm:$0xf]  ;;  %v8438_v16 = vld [vmem:[%s9544_s30 + $0x704] sm:$0xf] }
 0x2c4   : > { %6328 = vmatpush.bf16.msrb.mxu0 %v7376_v29  ;;  %6293 = vmatmul.bf16.vlgmr.msra.gmra.mxu1 %v9782_v20  ;;  %v8390_v20 = vld [vmem:[%s9544_s30 + $0x584] sm:$0xf]  ;;  %v7501_v29 = vld [vmem:[%s9544_s30 + $0x6b8] sm:$0xf0] }
 0x2c5   : > { %6337 = vmatpush.bf16.msrb.mxu1 %v7472_v31  ;;  %6306 = vmatmul.bf16.vlgmr.msra.gmra.mxu2 %v9788_v24  ;;  %v7445_v24 = vld [vmem:[%s9544_s30 + $0x648] sm:$0xf0]  ;;  %v7352_v40 = vor.u32 %v8390_v20, %v7349_v0  ;;  %v7565_v31 = vld [vmem:[%s9544_s30 + $0x738] sm:$0xf0]  ;;  %v7504_v36 = vor.u32 %v8428_v30, %v7501_v29  ;;  %v8500_v30 = vld [vmem:[%s9544_s30 + $0x8f4] sm:$0xf] }
 0x2c6   : > { %6350 = vmatpush.bf16.msrb.mxu2 %v7536_v32  ;;  %6319 = vmatmul.bf16.vlgmr.msra.gmra.mxu3 %v9786_v23  ;;  %v8430_v23 = vld [vmem:[%s9544_s30 + $0x6c4] sm:$0xf]  ;;  %v7448_v10 = vor.u32 %v8414_v1, %v7445_v24  ;;  %v7568_v39 = vor.u32 %v8444_v63, %v7565_v31  ;;  %v7485_v0 = vld [vmem:[%s9544_s30 + $0x698] sm:$0xf0]  ;;  %v8440_v1 = vld [vmem:[%s9544_s30 + $0x714] sm:$0xf]  ;;  %v7416_v63 = vor.u32 %v8406_v5, %v7413_v6 }
 0x2c7   : > { %6363 = vmatpush.bf16.msrb.mxu3 %v7600_v37  ;;  %v7512_v11 = vor.u32 %v8430_v23, %v7509_v3  ;;  %v8466_v32 = vld [vmem:[%s9544_s30 + $0x7e4] sm:$0xf]  ;;  %v7549_v24 = vld [vmem:[%s9544_s30 + $0x718] sm:$0xf0]  ;;  %v7637_v23 = vld [vmem:[%s9544_s30 + $0x7c8] sm:$0xf0] }
 0x2c8   : > { %6329 = vmatpush.bf16.msrb.mxu0 %v7368_v45  ;;  %v8410_v37 = vld [vmem:[%s9544_s30 + $0x624] sm:$0xf]  ;;  %v6099_v41 = vpop.f32.mrf.mxu2  ;;  %v7656_v43 = vor.u32 %v8466_v32, %v7653_v33  ;;  %v7493_v45 = vld [vmem:[%s9544_s30 + $0x6a8] sm:$0xf0]  ;;  %v6075_v59 = vpop.f32.mrf.mxu0  ;;  %v7552_v8 = vor.u32 %v8440_v1, %v7549_v24  ;;  %v7789_v29 = vld [vmem:[%s9544_s30 + $0x8f8] sm:$0xf0] }
 0x2c9   : > { %6338 = vmatpush.bf16.msrb.mxu1 %v7464_v46  ;;  %v8442_v46 = vld [vmem:[%s9544_s30 + $0x724] sm:$0xf]  ;;  %v6112_v47 = vpop.f32.mrf.mxu3  ;;  %v6088_v42 = vpop.f32.mrf.mxu1  ;;  %v7432_v51 = vor.u32 %v8410_v37, %v7429_v38  ;;  %v7496_v52 = vor.u32 %v8426_v44, %v7493_v45  ;;  %v8516_v32 = vld [vmem:[%s9544_s30 + $0x974] sm:$0xf]  ;;  %v7853_v33 = vld [vmem:[%s9544_s30 + $0x978] sm:$0xf0]  ;;  %v7792_v38 = vor.u32 %v8500_v30, %v7789_v29 }
 0x2ca   : > { %6351 = vmatpush.bf16.msrb.mxu2 %v7528_v61  ;;  %v6100_v61 = vadd.f32 %v6099_v41, %v6087_v28  ;;  %v7560_v20 = vor.u32 %v8442_v46, %v7557_v48  ;;  %v7621_v41 = vld [vmem:[%s9544_s30 + $0x7a8] sm:$0xf0]  ;;  %v7856_v44 = vor.u32 %v8516_v32, %v7853_v33  ;;  %v8498_v46 = vld [vmem:[%s9544_s30 + $0x8e4] sm:$0xf]  ;;  %v8456_v42 = vld [vmem:[%s9544_s30 + $0x794] sm:$0xf] }
 0x2cb   : > { %6364 = vmatpush.bf16.msrb.mxu3 %v7592_v49  ;;  %v7645_v49 = vld [vmem:[%s9544_s30 + $0x7d8] sm:$0xf0]  ;;  %v7717_v45 = vld [vmem:[%s9544_s30 + $0x868] sm:$0xf0]  ;;  %v8510_v6 = vld [vmem:[%s9544_s30 + $0x944] sm:$0xf] }
 0x2cc   : > { %6330 = vmatpush.bf16.msrb.mxu0 %v7360_v53  ;;  %v10301_v50 = vadd.f32 %v6112_v47, %v6100_v61  ;;  %v7421_v53 = vld [vmem:[%s9544_s30 + $0x618] sm:$0xf0]  ;;  %v7781_v61 = vld [vmem:[%s9544_s30 + $0x8e8] sm:$0xf0]  ;;  %v8514_v47 = vld [vmem:[%s9544_s30 + $0x964] sm:$0xf] }
 0x2cd   : > { %6339 = vmatpush.bf16.msrb.mxu1 %v7456_v60  ;;  %v7648_v60 = vor.u32 %v8464_v58, %v7645_v49  ;;  %v7845_v48 = vld [vmem:[%s9544_s30 + $0x968] sm:$0xf0]  ;;  %v7784_v59 = vor.u32 %v8498_v46, %v7781_v61  ;;  %v7821_v32 = vld [vmem:[%s9544_s30 + $0x938] sm:$0xf0]  ;;  %v8530_v33 = vld [vmem:[%s9544_s30 + $0x9e4] sm:$0xf] }
 0x2ce   : > { %6352 = vmatpush.bf16.msrb.mxu2 %v7520_v62  ;;  %v8424_v62 = vld [vmem:[%s9544_s30 + $0x694] sm:$0xf]  ;;  %v7765_v5 = vld [vmem:[%s9544_s30 + $0x8c8] sm:$0xf0]  ;;  %v8506_v61 = vld [vmem:[%s9544_s30 + $0x924] sm:$0xf] }
 0x2cf   : > { %6365 = vmatpush.bf16.msrb.mxu3 %v7584_v2  ;;  %v8462_v2 = vld [vmem:[%s9544_s30 + $0x7c4] sm:$0xf]  ;;  %v7488_v4 = vor.u32 %v8424_v62, %v7485_v0  ;;  %v8512_v62 = vld [vmem:[%s9544_s30 + $0x954] sm:$0xf]  ;;  %v7837_v0 = vld [vmem:[%s9544_s30 + $0x958] sm:$0xf0] }
 0x2d0   : > { %6331 = vmatpush.bf16.msrb.mxu0 %v7352_v40  ;;  %v7640_v9 = vor.u32 %v8462_v2, %v7637_v23  ;;  %v7477_v40 = vld [vmem:[%s9544_s30 + $0x688] sm:$0xf0] }
 0x2d1   : > { %6340 = vmatpush.bf16.msrb.mxu1 %v7448_v10  ;;  %v7541_v10 = vld [vmem:[%s9544_s30 + $0x708] sm:$0xf0]  ;;  %v6114_v28 = vpop.f32.mrf.mxu3  ;;  %v7480_v31 = vor.u32 %v8422_v7, %v7477_v40  ;;  %v7917_v40 = vld [vmem:[%s9544_s30 + $0x9f8] sm:$0xf0] }
 0x2d2   : > { %6353 = vmatpush.bf16.msrb.mxu2 %v7512_v11  ;;  %v6101_v11 = vpop.f32.mrf.mxu2  ;;  %v7605_v23 = vld [vmem:[%s9544_s30 + $0x788] sm:$0xf0]  ;;  %v7693_v28 = vld [vmem:[%s9544_s30 + $0x838] sm:$0xf0] }
 0x2d3   : > { %6366 = vmatpush.bf16.msrb.mxu3 %v7576_v19  ;;  %6332 = vmatmul.bf16.vlgmr.msrb.gmra.mxu0 %v9790_v25  ;;  %v8408_v25 = vld [vmem:[%s9544_s30 + $0x614] sm:$0xf]  ;;  %v7749_v46 = vld [vmem:[%s9544_s30 + $0x8a8] sm:$0xf0] }
 0x2d4   : > { %6376 = vmatpush.bf16.msra.mxu0 %v7664_v27  ;;  %v7424_v3 = vor.u32 %v8408_v25, %v7421_v53  ;;  %v8484_v19 = vld [vmem:[%s9544_s30 + $0x874] sm:$0xf]  ;;  %v7725_v27 = vld [vmem:[%s9544_s30 + $0x878] sm:$0xf0]  ;;  %v7848_v25 = vor.u32 %v8514_v47, %v7845_v48 }
 0x2d5   : > { %6341 = vmatpush.bf16.msrb.mxu1 %v7440_v35  ;;  %v7544_v35 = vor.u32 %v8438_v16, %v7541_v10  ;;  %v7728_v37 = vor.u32 %v8484_v19, %v7725_v27  ;;  %v7709_v53 = vld [vmem:[%s9544_s30 + $0x858] sm:$0xf0]  ;;  %v8476_v19 = vld [vmem:[%s9544_s30 + $0x834] sm:$0xf] }
 0x2d6   : > { %6354 = vmatpush.bf16.msrb.mxu2 %v7504_v36  ;;  %v7632_v36 = vor.u32 %v8460_v34, %v7629_v18 }
 0x2d7   : > { %6367 = vmatpush.bf16.msrb.mxu3 %v7568_v39  ;;  %v8458_v39 = vld [vmem:[%s9544_s30 + $0x7a4] sm:$0xf] }
 0x2d8   : > { %6377 = vmatpush.bf16.msra.mxu0 %v7656_v43  ;;  %v8482_v43 = vld [vmem:[%s9544_s30 + $0x864] sm:$0xf]  ;;  %v7624_v58 = vor.u32 %v8458_v39, %v7621_v41  ;;  %v7685_v39 = vld [vmem:[%s9544_s30 + $0x828] sm:$0xf0] }
 0x2d9   : > { %6342 = vmatpush.bf16.msrb.mxu1 %v7432_v51  ;;  %v7720_v49 = vor.u32 %v8482_v43, %v7717_v45  ;;  %v7613_v51 = vld [vmem:[%s9544_s30 + $0x798] sm:$0xf0]  ;;  %v8490_v45 = vld [vmem:[%s9544_s30 + $0x8a4] sm:$0xf] }
 0x2da   : > { %6355 = vmatpush.bf16.msrb.mxu2 %v7496_v52  ;;  %v8480_v52 = vld [vmem:[%s9544_s30 + $0x854] sm:$0xf]  ;;  %v7616_v1 = vor.u32 %v8456_v42, %v7613_v51  ;;  %v7901_v42 = vld [vmem:[%s9544_s30 + $0x9d8] sm:$0xf0] }
 0x2db   : > { %6368 = vmatpush.bf16.msrb.mxu3 %v7560_v20  ;;  %v8496_v20 = vld [vmem:[%s9544_s30 + $0x8d4] sm:$0xf]  ;;  %v7712_v24 = vor.u32 %v8480_v52, %v7709_v53  ;;  %v7752_v53 = vor.u32 %v8490_v45, %v7749_v46  ;;  %v8562_v45 = vld [vmem:[%s9544_s30 + $0xae4] sm:$0xf]  ;;  %v8037_v46 = vld [vmem:[%s9544_s30 + $0xae8] sm:$0xf0] }
 0x2dc   : > { %6378 = vmatpush.bf16.msra.mxu0 %v7648_v60  ;;  %v7773_v60 = vld [vmem:[%s9544_s30 + $0x8d8] sm:$0xf0] }
 0x2dd   : > { %6343 = vmatpush.bf16.msrb.mxu1 %v7424_v3  ;;  %v7776_v2 = vor.u32 %v8496_v20, %v7773_v60  ;;  %v8478_v3 = vld [vmem:[%s9544_s30 + $0x844] sm:$0xf]  ;;  %v8472_v20 = vld [vmem:[%s9544_s30 + $0x814] sm:$0xf] }
 0x2de   : > { %6356 = vmatpush.bf16.msrb.mxu2 %v7488_v4  ;;  %v7840_v4 = vor.u32 %v8512_v62, %v7837_v0  ;;  %v8488_v0 = vld [vmem:[%s9544_s30 + $0x894] sm:$0xf] }
 0x2df   : > { %6369 = vmatpush.bf16.msrb.mxu3 %v7552_v8  ;;  %v7829_v8 = vld [vmem:[%s9544_s30 + $0x948] sm:$0xf0] }
 0x2e0   : > { %6379 = vmatpush.bf16.msra.mxu0 %v7640_v9  ;;  %v6125_v7 = vpop.f32.mrf.mxu0  ;;  %v8532_v9 = vld [vmem:[%s9544_s30 + $0x9f4] sm:$0xf]  ;;  %v7832_v27 = vor.u32 %v8510_v6, %v7829_v8  ;;  %v7733_v8 = vld [vmem:[%s9544_s30 + $0x888] sm:$0xf0] }
 0x2e1   : > { %6344 = vmatpush.bf16.msrb.mxu1 %v7416_v63  ;;  %v6126_v16 = vadd.f32 %v6125_v7, %v10301_v50  ;;  %v6138_v11 = vpop.f32.mrf.mxu1  ;;  %v7920_v29 = vor.u32 %v8532_v9, %v7917_v40  ;;  %v8492_v63 = vld [vmem:[%s9544_s30 + $0x8b4] sm:$0xf]  ;;  %v8502_v9 = vld [vmem:[%s9544_s30 + $0x904] sm:$0xf]  ;;  %v7797_v40 = vld [vmem:[%s9544_s30 + $0x908] sm:$0xf0] }
 0x2e2   : > { %6357 = vmatpush.bf16.msrb.mxu2 %v7480_v31  ;;  %v7757_v31 = vld [vmem:[%s9544_s30 + $0x8b8] sm:$0xf0]  ;;  %v8508_v50 = vld [vmem:[%s9544_s30 + $0x934] sm:$0xf] }
 0x2e3   : > { %6370 = vmatpush.bf16.msrb.mxu3 %v7544_v35  ;;  %v6139_v30 = vadd.f32 %v6138_v11, %v6126_v16  ;;  %v7909_v35 = vld [vmem:[%s9544_s30 + $0x9e8] sm:$0xf0]  ;;  %v7824_v41 = vor.u32 %v8508_v50, %v7821_v32  ;;  %v7885_v11 = vld [vmem:[%s9544_s30 + $0x9b8] sm:$0xf0]  ;;  %v8580_v50 = vld [vmem:[%s9544_s30 + $0xb74] sm:$0xf] }
 0x2e4   : > { %6380 = vmatpush.bf16.msra.mxu0 %v7632_v36  ;;  %6345 = vmatmul.bf16.vlgmr.msrb.gmra.mxu1 %v9848_v54  ;;  %v8454_v54 = vld [vmem:[%s9544_s30 + $0x784] sm:$0xf]  ;;  %v7696_v36 = vor.u32 %v8476_v19, %v7693_v28  ;;  %v7981_v28 = vld [vmem:[%s9544_s30 + $0xa78] sm:$0xf0] }
 0x2e5   : > { %6389 = vmatpush.bf16.msra.mxu1 %v7728_v37  ;;  %6358 = vmatmul.bf16.vlgmr.msrb.gmra.mxu2 %v9852_v56  ;;  %v7701_v56 = vld [vmem:[%s9544_s30 + $0x848] sm:$0xf0]  ;;  %v7608_v10 = vor.u32 %v8454_v54, %v7605_v23  ;;  %v7760_v37 = vor.u32 %v8492_v63, %v7757_v31  ;;  %v8504_v54 = vld [vmem:[%s9544_s30 + $0x914] sm:$0xf]  ;;  %v8109_v32 = vld [vmem:[%s9544_s30 + $0xb78] sm:$0xf0] }
 0x2e6   : > { %6402 = vmatpush.bf16.msra.mxu2 %v7792_v38  ;;  %6371 = vmatmul.bf16.vlgmr.msrb.gmra.mxu3 %v9850_v55  ;;  %v8494_v55 = vld [vmem:[%s9544_s30 + $0x8c4] sm:$0xf]  ;;  %v7704_v34 = vor.u32 %v8478_v3, %v7701_v56  ;;  %v7893_v23 = vld [vmem:[%s9544_s30 + $0x9c8] sm:$0xf0] }
 0x2e7   : > { %6415 = vmatpush.bf16.msra.mxu3 %v7856_v44  ;;  %v7768_v18 = vor.u32 %v8494_v55, %v7765_v5  ;;  %v8474_v38 = vld [vmem:[%s9544_s30 + $0x824] sm:$0xf]  ;;  %v7912_v44 = vor.u32 %v8530_v33, %v7909_v35  ;;  %v7669_v55 = vld [vmem:[%s9544_s30 + $0x808] sm:$0xf0]  ;;  %v7800_v33 = vor.u32 %v8502_v9, %v7797_v40 }
 0x2e8   : > { %6381 = vmatpush.bf16.msra.mxu0 %v7624_v58  ;;  %v6151_v43 = vpop.f32.mrf.mxu2  ;;  %v6127_v48 = vpop.f32.mrf.mxu0  ;;  %v8486_v5 = vld [vmem:[%s9544_s30 + $0x884] sm:$0xf] }
 0x2e9   : > { %6390 = vmatpush.bf16.msra.mxu1 %v7720_v49  ;;  %v6152_v47 = vadd.f32 %v6151_v43, %v6139_v30  ;;  %v6164_v58 = vpop.f32.mrf.mxu3  ;;  %v7813_v49 = vld [vmem:[%s9544_s30 + $0x928] sm:$0xf0]  ;;  %v6140_v51 = vpop.f32.mrf.mxu1  ;;  %v8045_v30 = vld [vmem:[%s9544_s30 + $0xaf8] sm:$0xf0]  ;;  %v7736_v31 = vor.u32 %v8486_v5, %v7733_v8  ;;  %v8112_v43 = vor.u32 %v8580_v50, %v8109_v32 }
 0x2ea   : > { %6403 = vmatpush.bf16.msra.mxu2 %v7784_v59  ;;  %v8528_v59 = vld [vmem:[%s9544_s30 + $0x9d4] sm:$0xf]  ;;  %v7816_v60 = vor.u32 %v8506_v61, %v7813_v49  ;;  %v8578_v61 = vld [vmem:[%s9544_s30 + $0xb64] sm:$0xf]  ;;  %v8040_v49 = vor.u32 %v8562_v45, %v8037_v46  ;;  %v8085_v5 = vld [vmem:[%s9544_s30 + $0xb48] sm:$0xf0] }
 0x2eb   : > { %6416 = vmatpush.bf16.msra.mxu3 %v7848_v25  ;;  %v6165_v52 = vadd.f32 %v6164_v58, %v6152_v47  ;;  %v7688_v25 = vor.u32 %v8474_v38, %v7685_v39  ;;  %v7904_v62 = vor.u32 %v8528_v59, %v7901_v42  ;;  %v8522_v38 = vld [vmem:[%s9544_s30 + $0x9a4] sm:$0xf]  ;;  %v7877_v39 = vld [vmem:[%s9544_s30 + $0x9a8] sm:$0xf0]  ;;  %v8520_v59 = vld [vmem:[%s9544_s30 + $0x994] sm:$0xf] }
 0x2ec   : > { %6382 = vmatpush.bf16.msra.mxu0 %v7616_v1  ;;  %v7741_v1 = vld [vmem:[%s9544_s30 + $0x898] sm:$0xf0]  ;;  %v8101_v47 = vld [vmem:[%s9544_s30 + $0xb68] sm:$0xf0]  ;;  %v7880_v48 = vor.u32 %v8522_v38, %v7877_v39  ;;  %v8544_v51 = vld [vmem:[%s9544_s30 + $0xa54] sm:$0xf] }
 0x2ed   : > { %6391 = vmatpush.bf16.msra.mxu1 %v7712_v24  ;;  %v7805_v24 = vld [vmem:[%s9544_s30 + $0x918] sm:$0xf0]  ;;  %v7744_v56 = vor.u32 %v8488_v0, %v7741_v1  ;;  %v7861_v1 = vld [vmem:[%s9544_s30 + $0x988] sm:$0xf0] }
 0x2ee   : > { %6404 = vmatpush.bf16.msra.mxu2 %v7776_v2  ;;  %v8526_v2 = vld [vmem:[%s9544_s30 + $0x9c4] sm:$0xf]  ;;  %v7808_v6 = vor.u32 %v8504_v54, %v7805_v24  ;;  %v7869_v42 = vld [vmem:[%s9544_s30 + $0x998] sm:$0xf0]  ;;  %v8165_v50 = vld [vmem:[%s9544_s30 + $0xbe8] sm:$0xf0] }
 0x2ef   : > { %6417 = vmatpush.bf16.msra.mxu3 %v7840_v4  ;;  %v8470_v4 = vld [vmem:[%s9544_s30 + $0x804] sm:$0xf]  ;;  %v7896_v7 = vor.u32 %v8526_v2, %v7893_v23  ;;  %v7872_v0 = vor.u32 %v8520_v59, %v7869_v42 }
 0x2f0   : > { %6383 = vmatpush.bf16.msra.mxu0 %v7608_v10  ;;  %v6153_v16 = vpop.f32.mrf.mxu2  ;;  %v8524_v10 = vld [vmem:[%s9544_s30 + $0x9b4] sm:$0xf]  ;;  %v6177_v19 = vpop.f32.mrf.mxu0  ;;  %v7672_v63 = vor.u32 %v8470_v4, %v7669_v55  ;;  %v8542_v2 = vld [vmem:[%s9544_s30 + $0xa44] sm:$0xf]  ;;  %v8648_v4 = vld [vmem:[%s9986_s18] sm:$0x3] }
 0x2f1   : > { %6392 = vmatpush.bf16.msra.mxu1 %v7704_v34  ;;  %v8548_v34 = vld [vmem:[%s9544_s30 + $0xa74] sm:$0xf]  ;;  %v7888_v35 = vor.u32 %v8524_v10, %v7885_v11  ;;  %v8558_v23 = vld [vmem:[%s9544_s30 + $0xac4] sm:$0xf]  ;;  %v3833_v55 = vperm.slane %v8648_v4, 1 }
 0x2f2   : > { %6405 = vmatpush.bf16.msra.mxu2 %v7768_v18  ;;  %v6166_v18 = vpop.f32.mrf.mxu3  ;;  %v8540_v10 = vld [vmem:[%s9544_s30 + $0xa34] sm:$0xf]  ;;  %v7949_v11 = vld [vmem:[%s9544_s30 + $0xa38] sm:$0xf0]  ;;  %v7989_v4 = vld [vmem:[%s9544_s30 + $0xa88] sm:$0xf0] }
 0x2f3   : > { %6418 = vmatpush.bf16.msra.mxu3 %v7832_v27  ;;  %6384 = vmatmul.bf16.vlgmr.msra.gmra.mxu0 %v9854_v57  ;;  %v7677_v57 = vld [vmem:[%s9544_s30 + $0x818] sm:$0xf0]  ;;  %v8564_v27 = vld [vmem:[%s9544_s30 + $0xaf4] sm:$0xf]  ;;  %v7952_v32 = vor.u32 %v8540_v10, %v7949_v11 }
 0x2f4   : > { %6428 = vmatpush.bf16.msrb.mxu0 %v7920_v29  ;;  %v7680_v3 = vor.u32 %v8472_v20, %v7677_v57  ;;  %v10392_v29 = vadd.f32 %v6177_v19, %v6165_v52  ;;  %v8104_v52 = vor.u32 %v8578_v61, %v8101_v47  ;;  %v8029_v20 = vld [vmem:[%s9544_s30 + $0xad8] sm:$0xf0]  ;;  %v8556_v19 = vld [vmem:[%s9544_s30 + $0xab4] sm:$0xf]  ;;  %v8069_v61 = vld [vmem:[%s9544_s30 + $0xb28] sm:$0xf0] }
 0x2f5   : > { %6393 = vmatpush.bf16.msra.mxu1 %v7696_v36  ;;  %v7984_v36 = vor.u32 %v8548_v34, %v7981_v28  ;;  %v8013_v28 = vld [vmem:[%s9544_s30 + $0xab8] sm:$0xf0]  ;;  %v8592_v47 = vld [vmem:[%s9544_s30 + $0xbd4] sm:$0xf] }
 0x2f6   : > { %6406 = vmatpush.bf16.msra.mxu2 %v7760_v37  ;;  %v8048_v37 = vor.u32 %v8564_v27, %v8045_v30  ;;  %v8572_v27 = vld [vmem:[%s9544_s30 + $0xb34] sm:$0xf] }
 0x2f7   : > { %6419 = vmatpush.bf16.msra.mxu3 %v7824_v41  ;;  %v8546_v41 = vld [vmem:[%s9544_s30 + $0xa64] sm:$0xf] }
 0x2f8   : > { %6429 = vmatpush.bf16.msrb.mxu0 %v7912_v44  ;;  %v7973_v44 = vld [vmem:[%s9544_s30 + $0xa68] sm:$0xf0]  ;;  %v6179_v57 = vpop.f32.mrf.mxu0 }
 0x2f9   : > { %6394 = vmatpush.bf16.msra.mxu1 %v7688_v25  ;;  %v7976_v58 = vor.u32 %v8546_v41, %v7973_v44  ;;  %v7965_v25 = vld [vmem:[%s9544_s30 + $0xa58] sm:$0xf0]  ;;  %v8554_v41 = vld [vmem:[%s9544_s30 + $0xaa4] sm:$0xf]  ;;  %v8568_v57 = vld [vmem:[%s9544_s30 + $0xb14] sm:$0xf] }
 0x2fa   : > { %6407 = vmatpush.bf16.msra.mxu2 %v7752_v53  ;;  %v8560_v53 = vld [vmem:[%s9544_s30 + $0xad4] sm:$0xf]  ;;  %v7968_v54 = vor.u32 %v8544_v51, %v7965_v25  ;;  %v8570_v44 = vld [vmem:[%s9544_s30 + $0xb24] sm:$0xf] }
 0x2fb   : > { %6420 = vmatpush.bf16.msra.mxu3 %v7816_v60  ;;  %v8576_v60 = vld [vmem:[%s9544_s30 + $0xb54] sm:$0xf]  ;;  %v8032_v24 = vor.u32 %v8560_v53, %v8029_v20  ;;  %v7997_v20 = vld [vmem:[%s9544_s30 + $0xa98] sm:$0xf0] }
 0x2fc   : > { %6430 = vmatpush.bf16.msrb.mxu0 %v7904_v62  ;;  %v8093_v62 = vld [vmem:[%s9544_s30 + $0xb58] sm:$0xf0]  ;;  %v8536_v51 = vld [vmem:[%s9544_s30 + $0xa14] sm:$0xf] }
 0x2fd   : > { %6395 = vmatpush.bf16.msra.mxu1 %v7680_v3  ;;  %v8021_v3 = vld [vmem:[%s9544_s30 + $0xac8] sm:$0xf0]  ;;  %v8552_v53 = vld [vmem:[%s9544_s30 + $0xa94] sm:$0xf] }
 0x2fe   : > { %6408 = vmatpush.bf16.msra.mxu2 %v7744_v56  ;;  %v8574_v56 = vld [vmem:[%s9544_s30 + $0xb44] sm:$0xf]  ;;  %v8024_v16 = vor.u32 %v8558_v23, %v8021_v3 }
 0x2ff   : > { %6421 = vmatpush.bf16.msra.mxu3 %v7808_v6  ;;  %v8596_v6 = vld [vmem:[%s9544_s30 + $0xbf4] sm:$0xf]  ;;  %v8088_v34 = vor.u32 %v8574_v56, %v8085_v5  ;;  %v8550_v56 = vld [vmem:[%s9544_s30 + $0xa84] sm:$0xf] }
 0x300   : > { %6431 = vmatpush.bf16.msrb.mxu0 %v7896_v7  ;;  %v8173_v7 = vld [vmem:[%s9544_s30 + $0xbf8] sm:$0xf0]  ;;  %v7992_v10 = vor.u32 %v8550_v56, %v7989_v4 }
 0x301   : > { %6396 = vmatpush.bf16.msra.mxu1 %v7672_v63  ;;  %v6190_v9 = vpop.f32.mrf.mxu1  ;;  %v8176_v18 = vor.u32 %v8596_v6, %v8173_v7  ;;  %v8077_v63 = vld [vmem:[%s9544_s30 + $0xb38] sm:$0xf0]  ;;  %v8053_v6 = vld [vmem:[%s9544_s30 + $0xb08] sm:$0xf0]  ;;  %v8588_v7 = vld [vmem:[%s9544_s30 + $0xbb4] sm:$0xf] }
 0x302   : > { %6409 = vmatpush.bf16.msra.mxu2 %v7736_v31  ;;  %v6191_v30 = vadd.f32 %v6190_v9, %v3833_v55  ;;  %v8594_v31 = vld [vmem:[%s9544_s30 + $0xbe4] sm:$0xf]  ;;  %v8080_v38 = vor.u32 %v8572_v27, %v8077_v63  ;;  %v8604_v9 = vld [vmem:[%s9544_s30 + $0xc34] sm:$0xf] }
 0x303   : > { %6422 = vmatpush.bf16.msra.mxu3 %v7800_v33  ;;  %v8016_v33 = vor.u32 %v8556_v19, %v8013_v28  ;;  %v8168_v39 = vor.u32 %v8594_v31, %v8165_v50  ;;  %v8566_v55 = vld [vmem:[%s9544_s30 + $0xb04] sm:$0xf]  ;;  %v8133_v28 = vld [vmem:[%s9544_s30 + $0xba8] sm:$0xf0] }
 0x304   : > { %6432 = vmatpush.bf16.msrb.mxu0 %v7888_v35  ;;  %6397 = vmatmul.bf16.vlgmr.msra.gmra.mxu1 %v9938_v17  ;;  %v8518_v17 = vld [vmem:[%s9544_s30 + $0x984] sm:$0xf]  ;;  %v8056_v11 = vor.u32 %v8566_v55, %v8053_v6 }
 0x305   : > { %6441 = vmatpush.bf16.msrb.mxu1 %v7984_v36  ;;  %6410 = vmatmul.bf16.vlgmr.msra.gmra.mxu2 %v9950_v22  ;;  %v7957_v22 = vld [vmem:[%s9544_s30 + $0xa48] sm:$0xf0]  ;;  %v7864_v8 = vor.u32 %v8518_v17, %v7861_v1  ;;  %v8538_v35 = vld [vmem:[%s9544_s30 + $0xa24] sm:$0xf] }
 0x306   : > { %6454 = vmatpush.bf16.msrb.mxu2 %v8048_v37  ;;  %6423 = vmatmul.bf16.vlgmr.msra.gmra.mxu3 %v9948_v21  ;;  %v8096_v21 = vor.u32 %v8576_v60, %v8093_v62  ;;  %v7960_v40 = vor.u32 %v8542_v2, %v7957_v22  ;;  %v7941_v36 = vld [vmem:[%s9544_s30 + $0xa28] sm:$0xf0]  ;;  %v8061_v60 = vld [vmem:[%s9544_s30 + $0xb18] sm:$0xf0]  ;;  %v8590_v62 = vld [vmem:[%s9544_s30 + $0xbc4] sm:$0xf] }
 0x307   : > { %6467 = vmatpush.bf16.msrb.mxu3 %v8112_v43  ;;  %v8005_v43 = vld [vmem:[%s9544_s30 + $0xaa8] sm:$0xf0]  ;;  %v7944_v59 = vor.u32 %v8538_v35, %v7941_v36  ;;  %v8586_v19 = vld [vmem:[%s9544_s30 + $0xba4] sm:$0xf]  ;;  %v8600_v35 = vld [vmem:[%s9544_s30 + $0xc14] sm:$0xf] }
 0x308   : > { %6433 = vmatpush.bf16.msrb.mxu0 %v7880_v48  ;;  %v6203_v37 = vpop.f32.mrf.mxu2  ;;  %v8157_v48 = vld [vmem:[%s9544_s30 + $0xbd8] sm:$0xf0]  ;;  %v8008_v42 = vor.u32 %v8554_v41, %v8005_v43  ;;  %v7925_v2 = vld [vmem:[%s9544_s30 + $0xa08] sm:$0xf0]  ;;  %v8602_v27 = vld [vmem:[%s9544_s30 + $0xc24] sm:$0xf]  ;;  %v8136_v31 = vor.u32 %v8586_v19, %v8133_v28 }
 0x309   : > { %6442 = vmatpush.bf16.msrb.mxu1 %v7976_v58  ;;  %v6204_v45 = vadd.f32 %v6203_v37, %v6191_v30  ;;  %v6216_v46 = vpop.f32.mrf.mxu3  ;;  %v8160_v25 = vor.u32 %v8592_v47, %v8157_v48  ;;  %v8197_v30 = vld [vmem:[%s9544_s30 + $0xc28] sm:$0xf0]  ;;  %v8189_v36 = vld [vmem:[%s9544_s30 + $0xc18] sm:$0xf0]  ;;  %v8598_v43 = vld [vmem:[%s9544_s30 + $0xc04] sm:$0xf] }
 0x30a   : > { %6455 = vmatpush.bf16.msrb.mxu2 %v8040_v49  ;;  %v6192_v49 = vpop.f32.mrf.mxu1  ;;  %v8200_v50 = vor.u32 %v8602_v27, %v8197_v30  ;;  %v8117_v41 = vld [vmem:[%s9544_s30 + $0xb88] sm:$0xf0] }
 0x30b   : > { %6468 = vmatpush.bf16.msrb.mxu3 %v8104_v52  ;;  %v6217_v58 = vadd.f32 %v6216_v46, %v6204_v45  ;;  %v7933_v52 = vld [vmem:[%s9544_s30 + $0xa18] sm:$0xf0] }
 0x30c   : > { %6434 = vmatpush.bf16.msrb.mxu0 %v7872_v0  ;;  %v8149_v0 = vld [vmem:[%s9544_s30 + $0xbc8] sm:$0xf0]  ;;  %v7936_v1 = vor.u32 %v8536_v51, %v7933_v52  ;;  %v8649_v49 = vld [vmem:[#allocation1] sm:$0xff] }
 0x30d   : > { %6443 = vmatpush.bf16.msrb.mxu1 %v7968_v54  ;;  %v8000_v54 = vor.u32 %v8552_v53, %v7997_v20  ;;  %v8152_v3 = vor.u32 %v8590_v62, %v8149_v0 }
 0x30e   : > { %6456 = vmatpush.bf16.msrb.mxu2 %v8032_v24  ;;  %v8534_v24 = vld [vmem:[%s9544_s30 + $0xa04] sm:$0xf] }
 0x30f   : > { %6469 = vmatpush.bf16.msrb.mxu3 %v8096_v21  ;;  %v8064_v21 = vor.u32 %v8568_v57, %v8061_v60 }
 0x310   : > { %6435 = vmatpush.bf16.msrb.mxu0 %v7864_v8  ;;  %v6229_v17 = vpop.f32.mrf.mxu0  ;;  %v6205_v23 = vpop.f32.mrf.mxu2  ;;  %v8141_v8 = vld [vmem:[%s9544_s30 + $0xbb8] sm:$0xf0] }
 0x311   : > { %6444 = vmatpush.bf16.msrb.mxu1 %v7960_v40  ;;  %v6230_v22 = vadd.f32 %v6229_v17, %v6217_v58  ;;  %v6218_v5 = vpop.f32.mrf.mxu3  ;;  %v8205_v40 = vld [vmem:[%s9544_s30 + $0xc38] sm:$0xf0] }
 0x312   : > { %6457 = vmatpush.bf16.msrb.mxu2 %v8024_v16  ;;  %v7928_v16 = vor.u32 %v8534_v24, %v7925_v2 }
 0x313   : > { %6470 = vmatpush.bf16.msrb.mxu3 %v8088_v34  ;;  %6436 = vmatmul.bf16.vlgmr.msrb.gmra.mxu0 %v9952_v26  ;;  %v8072_v26 = vor.u32 %v8570_v44, %v8069_v61  ;;  %v8144_v34 = vor.u32 %v8588_v7, %v8141_v8  ;;  %v8181_v44 = vld [vmem:[%s9544_s30 + $0xc08] sm:$0xf0] }
 0x314   : > { %6480 = vmatpush.bf16.msra.mxu0 %v8176_v18  ;;  %v8208_v18 = vor.u32 %v8604_v9, %v8205_v40  ;;  %v8184_v61 = vor.u32 %v8598_v43, %v8181_v44 }
 0x315   : > { %6445 = vmatpush.bf16.msrb.mxu1 %v7952_v32  ;;  %v8584_v32 = vld [vmem:[%s9544_s30 + $0xb94] sm:$0xf] }
 0x316   : > { %6458 = vmatpush.bf16.msrb.mxu2 %v8016_v33  ;;  %v8125_v33 = vld [vmem:[%s9544_s30 + $0xb98] sm:$0xf0] }
 0x317   : > { %6471 = vmatpush.bf16.msrb.mxu3 %v8080_v38  ;;  %v8128_v37 = vor.u32 %v8584_v32, %v8125_v33  ;;  %v8192_v38 = vor.u32 %v8600_v35, %v8189_v36 }
 0x318   : > { %6481 = vmatpush.bf16.msra.mxu0 %v8168_v39  ;;  %v6231_v63 = vpop.f32.mrf.mxu0  ;;  %v8582_v39 = vld [vmem:[%s9544_s30 + $0xb84] sm:$0xf] }
 0x319   : > { %6446 = vmatpush.bf16.msrb.mxu1 %v7944_v59  ;;  %v8120_v45 = vor.u32 %v8582_v39, %v8117_v41 }
 0x31a   : > { %6459 = vmatpush.bf16.msrb.mxu2 %v8008_v42 }
 0x31b   : > { %6472 = vmatpush.bf16.msrb.mxu3 %v8072_v26 }
 0x31c   : > { %6482 = vmatpush.bf16.msra.mxu0 %v8160_v25 }
 0x31d   : > { %6447 = vmatpush.bf16.msrb.mxu1 %v7936_v1 }
 0x31e   : > { %6460 = vmatpush.bf16.msrb.mxu2 %v8000_v54 }
 0x31f   : > { %6473 = vmatpush.bf16.msrb.mxu3 %v8064_v21 }
 0x320   : > { %6483 = vmatpush.bf16.msra.mxu0 %v8152_v3 }
 0x321   : > { %6448 = vmatpush.bf16.msrb.mxu1 %v7928_v16  ;;  %v6242_v46 = vpop.f32.mrf.mxu1 }
 0x322   : > { %6461 = vmatpush.bf16.msrb.mxu2 %v7992_v10 }
 0x323   : > { %6474 = vmatpush.bf16.msrb.mxu3 %v8056_v11 }
 0x324   : > { %6484 = vmatpush.bf16.msra.mxu0 %v8144_v34  ;;  %6449 = vmatmul.bf16.vlgmr.msrb.gmra.mxu1 %v9995_v12  ;;  %v6243_v12 = vadd.f32 %v6242_v46, %v6230_v22  ;;  %v6506_v46 = vmax.f32 %v10392_v29, 0.0 }
 0x325   : > { %6497 = vmatpush.bf16.msra.mxu1 %v8208_v18  ;;  %6462 = vmatmul.bf16.vlgmr.msrb.gmra.mxu2 %v9999_v14 }
 0x326   : > { %6475 = vmatmul.bf16.vlgmr.msrb.gmra.mxu3 %v9997_v13 }
 0x328   : > { %6485 = vmatpush.bf16.msra.mxu0 %v8136_v31  ;;  %v6255_v14 = vpop.f32.mrf.mxu2 }
 0x329   : > { %6498 = vmatpush.bf16.msra.mxu1 %v8200_v50  ;;  %v6256_v47 = vadd.f32 %v6255_v14, %v6243_v12  ;;  %v6268_v48 = vpop.f32.mrf.mxu3  ;;  %v6244_v58 = vpop.f32.mrf.mxu1 }
 0x32b   : > { %v6269_v13 = vadd.f32 %v6268_v48, %v6256_v47 }
 0x32c   : > { %6486 = vmatpush.bf16.msra.mxu0 %v8128_v37 }
 0x32d   : > { %6499 = vmatpush.bf16.msra.mxu1 %v8192_v38 }
 0x330   : > { %6487 = vmatpush.bf16.msra.mxu0 %v8120_v45  ;;  %v6281_v59 = vpop.f32.mrf.mxu0  ;;  %v6257_v51 = vpop.f32.mrf.mxu2 }
 0x331   : > { %6500 = vmatpush.bf16.msra.mxu1 %v8184_v61  ;;  %v6282_v42 = vadd.f32 %v6281_v59, %v6269_v13  ;;  %v6270_v52 = vpop.f32.mrf.mxu3 }
 0x333   : > { %6488 = vmatmul.bf16.vlgmr.msra.gmra.mxu0 %v10001_v15 }
 0x334   : > { %8210 = vmatmul.msk.bf16.vlgmr.msra.gmra.mxu1 %vm5853_vm0, %v8649_v49 }
 0x338   : > { %v6283_v26 = vpop.f32.mrf.mxu0 }
 0x341   : > { %v6294_v25 = vpop.f32.mrf.mxu1 }
 0x342   : > { %v6295_v53 = vadd.f32 %v6294_v25, %v6282_v42 }
 0x348   : > { %v6307_v20 = vpop.f32.mrf.mxu2 }
 0x349   : > { %v6320_v57 = vpop.f32.mrf.mxu3  ;;  %v6308_v60 = vadd.f32 %v6307_v20, %v6295_v53  ;;  %v6296_v62 = vpop.f32.mrf.mxu1 }
 0x34b   : > { %v6321_v0 = vadd.f32 %v6320_v57, %v6308_v60 }
 0x350   : > { %v6333_v17 = vpop.f32.mrf.mxu0  ;;  %v6309_v15 = vpop.f32.mrf.mxu2 }
 0x351   : > { %v6334_v1 = vadd.f32 %v6333_v17, %v6321_v0  ;;  %v6322_v54 = vpop.f32.mrf.mxu3 }
 0x358   : > { %v6335_v24 = vpop.f32.mrf.mxu0 }
 0x361   : > { %v6346_v2 = vpop.f32.mrf.mxu1 }
 0x362   : > { %v6347_v10 = vadd.f32 %v6346_v2, %v6334_v1 }
 0x368   : > { %v6359_v22 = vpop.f32.mrf.mxu2 }
 0x369   : > { %v6372_v23 = vpop.f32.mrf.mxu3  ;;  %v6348_v21 = vpop.f32.mrf.mxu1  ;;  %v6360_v11 = vadd.f32 %v6359_v22, %v6347_v10 }
 0x36b   : > { %v6373_v18 = vadd.f32 %v6372_v23, %v6360_v11 }
 0x370   : > { %v6385_v3 = vpop.f32.mrf.mxu0  ;;  %v6361_v56 = vpop.f32.mrf.mxu2 }
 0x371   : > { %v6374_v4 = vpop.f32.mrf.mxu3  ;;  %v6386_v19 = vadd.f32 %v6385_v3, %v6373_v18 }
 0x378   : > { %v6387_v55 = vpop.f32.mrf.mxu0 }
 0x381   : > { %v6398_v5 = vpop.f32.mrf.mxu1 }
 0x382   : > { %v6399_v28 = vadd.f32 %v6398_v5, %v6386_v19 }
 0x388   : > { %v6411_v6 = vpop.f32.mrf.mxu2 }
 0x389   : > { %v6424_v7 = vpop.f32.mrf.mxu3  ;;  %v6400_v8 = vpop.f32.mrf.mxu1  ;;  %v6412_v27 = vadd.f32 %v6411_v6, %v6399_v28 }
 0x38b   : > { %v6425_v63 = vadd.f32 %v6424_v7, %v6412_v27 }
 0x390   : > { %v6437_v9 = vpop.f32.mrf.mxu0  ;;  %v6413_v40 = vpop.f32.mrf.mxu2 }
 0x391   : > { %v6426_v16 = vpop.f32.mrf.mxu3  ;;  %v6438_v31 = vadd.f32 %v6437_v9, %v6425_v63 }
 0x398   : > { %v6439_v34 = vpop.f32.mrf.mxu0 }
 0x3a1   : > { %v6450_v30 = vpop.f32.mrf.mxu1 }
 0x3a2   : > { %v6451_v50 = vadd.f32 %v6450_v30, %v6438_v31 }
 0x3a8   : > { %v6463_v32 = vpop.f32.mrf.mxu2 }
 0x3a9   : > { %v6476_v33 = vpop.f32.mrf.mxu3  ;;  %v6464_v35 = vadd.f32 %v6463_v32, %v6451_v50  ;;  %v6452_v36 = vpop.f32.mrf.mxu1 }
 0x3ab   : > { %v6477_v37 = vadd.f32 %v6476_v33, %v6464_v35 }
 0x3b0   : > { %v6489_v38 = vpop.f32.mrf.mxu0  ;;  %v6465_v41 = vpop.f32.mrf.mxu2 }
 0x3b1   : > { %v6490_v39 = vadd.f32 %v6489_v38, %v6477_v37  ;;  %v6478_v43 = vpop.f32.mrf.mxu3  ;;  %v6502_v44 = vpop.f32.mrf.mxu1 }
 0x3b3   : > { %v6503_v45 = vadd.f32 %v6502_v44, %v6490_v39 }
 0x3b5   : > { %v6507_v61 = vmax.f32 %v6503_v45, 0.0 }
 0x3b7   : > { %v6508_v12 = vpack.c.bf16 %v6507_v61, %v6506_v46 }
 0x3b8   : > { %v6491_v14 = vpop.f32.mrf.mxu0 }
 0x3b9   : > { %v6510_v47 = vrot.slane %v6508_v12, 3  ;;  %v6504_v48 = vpop.f32.mrf.mxu1 }
 0x3bb   : > { %v6514_v13 = vsel %vm6511_vm1, %v6508_v12, %v6510_v47 }
 0x3bc   : > { %6516 = vst [vmem:[%s3431_s24] sm:$0x3] %v6514_v13 }
 0x3bd PF: > { %s13_s16 = sadd.s32 1, %s8688_s16   ;;  %s10503_s12 = smov %s8676_s13 }
 0x3be   : > { %p10_p10 = scmp.ge.s32.totalorder %s13_s16, 6   ;;  %s10504_s13 = smov %s8745_s20 }
 0x3bf   : > { %s10505_s14 = smov %s8684_s15  ;;  %s10506_s15 = smov %s10508_s17 }
 0x3c0   :  { %12 = sbr.rel (!%p10_p10) target bundleno = 3 (0x3), region = 131 }

</bundles_post_ra>
